<compile_context>
chip_gen: v7x
topology: tpu7x:2x2x1
jax: 0.10.0
libtpu: 0.0.40
codegen_flags: <defaults>
</compile_context>

<pallas_src>
import math
import functools

import jax
import jax.numpy as jnp
from jax.experimental import pallas as pl
from jax.experimental.pallas import tpu as pltpu

# ---------------------------------------------------------------------------
# "config" constants (small synthetic ChatGLM-style config)
# ---------------------------------------------------------------------------
NUM_ATTENTION_HEADS = 4
KV_CHANNELS = 32                                   # head_dim
HIDDEN_SIZE_PER_PARTITION = NUM_ATTENTION_HEADS * KV_CHANNELS
APPLY_QUERY_KEY_LAYER_SCALING = True               # irrelevant in the SDPA path
ATTENTION_SOFTMAX_IN_FP32 = True
MULTI_QUERY_ATTENTION = False
USE_LINEAR_ATTENTION = False                       # standard attention path
# TODO(synk): the `use_linear_attention` branch (local-window linear attention
# with a python loop over seq) is not implemented here; only the standard
# causal SDPA branch is reproduced. attention_dropout is inactive in that path.

_MASK_VALUE = float(jnp.finfo(jnp.float32).min) / 2.0   # finite "-inf"


def _round_up(x: int, m: int) -> int:
    return ((x + m - 1) // m) * m


def _pick_block(seq_len: int) -> int:
    # Prefer the largest (256-aligned) tile that divides the sequence; fall
    # back to padding. 512x512 f32 scores are only ~4 MiB at H=4, well within
    # VMEM on every generation, and big tiles minimize fixed per-step overhead
    # (including the skipped upper-triangle steps).
    for cand in (512, 256, 128):
        if seq_len >= cand and seq_len % cand == 0:
            return cand
    return 512 if seq_len > 512 else _round_up(seq_len, 128)


# ---------------------------------------------------------------------------
# Pallas kernel: flash-style causal attention, all heads of one batch per step
# ---------------------------------------------------------------------------
def _flash_causal_kernel(q_ref, k_ref, v_ref, o_ref,
                         m_ref, l_ref, acc_ref,
                         *, scale, num_heads, head_dim, block_q, block_k):
    """One grid step (b, qi, kv).

    q_ref: (1, H, TQ, D)   k_ref / v_ref: (1, H, TK, D)   o_ref: (TQ, H*D)
    scratch: m_ref / l_ref (H, TQ, 1) f32, acc_ref (H, TQ, D) f32
    """
    qi = pl.program_id(1)
    kv = pl.program_id(2)

    @pl.when(kv == 0)
    def _init():
        m_ref[...] = jnp.full(m_ref.shape, _MASK_VALUE, dtype=m_ref.dtype)
        l_ref[...] = jnp.zeros_like(l_ref)
        acc_ref[...] = jnp.zeros_like(acc_ref)

    def _accumulate(apply_causal_mask):
        # Fold the softmax scale into q: H*TQ*D multiplies instead of H*TQ*TK.
        q = q_ref[0] * scale                # (H, TQ, D), native dtype
        k = k_ref[0]                        # (H, TK, D)
        v = v_ref[0]                        # (H, TK, D)

        # QK^T batched over heads on the MXU, f32 accumulation, no explicit .T
        s = jnp.einsum("hqd,hkd->hqk", q, k,
                       preferred_element_type=jnp.float32)      # (H, TQ, TK)

        if apply_causal_mask:
            # Only the diagonal tile is partially masked; since TQ == TK and
            # qi == kv here, block-local indices suffice (no global offsets).
            row = jax.lax.broadcasted_iota(jnp.int32, (1, block_q, block_k), 1)
            col = jax.lax.broadcasted_iota(jnp.int32, (1, block_q, block_k), 2)
            s = jnp.where(col <= row, s, _MASK_VALUE)

        # online softmax (all f32)
        m_prev = m_ref[...]                                  # (H, TQ, 1)
        m_new = jnp.maximum(m_prev, jnp.max(s, axis=-1, keepdims=True))
        alpha = jnp.exp(m_prev - m_new)
        p = jnp.exp(s - m_new)                               # (H, TQ, TK) f32

        l_ref[...] = alpha * l_ref[...] + jnp.sum(p, axis=-1, keepdims=True)
        pv = jnp.einsum("hqk,hkd->hqd", p.astype(v.dtype), v,
                        preferred_element_type=jnp.float32)  # (H, TQ, D)
        acc_ref[...] = alpha * acc_ref[...] + pv
        m_ref[...] = m_new

    # Off-diagonal tiles are fully unmasked: fast path (no iota/compare/where).
    @pl.when(kv < qi)
    def _off_diagonal():
        _accumulate(apply_causal_mask=False)

    # The diagonal tile is both masked and the last KV tile contributing to
    # this query tile: accumulate, then finalize into the lane-dense output.
    # Tiles with kv > qi are skipped entirely; their K/V index_map is clamped
    # to qi so they also issue no DMA.
    @pl.when(kv == qi)
    def _diagonal_and_finalize():
        _accumulate(apply_causal_mask=True)
        out = acc_ref[...] / l_ref[...]          # exact divide, (H, TQ, D) f32
        # direct per-head stores into the lane-dense (TQ, H*D) output block
        # TODO(synk): a fully lane-dense (TQ, H*D) accumulator would also cut
        # inner-loop ld/st pressure but needs bundle-dump validation (per-step
        # sub-128-lane slicing can itself trigger relayouts).
        for h in range(num_heads):
            o_ref[:, h * head_dim:(h + 1) * head_dim] = out[h].astype(o_ref.dtype)


# ---------------------------------------------------------------------------
# Wrapper reproducing CoreAttention.forward (standard path, attention_mask=None)
# ---------------------------------------------------------------------------
def core_attention_forward(query_layer, key_layer, value_layer,
                           attention_mask=None, batch_size=None,
                           block_size=None):
    # TODO(synk): explicit (non-causal) attention_mask handling and the decode
    # (kv_len > q_len) path are not implemented; the reference path with
    # mask=None and q_len == kv_len uses is_causal=True.
    assert attention_mask is None, "only the causal (mask=None) path is implemented"

    S, B, H, D = query_layer.shape
    assert key_layer.shape == (S, B, H, D) and value_layer.shape == (S, B, H, D)
    HD = H * D

    # permute(1, 2, 0, 3): [seq, batch, heads, dim] -> [batch, heads, seq, dim]
    # (k/v must be permuted anyway for kv_cache).
    # TODO(synk): a native [S,B,H,D] q read was evaluated, but with D=32 the
    # trailing (H=4, D=32) tile wastes 7/8 of every vreg and forces a per-step
    # in-kernel transpose, so the single wrapper transpose for q is kept.
    qp = jnp.transpose(query_layer, (1, 2, 0, 3))
    kp = jnp.transpose(key_layer, (1, 2, 0, 3))
    vp = jnp.transpose(value_layer, (1, 2, 0, 3))
    # kv_cache returned in the permuted [batch, heads, seq, dim] layout
    # (matches the torch>=2 branch, which permutes before caching)
    kv_cache = (kp, vp)

    blk = block_size if block_size is not None else _pick_block(S)
    s_pad = _round_up(S, blk)
    if s_pad != S:
        # Pad the sequence axis; padded KV columns are masked by the causal
        # mask (they only appear in the diagonal tile of the last q tile) and
        # padded query rows are sliced off below.
        pad = ((0, 0), (0, 0), (0, s_pad - S), (0, 0))
        qp_k, kp_k, vp_k = jnp.pad(qp, pad), jnp.pad(kp, pad), jnp.pad(vp, pad)
    else:
        qp_k, kp_k, vp_k = qp, kp, vp

    num_q = s_pad // blk
    num_kv = s_pad // blk

    scale = 1.0 / math.sqrt(D)      # SDPA default scaling (torch>=2 branch)
    kernel = functools.partial(_flash_causal_kernel, scale=scale, num_heads=H,
                               head_dim=D, block_q=blk, block_k=blk)

    # v7x megacore: shard the batch axis when possible (a naive qi split of the
    # causal triangle is ~3x imbalanced across the two TensorCores).
    # TODO(synk): for B == 1 a paired qi remap (qi <-> num_q-1-qi) would
    # balance the triangle; plain qi sharding is used instead.
    if B >= 2:
        dims = ("parallel", "arbitrary", "arbitrary")
    else:
        dims = ("arbitrary", "parallel", "arbitrary")

    out = pl.pallas_call(
        kernel,
        out_shape=jax.ShapeDtypeStruct((s_pad, B * HD), query_layer.dtype),
        grid_spec=pltpu.PrefetchScalarGridSpec(
            num_scalar_prefetch=0,
            grid=(B, num_q, num_kv),              # KV (reduction) axis last
            in_specs=[
                pl.BlockSpec((1, H, blk, D), lambda b, qi, kv: (b, 0, qi, 0)),
                # clamp kv -> qi so fully-masked tiles reuse the resident block
                # (no extra DMA); their compute is skipped by pl.when
                pl.BlockSpec((1, H, blk, D),
                             lambda b, qi, kv: (b, 0, jnp.minimum(kv, qi), 0)),
                pl.BlockSpec((1, H, blk, D),
                             lambda b, qi, kv: (b, 0, jnp.minimum(kv, qi), 0)),
            ],
            # lane-dense output: 128-wide (H*D) blocks of a [S_pad, B*H*D] slab
            out_specs=pl.BlockSpec((blk, HD), lambda b, qi, kv: (qi, b)),
            scratch_shapes=[
                pltpu.VMEM((H, blk, 1), jnp.float32),   # running max m
                pltpu.VMEM((H, blk, 1), jnp.float32),   # running sum l
                pltpu.VMEM((H, blk, D), jnp.float32),   # output accumulator
            ],
        ),
        compiler_params=pltpu.CompilerParams(
            dimension_semantics=dims,
            # v5e scoped default is only 16 MiB; 48 MiB covers 512x512 tiles
            # comfortably while leaving headroom under v7x's 64 MiB physical.
            vmem_limit_bytes=48 * 1024 * 1024,
        ),
    )(qp_k, kp_k, vp_k)

    # [S_pad, B*H*D] -> drop padded rows -> [S, B, hidden]: contiguous reshape,
    # no output transpose needed.
    context_layer = out[:S].reshape(S, B, HD)
    return context_layer, kv_cache, None


# ---------------------------------------------------------------------------
# Pure-JAX reference for a correctness check
# ---------------------------------------------------------------------------
def _reference(query_layer, key_layer, value_layer):
    S, B, H, D = query_layer.shape
    q = jnp.transpose(query_layer, (1, 2, 0, 3)).astype(jnp.float32)
    k = jnp.transpose(key_layer, (1, 2, 0, 3)).astype(jnp.float32)
    v = jnp.transpose(value_layer, (1, 2, 0, 3)).astype(jnp.float32)
    s = jnp.einsum("bhqd,bhkd->bhqk", q, k) / math.sqrt(D)
    causal = jnp.tril(jnp.ones((S, S), dtype=bool))
    s = jnp.where(causal, s, -jnp.inf)
    p = jax.nn.softmax(s, axis=-1)
    o = jnp.einsum("bhqk,bhkd->bhqd", p, v)
    o = jnp.transpose(o, (2, 0, 1, 3)).reshape(S, B, H * D)
    return o.astype(query_layer.dtype)


if __name__ == "__main__":
    batch = 2
    seq = 8
    heads = NUM_ATTENTION_HEADS
    head_dim = KV_CHANNELS

    key = jax.random.PRNGKey(0)
    kq, kk, kv = jax.random.split(key, 3)
    query_layer = jax.random.normal(kq, (seq, batch, heads, head_dim), dtype=jnp.float32)
    key_layer = jax.random.normal(kk, (seq, batch, heads, head_dim), dtype=jnp.float32)
    value_layer = jax.random.normal(kv, (seq, batch, heads, head_dim), dtype=jnp.float32)

    context_layer, kv_cache, reg_loss = core_attention_forward(
        query_layer, key_layer, value_layer, attention_mask=None, batch_size=batch)
    context_layer = jax.block_until_ready(context_layer)

    ref = _reference(query_layer, key_layer, value_layer)
    assert context_layer.shape == (seq, batch, HIDDEN_SIZE_PER_PARTITION)
    assert kv_cache[0].shape == (batch, heads, seq, head_dim)
    assert reg_loss is None
    # tolerance covers DEFAULT (bf16-pass) MXU precision used by both the
    # kernel and the jnp reference; the epilogue divide itself is exact now
    err = float(jnp.max(jnp.abs(context_layer - ref)))
    assert jnp.allclose(context_layer, ref, atol=2e-2, rtol=2e-2), err

    # multi-tile path: exercises off-diagonal fast path, causal block skipping
    # and the B == 1 dimension-semantics branch
    seq2 = 256
    k2q, k2k, k2v = jax.random.split(jax.random.PRNGKey(1), 3)
    q2 = jax.random.normal(k2q, (seq2, 1, heads, head_dim), dtype=jnp.float32)
    key2 = jax.random.normal(k2k, (seq2, 1, heads, head_dim), dtype=jnp.float32)
    v2 = jax.random.normal(k2v, (seq2, 1, heads, head_dim), dtype=jnp.float32)
    ctx2, _, _ = core_attention_forward(q2, key2, v2, attention_mask=None,
                                        batch_size=1, block_size=128)
    ctx2 = jax.block_until_ready(ctx2)
    ref2 = _reference(q2, key2, v2)
    err2 = float(jnp.max(jnp.abs(ctx2 - ref2)))
    assert jnp.allclose(ctx2, ref2, atol=2e-2, rtol=2e-2), err2

    # bf16 path: matmuls run natively in bf16 with f32 accumulation
    q16 = query_layer.astype(jnp.bfloat16)
    k16 = key_layer.astype(jnp.bfloat16)
    v16 = value_layer.astype(jnp.bfloat16)
    ctx16, _, _ = core_attention_forward(q16, k16, v16,
                                         attention_mask=None, batch_size=batch)
    ctx16 = jax.block_until_ready(ctx16)
    ref16 = _reference(q16, k16, v16).astype(jnp.float32)
    assert jnp.allclose(ctx16.astype(jnp.float32), ref16, atol=1e-1, rtol=1e-1)

    print("KERNEL_OK")
</pallas_src>

<mosaic_0001>
module attributes {stable_mosaic.version = 11 : i64} {
  func.func @_flash_causal_kernel(%arg0: i32, %arg1: i32, %arg2: i32, %arg3: memref<1x4x128x32xf32, #tpu.memory_space<vmem>>, %arg4: memref<1x4x128x32xf32, #tpu.memory_space<vmem>>, %arg5: memref<1x4x128x32xf32, #tpu.memory_space<vmem>>, %arg6: memref<128x128xf32, #tpu.memory_space<vmem>>, %arg7: memref<4x128x1xf32, #tpu.memory_space<vmem>>, %arg8: memref<4x128x1xf32, #tpu.memory_space<vmem>>, %arg9: memref<4x128x32xf32, #tpu.memory_space<vmem>>) attributes {dimension_semantics = [#tpu.dimension_semantics<parallel>, #tpu.dimension_semantics<arbitrary>, #tpu.dimension_semantics<arbitrary>], iteration_bounds = array<i64: 2, 1, 1>, scalar_prefetch = 0 : i64, scratch_operands = 3 : i64, tpu.core_type = #tpu.core_type<tc>, window_params = [{transform_indices = @transform_0, window_bounds = array<i64: 1, 4, 128, 32>}, {transform_indices = @transform_1, window_bounds = array<i64: 1, 4, 128, 32>}, {transform_indices = @transform_2, window_bounds = array<i64: 1, 4, 128, 32>}, {transform_indices = @transform_3, window_bounds = array<i64: 128, 128>}]} {
    %c0_i32 = arith.constant 0 : i32
    %0 = arith.cmpi eq, %arg2, %c0_i32 : i32
    %1 = arith.extui %0 : i1 to i32
    %c0_i32_0 = arith.constant 0 : i32
    %2 = arith.cmpi ne, %1, %c0_i32_0 : i32
    scf.if %2 {
      %cst = arith.constant -1.70141173E+38 : f32
      %9 = vector.broadcast %cst : f32 to vector<4x128x1xf32>
      %c0 = arith.constant 0 : index
      %c0_3 = arith.constant 0 : index
      %c0_4 = arith.constant 0 : index
      %10 = vector.load %arg7[%c0, %c0_3, %c0_4] : memref<4x128x1xf32, #tpu.memory_space<vmem>>, vector<4x128x1xf32>
      tpu.vector_store %arg7[%c0, %c0_3, %c0_4], %9 {strides = array<i32>} : memref<4x128x1xf32, #tpu.memory_space<vmem>>, vector<4x128x1xf32>,
      %cst_5 = arith.constant 0.000000e+00 : f32
      %11 = vector.broadcast %cst_5 : f32 to vector<4x128x1xf32>
      %c0_6 = arith.constant 0 : index
      %c0_7 = arith.constant 0 : index
      %c0_8 = arith.constant 0 : index
      %12 = vector.load %arg8[%c0_6, %c0_7, %c0_8] : memref<4x128x1xf32, #tpu.memory_space<vmem>>, vector<4x128x1xf32>
      tpu.vector_store %arg8[%c0_6, %c0_7, %c0_8], %11 {strides = array<i32>} : memref<4x128x1xf32, #tpu.memory_space<vmem>>, vector<4x128x1xf32>,
      %cst_9 = arith.constant 0.000000e+00 : f32
      %13 = vector.broadcast %cst_9 : f32 to vector<4x128x32xf32>
      %c0_10 = arith.constant 0 : index
      %c0_11 = arith.constant 0 : index
      %c0_12 = arith.constant 0 : index
      %14 = vector.load %arg9[%c0_10, %c0_11, %c0_12] : memref<4x128x32xf32, #tpu.memory_space<vmem>>, vector<4x128x32xf32>
      tpu.vector_store %arg9[%c0_10, %c0_11, %c0_12], %13 {strides = array<i32>} : memref<4x128x32xf32, #tpu.memory_space<vmem>>, vector<4x128x32xf32>,
    } else {
    }
    %3 = arith.cmpi slt, %arg2, %arg1 : i32
    %4 = arith.extui %3 : i1 to i32
    %c0_i32_1 = arith.constant 0 : i32
    %5 = arith.cmpi ne, %4, %c0_i32_1 : i32
    scf.if %5 {
      %c0 = arith.constant 0 : index
      %c0_3 = arith.constant 0 : index
      %c0_4 = arith.constant 0 : index
      %c0_5 = arith.constant 0 : index
      %9 = vector.load %arg3[%c0, %c0_3, %c0_4, %c0_5] : memref<1x4x128x32xf32, #tpu.memory_space<vmem>>, vector<1x4x128x32xf32>
      %10 = vector.shape_cast %9 : vector<1x4x128x32xf32> to vector<4x128x32xf32>
      %cst = arith.constant 0.176776692 : f32
      %11 = vector.broadcast %cst : f32 to vector<4x128x32xf32>
      %12 = arith.mulf %10, %11 : vector<4x128x32xf32>
      %c0_6 = arith.constant 0 : index
      %c0_7 = arith.constant 0 : index
      %c0_8 = arith.constant 0 : index
      %c0_9 = arith.constant 0 : index
      %13 = vector.load %arg4[%c0_6, %c0_7, %c0_8, %c0_9] : memref<1x4x128x32xf32, #tpu.memory_space<vmem>>, vector<1x4x128x32xf32>
      %14 = vector.shape_cast %13 : vector<1x4x128x32xf32> to vector<4x128x32xf32>
      %c0_10 = arith.constant 0 : index
      %c0_11 = arith.constant 0 : index
      %c0_12 = arith.constant 0 : index
      %c0_13 = arith.constant 0 : index
      %15 = vector.load %arg5[%c0_10, %c0_11, %c0_12, %c0_13] : memref<1x4x128x32xf32, #tpu.memory_space<vmem>>, vector<1x4x128x32xf32>
      %16 = vector.shape_cast %15 : vector<1x4x128x32xf32> to vector<4x128x32xf32>
      "tpu.trace_start"() <{level = 10 : i32, message = "hqd,hkd->hqk"}> : () -> ()
      %cst_14 = arith.constant dense<0.000000e+00> : vector<4x128x128xf32>
      %17 = tpu.matmul %12, %14, %cst_14 {dimension_numbers = #tpu.dot_dimension_numbers<[2], [2], [1], [1], [0, 0, 0, 1, 1, 1], [0], [0]>} : vector<4x128x32xf32>, vector<4x128x32xf32>, vector<4x128x128xf32> -> vector<4x128x128xf32>
      "tpu.trace_stop"() : () -> ()
      %c0_15 = arith.constant 0 : index
      %c0_16 = arith.constant 0 : index
      %c0_17 = arith.constant 0 : index
      %18 = vector.load %arg7[%c0_15, %c0_16, %c0_17] : memref<4x128x1xf32, #tpu.memory_space<vmem>>, vector<4x128x1xf32>
      %cst_18 = arith.constant dense<0xFF800000> : vector<4x128xf32>
      %19 = vector.multi_reduction <maximumf>, %17, %cst_18 [2] : vector<4x128x128xf32> to vector<4x128xf32>
      %20 = vector.shape_cast %19 : vector<4x128xf32> to vector<4x128x1xf32>
      %21 = arith.maximumf %18, %20 : vector<4x128x1xf32>
      %22 = arith.subf %18, %21 : vector<4x128x1xf32>
      %23 = math.exp %22 : vector<4x128x1xf32>
      %24 = vector.broadcast %21 : vector<4x128x1xf32> to vector<4x128x128xf32>
      %25 = arith.subf %17, %24 : vector<4x128x128xf32>
      %26 = math.exp %25 : vector<4x128x128xf32>
      %c0_19 = arith.constant 0 : index
      %c0_20 = arith.constant 0 : index
      %c0_21 = arith.constant 0 : index
      %27 = vector.load %arg8[%c0_19, %c0_20, %c0_21] : memref<4x128x1xf32, #tpu.memory_space<vmem>>, vector<4x128x1xf32>
      %28 = arith.mulf %23, %27 : vector<4x128x1xf32>
      %cst_22 = arith.constant dense<0.000000e+00> : vector<4x128xf32>
      %29 = vector.multi_reduction <add>, %26, %cst_22 [2] : vector<4x128x128xf32> to vector<4x128xf32>
      %30 = vector.shape_cast %29 : vector<4x128xf32> to vector<4x128x1xf32>
      %31 = arith.addf %28, %30 : vector<4x128x1xf32>
      %c0_23 = arith.constant 0 : index
      %c0_24 = arith.constant 0 : index
      %c0_25 = arith.constant 0 : index
      %32 = vector.load %arg8[%c0_23, %c0_24, %c0_25] : memref<4x128x1xf32, #tpu.memory_space<vmem>>, vector<4x128x1xf32>
      tpu.vector_store %arg8[%c0_23, %c0_24, %c0_25], %31 {strides = array<i32>} : memref<4x128x1xf32, #tpu.memory_space<vmem>>, vector<4x128x1xf32>,
      "tpu.trace_start"() <{level = 10 : i32, message = "hqk,hkd->hqd"}> : () -> ()
      %cst_26 = arith.constant dense<0.000000e+00> : vector<4x128x32xf32>
      %33 = tpu.matmul %26, %16, %cst_26 {dimension_numbers = #tpu.dot_dimension_numbers<[2], [1], [1], [2], [0, 0, 0, 1, 1, 2], [0], [0]>} : vector<4x128x128xf32>, vector<4x128x32xf32>, vector<4x128x32xf32> -> vector<4x128x32xf32>
      "tpu.trace_stop"() : () -> ()
      %c0_27 = arith.constant 0 : index
      %c0_28 = arith.constant 0 : index
      %c0_29 = arith.constant 0 : index
      %34 = vector.load %arg9[%c0_27, %c0_28, %c0_29] : memref<4x128x32xf32, #tpu.memory_space<vmem>>, vector<4x128x32xf32>
      %35 = vector.broadcast %23 : vector<4x128x1xf32> to vector<4x128x32xf32>
      %36 = arith.mulf %35, %34 : vector<4x128x32xf32>
      %37 = arith.addf %36, %33 : vector<4x128x32xf32>
      %c0_30 = arith.constant 0 : index
      %c0_31 = arith.constant 0 : index
      %c0_32 = arith.constant 0 : index
      %38 = vector.load %arg9[%c0_30, %c0_31, %c0_32] : memref<4x128x32xf32, #tpu.memory_space<vmem>>, vector<4x128x32xf32>
      tpu.vector_store %arg9[%c0_30, %c0_31, %c0_32], %37 {strides = array<i32>} : memref<4x128x32xf32, #tpu.memory_space<vmem>>, vector<4x128x32xf32>,
      %c0_33 = arith.constant 0 : index
      %c0_34 = arith.constant 0 : index
      %c0_35 = arith.constant 0 : index
      %39 = vector.load %arg7[%c0_33, %c0_34, %c0_35] : memref<4x128x1xf32, #tpu.memory_space<vmem>>, vector<4x128x1xf32>
      tpu.vector_store %arg7[%c0_33, %c0_34, %c0_35], %21 {strides = array<i32>} : memref<4x128x1xf32, #tpu.memory_space<vmem>>, vector<4x128x1xf32>,
    } else {
    }
    %6 = arith.cmpi eq, %arg2, %arg1 : i32
    %7 = arith.extui %6 : i1 to i32
    %c0_i32_2 = arith.constant 0 : i32
    %8 = arith.cmpi ne, %7, %c0_i32_2 : i32
    scf.if %8 {
      %c0 = arith.constant 0 : index
      %c0_3 = arith.constant 0 : index
      %c0_4 = arith.constant 0 : index
      %c0_5 = arith.constant 0 : index
      %9 = vector.load %arg3[%c0, %c0_3, %c0_4, %c0_5] : memref<1x4x128x32xf32, #tpu.memory_space<vmem>>, vector<1x4x128x32xf32>
      %10 = vector.shape_cast %9 : vector<1x4x128x32xf32> to vector<4x128x32xf32>
      %cst = arith.constant 0.176776692 : f32
      %11 = vector.broadcast %cst : f32 to vector<4x128x32xf32>
      %12 = arith.mulf %10, %11 : vector<4x128x32xf32>
      %c0_6 = arith.constant 0 : index
      %c0_7 = arith.constant 0 : index
      %c0_8 = arith.constant 0 : index
      %c0_9 = arith.constant 0 : index
      %13 = vector.load %arg4[%c0_6, %c0_7, %c0_8, %c0_9] : memref<1x4x128x32xf32, #tpu.memory_space<vmem>>, vector<1x4x128x32xf32>
      %14 = vector.shape_cast %13 : vector<1x4x128x32xf32> to vector<4x128x32xf32>
      %c0_10 = arith.constant 0 : index
      %c0_11 = arith.constant 0 : index
      %c0_12 = arith.constant 0 : index
      %c0_13 = arith.constant 0 : index
      %15 = vector.load %arg5[%c0_10, %c0_11, %c0_12, %c0_13] : memref<1x4x128x32xf32, #tpu.memory_space<vmem>>, vector<1x4x128x32xf32>
      %16 = vector.shape_cast %15 : vector<1x4x128x32xf32> to vector<4x128x32xf32>
      "tpu.trace_start"() <{level = 10 : i32, message = "hqd,hkd->hqk"}> : () -> ()
      %cst_14 = arith.constant dense<0.000000e+00> : vector<4x128x128xf32>
      %17 = tpu.matmul %12, %14, %cst_14 {dimension_numbers = #tpu.dot_dimension_numbers<[2], [2], [1], [1], [0, 0, 0, 1, 1, 1], [0], [0]>} : vector<4x128x32xf32>, vector<4x128x32xf32>, vector<4x128x128xf32> -> vector<4x128x128xf32>
      "tpu.trace_stop"() : () -> ()
      %18 = tpu.iota {dimensions = array<i32: 1>} : vector<1x128x128xi32>
      %19 = tpu.iota {dimensions = array<i32: 2>} : vector<1x128x128xi32>
      %20 = arith.cmpi sle, %19, %18 : vector<1x128x128xi32>
      %cst_15 = arith.constant -1.70141173E+38 : f32
      %21 = vector.shape_cast %20 : vector<1x128x128xi1> to vector<1x128x128xi1>
      %22 = vector.broadcast %21 : vector<1x128x128xi1> to vector<4x128x128xi1>
      %23 = vector.broadcast %cst_15 : f32 to vector<4x128x128xf32>
      %24 = arith.select %22, %17, %23 : vector<4x128x128xi1>, vector<4x128x128xf32>
      %c0_16 = arith.constant 0 : index
      %c0_17 = arith.constant 0 : index
      %c0_18 = arith.constant 0 : index
      %25 = vector.load %arg7[%c0_16, %c0_17, %c0_18] : memref<4x128x1xf32, #tpu.memory_space<vmem>>, vector<4x128x1xf32>
      %cst_19 = arith.constant dense<0xFF800000> : vector<4x128xf32>
      %26 = vector.multi_reduction <maximumf>, %24, %cst_19 [2] : vector<4x128x128xf32> to vector<4x128xf32>
      %27 = vector.shape_cast %26 : vector<4x128xf32> to vector<4x128x1xf32>
      %28 = arith.maximumf %25, %27 : vector<4x128x1xf32>
      %29 = arith.subf %25, %28 : vector<4x128x1xf32>
      %30 = math.exp %29 : vector<4x128x1xf32>
      %31 = vector.broadcast %28 : vector<4x128x1xf32> to vector<4x128x128xf32>
      %32 = arith.subf %24, %31 : vector<4x128x128xf32>
      %33 = math.exp %32 : vector<4x128x128xf32>
      %c0_20 = arith.constant 0 : index
      %c0_21 = arith.constant 0 : index
      %c0_22 = arith.constant 0 : index
      %34 = vector.load %arg8[%c0_20, %c0_21, %c0_22] : memref<4x128x1xf32, #tpu.memory_space<vmem>>, vector<4x128x1xf32>
      %35 = arith.mulf %30, %34 : vector<4x128x1xf32>
      %cst_23 = arith.constant dense<0.000000e+00> : vector<4x128xf32>
      %36 = vector.multi_reduction <add>, %33, %cst_23 [2] : vector<4x128x128xf32> to vector<4x128xf32>
      %37 = vector.shape_cast %36 : vector<4x128xf32> to vector<4x128x1xf32>
      %38 = arith.addf %35, %37 : vector<4x128x1xf32>
      %c0_24 = arith.constant 0 : index
      %c0_25 = arith.constant 0 : index
      %c0_26 = arith.constant 0 : index
      %39 = vector.load %arg8[%c0_24, %c0_25, %c0_26] : memref<4x128x1xf32, #tpu.memory_space<vmem>>, vector<4x128x1xf32>
      tpu.vector_store %arg8[%c0_24, %c0_25, %c0_26], %38 {strides = array<i32>} : memref<4x128x1xf32, #tpu.memory_space<vmem>>, vector<4x128x1xf32>,
      "tpu.trace_start"() <{level = 10 : i32, message = "hqk,hkd->hqd"}> : () -> ()
      %cst_27 = arith.constant dense<0.000000e+00> : vector<4x128x32xf32>
      %40 = tpu.matmul %33, %16, %cst_27 {dimension_numbers = #tpu.dot_dimension_numbers<[2], [1], [1], [2], [0, 0, 0, 1, 1, 2], [0], [0]>} : vector<4x128x128xf32>, vector<4x128x32xf32>, vector<4x128x32xf32> -> vector<4x128x32xf32>
      "tpu.trace_stop"() : () -> ()
      %c0_28 = arith.constant 0 : index
      %c0_29 = arith.constant 0 : index
      %c0_30 = arith.constant 0 : index
      %41 = vector.load %arg9[%c0_28, %c0_29, %c0_30] : memref<4x128x32xf32, #tpu.memory_space<vmem>>, vector<4x128x32xf32>
      %42 = vector.broadcast %30 : vector<4x128x1xf32> to vector<4x128x32xf32>
      %43 = arith.mulf %42, %41 : vector<4x128x32xf32>
      %44 = arith.addf %43, %40 : vector<4x128x32xf32>
      %c0_31 = arith.constant 0 : index
      %c0_32 = arith.constant 0 : index
      %c0_33 = arith.constant 0 : index
      %45 = vector.load %arg9[%c0_31, %c0_32, %c0_33] : memref<4x128x32xf32, #tpu.memory_space<vmem>>, vector<4x128x32xf32>
      tpu.vector_store %arg9[%c0_31, %c0_32, %c0_33], %44 {strides = array<i32>} : memref<4x128x32xf32, #tpu.memory_space<vmem>>, vector<4x128x32xf32>,
      %c0_34 = arith.constant 0 : index
      %c0_35 = arith.constant 0 : index
      %c0_36 = arith.constant 0 : index
      %46 = vector.load %arg7[%c0_34, %c0_35, %c0_36] : memref<4x128x1xf32, #tpu.memory_space<vmem>>, vector<4x128x1xf32>
      tpu.vector_store %arg7[%c0_34, %c0_35, %c0_36], %28 {strides = array<i32>} : memref<4x128x1xf32, #tpu.memory_space<vmem>>, vector<4x128x1xf32>,
      %c0_37 = arith.constant 0 : index
      %c0_38 = arith.constant 0 : index
      %c0_39 = arith.constant 0 : index
      %47 = vector.load %arg9[%c0_37, %c0_38, %c0_39] : memref<4x128x32xf32, #tpu.memory_space<vmem>>, vector<4x128x32xf32>
      %c0_40 = arith.constant 0 : index
      %c0_41 = arith.constant 0 : index
      %c0_42 = arith.constant 0 : index
      %48 = vector.load %arg8[%c0_40, %c0_41, %c0_42] : memref<4x128x1xf32, #tpu.memory_space<vmem>>, vector<4x128x1xf32>
      %49 = vector.broadcast %48 : vector<4x128x1xf32> to vector<4x128x32xf32>
      %50 = arith.divf %47, %49 : vector<4x128x32xf32>
      %51 = vector.extract_strided_slice %50 {offsets = [0, 0, 0], sizes = [1, 128, 32], strides = [1, 1, 1]} : vector<4x128x32xf32> to vector<1x128x32xf32>
      %52 = vector.shape_cast %51 : vector<1x128x32xf32> to vector<128x32xf32>
      %c0_43 = arith.constant 0 : index
      %c0_44 = arith.constant 0 : index
      %53 = vector.load %arg6[%c0_43, %c0_44] : memref<128x128xf32, #tpu.memory_space<vmem>>, vector<128x32xf32>
      tpu.vector_store %arg6[%c0_43, %c0_44], %52 {strides = array<i32>} : memref<128x128xf32, #tpu.memory_space<vmem>>, vector<128x32xf32>,
      %54 = vector.extract_strided_slice %50 {offsets = [1, 0, 0], sizes = [1, 128, 32], strides = [1, 1, 1]} : vector<4x128x32xf32> to vector<1x128x32xf32>
      %55 = vector.shape_cast %54 : vector<1x128x32xf32> to vector<128x32xf32>
      %c0_45 = arith.constant 0 : index
      %c32 = arith.constant 32 : index
      %56 = vector.load %arg6[%c0_45, %c32] : memref<128x128xf32, #tpu.memory_space<vmem>>, vector<128x32xf32>
      tpu.vector_store %arg6[%c0_45, %c32], %55 {strides = array<i32>} : memref<128x128xf32, #tpu.memory_space<vmem>>, vector<128x32xf32>,
      %57 = vector.extract_strided_slice %50 {offsets = [2, 0, 0], sizes = [1, 128, 32], strides = [1, 1, 1]} : vector<4x128x32xf32> to vector<1x128x32xf32>
      %58 = vector.shape_cast %57 : vector<1x128x32xf32> to vector<128x32xf32>
      %c0_46 = arith.constant 0 : index
      %c64 = arith.constant 64 : index
      %59 = vector.load %arg6[%c0_46, %c64] : memref<128x128xf32, #tpu.memory_space<vmem>>, vector<128x32xf32>
      tpu.vector_store %arg6[%c0_46, %c64], %58 {strides = array<i32>} : memref<128x128xf32, #tpu.memory_space<vmem>>, vector<128x32xf32>,
      %60 = vector.extract_strided_slice %50 {offsets = [3, 0, 0], sizes = [1, 128, 32], strides = [1, 1, 1]} : vector<4x128x32xf32> to vector<1x128x32xf32>
      %61 = vector.shape_cast %60 : vector<1x128x32xf32> to vector<128x32xf32>
      %c0_47 = arith.constant 0 : index
      %c96 = arith.constant 96 : index
      %62 = vector.load %arg6[%c0_47, %c96] : memref<128x128xf32, #tpu.memory_space<vmem>>, vector<128x32xf32>
      tpu.vector_store %arg6[%c0_47, %c96], %61 {strides = array<i32>} : memref<128x128xf32, #tpu.memory_space<vmem>>, vector<128x32xf32>,
    } else {
    }
    return
  }
  func.func @transform_0(%arg0: i32, %arg1: i32, %arg2: i32) -> (i32, i32, i32, i32) {
    %c0_i32 = arith.constant 0 : i32
    %c0_i32_0 = arith.constant 0 : i32
    %c0_i32_1 = arith.constant 0 : i32
    return %arg0, %c0_i32, %arg1, %c0_i32_0 : i32, i32, i32, i32
  }
  func.func @transform_1(%arg0: i32, %arg1: i32, %arg2: i32) -> (i32, i32, i32, i32) {
    %0 = arith.minsi %arg2, %arg1 : i32
    %c0_i32 = arith.constant 0 : i32
    %c0_i32_0 = arith.constant 0 : i32
    %c0_i32_1 = arith.constant 0 : i32
    return %arg0, %c0_i32, %0, %c0_i32_0 : i32, i32, i32, i32
  }
  func.func @transform_2(%arg0: i32, %arg1: i32, %arg2: i32) -> (i32, i32, i32, i32) {
    %0 = arith.minsi %arg2, %arg1 : i32
    %c0_i32 = arith.constant 0 : i32
    %c0_i32_0 = arith.constant 0 : i32
    %c0_i32_1 = arith.constant 0 : i32
    return %arg0, %c0_i32, %0, %c0_i32_0 : i32, i32, i32, i32
  }
  func.func @transform_3(%arg0: i32, %arg1: i32, %arg2: i32) -> (i32, i32) {
    %c0_i32 = arith.constant 0 : i32
    return %arg1, %arg0 : i32, i32
  }
}

</mosaic_0001>

<bundles_post_ra>
// kernel: tpu_custom_call.1
= control target key start
LH: loop header
LB: loop body
LE: loop exit
PB: predicated region body
PF: predicated region fallthrough
CT: control target
= control target key end

     0   :  { %8 = vsyncpa [#allocation6], 0  ;;  %s14249_s0 = inlined_call_operand.vmem [shape: f32[2,4,128,32], index: 0, kind: input, shape index: {}]   ;;  %s14250_s1 = inlined_call_operand.vmem [shape: f32[2,4,128,32], index: 1, kind: input, shape index: {}]   ;;  %s14251_s2 = inlined_call_operand.vmem [shape: f32[2,4,128,32], index: 2, kind: input, shape index: {}]   ;;  %s14252_s3 = inlined_call_operand.hbm [shape: f32[128,256], index: 3, kind: output, shape index: {}]  }
   0x1   :  { %10 = vsyncpa [#allocation6 + $0x1], 0  ;;  %s11043_s12 = smov 0   ;;  %s11045_s13 = smov 0  }
   0x2   :  { %s11047_s14 = smov 0   ;;  %s11049_s15 = smov 0  }
   0x3   :  { %s11051_s16 = smov 0   ;;  %s11053_s17 = smov 0  }
   0x4 LB: > { %s9184_s18 = sadd.s32 4294967295, %s11011_s17   ;;  %s9185_s19 = sadd.s32 4294967294, %s11011_s17   ;;  %s11011_s17 = sphi %s11053_s17, %s16_s17   ;;  %s11007_s16 = sphi %s11051_s16, %s14976_s16   ;;  %s11003_s15 = sphi %s11049_s15, %s14975_s15   ;;  %s10999_s14 = sphi %s11047_s14, %s14974_s14   ;;  %s10995_s13 = sphi %s11045_s13, %s14973_s13   ;;  %s10991_s12 = sphi %s11043_s12, %s14972_s12  }
   0x5   : > { %s35_s20 = sadd.s32 1, %s11007_s16  ;;  %s136_s21 = sadd.s32 1, %s10999_s14 }
   0x6   : > { %p37_p0 = scmp.ge.s32.totalorder %s35_s20, 2  ;;  %p146_p1 = scmp.ne.s32.totalorder %s10999_s14, %s10995_s13 }
   0x7   : > { %p147_p2 = scmp.eq.s32.totalorder %s9184_s18, 1  ;;  %p152_p3 = scmp.ne.s32.totalorder %s10995_s13, %s10991_s12 }
   0x8   : > { %s14978_s20 = smov (%p37_p0, %s35_s20), 0  ;;  %p153_p5 = scmp.eq.s32.totalorder %s9185_s19, 1 }
   0x9   : > { %p11083_p4 = por %p147_p2, %p146_p1  ;;  %s132_s23 = ssub.s32 %s11007_s16, %s14978_s20 }
   0xa   : > { %p9188_p6 = scmp.ge.s32.totalorder %s11011_s17, 1  ;;  %p134_p7 = scmp.eq.s32.totalorder %s132_s23, 0 }
   0xb   : > { %p11090_p8 = por %p153_p5, %p152_p3  ;;  %p218_p9 = scmp.lt.s32.totalorder %s11011_s17, 3 }
   0xc   : > { %s11096_s25 = scalar_select %p134_p7, %s10999_s14, %s136_s21  }
   0xd   : > { %p219_p10 = pnand %p9188_p6, %p218_p9 }
   0xf   : > { %222 = sbr.rel (%p219_p10) target bundleno = 1309 (0x51d), region = 32 }
  0x16   : > { %p269_p11 = scmp.lt.s32.totalorder %s11003_s15, 1  ;;  %vm14253_vm0 = vcmask 261120   ;;  %vm14254_vm3 = vcmask 7168   ;;  %s265_s10 = sand.u32 1, %s10995_s13  }
  0x17   : > { %vm11110_vm1 = vmpackc.low %vm14253_vm0, %vm14253_vm0  ;;  %s9189_s11 = sshll.u32 %s265_s10, 7  ;;  %s11016_s19 = smov 32  }
  0x18   : > { %s270_s26 = scalar_select %p269_p11, %s11003_s15, 1 }
  0x19   : > { %s14004_s18 = scalar_lea.vmem [#allocation5], %s9189_s11  ;;  %s11017_s21 = smov 64  }
  0x1a   : > { %s11100_s27 = sshll.u32 %s270_s26, 9  ;;  %s11018_s23 = smov 96  }
  0x1b   : > { %s11106_s30 = scalar_lea.vmem %s14250_s1, %s11100_s27  ;;  %s11142_s6 = scalar_lea.vmem %s14249_s0, %s11100_s27 }
  0x1c   : > { %v4427_v1 = vld [vmem:[%s11106_s30] sm:$0xff]  ;;  %v4428_v2 = vld [vmem:[%s11106_s30 + $0x8] sm:$0xff]  ;;  %v4429_v6 = vld [vmem:[%s11106_s30 + $0x10] sm:$0xff]  ;;  %s12338_s9 = scalar_lea.vmem %s14251_s2, %s11100_s27  ;;  %s9453_s26 = sshll.u32 %s11003_s15, 7 }
  0x1d   : > { %v4443_v3 = vld [vmem:[%s11106_s30 + $0x80] sm:$0xff]  ;;  %v10163_v4 = vpack.c.bf16 %v4428_v2, %v4427_v1  ;;  %v4444_v5 = vld [vmem:[%s11106_s30 + $0x88] sm:$0xff]  ;;  %v4430_v7 = vld [vmem:[%s11106_s30 + $0x18] sm:$0xff]  ;;  %s9067_s27 = sshll.u32 %s14004_s18, 4  ;;  %s14203_s15 = scalar_lea.sflag [#allocation6], %s265_s10  ;;  %s14197_s27 = int_to_ptr.vmem [resolvable:$true] %s9067_s27 }
  0x1e   : > { %v10211_v8 = vpack.c.bf16 %v4444_v5, %v4443_v3  ;;  %v10169_v9 = vpack.c.bf16 %v4430_v7, %v4429_v6  ;;  %v4445_v10 = vld [vmem:[%s11106_s30 + $0x90] sm:$0xff]  ;;  %v4446_v11 = vld [vmem:[%s11106_s30 + $0x98] sm:$0xff]  ;;  %v4431_v13 = vld [vmem:[%s11106_s30 + $0x20] sm:$0xff]  ;;  %s10933_s4 = scalar_lea.vmem %s14197_s27, 2048  ;;  %s11019_s5 = smov [#allocation5]  }
  0x1f   : > { %10165 = vmatprep.subr.msk.bf16.mxu0 %vm11110_vm1, %v10163_v4  ;;  %v10217_v12 = vpack.c.bf16 %v4446_v11, %v4445_v10  ;;  %v4432_v14 = vld [vmem:[%s11106_s30 + $0x28] sm:$0xff]  ;;  %v4447_v15 = vld [vmem:[%s11106_s30 + $0xa0] sm:$0xff]  ;;  %v4433_v23 = vld [vmem:[%s11106_s30 + $0x30] sm:$0xff]  ;;  %p10934_p12 = scmp.ne.s32.totalorder %s14197_s27, %s10933_s4 }
  0x20   : > { %10213 = vmatprep.subr.msk.bf16.mxu1 %vm11110_vm1, %v10211_v8  ;;  %10168 = vmatpush3.bf16.xpose.msk.msra.mxu0 %vm11110_vm1, %v10163_v4  ;;  %v4448_v16 = vld [vmem:[%s11106_s30 + $0xa8] sm:$0xff]  ;;  %v10175_v17 = vpack.c.bf16 %v4432_v14, %v4431_v13  ;;  %v4299_v19 = vld [vmem:[%s11142_s6] sm:$0xff]  ;;  %v4434_v24 = vld [vmem:[%s11106_s30 + $0x38] sm:$0xff] }
  0x21   : > { %10216 = vmatpush3.bf16.xpose.msk.msra.mxu1 %vm11110_vm1, %v10211_v8  ;;  %10171 = vmatprep.subr.msk.bf16.mxu0 %vm11110_vm1, %v10169_v9  ;;  %v10223_v18 = vpack.c.bf16 %v4448_v16, %v4447_v15  ;;  %v4363_v20 = vmul.f32 0.17677669, %v4299_v19  ;;  %v4315_v21 = vld [vmem:[%s11142_s6 + $0x80] sm:$0xff]  ;;  %v4449_v25 = vld [vmem:[%s11106_s30 + $0xb0] sm:$0xff]  ;;  %v4450_v26 = vld [vmem:[%s11106_s30 + $0xb8] sm:$0xff]  ;;  %v10181_v27 = vpack.c.bf16 %v4434_v24, %v4433_v23  ;;  %p10935_p13 = pnand %p10934_p12, %p11083_p4 }
  0x22   : > { %10219 = vmatprep.subr.msk.bf16.mxu1 %vm11110_vm1, %v10217_v12  ;;  %v4379_v22 = vmul.f32 0.17677669, %v4315_v21  ;;  %v10229_v28 = vpack.c.bf16 %v4450_v26, %v4449_v25  ;;  %v4435_v29 = vld [vmem:[%s11106_s30 + $0x40] sm:$0xff]  ;;  %v4436_v30 = vld [vmem:[%s11106_s30 + $0x48] sm:$0xff]  ;;  %v4437_v35 = vld [vmem:[%s11106_s30 + $0x50] sm:$0xff] }
  0x23   : > { %9747 = vmatprep.mubr.msk.f32.mxu0 %vm14253_vm0, %v4363_v20  ;;  %v4451_v31 = vld [vmem:[%s11106_s30 + $0xc0] sm:$0xff]  ;;  %v4452_v32 = vld [vmem:[%s11106_s30 + $0xc8] sm:$0xff]  ;;  %v10187_v33 = vpack.c.bf16 %v4436_v30, %v4435_v29  ;;  %v4438_v36 = vld [vmem:[%s11106_s30 + $0x58] sm:$0xff]  ;;  %p10936_p0 = pneg %p10935_p13 }
  0x24   : > { %9803 = vmatprep.mubr.msk.f32.mxu1 %vm14253_vm0, %v4379_v22  ;;  %v10235_v34 = vpack.c.bf16 %v4452_v32, %v4451_v31  ;;  %v4453_v37 = vld [vmem:[%s11106_s30 + $0xd0] sm:$0xff]  ;;  %v4454_v38 = vld [vmem:[%s11106_s30 + $0xd8] sm:$0xff]  ;;  %v10193_v39 = vpack.c.bf16 %v4438_v36, %v4437_v35  ;;  %v4439_v41 = vld [vmem:[%s11106_s30 + $0x60] sm:$0xff] }
  0x25   : > { %v10241_v40 = vpack.c.bf16 %v4454_v38, %v4453_v37  ;;  %v4440_v42 = vld [vmem:[%s11106_s30 + $0x68] sm:$0xff]  ;;  %v4455_v43 = vld [vmem:[%s11106_s30 + $0xe0] sm:$0xff]  ;;  %v4441_v47 = vld [vmem:[%s11106_s30 + $0x70] sm:$0xff] }
  0x26   : > { %v4456_v44 = vld [vmem:[%s11106_s30 + $0xe8] sm:$0xff]  ;;  %v10199_v45 = vpack.c.bf16 %v4440_v42, %v4439_v41  ;;  %v4442_v48 = vld [vmem:[%s11106_s30 + $0x78] sm:$0xff]  ;;  %v4457_v49 = vld [vmem:[%s11106_s30 + $0xf0] sm:$0xff] }
  0x27   : > { %v10247_v46 = vpack.c.bf16 %v4456_v44, %v4455_v43  ;;  %v4458_v50 = vld [vmem:[%s11106_s30 + $0xf8] sm:$0xff]  ;;  %v10205_v51 = vpack.c.bf16 %v4442_v48, %v4441_v47  ;;  %v4459_v53 = vld [vmem:[%s11106_s30 + $0x100] sm:$0xff]  ;;  %v4460_v54 = vld [vmem:[%s11106_s30 + $0x108] sm:$0xff] }
  0x28   : > { %10174 = vmatpush3.bf16.xpose.msk.msra.mxu0 %vm11110_vm1, %v10169_v9  ;;  %v10253_v52 = vpack.c.bf16 %v4458_v50, %v4457_v49  ;;  %v4475_v55 = vld [vmem:[%s11106_s30 + $0x180] sm:$0xff]  ;;  %v4476_v56 = vld [vmem:[%s11106_s30 + $0x188] sm:$0xff]  ;;  %v10259_v57 = vpack.c.bf16 %v4460_v54, %v4459_v53  ;;  %v4301_v61 = vld [vmem:[%s11142_s6 + $0x10] sm:$0xff] }
  0x29   : > { %10222 = vmatpush3.bf16.xpose.msk.msra.mxu1 %vm11110_vm1, %v10217_v12  ;;  %10177 = vmatprep.subr.msk.bf16.mxu0 %vm11110_vm1, %v10175_v17  ;;  %v10307_v58 = vpack.c.bf16 %v4476_v56, %v4475_v55  ;;  %v4300_v59 = vld [vmem:[%s11142_s6 + $0x8] sm:$0xff]  ;;  %v4317_v63 = vld [vmem:[%s11142_s6 + $0x90] sm:$0xff]  ;;  %v4462_v2 = vld [vmem:[%s11106_s30 + $0x118] sm:$0xff]  ;;  %v4365_v7 = vmul.f32 0.17677669, %v4301_v61 }
  0x2a   : > { %10225 = vmatprep.subr.msk.bf16.mxu1 %vm11110_vm1, %v10223_v18  ;;  %v4316_v60 = vld [vmem:[%s11142_s6 + $0x88] sm:$0xff]  ;;  %v4364_v62 = vmul.f32 0.17677669, %v4300_v59  ;;  %v4461_v1 = vld [vmem:[%s11106_s30 + $0x110] sm:$0xff]  ;;  %v4302_v4 = vld [vmem:[%s11142_s6 + $0x18] sm:$0xff] }
  0x2b   : > { %v4380_v3 = vmul.f32 0.17677669, %v4316_v60  ;;  %v4477_v5 = vld [vmem:[%s11106_s30 + $0x190] sm:$0xff]  ;;  %v4478_v6 = vld [vmem:[%s11106_s30 + $0x198] sm:$0xff]  ;;  %v4303_v9 = vld [vmem:[%s11142_s6 + $0x20] sm:$0xff]  ;;  %v10265_v11 = vpack.c.bf16 %v4462_v2, %v4461_v1 }
  0x2c   : > { %v4318_v8 = vld [vmem:[%s11142_s6 + $0x98] sm:$0xff]  ;;  %v4381_v10 = vmul.f32 0.17677669, %v4317_v63  ;;  %v4319_v12 = vld [vmem:[%s11142_s6 + $0xa0] sm:$0xff]  ;;  %v4366_v13 = vmul.f32 0.17677669, %v4302_v4  ;;  %v10313_v14 = vpack.c.bf16 %v4478_v6, %v4477_v5 }
  0x2d   : > { %v4382_v15 = vmul.f32 0.17677669, %v4318_v8  ;;  %v4367_v16 = vmul.f32 0.17677669, %v4303_v9  ;;  %v4320_v19 = vld [vmem:[%s11142_s6 + $0xa8] sm:$0xff]  ;;  %v4463_v20 = vld [vmem:[%s11106_s30 + $0x120] sm:$0xff] }
  0x2e   : > { %v4464_v21 = vld [vmem:[%s11106_s30 + $0x128] sm:$0xff]  ;;  %v4479_v23 = vld [vmem:[%s11106_s30 + $0x1a0] sm:$0xff]  ;;  %v4305_v25 = vld [vmem:[%s11142_s6 + $0x30] sm:$0xff]  ;;  %v4384_v26 = vmul.f32 0.17677669, %v4320_v19 }
  0x2f   : > { %v4480_v24 = vld [vmem:[%s11106_s30 + $0x1a8] sm:$0xff]  ;;  %v10271_v29 = vpack.c.bf16 %v4464_v21, %v4463_v20  ;;  %v4322_v30 = vld [vmem:[%s11142_s6 + $0xb8] sm:$0xff]  ;;  %v4307_v31 = vld [vmem:[%s11142_s6 + $0x40] sm:$0xff] }
  0x30   : > { %10180 = vmatpush3.bf16.xpose.msk.msra.mxu0 %vm11110_vm1, %v10175_v17  ;;  %v4304_v17 = vld [vmem:[%s11142_s6 + $0x28] sm:$0xff]  ;;  %v10319_v32 = vpack.c.bf16 %v4480_v24, %v4479_v23  ;;  %v4386_v37 = vmul.f32 0.17677669, %v4322_v30  ;;  %v4371_v38 = vmul.f32 0.17677669, %v4307_v31  ;;  %v4465_v42 = vld [vmem:[%s11106_s30 + $0x130] sm:$0xff] }
  0x31   : > { %10228 = vmatpush3.bf16.xpose.msk.msra.mxu1 %vm11110_vm1, %v10223_v18  ;;  %10183 = vmatprep.subr.msk.bf16.mxu0 %vm11110_vm1, %v10181_v27  ;;  %v4383_v18 = vmul.f32 0.17677669, %v4319_v12  ;;  %v4368_v22 = vmul.f32 0.17677669, %v4304_v17  ;;  %v4324_v41 = vld [vmem:[%s11142_s6 + $0xc8] sm:$0xff]  ;;  %v4466_v43 = vld [vmem:[%s11106_s30 + $0x138] sm:$0xff] }
  0x32   : > { %10231 = vmatprep.subr.msk.bf16.mxu1 %vm11110_vm1, %v10229_v28  ;;  %v4481_v44 = vld [vmem:[%s11106_s30 + $0x1b0] sm:$0xff]  ;;  %v4388_v48 = vmul.f32 0.17677669, %v4324_v41  ;;  %v4310_v49 = vld [vmem:[%s11142_s6 + $0x58] sm:$0xff]  ;;  %v4311_v53 = vld [vmem:[%s11142_s6 + $0x60] sm:$0xff] }
  0x33   : > { %v4309_v47 = vld [vmem:[%s11142_s6 + $0x50] sm:$0xff]  ;;  %v4327_v56 = vld [vmem:[%s11142_s6 + $0xe0] sm:$0xff]  ;;  %v4375_v60 = vmul.f32 0.17677669, %v4311_v53  ;;  %v4312_v61 = vld [vmem:[%s11142_s6 + $0x68] sm:$0xff] }
  0x34   : > { %v4325_v50 = vld [vmem:[%s11142_s6 + $0xd0] sm:$0xff]  ;;  %v4373_v55 = vmul.f32 0.17677669, %v4309_v47  ;;  %v4328_v63 = vld [vmem:[%s11142_s6 + $0xe8] sm:$0xff]  ;;  %v4467_v1 = vld [vmem:[%s11106_s30 + $0x140] sm:$0xff] }
  0x35   : > { %v4468_v2 = vld [vmem:[%s11106_s30 + $0x148] sm:$0xff]  ;;  %v4376_v5 = vmul.f32 0.17677669, %v4312_v61  ;;  %v4313_v6 = vld [vmem:[%s11142_s6 + $0x70] sm:$0xff]  ;;  %v4314_v8 = vld [vmem:[%s11142_s6 + $0x78] sm:$0xff] }
  0x36   : > { %v4484_v4 = vld [vmem:[%s11106_s30 + $0x1c8] sm:$0xff]  ;;  %v4329_v9 = vld [vmem:[%s11142_s6 + $0xf0] sm:$0xff]  ;;  %v4331_v12 = vld [vmem:[%s11142_s6 + $0x100] sm:$0xff] }
  0x37   : > { %v4393_v17 = vmul.f32 0.17677669, %v4329_v9  ;;  %v4395_v19 = vmul.f32 0.17677669, %v4331_v12  ;;  %v4469_v21 = vld [vmem:[%s11106_s30 + $0x150] sm:$0xff]  ;;  %v4486_v24 = vld [vmem:[%s11106_s30 + $0x1d8] sm:$0xff] }
  0x38   : > { %10186 = vmatpush3.bf16.xpose.msk.msra.mxu0 %vm11110_vm1, %v10181_v27  ;;  %v4306_v27 = vld [vmem:[%s11142_s6 + $0x38] sm:$0xff]  ;;  %v4485_v23 = vld [vmem:[%s11106_s30 + $0x1d0] sm:$0xff]  ;;  %v4488_v30 = vld [vmem:[%s11106_s30 + $0x1e8] sm:$0xff] }
  0x39   : > { %10234 = vmatpush3.bf16.xpose.msk.msra.mxu1 %vm11110_vm1, %v10229_v28  ;;  %10189 = vmatprep.subr.msk.bf16.mxu0 %vm11110_vm1, %v10187_v33  ;;  %v4321_v28 = vld [vmem:[%s11142_s6 + $0xb0] sm:$0xff]  ;;  %v4370_v35 = vmul.f32 0.17677669, %v4306_v27  ;;  %v4471_v27 = vld [vmem:[%s11106_s30 + $0x160] sm:$0xff]  ;;  %v4336_v53 = vld [vmem:[%s11142_s6 + $0x128] sm:$0xff] }
  0x3a   : > { %10237 = vmatprep.subr.msk.bf16.mxu1 %vm11110_vm1, %v10235_v34  ;;  %v4385_v36 = vmul.f32 0.17677669, %v4321_v28  ;;  %v4472_v28 = vld [vmem:[%s11106_s30 + $0x168] sm:$0xff]  ;;  %v4333_v41 = vld [vmem:[%s11142_s6 + $0x110] sm:$0xff]  ;;  %v4338_v61 = vld [vmem:[%s11142_s6 + $0x138] sm:$0xff] }
  0x3b   : > { %v10295_v31 = vpack.c.bf16 %v4472_v28, %v4471_v27  ;;  %v4341_v9 = vld [vmem:[%s11142_s6 + $0x150] sm:$0xff] }
  0x40   : > { %10192 = vmatpush3.bf16.xpose.msk.msra.mxu0 %vm11110_vm1, %v10187_v33  ;;  %v4369_v33 = vmul.f32 0.17677669, %v4305_v25 }
  0x41   : > { %10240 = vmatpush3.bf16.xpose.msk.msra.mxu1 %vm11110_vm1, %v10235_v34  ;;  %10195 = vmatprep.subr.msk.bf16.mxu0 %vm11110_vm1, %v10193_v39  ;;  %v4323_v34 = vld [vmem:[%s11142_s6 + $0xc0] sm:$0xff] }
  0x42   : > { %10243 = vmatprep.subr.msk.bf16.mxu1 %vm11110_vm1, %v10241_v40 }
  0x48   : > { %10198 = vmatpush3.bf16.xpose.msk.msra.mxu0 %vm11110_vm1, %v10193_v39  ;;  %v4308_v39 = vld [vmem:[%s11142_s6 + $0x48] sm:$0xff] }
  0x49   : > { %10246 = vmatpush3.bf16.xpose.msk.msra.mxu1 %vm11110_vm1, %v10241_v40  ;;  %10201 = vmatprep.subr.msk.bf16.mxu0 %vm11110_vm1, %v10199_v45  ;;  %v4387_v40 = vmul.f32 0.17677669, %v4323_v34  ;;  %v4474_v34 = vld [vmem:[%s11106_s30 + $0x178] sm:$0xff] }
  0x4a   : > { %10249 = vmatprep.subr.msk.bf16.mxu1 %vm11110_vm1, %v10247_v46 }
  0x50   : > { %10204 = vmatpush3.bf16.xpose.msk.msra.mxu0 %vm11110_vm1, %v10199_v45  ;;  %v4482_v45 = vld [vmem:[%s11106_s30 + $0x1b8] sm:$0xff] }
  0x51   : > { %10252 = vmatpush3.bf16.xpose.msk.msra.mxu1 %vm11110_vm1, %v10247_v46  ;;  %10207 = vmatprep.subr.msk.bf16.mxu0 %vm11110_vm1, %v10205_v51  ;;  %v4372_v46 = vmul.f32 0.17677669, %v4308_v39  ;;  %v10325_v54 = vpack.c.bf16 %v4482_v45, %v4481_v44  ;;  %v4332_v39 = vld [vmem:[%s11142_s6 + $0x108] sm:$0xff]  ;;  %v4397_v45 = vmul.f32 0.17677669, %v4333_v41 }
  0x52   : > { %10255 = vmatprep.subr.msk.bf16.mxu1 %vm11110_vm1, %v10253_v52  ;;  %v11013_v41 = vmov -1.7014117e+38  }
  0x53   : > { %329 = vst.msk [vmem:[#allocation2 + $0x88] sm:$0xff] %vm14254_vm3, %v11013_v41  ;;  %312 = vst.msk [vmem:[#allocation2] sm:$0xff] %vm14254_vm3, %v11013_v41 }
  0x54   : > { %313 = vst.msk [vmem:[#allocation2 + $0x8] sm:$0xff] %vm14254_vm3, %v11013_v41  ;;  %314 = vst.msk [vmem:[#allocation2 + $0x10] sm:$0xff] %vm14254_vm3, %v11013_v41 }
  0x55   : > { %315 = vst.msk [vmem:[#allocation2 + $0x18] sm:$0xff] %vm14254_vm3, %v11013_v41  ;;  %316 = vst.msk [vmem:[#allocation2 + $0x20] sm:$0xff] %vm14254_vm3, %v11013_v41 }
  0x56   : > { %317 = vst.msk [vmem:[#allocation2 + $0x28] sm:$0xff] %vm14254_vm3, %v11013_v41  ;;  %318 = vst.msk [vmem:[#allocation2 + $0x30] sm:$0xff] %vm14254_vm3, %v11013_v41 }
  0x57   : > { %319 = vst.msk [vmem:[#allocation2 + $0x38] sm:$0xff] %vm14254_vm3, %v11013_v41  ;;  %320 = vst.msk [vmem:[#allocation2 + $0x40] sm:$0xff] %vm14254_vm3, %v11013_v41 }
  0x58   : > { %10210 = vmatpush3.bf16.xpose.msk.msra.mxu0 %vm11110_vm1, %v10205_v51  ;;  %v10277_v51 = vpack.c.bf16 %v4466_v43, %v4465_v42  ;;  %v4349_v42 = vld [vmem:[%s11142_s6 + $0x190] sm:$0xff]  ;;  %v4396_v43 = vmul.f32 0.17677669, %v4332_v39  ;;  %321 = vst.msk [vmem:[#allocation2 + $0x48] sm:$0xff] %vm14254_vm3, %v11013_v41  ;;  %322 = vst.msk [vmem:[#allocation2 + $0x50] sm:$0xff] %vm14254_vm3, %v11013_v41 }
  0x59   : > { %10258 = vmatpush3.bf16.xpose.msk.msra.mxu1 %vm11110_vm1, %v10253_v52  ;;  %10261 = vmatprep.subr.msk.bf16.mxu0 %vm11110_vm1, %v10259_v57  ;;  %v4326_v52 = vld [vmem:[%s11142_s6 + $0xd8] sm:$0xff]  ;;  %v4413_v47 = vmul.f32 0.17677669, %v4349_v42  ;;  %323 = vst.msk [vmem:[#allocation2 + $0x58] sm:$0xff] %vm14254_vm3, %v11013_v41  ;;  %324 = vst.msk [vmem:[#allocation2 + $0x60] sm:$0xff] %vm14254_vm3, %v11013_v41 }
  0x5a   : > { %10309 = vmatprep.subr.msk.bf16.mxu1 %vm11110_vm1, %v10307_v58  ;;  %v4390_v59 = vmul.f32 0.17677669, %v4326_v52  ;;  %325 = vst.msk [vmem:[#allocation2 + $0x68] sm:$0xff] %vm14254_vm3, %v11013_v41  ;;  %326 = vst.msk [vmem:[#allocation2 + $0x70] sm:$0xff] %vm14254_vm3, %v11013_v41 }
  0x5b   : > { %327 = vst.msk [vmem:[#allocation2 + $0x78] sm:$0xff] %vm14254_vm3, %v11013_v41  ;;  %328 = vst.msk [vmem:[#allocation2 + $0x80] sm:$0xff] %vm14254_vm3, %v11013_v41 }
  0x5c   : > { %330 = vst.msk [vmem:[#allocation2 + $0x90] sm:$0xff] %vm14254_vm3, %v11013_v41  ;;  %331 = vst.msk [vmem:[#allocation2 + $0x98] sm:$0xff] %vm14254_vm3, %v11013_v41 }
  0x5d   : > { %332 = vst.msk [vmem:[#allocation2 + $0xa0] sm:$0xff] %vm14254_vm3, %v11013_v41  ;;  %333 = vst.msk [vmem:[#allocation2 + $0xa8] sm:$0xff] %vm14254_vm3, %v11013_v41 }
  0x5e   : > { %334 = vst.msk [vmem:[#allocation2 + $0xb0] sm:$0xff] %vm14254_vm3, %v11013_v41  ;;  %335 = vst.msk [vmem:[#allocation2 + $0xb8] sm:$0xff] %vm14254_vm3, %v11013_v41 }
  0x5f   : > { %9748 = vmatmul.mubr.msk.f32.vlgmr.msra.gmra.mrb[0].mxu0 %vm14253_vm0, %v4364_v62  ;;  %v4391_v62 = vmul.f32 0.17677669, %v4327_v56  ;;  %v4337_v56 = vld [vmem:[%s11142_s6 + $0x130] sm:$0xff]  ;;  %336 = vst.msk [vmem:[#allocation2 + $0xc0] sm:$0xff] %vm14254_vm3, %v11013_v41  ;;  %337 = vst.msk [vmem:[#allocation2 + $0xc8] sm:$0xff] %vm14254_vm3, %v11013_v41 }
  0x60   : > { %9804 = vmatmul.mubr.msk.f32.vlgmr.msra.gmra.mrb[0].mxu1 %vm14253_vm0, %v4380_v3  ;;  %10264 = vmatpush3.bf16.xpose.msk.msra.mxu0 %vm11110_vm1, %v10259_v57  ;;  %v4374_v57 = vmul.f32 0.17677669, %v4310_v49  ;;  %v4483_v3 = vld [vmem:[%s11106_s30 + $0x1c0] sm:$0xff]  ;;  %338 = vst.msk [vmem:[#allocation2 + $0xd0] sm:$0xff] %vm14254_vm3, %v11013_v41  ;;  %339 = vst.msk [vmem:[#allocation2 + $0xd8] sm:$0xff] %vm14254_vm3, %v11013_v41 }
  0x61   : > { %9750 = vmatprep.mubr.msk.f32.mxu0 %vm14253_vm0, %v4365_v7  ;;  %10312 = vmatpush3.bf16.xpose.msk.msra.mxu1 %vm11110_vm1, %v10307_v58  ;;  %v4389_v58 = vmul.f32 0.17677669, %v4325_v50  ;;  %v4392_v7 = vmul.f32 0.17677669, %v4328_v63  ;;  %v4335_v49 = vld [vmem:[%s11142_s6 + $0x120] sm:$0xff]  ;;  %v4354_v63 = vld [vmem:[%s11142_s6 + $0x1b8] sm:$0xff] }
  0x62   : > { %9806 = vmatprep.mubr.msk.f32.mxu1 %vm14253_vm0, %v4381_v10  ;;  %10267 = vmatprep.subr.msk.bf16.mxu0 %vm11110_vm1, %v10265_v11  ;;  %v10283_v10 = vpack.c.bf16 %v4468_v2, %v4467_v1  ;;  %v4351_v50 = vld [vmem:[%s11142_s6 + $0x1a0] sm:$0xff]  ;;  %v4399_v52 = vmul.f32 0.17677669, %v4335_v49  ;;  %340 = vst.msk [vmem:[#allocation2 + $0xe0] sm:$0xff] %vm14254_vm3, %v11013_v41  ;;  %341 = vst.msk [vmem:[#allocation2 + $0xe8] sm:$0xff] %vm14254_vm3, %v11013_v41 }
  0x63   : > { %9751 = vmatmul.mubr.msk.f32.gmra.mrb[2].mxu0 %vm14253_vm0, %v4366_v13  ;;  %10315 = vmatprep.subr.msk.bf16.mxu1 %vm11110_vm1, %v10313_v14  ;;  %v10331_v13 = vpack.c.bf16 %v4484_v4, %v4483_v3  ;;  %v4339_v1 = vld [vmem:[%s11142_s6 + $0x140] sm:$0xff]  ;;  %v4402_v3 = vmul.f32 0.17677669, %v4338_v61  ;;  %v4418_v4 = vmul.f32 0.17677669, %v4354_v63  ;;  %342 = vst.msk [vmem:[#allocation2 + $0xf0] sm:$0xff] %vm14254_vm3, %v11013_v41 }
  0x64   : > { %9807 = vmatmul.mubr.msk.f32.gmra.mrb[2].mxu1 %vm14253_vm0, %v4382_v15  ;;  %9753 = vmatprep.mubr.msk.f32.mxu0 %vm14253_vm0, %v4367_v16  ;;  %v4347_v15 = vld [vmem:[%s11142_s6 + $0x180] sm:$0xff]  ;;  %v4378_v16 = vmul.f32 0.17677669, %v4314_v8  ;;  %v4356_v8 = vld [vmem:[%s11142_s6 + $0x1c8] sm:$0xff]  ;;  %343 = vst.msk [vmem:[#allocation2 + $0xf8] sm:$0xff] %vm14254_vm3, %v11013_v41  ;;  %344 = vst.msk [vmem:[#allocation2 + $0x100] sm:$0xff] %vm14254_vm3, %v11013_v41 }
  0x65   : > { %9809 = vmatprep.mubr.msk.f32.mxu1 %vm14253_vm0, %v4383_v18  ;;  %v4411_v20 = vmul.f32 0.17677669, %v4347_v15  ;;  %v4355_v2 = vld [vmem:[%s11142_s6 + $0x1c0] sm:$0xff]  ;;  %v4420_v12 = vmul.f32 0.17677669, %v4356_v8  ;;  %345 = vst.msk [vmem:[#allocation2 + $0x108] sm:$0xff] %vm14254_vm3, %v11013_v41 }
  0x66   : > { %346 = vst.msk [vmem:[#allocation2 + $0x110] sm:$0xff] %vm14254_vm3, %v11013_v41  ;;  %347 = vst.msk [vmem:[#allocation2 + $0x118] sm:$0xff] %vm14254_vm3, %v11013_v41 }
  0x67   : > { %9754 = vmatmul.mubr.msk.f32.gmra.mrb[4].mxu0 %vm14253_vm0, %v4368_v22  ;;  %v4470_v22 = vld [vmem:[%s11106_s30 + $0x158] sm:$0xff]  ;;  %348 = vst.msk [vmem:[#allocation2 + $0x120] sm:$0xff] %vm14254_vm3, %v11013_v41  ;;  %349 = vst.msk [vmem:[#allocation2 + $0x128] sm:$0xff] %vm14254_vm3, %v11013_v41 }
  0x68   : > { %10270 = vmatpush3.bf16.xpose.msk.msra.mxu0 %vm11110_vm1, %v10265_v11  ;;  %9810 = vmatmul.mubr.msk.f32.gmra.mrb[4].mxu1 %vm14253_vm0, %v4384_v26  ;;  %v4330_v11 = vld [vmem:[%s11142_s6 + $0xf8] sm:$0xff]  ;;  %v10289_v25 = vpack.c.bf16 %v4470_v22, %v4469_v21  ;;  %v10337_v26 = vpack.c.bf16 %v4486_v24, %v4485_v23  ;;  %v4344_v22 = vld [vmem:[%s11142_s6 + $0x168] sm:$0xff]  ;;  %350 = vst.msk [vmem:[#allocation2 + $0x130] sm:$0xff] %vm14254_vm3, %v11013_v41  ;;  %351 = vst.msk [vmem:[#allocation2 + $0x138] sm:$0xff] %vm14254_vm3, %v11013_v41 }
  0x69   : > { %10318 = vmatpush3.bf16.xpose.msk.msra.mxu1 %vm11110_vm1, %v10313_v14  ;;  %10273 = vmatprep.subr.msk.bf16.mxu0 %vm11110_vm1, %v10271_v29  ;;  %v4377_v14 = vmul.f32 0.17677669, %v4313_v6  ;;  %v4394_v18 = vmul.f32 0.17677669, %v4330_v11  ;;  %v4340_v6 = vld [vmem:[%s11142_s6 + $0x148] sm:$0xff]  ;;  %352 = vst.msk [vmem:[#allocation2 + $0x140] sm:$0xff] %vm14254_vm3, %v11013_v41 }
  0x6a   : > { %10321 = vmatprep.subr.msk.bf16.mxu1 %vm11110_vm1, %v10319_v32  ;;  %9756 = vmatprep.mubr.msk.f32.mxu0 %vm14253_vm0, %v4369_v33  ;;  %v4473_v33 = vld [vmem:[%s11106_s30 + $0x170] sm:$0xff]  ;;  %v4404_v11 = vmul.f32 0.17677669, %v4340_v6  ;;  %v4360_v24 = vld [vmem:[%s11142_s6 + $0x1e8] sm:$0xff]  ;;  %v4408_v27 = vmul.f32 0.17677669, %v4344_v22 }
  0x6b   : > { %9757 = vmatmul.mubr.msk.f32.gmra.mrb[6].mxu0 %vm14253_vm0, %v4370_v35  ;;  %9812 = vmatprep.mubr.msk.f32.mxu1 %vm14253_vm0, %v4385_v36  ;;  %v4489_v35 = vld [vmem:[%s11106_s30 + $0x1f0] sm:$0xff]  ;;  %v4490_v36 = vld [vmem:[%s11106_s30 + $0x1f8] sm:$0xff]  ;;  %v4424_v28 = vmul.f32 0.17677669, %v4360_v24  ;;  %353 = vst.msk [vmem:[#allocation2 + $0x148] sm:$0xff] %vm14254_vm3, %v11013_v41  ;;  %354 = vst.msk [vmem:[#allocation2 + $0x150] sm:$0xff] %vm14254_vm3, %v11013_v41 }
  0x6c   : > { %9813 = vmatmul.mubr.msk.f32.gmra.mrb[6].mxu1 %vm14253_vm0, %v4386_v37  ;;  %9759 = vmatprep.mubr.msk.f32.mxu0 %vm14253_vm0, %v4371_v38  ;;  %v10301_v37 = vpack.c.bf16 %v4474_v34, %v4473_v33  ;;  %v10349_v38 = vpack.c.bf16 %v4490_v36, %v4489_v35  ;;  %v5520_v35 = vlaneseq  ;;  %355 = vst.msk [vmem:[#allocation2 + $0x158] sm:$0xff] %vm14254_vm3, %v11013_v41  ;;  %356 = vst.msk [vmem:[#allocation2 + $0x160] sm:$0xff] %vm14254_vm3, %v11013_v41 }
  0x6d   : > { %9815 = vmatprep.mubr.msk.f32.mxu1 %vm14253_vm0, %v4387_v40  ;;  %v4348_v40 = vld [vmem:[%s11142_s6 + $0x188] sm:$0xff]  ;;  %357 = vst.msk [vmem:[#allocation2 + $0x168] sm:$0xff] %vm14254_vm3, %v11013_v41  ;;  %358 = vst.msk [vmem:[#allocation2 + $0x170] sm:$0xff] %vm14254_vm3, %v11013_v41 }
  0x6e   : > { %v4412_v44 = vmul.f32 0.17677669, %v4348_v40  ;;  %v11440_v36 = vshrl.u32 %v5520_v35, 7  ;;  %359 = vst.msk [vmem:[#allocation2 + $0x178] sm:$0xff] %vm14254_vm3, %v11013_v41  ;;  %360 = vst.msk [vmem:[#allocation2 + $0x180] sm:$0xff] %vm14254_vm3, %v11013_v41 }
  0x6f   : > { %9760 = vmatmul.mubr.msk.f32.gmra.mrb[8].mxu0 %vm14253_vm0, %v4372_v46  ;;  %v4334_v46 = vld [vmem:[%s11142_s6 + $0x118] sm:$0xff]  ;;  %361 = vst.msk [vmem:[#allocation2 + $0x188] sm:$0xff] %vm14254_vm3, %v11013_v41  ;;  %362 = vst.msk [vmem:[#allocation2 + $0x190] sm:$0xff] %vm14254_vm3, %v11013_v41 }
  0x70   : > { %10276 = vmatpush3.bf16.xpose.msk.msra.mxu0 %vm11110_vm1, %v10271_v29  ;;  %9816 = vmatmul.mubr.msk.f32.gmra.mrb[8].mxu1 %vm14253_vm0, %v4388_v48  ;;  %v4487_v29 = vld [vmem:[%s11106_s30 + $0x1e0] sm:$0xff]  ;;  %v4350_v48 = vld [vmem:[%s11142_s6 + $0x198] sm:$0xff]  ;;  %v11450_v39 = vadd.s32 24, %v11440_v36  ;;  %363 = vst.msk [vmem:[#allocation2 + $0x198] sm:$0xff] %vm14254_vm3, %v11013_v41  ;;  %364 = vst.msk [vmem:[#allocation2 + $0x1a0] sm:$0xff] %vm14254_vm3, %v11013_v41  ;;  %v11665_v6 = vadd.s32 48, %v11440_v36  ;;  %s14193_s30 = scalar_lea.hbm %s14252_s3, %s9453_s26 }
  0x71   : > { %10324 = vmatpush3.bf16.xpose.msk.msra.mxu1 %vm11110_vm1, %v10319_v32  ;;  %10279 = vmatprep.subr.msk.bf16.mxu0 %vm11110_vm1, %v10277_v51  ;;  %v10343_v32 = vpack.c.bf16 %v4488_v30, %v4487_v29  ;;  %v4414_v0 = vmul.f32 0.17677669, %v4350_v48  ;;  %v4346_v30 = vld [vmem:[%s11142_s6 + $0x178] sm:$0xff]  ;;  %365 = vst.msk [vmem:[#allocation2 + $0x1a8] sm:$0xff] %vm14254_vm3, %v11013_v41  ;;  %366 = vst.msk [vmem:[#allocation2 + $0x1b0] sm:$0xff] %vm14254_vm3, %v11013_v41  ;;  %v11670_v8 = vadd.s32 56, %v11440_v36 }
  0x72   : > { %10327 = vmatprep.subr.msk.bf16.mxu1 %vm11110_vm1, %v10325_v54  ;;  %9762 = vmatprep.mubr.msk.f32.mxu0 %vm14253_vm0, %v4373_v55  ;;  %v4352_v55 = vld [vmem:[%s11142_s6 + $0x1a8] sm:$0xff]  ;;  %v4410_v33 = vmul.f32 0.17677669, %v4346_v30  ;;  %367 = vst.msk [vmem:[#allocation2 + $0x1b8] sm:$0xff] %vm14254_vm3, %v11013_v41  ;;  %368 = vst.msk [vmem:[#allocation2 + $0x1c0] sm:$0xff] %vm14254_vm3, %v11013_v41 }
  0x73   : > { %9763 = vmatmul.mubr.msk.f32.gmra.mrb[10].mxu0 %vm14253_vm0, %v4374_v57  ;;  %9818 = vmatprep.mubr.msk.f32.mxu1 %vm14253_vm0, %v4389_v58  ;;  %v4353_v57 = vld [vmem:[%s11142_s6 + $0x1b0] sm:$0xff]  ;;  %v4400_v58 = vmul.f32 0.17677669, %v4336_v53  ;;  %369 = vst.msk [vmem:[#allocation2 + $0x1c8] sm:$0xff] %vm14254_vm3, %v11013_v41  ;;  %370 = vst.msk [vmem:[#allocation2 + $0x1d0] sm:$0xff] %vm14254_vm3, %v11013_v41 }
  0x74   : > { %9819 = vmatmul.mubr.msk.f32.gmra.mrb[10].mxu1 %vm14253_vm0, %v4390_v59  ;;  %9765 = vmatprep.mubr.msk.f32.mxu0 %vm14253_vm0, %v4375_v60  ;;  %v4416_v59 = vmul.f32 0.17677669, %v4352_v55  ;;  %v4401_v60 = vmul.f32 0.17677669, %v4337_v56  ;;  %371 = vst.msk [vmem:[#allocation2 + $0x1d8] sm:$0xff] %vm14254_vm3, %v11013_v41  ;;  %372 = vst.msk [vmem:[#allocation2 + $0x1e0] sm:$0xff] %vm14254_vm3, %v11013_v41 }
  0x75   : > { %9821 = vmatprep.mubr.msk.f32.mxu1 %vm14253_vm0, %v4391_v62  ;;  %v4417_v62 = vmul.f32 0.17677669, %v4353_v57  ;;  %373 = vst.msk [vmem:[#allocation2 + $0x1e8] sm:$0xff] %vm14254_vm3, %v11013_v41  ;;  %374 = vst.msk [vmem:[#allocation2 + $0x1f0] sm:$0xff] %vm14254_vm3, %v11013_v41  ;;  %v11620_v55 = vadd.s32 32, %v11440_v36 }
  0x76   : > { %375 = vst.msk [vmem:[#allocation2 + $0x1f8] sm:$0xff] %vm14254_vm3, %v11013_v41  ;;  %v12020_v41 = vadd.s32 88, %v11440_v36 }
  0x77   : > { %9766 = vmatmul.mubr.msk.f32.gmra.mrb[12].mxu0 %vm14253_vm0, %v4376_v5  ;;  %v4403_v5 = vmul.f32 0.17677669, %v4339_v1 }
  0x78   : > { %10282 = vmatpush3.bf16.xpose.msk.msra.mxu0 %vm11110_vm1, %v10277_v51  ;;  %9822 = vmatmul.mubr.msk.f32.gmra.mrb[12].mxu1 %vm14253_vm0, %v4392_v7  ;;  %v4398_v51 = vmul.f32 0.17677669, %v4334_v46  ;;  %v4419_v7 = vmul.f32 0.17677669, %v4355_v2 }
  0x79   : > { %10330 = vmatpush3.bf16.xpose.msk.msra.mxu1 %vm11110_vm1, %v10325_v54  ;;  %10285 = vmatprep.subr.msk.bf16.mxu0 %vm11110_vm1, %v10283_v10  ;;  %v4415_v54 = vmul.f32 0.17677669, %v4351_v50 }
  0x7a   : > { %10333 = vmatprep.subr.msk.bf16.mxu1 %vm11110_vm1, %v10331_v13  ;;  %9768 = vmatprep.mubr.msk.f32.mxu0 %vm14253_vm0, %v4377_v14  ;;  %v4342_v14 = vld [vmem:[%s11142_s6 + $0x158] sm:$0xff] }
  0x7b   : > { %9769 = vmatmul.mubr.msk.f32.gmra.mrb[14].mxu0 %vm14253_vm0, %v4378_v16  ;;  %9824 = vmatprep.mubr.msk.f32.mxu1 %vm14253_vm0, %v4393_v17  ;;  %v4358_v16 = vld [vmem:[%s11142_s6 + $0x1d8] sm:$0xff]  ;;  %v4343_v17 = vld [vmem:[%s11142_s6 + $0x160] sm:$0xff] }
  0x7c   : > { %9825 = vmatmul.mubr.msk.f32.gmra.mrb[14].mxu1 %vm14253_vm0, %v4394_v18  ;;  %9859 = vmatprep.mubr.msk.f32.mxu0 %vm14253_vm0, %v4395_v19  ;;  %v4359_v18 = vld [vmem:[%s11142_s6 + $0x1e0] sm:$0xff]  ;;  %v4406_v19 = vmul.f32 0.17677669, %v4342_v14  ;;  %v4407_v21 = vmul.f32 0.17677669, %v4343_v17 }
  0x7d   : > { %9915 = vmatprep.mubr.msk.f32.mxu1 %vm14253_vm0, %v4411_v20  ;;  %v4422_v20 = vmul.f32 0.17677669, %v4358_v16  ;;  %v4423_v23 = vmul.f32 0.17677669, %v4359_v18 }
  0x80   : > { %10288 = vmatpush3.bf16.xpose.msk.msra.mxu0 %vm11110_vm1, %v10283_v10  ;;  %v4357_v10 = vld [vmem:[%s11142_s6 + $0x1d0] sm:$0xff] }
  0x81   : > { %10336 = vmatpush3.bf16.xpose.msk.msra.mxu1 %vm11110_vm1, %v10331_v13  ;;  %10291 = vmatprep.subr.msk.bf16.mxu0 %vm11110_vm1, %v10289_v25  ;;  %v4405_v13 = vmul.f32 0.17677669, %v4341_v9  ;;  %v4421_v15 = vmul.f32 0.17677669, %v4357_v10 }
  0x82   : > { %10339 = vmatprep.subr.msk.bf16.mxu1 %vm11110_vm1, %v10337_v26 }
  0x88   : > { %10294 = vmatpush3.bf16.xpose.msk.msra.mxu0 %vm11110_vm1, %v10289_v25  ;;  %v4345_v25 = vld [vmem:[%s11142_s6 + $0x170] sm:$0xff] }
  0x89   : > { %10342 = vmatpush3.bf16.xpose.msk.msra.mxu1 %vm11110_vm1, %v10337_v26  ;;  %10297 = vmatprep.subr.msk.bf16.mxu0 %vm11110_vm1, %v10295_v31  ;;  %v4361_v26 = vld [vmem:[%s11142_s6 + $0x1f0] sm:$0xff]  ;;  %v4409_v29 = vmul.f32 0.17677669, %v4345_v25 }
  0x8a   : > { %10345 = vmatprep.subr.msk.bf16.mxu1 %vm11110_vm1, %v10343_v32 }
  0x90   : > { %10300 = vmatpush3.bf16.xpose.msk.msra.mxu0 %vm11110_vm1, %v10295_v31  ;;  %v4425_v31 = vmul.f32 0.17677669, %v4361_v26 }
  0x91   : > { %10348 = vmatpush3.bf16.xpose.msk.msra.mxu1 %vm11110_vm1, %v10343_v32  ;;  %10303 = vmatprep.subr.msk.bf16.mxu0 %vm11110_vm1, %v10301_v37  ;;  %v4362_v32 = vld [vmem:[%s11142_s6 + $0x1f8] sm:$0xff]  ;;  %s10937_s6 = sshll.u32 %s11019_s5, 4  ;;  %s10938_s6 = int_to_ptr.vmem [resolvable:$false] %s10937_s6 }
  0x92   : > { %10351 = vmatprep.subr.msk.bf16.mxu1 %vm11110_vm1, %v10349_v38  ;;  %v4426_v34 = vmul.f32 0.17677669, %v4362_v32  ;;  %s10939_s7 = scalar_lea.vmem %s10938_s6, 4096  ;;  %p10940_p1 = scmp.lt.s32.totalorder %s14197_s27, %s10938_s6 }
  0x93   : > { %p10941_p2 = scmp.lt.s32.totalorder %s10939_s7, %s10933_s4 }
  0x95   : > { %p10942_p3 = por %p10941_p2, %p10940_p1 }
  0x97   : > { %p10943_p5 = pnand %p10942_p3, %p10936_p0 }
  0x98   : > { %10306 = vmatpush3.bf16.xpose.msk.msra.mxu0 %vm11110_vm1, %v10301_v37  ;;  %v11443_v37 = vadd.s32 8, %v11440_v36 }
  0x99   : > { %10354 = vmatpush3.bf16.xpose.msk.msra.mxu1 %vm11110_vm1, %v10349_v38  ;;  %v11445_v38 = vand.u32 127, %v5520_v35 }
  0x9b   : > { %vm5540_vm2 = vcmp.le.s32.totalorder %v11445_v38, %v11443_v37  ;;  %vm5539_vm4 = vcmp.le.s32.totalorder %v11445_v38, %v11440_v36  ;;  %vm5542_vm5 = vcmp.le.s32.totalorder %v11445_v38, %v11450_v39  ;;  %vm5543_vm7 = vcmp.le.s32.totalorder %v11445_v38, %v11620_v55 }
  0x9c   : > { %vm5545_vm9 = vcmp.le.s32.totalorder %v11445_v38, %v11665_v6  ;;  %vm5546_vm10 = vcmp.le.s32.totalorder %v11445_v38, %v11670_v8  ;;  %vm5550_vm14 = vcmp.le.s32.totalorder %v11445_v38, %v12020_v41 }
  0x9f   : > { %9860 = vmatmul.mubr.msk.f32.vlgmr.msra.gmra.mrb[16].mxu0 %vm14253_vm0, %v4396_v43 }
  0xa0   : > { %9916 = vmatmul.mubr.msk.f32.vlgmr.msra.gmra.mrb[16].mxu1 %vm14253_vm0, %v4412_v44  ;;  %9862 = vmatprep.mubr.msk.f32.mxu0 %vm14253_vm0, %v4397_v45 }
  0xa1   : > { %9918 = vmatprep.mubr.msk.f32.mxu1 %vm14253_vm0, %v4413_v47 }
  0xa3   : > { %9863 = vmatmul.mubr.msk.f32.gmra.mrb[18].mxu0 %vm14253_vm0, %v4398_v51 }
  0xa4   : > { %9919 = vmatmul.mubr.msk.f32.gmra.mrb[18].mxu1 %vm14253_vm0, %v4414_v0  ;;  %9865 = vmatprep.mubr.msk.f32.mxu0 %vm14253_vm0, %v4399_v52  ;;  %v11611_v52 = vadd.s32 16, %v11440_v36 }
  0xa5   : > { %9921 = vmatprep.mubr.msk.f32.mxu1 %vm14253_vm0, %v4415_v54 }
  0xa6   : > { %vm5541_vm6 = vcmp.le.s32.totalorder %v11445_v38, %v11611_v52 }
  0xa7   : > { %9866 = vmatmul.mubr.msk.f32.gmra.mrb[20].mxu0 %vm14253_vm0, %v4400_v58  ;;  %v11628_v58 = vadd.s32 40, %v11440_v36 }
  0xa8   : > { %9922 = vmatmul.mubr.msk.f32.gmra.mrb[20].mxu1 %vm14253_vm0, %v4416_v59  ;;  %9868 = vmatprep.mubr.msk.f32.mxu0 %vm14253_vm0, %v4401_v60 }
  0xa9   : > { %9924 = vmatprep.mubr.msk.f32.mxu1 %vm14253_vm0, %v4417_v62  ;;  %vm5544_vm8 = vcmp.le.s32.totalorder %v11445_v38, %v11628_v58 }
  0xab   : > { %9869 = vmatmul.mubr.msk.f32.gmra.mrb[22].mxu0 %vm14253_vm0, %v4402_v3 }
  0xac   : > { %9925 = vmatmul.mubr.msk.f32.gmra.mrb[22].mxu1 %vm14253_vm0, %v4418_v4  ;;  %9871 = vmatprep.mubr.msk.f32.mxu0 %vm14253_vm0, %v4403_v5 }
  0xad   : > { %9927 = vmatprep.mubr.msk.f32.mxu1 %vm14253_vm0, %v4419_v7 }
  0xaf   : > { %9872 = vmatmul.mubr.msk.f32.gmra.mrb[24].mxu0 %vm14253_vm0, %v4404_v11 }
  0xb0   : > { %9928 = vmatmul.mubr.msk.f32.gmra.mrb[24].mxu1 %vm14253_vm0, %v4420_v12  ;;  %9874 = vmatprep.mubr.msk.f32.mxu0 %vm14253_vm0, %v4405_v13  ;;  %v11014_v12 = vmov 0  }
  0xb1   : > { %9930 = vmatprep.mubr.msk.f32.mxu1 %vm14253_vm0, %v4421_v15  ;;  %10547 = vset.pattern.permute.xlu1 %v11014_v12 }
  0xb2   : > { %10548 = vset.pattern.permute.xlu0 %v11014_v12 }
  0xb3   : > { %9875 = vmatmul.mubr.msk.f32.gmra.mrb[26].mxu0 %vm14253_vm0, %v4406_v19 }
  0xb4   : > { %9931 = vmatmul.mubr.msk.f32.gmra.mrb[26].mxu1 %vm14253_vm0, %v4422_v20  ;;  %9877 = vmatprep.mubr.msk.f32.mxu0 %vm14253_vm0, %v4407_v21  ;;  %v11715_v21 = vadd.s32 64, %v11440_v36 }
  0xb5   : > { %9933 = vmatprep.mubr.msk.f32.mxu1 %vm14253_vm0, %v4423_v23  ;;  %v11720_v23 = vadd.s32 72, %v11440_v36 }
  0xb6   : > { %vm5547_vm11 = vcmp.le.s32.totalorder %v11445_v38, %v11715_v21 }
  0xb7   : > { %9878 = vmatmul.mubr.msk.f32.gmra.mrb[28].mxu0 %vm14253_vm0, %v4408_v27  ;;  %v11015_v27 = vmov 0.0   ;;  %vm5548_vm12 = vcmp.le.s32.totalorder %v11445_v38, %v11720_v23 }
  0xb8   : > { %9934 = vmatmul.mubr.msk.f32.gmra.mrb[28].mxu1 %vm14253_vm0, %v4424_v28  ;;  %9880 = vmatprep.mubr.msk.f32.mxu0 %vm14253_vm0, %v4409_v29  ;;  %458 = vst.msk [vmem:[#allocation4 + $0x88] sm:$0xff] %vm14253_vm0, %v11015_v27  ;;  %441 = vst.msk [vmem:[#allocation4] sm:$0xff] %vm14253_vm0, %v11015_v27 }
  0xb9   : > { %9936 = vmatprep.mubr.msk.f32.mxu1 %vm14253_vm0, %v4425_v31  ;;  %376 = vst.msk [vmem:[#allocation3] sm:$0xff] %vm14254_vm3, %v11015_v27  ;;  %377 = vst.msk [vmem:[#allocation3 + $0x8] sm:$0xff] %vm14254_vm3, %v11015_v27 }
  0xba   : > { %378 = vst.msk [vmem:[#allocation3 + $0x10] sm:$0xff] %vm14254_vm3, %v11015_v27  ;;  %379 = vst.msk [vmem:[#allocation3 + $0x18] sm:$0xff] %vm14254_vm3, %v11015_v27 }
  0xbb   : > { %9881 = vmatmul.mubr.msk.f32.gmra.mrb[30].mxu0 %vm14253_vm0, %v4410_v33  ;;  %380 = vst.msk [vmem:[#allocation3 + $0x20] sm:$0xff] %vm14254_vm3, %v11015_v27  ;;  %381 = vst.msk [vmem:[#allocation3 + $0x28] sm:$0xff] %vm14254_vm3, %v11015_v27 }
  0xbc   : > { %9937 = vmatmul.mubr.msk.f32.gmra.mrb[30].mxu1 %vm14253_vm0, %v4426_v34  ;;  %382 = vst.msk [vmem:[#allocation3 + $0x30] sm:$0xff] %vm14254_vm3, %v11015_v27  ;;  %383 = vst.msk [vmem:[#allocation3 + $0x38] sm:$0xff] %vm14254_vm3, %v11015_v27 }
  0xbd   : > { %384 = vst.msk [vmem:[#allocation3 + $0x40] sm:$0xff] %vm14254_vm3, %v11015_v27  ;;  %385 = vst.msk [vmem:[#allocation3 + $0x48] sm:$0xff] %vm14254_vm3, %v11015_v27 }
  0xbe   : > { %386 = vst.msk [vmem:[#allocation3 + $0x50] sm:$0xff] %vm14254_vm3, %v11015_v27  ;;  %387 = vst.msk [vmem:[#allocation3 + $0x58] sm:$0xff] %vm14254_vm3, %v11015_v27 }
  0xbf   : > { %388 = vst.msk [vmem:[#allocation3 + $0x60] sm:$0xff] %vm14254_vm3, %v11015_v27  ;;  %389 = vst.msk [vmem:[#allocation3 + $0x68] sm:$0xff] %vm14254_vm3, %v11015_v27 }
  0xc0   : > { %390 = vst.msk [vmem:[#allocation3 + $0x70] sm:$0xff] %vm14254_vm3, %v11015_v27  ;;  %391 = vst.msk [vmem:[#allocation3 + $0x78] sm:$0xff] %vm14254_vm3, %v11015_v27 }
  0xc1   : > { %392 = vst.msk [vmem:[#allocation3 + $0x80] sm:$0xff] %vm14254_vm3, %v11015_v27  ;;  %393 = vst.msk [vmem:[#allocation3 + $0x88] sm:$0xff] %vm14254_vm3, %v11015_v27 }
  0xc2   : > { %394 = vst.msk [vmem:[#allocation3 + $0x90] sm:$0xff] %vm14254_vm3, %v11015_v27  ;;  %395 = vst.msk [vmem:[#allocation3 + $0x98] sm:$0xff] %vm14254_vm3, %v11015_v27 }
  0xc3   : > { %396 = vst.msk [vmem:[#allocation3 + $0xa0] sm:$0xff] %vm14254_vm3, %v11015_v27  ;;  %397 = vst.msk [vmem:[#allocation3 + $0xa8] sm:$0xff] %vm14254_vm3, %v11015_v27 }
  0xc4   : > { %398 = vst.msk [vmem:[#allocation3 + $0xb0] sm:$0xff] %vm14254_vm3, %v11015_v27  ;;  %399 = vst.msk [vmem:[#allocation3 + $0xb8] sm:$0xff] %vm14254_vm3, %v11015_v27 }
  0xc5   : > { %400 = vst.msk [vmem:[#allocation3 + $0xc0] sm:$0xff] %vm14254_vm3, %v11015_v27  ;;  %401 = vst.msk [vmem:[#allocation3 + $0xc8] sm:$0xff] %vm14254_vm3, %v11015_v27 }
  0xc6   : > { %402 = vst.msk [vmem:[#allocation3 + $0xd0] sm:$0xff] %vm14254_vm3, %v11015_v27  ;;  %403 = vst.msk [vmem:[#allocation3 + $0xd8] sm:$0xff] %vm14254_vm3, %v11015_v27 }
  0xc7   : > { %404 = vst.msk [vmem:[#allocation3 + $0xe0] sm:$0xff] %vm14254_vm3, %v11015_v27  ;;  %405 = vst.msk [vmem:[#allocation3 + $0xe8] sm:$0xff] %vm14254_vm3, %v11015_v27 }
  0xc8   : > { %406 = vst.msk [vmem:[#allocation3 + $0xf0] sm:$0xff] %vm14254_vm3, %v11015_v27  ;;  %407 = vst.msk [vmem:[#allocation3 + $0xf8] sm:$0xff] %vm14254_vm3, %v11015_v27 }
  0xc9   : > { %408 = vst.msk [vmem:[#allocation3 + $0x100] sm:$0xff] %vm14254_vm3, %v11015_v27  ;;  %409 = vst.msk [vmem:[#allocation3 + $0x108] sm:$0xff] %vm14254_vm3, %v11015_v27 }
  0xca   : > { %410 = vst.msk [vmem:[#allocation3 + $0x110] sm:$0xff] %vm14254_vm3, %v11015_v27  ;;  %411 = vst.msk [vmem:[#allocation3 + $0x118] sm:$0xff] %vm14254_vm3, %v11015_v27 }
  0xcb   : > { %412 = vst.msk [vmem:[#allocation3 + $0x120] sm:$0xff] %vm14254_vm3, %v11015_v27  ;;  %413 = vst.msk [vmem:[#allocation3 + $0x128] sm:$0xff] %vm14254_vm3, %v11015_v27 }
  0xcc   : > { %414 = vst.msk [vmem:[#allocation3 + $0x130] sm:$0xff] %vm14254_vm3, %v11015_v27  ;;  %415 = vst.msk [vmem:[#allocation3 + $0x138] sm:$0xff] %vm14254_vm3, %v11015_v27 }
  0xcd   : > { %416 = vst.msk [vmem:[#allocation3 + $0x140] sm:$0xff] %vm14254_vm3, %v11015_v27  ;;  %417 = vst.msk [vmem:[#allocation3 + $0x148] sm:$0xff] %vm14254_vm3, %v11015_v27 }
  0xce   : > { %418 = vst.msk [vmem:[#allocation3 + $0x150] sm:$0xff] %vm14254_vm3, %v11015_v27  ;;  %419 = vst.msk [vmem:[#allocation3 + $0x158] sm:$0xff] %vm14254_vm3, %v11015_v27 }
  0xcf   : > { %420 = vst.msk [vmem:[#allocation3 + $0x160] sm:$0xff] %vm14254_vm3, %v11015_v27  ;;  %421 = vst.msk [vmem:[#allocation3 + $0x168] sm:$0xff] %vm14254_vm3, %v11015_v27 }
  0xd0   : > { %422 = vst.msk [vmem:[#allocation3 + $0x170] sm:$0xff] %vm14254_vm3, %v11015_v27  ;;  %423 = vst.msk [vmem:[#allocation3 + $0x178] sm:$0xff] %vm14254_vm3, %v11015_v27 }
  0xd1   : > { %424 = vst.msk [vmem:[#allocation3 + $0x180] sm:$0xff] %vm14254_vm3, %v11015_v27  ;;  %425 = vst.msk [vmem:[#allocation3 + $0x188] sm:$0xff] %vm14254_vm3, %v11015_v27 }
  0xd2   : > { %426 = vst.msk [vmem:[#allocation3 + $0x190] sm:$0xff] %vm14254_vm3, %v11015_v27  ;;  %427 = vst.msk [vmem:[#allocation3 + $0x198] sm:$0xff] %vm14254_vm3, %v11015_v27 }
  0xd3   : > { %428 = vst.msk [vmem:[#allocation3 + $0x1a0] sm:$0xff] %vm14254_vm3, %v11015_v27  ;;  %429 = vst.msk [vmem:[#allocation3 + $0x1a8] sm:$0xff] %vm14254_vm3, %v11015_v27 }
  0xd4   : > { %430 = vst.msk [vmem:[#allocation3 + $0x1b0] sm:$0xff] %vm14254_vm3, %v11015_v27  ;;  %431 = vst.msk [vmem:[#allocation3 + $0x1b8] sm:$0xff] %vm14254_vm3, %v11015_v27 }
  0xd5   : > { %432 = vst.msk [vmem:[#allocation3 + $0x1c0] sm:$0xff] %vm14254_vm3, %v11015_v27  ;;  %433 = vst.msk [vmem:[#allocation3 + $0x1c8] sm:$0xff] %vm14254_vm3, %v11015_v27 }
  0xd6   : > { %434 = vst.msk [vmem:[#allocation3 + $0x1d0] sm:$0xff] %vm14254_vm3, %v11015_v27  ;;  %435 = vst.msk [vmem:[#allocation3 + $0x1d8] sm:$0xff] %vm14254_vm3, %v11015_v27 }
  0xd7   : > { %436 = vst.msk [vmem:[#allocation3 + $0x1e0] sm:$0xff] %vm14254_vm3, %v11015_v27  ;;  %437 = vst.msk [vmem:[#allocation3 + $0x1e8] sm:$0xff] %vm14254_vm3, %v11015_v27 }
  0xd8   : > { %438 = vst.msk [vmem:[#allocation3 + $0x1f0] sm:$0xff] %vm14254_vm3, %v11015_v27  ;;  %439 = vst.msk [vmem:[#allocation3 + $0x1f8] sm:$0xff] %vm14254_vm3, %v11015_v27 }
  0xd9   : > { %442 = vst.msk [vmem:[#allocation4 + $0x8] sm:$0xff] %vm14253_vm0, %v11015_v27  ;;  %443 = vst.msk [vmem:[#allocation4 + $0x10] sm:$0xff] %vm14253_vm0, %v11015_v27 }
  0xda   : > { %444 = vst.msk [vmem:[#allocation4 + $0x18] sm:$0xff] %vm14253_vm0, %v11015_v27  ;;  %445 = vst.msk [vmem:[#allocation4 + $0x20] sm:$0xff] %vm14253_vm0, %v11015_v27 }
  0xdb   : > { %446 = vst.msk [vmem:[#allocation4 + $0x28] sm:$0xff] %vm14253_vm0, %v11015_v27  ;;  %447 = vst.msk [vmem:[#allocation4 + $0x30] sm:$0xff] %vm14253_vm0, %v11015_v27 }
  0xdc   : > { %448 = vst.msk [vmem:[#allocation4 + $0x38] sm:$0xff] %vm14253_vm0, %v11015_v27  ;;  %449 = vst.msk [vmem:[#allocation4 + $0x40] sm:$0xff] %vm14253_vm0, %v11015_v27 }
  0xdd   : > { %450 = vst.msk [vmem:[#allocation4 + $0x48] sm:$0xff] %vm14253_vm0, %v11015_v27  ;;  %451 = vst.msk [vmem:[#allocation4 + $0x50] sm:$0xff] %vm14253_vm0, %v11015_v27 }
  0xde   : > { %452 = vst.msk [vmem:[#allocation4 + $0x58] sm:$0xff] %vm14253_vm0, %v11015_v27  ;;  %453 = vst.msk [vmem:[#allocation4 + $0x60] sm:$0xff] %vm14253_vm0, %v11015_v27 }
  0xdf   : > { %454 = vst.msk [vmem:[#allocation4 + $0x68] sm:$0xff] %vm14253_vm0, %v11015_v27  ;;  %455 = vst.msk [vmem:[#allocation4 + $0x70] sm:$0xff] %vm14253_vm0, %v11015_v27 }
  0xe0   : > { %456 = vst.msk [vmem:[#allocation4 + $0x78] sm:$0xff] %vm14253_vm0, %v11015_v27  ;;  %457 = vst.msk [vmem:[#allocation4 + $0x80] sm:$0xff] %vm14253_vm0, %v11015_v27 }
  0xe1   : > { %459 = vst.msk [vmem:[#allocation4 + $0x90] sm:$0xff] %vm14253_vm0, %v11015_v27  ;;  %460 = vst.msk [vmem:[#allocation4 + $0x98] sm:$0xff] %vm14253_vm0, %v11015_v27 }
  0xe2   : > { %461 = vst.msk [vmem:[#allocation4 + $0xa0] sm:$0xff] %vm14253_vm0, %v11015_v27  ;;  %462 = vst.msk [vmem:[#allocation4 + $0xa8] sm:$0xff] %vm14253_vm0, %v11015_v27 }
  0xe3   : > { %463 = vst.msk [vmem:[#allocation4 + $0xb0] sm:$0xff] %vm14253_vm0, %v11015_v27  ;;  %464 = vst.msk [vmem:[#allocation4 + $0xb8] sm:$0xff] %vm14253_vm0, %v11015_v27 }
  0xe4   : > { %465 = vst.msk [vmem:[#allocation4 + $0xc0] sm:$0xff] %vm14253_vm0, %v11015_v27  ;;  %466 = vst.msk [vmem:[#allocation4 + $0xc8] sm:$0xff] %vm14253_vm0, %v11015_v27 }
  0xe5   : > { %467 = vst.msk [vmem:[#allocation4 + $0xd0] sm:$0xff] %vm14253_vm0, %v11015_v27  ;;  %468 = vst.msk [vmem:[#allocation4 + $0xd8] sm:$0xff] %vm14253_vm0, %v11015_v27 }
  0xe6   : > { %469 = vst.msk [vmem:[#allocation4 + $0xe0] sm:$0xff] %vm14253_vm0, %v11015_v27  ;;  %470 = vst.msk [vmem:[#allocation4 + $0xe8] sm:$0xff] %vm14253_vm0, %v11015_v27 }
  0xe7   : > { %471 = vst.msk [vmem:[#allocation4 + $0xf0] sm:$0xff] %vm14253_vm0, %v11015_v27  ;;  %472 = vst.msk [vmem:[#allocation4 + $0xf8] sm:$0xff] %vm14253_vm0, %v11015_v27 }
  0xe8   : > { %473 = vst.msk [vmem:[#allocation4 + $0x100] sm:$0xff] %vm14253_vm0, %v11015_v27  ;;  %474 = vst.msk [vmem:[#allocation4 + $0x108] sm:$0xff] %vm14253_vm0, %v11015_v27 }
  0xe9   : > { %475 = vst.msk [vmem:[#allocation4 + $0x110] sm:$0xff] %vm14253_vm0, %v11015_v27  ;;  %476 = vst.msk [vmem:[#allocation4 + $0x118] sm:$0xff] %vm14253_vm0, %v11015_v27 }
  0xea   : > { %477 = vst.msk [vmem:[#allocation4 + $0x120] sm:$0xff] %vm14253_vm0, %v11015_v27  ;;  %478 = vst.msk [vmem:[#allocation4 + $0x128] sm:$0xff] %vm14253_vm0, %v11015_v27 }
  0xeb   : > { %479 = vst.msk [vmem:[#allocation4 + $0x130] sm:$0xff] %vm14253_vm0, %v11015_v27  ;;  %480 = vst.msk [vmem:[#allocation4 + $0x138] sm:$0xff] %vm14253_vm0, %v11015_v27 }
  0xec   : > { %481 = vst.msk [vmem:[#allocation4 + $0x140] sm:$0xff] %vm14253_vm0, %v11015_v27  ;;  %482 = vst.msk [vmem:[#allocation4 + $0x148] sm:$0xff] %vm14253_vm0, %v11015_v27 }
  0xed   : > { %483 = vst.msk [vmem:[#allocation4 + $0x150] sm:$0xff] %vm14253_vm0, %v11015_v27  ;;  %484 = vst.msk [vmem:[#allocation4 + $0x158] sm:$0xff] %vm14253_vm0, %v11015_v27 }
  0xee   : > { %485 = vst.msk [vmem:[#allocation4 + $0x160] sm:$0xff] %vm14253_vm0, %v11015_v27  ;;  %486 = vst.msk [vmem:[#allocation4 + $0x168] sm:$0xff] %vm14253_vm0, %v11015_v27 }
  0xef   : > { %487 = vst.msk [vmem:[#allocation4 + $0x170] sm:$0xff] %vm14253_vm0, %v11015_v27  ;;  %488 = vst.msk [vmem:[#allocation4 + $0x178] sm:$0xff] %vm14253_vm0, %v11015_v27 }
  0xf0   : > { %489 = vst.msk [vmem:[#allocation4 + $0x180] sm:$0xff] %vm14253_vm0, %v11015_v27  ;;  %490 = vst.msk [vmem:[#allocation4 + $0x188] sm:$0xff] %vm14253_vm0, %v11015_v27 }
  0xf1   : > { %491 = vst.msk [vmem:[#allocation4 + $0x190] sm:$0xff] %vm14253_vm0, %v11015_v27  ;;  %492 = vst.msk [vmem:[#allocation4 + $0x198] sm:$0xff] %vm14253_vm0, %v11015_v27 }
  0xf2   : > { %493 = vst.msk [vmem:[#allocation4 + $0x1a0] sm:$0xff] %vm14253_vm0, %v11015_v27  ;;  %494 = vst.msk [vmem:[#allocation4 + $0x1a8] sm:$0xff] %vm14253_vm0, %v11015_v27 }
  0xf3   : > { %495 = vst.msk [vmem:[#allocation4 + $0x1b0] sm:$0xff] %vm14253_vm0, %v11015_v27  ;;  %496 = vst.msk [vmem:[#allocation4 + $0x1b8] sm:$0xff] %vm14253_vm0, %v11015_v27 }
  0xf4   : > { %497 = vst.msk [vmem:[#allocation4 + $0x1c0] sm:$0xff] %vm14253_vm0, %v11015_v27  ;;  %498 = vst.msk [vmem:[#allocation4 + $0x1c8] sm:$0xff] %vm14253_vm0, %v11015_v27 }
  0xf5   : > { %499 = vst.msk [vmem:[#allocation4 + $0x1d0] sm:$0xff] %vm14253_vm0, %v11015_v27  ;;  %500 = vst.msk [vmem:[#allocation4 + $0x1d8] sm:$0xff] %vm14253_vm0, %v11015_v27 }
  0xf6   : > { %501 = vst.msk [vmem:[#allocation4 + $0x1e0] sm:$0xff] %vm14253_vm0, %v11015_v27  ;;  %502 = vst.msk [vmem:[#allocation4 + $0x1e8] sm:$0xff] %vm14253_vm0, %v11015_v27 }
  0xf7   : > { %503 = vst.msk [vmem:[#allocation4 + $0x1f0] sm:$0xff] %vm14253_vm0, %v11015_v27  ;;  %504 = vst.msk [vmem:[#allocation4 + $0x1f8] sm:$0xff] %vm14253_vm0, %v11015_v27 }
 0x132   : > { %v11452_v40 = vpop.f32.mrb[0].mxu0 }
 0x133   : > { %v9805_v42 = vpop.f32.mrb[0].mxu1  ;;  %v4718_v43 = vpop.f32.mrb[1].mxu0  ;;  %v11586_v44 = vsel %vm5540_vm2, %v11452_v40, -1.7014117e+38  ;;  %v12017_v40 = vadd.s32 80, %v11440_v36 }
 0x134   : > { %v11591_v45 = vsel %vm5540_vm2, %v9805_v42, -1.7014117e+38  ;;  %5717 = vmax.xlane.f32.xlu0 %v11586_v44  ;;  %v4959_v46 = vpop.f32.mrb[1].mxu1  ;;  %v11602_v48 = vsel %vm5539_vm4, %v4718_v43, -1.7014117e+38 }
 0x135   : > { %5749 = vmax.xlane.f32.xlu1 %v11591_v45  ;;  %v11625_v56 = vsel %vm5539_vm4, %v4959_v46, -1.7014117e+38  ;;  %vm5549_vm13 = vcmp.le.s32.totalorder %v11445_v38, %v12017_v40 }
 0x136   : > { %v9752_v47 = vpop.f32.mrb[2].mxu0 }
 0x137   : > { %v11607_v49 = vsel %vm5542_vm5, %v9752_v47, -1.7014117e+38  ;;  %v4728_v50 = vpop.f32.mrb[3].mxu0  ;;  %v9808_v51 = vpop.f32.mrb[2].mxu1 }
 0x138   : > { %5715 = vmax.xlane.f32.xlu0 %v11602_v48  ;;  %v4969_v0 = vpop.f32.mrb[3].mxu1  ;;  %v11617_v53 = vsel %vm5542_vm5, %v9808_v51, -1.7014117e+38  ;;  %v11649_v2 = vsel %vm5541_vm6, %v4728_v50, -1.7014117e+38  ;;  %v12055_v50 = vadd.s32 96, %v11440_v36 }
 0x139   : > { %5721 = vmax.xlane.f32.xlu1 %v11607_v49  ;;  %v11637_v61 = vsel %vm5541_vm6, %v4969_v0, -1.7014117e+38  ;;  %v12058_v51 = vadd.s32 104, %v11440_v36 }
 0x13a   : > { %v9755_v54 = vpop.f32.mrb[4].mxu0  ;;  %vm5551_vm15 = vcmp.le.s32.totalorder %v11445_v38, %v12055_v50 }
 0x13b   : > { %v4738_v57 = vpop.f32.mrb[5].mxu0  ;;  %v9811_v59 = vpop.f32.mrb[4].mxu1  ;;  %v11662_v5 = vsel %vm5544_vm8, %v9755_v54, -1.7014117e+38  ;;  %vm5552_vm1 = vcmp.le.s32.totalorder %v11445_v38, %v12058_v51 }
 0x13c   : > { %5747 = vmax.xlane.f32.xlu0 %v11625_v56  ;;  %v4979_v60 = vpop.f32.mrb[5].mxu1  ;;  %v11657_v4 = vsel %vm5543_vm7, %v4738_v57, -1.7014117e+38  ;;  %14409 = vst [vmem:[#allocation9_spill] sm:$0xff] %v11662_v5  ;;  %v11688_v14 = vsel %vm5544_vm8, %v9811_v59, -1.7014117e+38 }
 0x13d   : > { %5753 = vmax.xlane.f32.xlu1 %v11617_v53  ;;  %14408 = vst [vmem:[#allocation8_spill] sm:$0xff] %v11657_v4  ;;  %v11683_v13 = vsel %vm5543_vm7, %v4979_v60, -1.7014117e+38  ;;  %14411 = vst [vmem:[#allocation11_spill] sm:$0xff] %v11688_v14  ;;  %v12093_v60 = vadd.s32 112, %v11440_v36 }
 0x13e   : > { %v9758_v62 = vpop.f32.mrb[6].mxu0  ;;  %14410 = vst [vmem:[#allocation10_spill] sm:$0xff] %v11683_v13 }
 0x13f   : > { %v4748_v63 = vpop.f32.mrb[7].mxu0  ;;  %v11643_v1 = vpop.f32.mrb[6].mxu1  ;;  %v11712_v20 = vsel %vm5546_vm10, %v9758_v62, -1.7014117e+38  ;;  %v12096_v62 = vadd.s32 120, %v11440_v36  ;;  %vm5553_vm0 = vcmp.le.s32.totalorder %v11445_v38, %v12093_v60  ;;  %v4492_v60 = vld [vmem:[%s12338_s9 + $0x8] sm:$0xff] }
 0x140   : > { %5751 = vmax.xlane.f32.xlu0 %v11637_v61  ;;  %v11651_v3 = vpop.f32.mrb[7].mxu1  ;;  %v11707_v19 = vsel %vm5545_vm9, %v4748_v63, -1.7014117e+38  ;;  %14413 = vst [vmem:[#allocation13_spill] sm:$0xff] %v11712_v20  ;;  %v11996_v29 = vsel %vm5546_vm10, %v11643_v1, -1.7014117e+38 }
 0x141   : > { %5719 = vmax.xlane.f32.xlu1 %v11649_v2  ;;  %14412 = vst [vmem:[#allocation12_spill] sm:$0xff] %v11707_v19  ;;  %v11990_v28 = vsel %vm5545_vm9, %v11651_v3, -1.7014117e+38  ;;  %14415 = vst [vmem:[#allocation15_spill] sm:$0xff] %v11996_v29  ;;  %vm5554_vm3 = vcmp.le.s32.totalorder %v11445_v38, %v12096_v62  ;;  %v4491_v38 = vld [vmem:[%s12338_s9] sm:$0xff] }
 0x142   : > { %v11667_v7 = vpop.f32.mrb[8].mxu0  ;;  %14414 = vst [vmem:[#allocation14_spill] sm:$0xff] %v11990_v28  ;;  %v10355_v62 = vpack.c.bf16 %v4492_v60, %v4491_v38  ;;  %v4495_v60 = vld [vmem:[%s12338_s9 + $0x20] sm:$0xff] }
 0x143   : > { %v11672_v9 = vpop.f32.mrb[9].mxu0  ;;  %v11674_v10 = vpop.f32.mrb[8].mxu1  ;;  %v12014_v35 = vsel %vm5548_vm12, %v11667_v7, -1.7014117e+38 }
 0x144   : > { %5723 = vmax.xlane.f32.xlu0 %v11657_v4  ;;  %v11677_v11 = vpop.f32.mrb[9].mxu1  ;;  %v12008_v34 = vsel %vm5547_vm11, %v11672_v9, -1.7014117e+38  ;;  %14417 = vst [vmem:[#allocation17_spill] sm:$0xff] %v12014_v35  ;;  %v12034_v43 = vsel %vm5548_vm12, %v11674_v10, -1.7014117e+38  ;;  %10356 = vmatprep.subr.bf16.mxu0 %v10355_v62 }
 0x145   : > { %5725 = vmax.xlane.f32.xlu1 %v11662_v5  ;;  %14416 = vst [vmem:[#allocation16_spill] sm:$0xff] %v12008_v34  ;;  %v12028_v42 = vsel %vm5547_vm11, %v11677_v11, -1.7014117e+38  ;;  %14419 = vst [vmem:[#allocation19_spill] sm:$0xff] %v12034_v43  ;;  %10358 = vmatpush3.bf16.msra.mxu0 %v10355_v62  ;;  %v4496_v62 = vld [vmem:[%s12338_s9 + $0x28] sm:$0xff] }
 0x146   : > { %v11692_v15 = vpop.f32.mrb[10].mxu0  ;;  %14418 = vst [vmem:[#allocation18_spill] sm:$0xff] %v12028_v42 }
 0x147   : > { %v11696_v16 = vpop.f32.mrb[11].mxu0  ;;  %v11698_v17 = vpop.f32.mrb[10].mxu1  ;;  %v12052_v47 = vsel %vm5550_vm14, %v11692_v15, -1.7014117e+38 }
 0x148   : > { %5755 = vmax.xlane.f32.xlu0 %v11683_v13  ;;  %v11701_v18 = vpop.f32.mrb[11].mxu1  ;;  %v12046_v46 = vsel %vm5549_vm13, %v11696_v16, -1.7014117e+38  ;;  %14421 = vst [vmem:[#allocation21_spill] sm:$0xff] %v12052_v47  ;;  %v12072_v54 = vsel %vm5550_vm14, %v11698_v17, -1.7014117e+38 }
 0x149   : > { %5757 = vmax.xlane.f32.xlu1 %v11688_v14  ;;  %14420 = vst [vmem:[#allocation20_spill] sm:$0xff] %v12046_v46  ;;  %v12066_v0 = vsel %vm5549_vm13, %v11701_v18, -1.7014117e+38  ;;  %14423 = vst [vmem:[#allocation23_spill] sm:$0xff] %v12072_v54 }
 0x14a   : > { %v11717_v22 = vpop.f32.mrb[12].mxu0  ;;  %14422 = vst [vmem:[#allocation22_spill] sm:$0xff] %v12066_v0 }
 0x14b   : > { %v11722_v24 = vpop.f32.mrb[13].mxu0  ;;  %v11724_v25 = vpop.f32.mrb[12].mxu1  ;;  %v12090_v59 = vsel %vm5552_vm1, %v11717_v22, -1.7014117e+38 }
 0x14c   : > { %5727 = vmax.xlane.f32.xlu0 %v11707_v19  ;;  %v11727_v26 = vpop.f32.mrb[13].mxu1  ;;  %v12084_v57 = vsel %vm5551_vm15, %v11722_v24, -1.7014117e+38  ;;  %14425 = vst [vmem:[#allocation25_spill] sm:$0xff] %v12090_v59  ;;  %v12110_v1 = vsel %vm5552_vm1, %v11724_v25, -1.7014117e+38 }
 0x14d   : > { %5729 = vmax.xlane.f32.xlu1 %v11712_v20  ;;  %14424 = vst [vmem:[#allocation24_spill] sm:$0xff] %v12084_v57  ;;  %v12104_v63 = vsel %vm5551_vm15, %v11727_v26, -1.7014117e+38  ;;  %14427 = vst [vmem:[#allocation27_spill] sm:$0xff] %v12110_v1 }
 0x14e   : > { %v9770_v30 = vpop.f32.mrb[14].mxu0  ;;  %14426 = vst [vmem:[#allocation26_spill] sm:$0xff] %v12104_v63 }
 0x14f   : > { %v4788_v31 = vpop.f32.mrb[15].mxu0  ;;  %v9826_v32 = vpop.f32.mrb[14].mxu1  ;;  %v12126_v7 = vsel %vm5554_vm3, %v9770_v30, -1.7014117e+38 }
 0x150   : > { %5759 = vmax.xlane.f32.xlu0 %v11990_v28  ;;  %v5029_v33 = vpop.f32.mrb[15].mxu1  ;;  %v12121_v3 = vsel %vm5553_vm0, %v4788_v31, -1.7014117e+38  ;;  %14429 = vst [vmem:[#allocation29_spill] sm:$0xff] %v12126_v7  ;;  %v12138_v10 = vsel %vm5554_vm3, %v9826_v32, -1.7014117e+38 }
 0x151   : > { %5761 = vmax.xlane.f32.xlu1 %v11996_v29  ;;  %14428 = vst [vmem:[#allocation28_spill] sm:$0xff] %v12121_v3  ;;  %v12133_v9 = vsel %vm5553_vm0, %v5029_v33, -1.7014117e+38  ;;  %14431 = vst [vmem:[#allocation31_spill] sm:$0xff] %v12138_v10 }
 0x152   : > { %14430 = vst [vmem:[#allocation30_spill] sm:$0xff] %v12133_v9 }
 0x154   : > { %5731 = vmax.xlane.f32.xlu0 %v12008_v34  ;;  %v12600_v34 = vld [vmem:[#allocation2 + $0xe0] sm:$0xff] }
 0x155   : > { %5733 = vmax.xlane.f32.xlu1 %v12014_v35 }
 0x158   : > { %5763 = vmax.xlane.f32.xlu0 %v12028_v42 }
 0x159   : > { %5765 = vmax.xlane.f32.xlu1 %v12034_v43 }
 0x15c   : > { %5735 = vmax.xlane.f32.xlu0 %v12046_v46 }
 0x15d   : > { %5737 = vmax.xlane.f32.xlu1 %v12052_v47 }
 0x160   : > { %5767 = vmax.xlane.f32.xlu0 %v12066_v0 }
 0x161   : > { %5769 = vmax.xlane.f32.xlu1 %v12072_v54  ;;  %v12538_v54 = vld [vmem:[#allocation2 + $0x50] sm:$0xff] }
 0x164   : > { %5739 = vmax.xlane.f32.xlu0 %v12084_v57  ;;  %v12514_v57 = vld [vmem:[#allocation2 + $0xc0] sm:$0xff] }
 0x165   : > { %5741 = vmax.xlane.f32.xlu1 %v12090_v59 }
 0x168   : > { %5771 = vmax.xlane.f32.xlu0 %v12104_v63 }
 0x169   : > { %5773 = vmax.xlane.f32.xlu1 %v12110_v1 }
 0x16c   : > { %5743 = vmax.xlane.f32.xlu0 %v12121_v3 }
 0x16d   : > { %5745 = vmax.xlane.f32.xlu1 %v12126_v7 }
 0x170   : > { %5775 = vmax.xlane.f32.xlu0 %v12133_v9 }
 0x171   : > { %5777 = vmax.xlane.f32.xlu1 %v12138_v10  ;;  %v12461_v10 = vld [vmem:[#allocation2 + $0x30] sm:$0xff] }
 0x172   : > { %v9861_v11 = vpop.f32.mrb[16].mxu0 }
 0x173   : > { %v5200_v12 = vpop.f32.mrb[17].mxu0  ;;  %v9917_v15 = vpop.f32.mrb[16].mxu1  ;;  %v12145_v16 = vsel %vm5540_vm2, %v9861_v11, -1.7014117e+38 }
 0x174   : > { %14432 = vst [vmem:[#allocation32_spill] sm:$0xff] %v12145_v16  ;;  %v12150_v17 = vsel %vm5539_vm4, %v5200_v12, -1.7014117e+38  ;;  %v5441_v18 = vpop.f32.mrb[17].mxu1  ;;  %v12162_v24 = vsel %vm5540_vm2, %v9917_v15, -1.7014117e+38 }
 0x175   : > { %14433 = vst [vmem:[#allocation33_spill] sm:$0xff] %v12150_v17  ;;  %5779 = vmax.xlane.f32.xlu0 %v12150_v17  ;;  %5781 = vmax.xlane.f32.xlu1 %v12145_v16  ;;  %v12157_v22 = vsel %vm5539_vm4, %v5441_v18, -1.7014117e+38  ;;  %14435 = vst [vmem:[#allocation35_spill] sm:$0xff] %v12162_v24 }
 0x176   : > { %14434 = vst [vmem:[#allocation34_spill] sm:$0xff] %v12157_v22  ;;  %v9864_v25 = vpop.f32.mrb[18].mxu0 }
 0x177   : > { %v5210_v26 = vpop.f32.mrb[19].mxu0  ;;  %v9920_v27 = vpop.f32.mrb[18].mxu1  ;;  %v12174_v36 = vsel %vm5542_vm5, %v9864_v25, -1.7014117e+38 }
 0x178   : > { %v5451_v30 = vpop.f32.mrb[19].mxu1  ;;  %v12169_v31 = vsel %vm5541_vm6, %v5210_v26, -1.7014117e+38  ;;  %14437 = vst [vmem:[#allocation37_spill] sm:$0xff] %v12174_v36  ;;  %v12186_v15 = vsel %vm5542_vm5, %v9920_v27, -1.7014117e+38 }
 0x179   : > { %5811 = vmax.xlane.f32.xlu0 %v12157_v22  ;;  %5813 = vmax.xlane.f32.xlu1 %v12162_v24  ;;  %14436 = vst [vmem:[#allocation36_spill] sm:$0xff] %v12169_v31  ;;  %v12181_v12 = vsel %vm5541_vm6, %v5451_v30, -1.7014117e+38  ;;  %14439 = vst [vmem:[#allocation39_spill] sm:$0xff] %v12186_v15 }
 0x17a   : > { %v9867_v37 = vpop.f32.mrb[20].mxu0  ;;  %14438 = vst [vmem:[#allocation38_spill] sm:$0xff] %v12181_v12 }
 0x17b   : > { %v5220_v32 = vpop.f32.mrb[21].mxu0  ;;  %v9923_v33 = vpop.f32.mrb[20].mxu1  ;;  %v12198_v52 = vsel %vm5544_vm8, %v9867_v37, -1.7014117e+38 }
 0x17c   : > { %v5461_v11 = vpop.f32.mrb[21].mxu1  ;;  %14441 = vst [vmem:[#allocation41_spill] sm:$0xff] %v12198_v52 }
 0x17d   : > { %5783 = vmax.xlane.f32.xlu0 %v12169_v31  ;;  %5785 = vmax.xlane.f32.xlu1 %v12174_v36  ;;  %v12193_v31 = vsel %vm5543_vm7, %v5220_v32, -1.7014117e+38  ;;  %v12210_v32 = vsel %vm5544_vm8, %v9923_v33, -1.7014117e+38 }
 0x17e   : > { %v9870_v18 = vpop.f32.mrb[22].mxu0  ;;  %14440 = vst [vmem:[#allocation40_spill] sm:$0xff] %v12193_v31  ;;  %14443 = vst [vmem:[#allocation43_spill] sm:$0xff] %v12210_v32 }
 0x17f   : > { %v5230_v25 = vpop.f32.mrb[23].mxu0  ;;  %v9926_v26 = vpop.f32.mrb[22].mxu1  ;;  %v12222_v55 = vsel %vm5546_vm10, %v9870_v18, -1.7014117e+38 }
 0x180   : > { %v5471_v22 = vpop.f32.mrb[23].mxu1  ;;  %14445 = vst [vmem:[#allocation45_spill] sm:$0xff] %v12222_v55 }
 0x181   : > { %5815 = vmax.xlane.f32.xlu0 %v12181_v12  ;;  %5817 = vmax.xlane.f32.xlu1 %v12186_v15  ;;  %v12205_v12 = vsel %vm5543_vm7, %v5461_v11, -1.7014117e+38 }
 0x182   : > { %v9873_v39 = vpop.f32.mrb[24].mxu0  ;;  %14442 = vst [vmem:[#allocation42_spill] sm:$0xff] %v12205_v12 }
 0x183   : > { %v5240_v27 = vpop.f32.mrb[25].mxu0  ;;  %v9929_v30 = vpop.f32.mrb[24].mxu1  ;;  %v12246_v6 = vsel %vm5548_vm12, %v9873_v39, -1.7014117e+38 }
 0x184   : > { %v5481_v36 = vpop.f32.mrb[25].mxu1  ;;  %14449 = vst [vmem:[#allocation49_spill] sm:$0xff] %v12246_v6 }
 0x185   : > { %5787 = vmax.xlane.f32.xlu0 %v12193_v31  ;;  %5789 = vmax.xlane.f32.xlu1 %v12198_v52  ;;  %v12217_v31 = vsel %vm5545_vm9, %v5230_v25, -1.7014117e+38  ;;  %v12234_v25 = vsel %vm5546_vm10, %v9926_v26, -1.7014117e+38  ;;  %v12253_v8 = vsel %vm5547_vm11, %v5481_v36, -1.7014117e+38 }
 0x186   : > { %v9876_v37 = vpop.f32.mrb[26].mxu0  ;;  %14444 = vst [vmem:[#allocation44_spill] sm:$0xff] %v12217_v31  ;;  %14447 = vst [vmem:[#allocation47_spill] sm:$0xff] %v12234_v25 }
 0x187   : > { %v5250_v15 = vpop.f32.mrb[27].mxu0  ;;  %v9932_v24 = vpop.f32.mrb[26].mxu1  ;;  %14450 = vst [vmem:[#allocation50_spill] sm:$0xff] %v12253_v8  ;;  %v12270_v21 = vsel %vm5550_vm14, %v9876_v37, -1.7014117e+38  ;;  %v4509_v37 = vld [vmem:[%s12338_s9 + $0x90] sm:$0xff] }
 0x188   : > { %v5491_v17 = vpop.f32.mrb[27].mxu1  ;;  %v12265_v26 = vsel %vm5549_vm13, %v5250_v15, -1.7014117e+38  ;;  %14453 = vst [vmem:[#allocation53_spill] sm:$0xff] %v12270_v21  ;;  %v12282_v36 = vsel %vm5550_vm14, %v9932_v24, -1.7014117e+38 }
 0x189   : > { %5819 = vmax.xlane.f32.xlu0 %v12205_v12  ;;  %5821 = vmax.xlane.f32.xlu1 %v12210_v32  ;;  %v12229_v12 = vsel %vm5545_vm9, %v5471_v22, -1.7014117e+38  ;;  %v12258_v22 = vsel %vm5548_vm12, %v9929_v30, -1.7014117e+38  ;;  %14452 = vst [vmem:[#allocation52_spill] sm:$0xff] %v12265_v26  ;;  %14455 = vst [vmem:[#allocation55_spill] sm:$0xff] %v12282_v36 }
 0x18a   : > { %v9879_v58 = vpop.f32.mrb[28].mxu0  ;;  %14446 = vst [vmem:[#allocation46_spill] sm:$0xff] %v12229_v12  ;;  %14451 = vst [vmem:[#allocation51_spill] sm:$0xff] %v12258_v22  ;;  %v12277_v23 = vsel %vm5549_vm13, %v5491_v17, -1.7014117e+38  ;;  %v4494_v30 = vld [vmem:[%s12338_s9 + $0x18] sm:$0xff] }
 0x18b   : > { %v5260_v33 = vpop.f32.mrb[29].mxu0  ;;  %v9935_v11 = vpop.f32.mrb[28].mxu1  ;;  %14454 = vst [vmem:[#allocation54_spill] sm:$0xff] %v12277_v23  ;;  %v12294_v40 = vsel %vm5552_vm1, %v9879_v58, -1.7014117e+38  ;;  %v4510_v58 = vld [vmem:[%s12338_s9 + $0x98] sm:$0xff] }
 0x18c   : > { %v5501_v52 = vpop.f32.mrb[29].mxu1  ;;  %v12289_v15 = vsel %vm5551_vm15, %v5260_v33, -1.7014117e+38  ;;  %14457 = vst [vmem:[#allocation57_spill] sm:$0xff] %v12294_v40  ;;  %v12306_v17 = vsel %vm5552_vm1, %v9935_v11, -1.7014117e+38  ;;  %v10391_v11 = vpack.c.bf16 %v4510_v58, %v4509_v37 }
 0x18d   : > { %5791 = vmax.xlane.f32.xlu0 %v12217_v31  ;;  %5793 = vmax.xlane.f32.xlu1 %v12222_v55  ;;  %v12241_v31 = vsel %vm5547_vm11, %v5240_v27, -1.7014117e+38  ;;  %14456 = vst [vmem:[#allocation56_spill] sm:$0xff] %v12289_v15  ;;  %v12301_v41 = vsel %vm5551_vm15, %v5501_v52, -1.7014117e+38  ;;  %14459 = vst [vmem:[#allocation59_spill] sm:$0xff] %v12306_v17 }
 0x18e   : > { %v9882_v18 = vpop.f32.mrb[30].mxu0  ;;  %14448 = vst [vmem:[#allocation48_spill] sm:$0xff] %v12241_v31  ;;  %14458 = vst [vmem:[#allocation58_spill] sm:$0xff] %v12301_v41  ;;  %v4493_v27 = vld [vmem:[%s12338_s9 + $0x10] sm:$0xff]  ;;  %v12348_v33 = vld [vmem:[#allocation2 + $0x8] sm:$0xff] }
 0x18f   : > { %v5270_v32 = vpop.f32.mrb[31].mxu0  ;;  %v9938_v16 = vpop.f32.mrb[30].mxu1  ;;  %v12318_v50 = vsel %vm5554_vm3, %v9882_v18, -1.7014117e+38  ;;  %v12350_v18 = vld [vmem:[#allocation2 + $0x88] sm:$0xff]  ;;  %v12362_v58 = vld [vmem:[#allocation2] sm:$0xff] }
 0x190   : > { %v5511_v9 = vpop.f32.mrb[31].mxu1  ;;  %v12313_v24 = vsel %vm5553_vm0, %v5270_v32, -1.7014117e+38  ;;  %14461 = vst [vmem:[#allocation61_spill] sm:$0xff] %v12318_v50  ;;  %v12330_v52 = vsel %vm5554_vm3, %v9938_v16, -1.7014117e+38  ;;  %v10359_v32 = vpack.c.bf16 %v4494_v30, %v4493_v27 }
 0x191   : > { %5823 = vmax.xlane.f32.xlu0 %v12229_v12  ;;  %5825 = vmax.xlane.f32.xlu1 %v12234_v25  ;;  %14460 = vst [vmem:[#allocation60_spill] sm:$0xff] %v12313_v24  ;;  %v12325_v51 = vsel %vm5553_vm0, %v5511_v9, -1.7014117e+38  ;;  %14463 = vst [vmem:[#allocation63_spill] sm:$0xff] %v12330_v52  ;;  %v4507_v9 = vld [vmem:[%s12338_s9 + $0x80] sm:$0xff]  ;;  %v4508_v16 = vld [vmem:[%s12338_s9 + $0x88] sm:$0xff] }
 0x192   : > { %14462 = vst [vmem:[#allocation62_spill] sm:$0xff] %v12325_v51  ;;  %v10387_v39 = vpack.c.bf16 %v4508_v16, %v4507_v9  ;;  %10360 = vmatprep.subr.bf16.mxu0 %v10359_v32  ;;  %v4511_v27 = vld [vmem:[%s12338_s9 + $0xa0] sm:$0xff]  ;;  %v4512_v30 = vld [vmem:[%s12338_s9 + $0xa8] sm:$0xff]  ;;  %vm14464_vm0 = vcmask 7168   ;;  %v4522_v25 = vld [vmem:[%s12338_s9 + $0xf8] sm:$0xff] }
 0x193   : > { %10362 = vmatpush3.bf16.msra.mxu0 %v10359_v32  ;;  %v10395_v32 = vpack.c.bf16 %v4512_v30, %v4511_v27  ;;  %vm14465_vm2 = vmmov %vm14464_vm0 }
 0x194   : > { %10388 = vmatprep.subr.bf16.mxu1 %v10387_v39  ;;  %vm14466_vm3 = vmmov %vm14464_vm0 }
 0x195   : > { %5795 = vmax.xlane.f32.xlu0 %v12241_v31  ;;  %5797 = vmax.xlane.f32.xlu1 %v12246_v6  ;;  %vm14467_vm4 = vmmov %vm14464_vm0  ;;  %v4520_v31 = vld [vmem:[%s12338_s9 + $0xe8] sm:$0xff] }
 0x196   : > { %10390 = vmatpush3.bf16.msra.mxu1 %v10387_v39  ;;  %v10363_v39 = vpack.c.bf16 %v4496_v62, %v4495_v60  ;;  %v4497_v60 = vld [vmem:[%s12338_s9 + $0x30] sm:$0xff]  ;;  %v4498_v62 = vld [vmem:[%s12338_s9 + $0x38] sm:$0xff]  ;;  %vm14468_vm5 = vmmov %vm14464_vm0 }
 0x197   : > { %10392 = vmatprep.subr.bf16.mxu1 %v10391_v11  ;;  %v10367_v30 = vpack.c.bf16 %v4498_v62, %v4497_v60  ;;  %v4499_v60 = vld [vmem:[%s12338_s9 + $0x40] sm:$0xff]  ;;  %v4500_v62 = vld [vmem:[%s12338_s9 + $0x48] sm:$0xff]  ;;  %vm14469_vm6 = vmmov %vm14464_vm0 }
 0x198   : > { %10364 = vmatprep.subr.bf16.mxu0 %v10363_v39  ;;  %vm14470_vm7 = vmmov %vm14464_vm0 }
 0x199   : > { %5827 = vmax.xlane.f32.xlu0 %v12253_v8  ;;  %5829 = vmax.xlane.f32.xlu1 %v12258_v22  ;;  %vm14471_vm8 = vmmov %vm14464_vm0  ;;  %v4519_v22 = vld [vmem:[%s12338_s9 + $0xe0] sm:$0xff] }
 0x19a   : > { %10394 = vmatpush3.bf16.msra.mxu1 %v10391_v11  ;;  %10366 = vmatpush3.bf16.msra.mxu0 %v10363_v39  ;;  %v12382_v39 = vld [vmem:[#allocation2 + $0x80] sm:$0xff]  ;;  %v10411_v12 = vpack.c.bf16 %v4520_v31, %v4519_v22  ;;  %vm14472_vm9 = vmmov %vm14464_vm0 }
 0x19b   : > { %10396 = vmatprep.subr.bf16.mxu1 %v10395_v32  ;;  %10368 = vmatprep.subr.bf16.mxu0 %v10367_v30  ;;  %vm14473_vm10 = vmmov %vm14464_vm0 }
 0x19c   : > { %vm14474_vm11 = vmmov %vm14464_vm0 }
 0x19d   : > { %5799 = vmax.xlane.f32.xlu0 %v12265_v26  ;;  %5801 = vmax.xlane.f32.xlu1 %v12270_v21  ;;  %v12421_v21 = vld [vmem:[#allocation2 + $0x20] sm:$0xff]  ;;  %vm14475_vm12 = vmmov %vm14464_vm0 }
 0x19e   : > { %10398 = vmatpush3.bf16.msra.mxu1 %v10395_v32  ;;  %10370 = vmatpush3.bf16.msra.mxu0 %v10367_v30  ;;  %vm14476_vm13 = vmmov %vm14464_vm0 }
 0x19f   : > { %vm14477_vm14 = vmmov %vm14464_vm0 }
 0x1a0   : > { %vm14478_vm15 = vmmov %vm14464_vm0 }
 0x1a1   : > { %5831 = vmax.xlane.f32.xlu0 %v12277_v23  ;;  %5833 = vmax.xlane.f32.xlu1 %v12282_v36  ;;  %v4517_v23 = vld [vmem:[%s12338_s9 + $0xd0] sm:$0xff]  ;;  %v4518_v36 = vld [vmem:[%s12338_s9 + $0xd8] sm:$0xff]  ;;  %vm14479_vm1 = vmmov %vm14464_vm0 }
 0x1a5   : > { %5803 = vmax.xlane.f32.xlu0 %v12289_v15  ;;  %5805 = vmax.xlane.f32.xlu1 %v12294_v40  ;;  %v12401_v40 = vld [vmem:[#allocation2 + $0x90] sm:$0xff] }
 0x1a9   : > { %5835 = vmax.xlane.f32.xlu0 %v12301_v41  ;;  %5837 = vmax.xlane.f32.xlu1 %v12306_v17  ;;  %v4516_v17 = vld [vmem:[%s12338_s9 + $0xc8] sm:$0xff] }
 0x1ad   : > { %5807 = vmax.xlane.f32.xlu0 %v12313_v24  ;;  %5809 = vmax.xlane.f32.xlu1 %v12318_v50 }
 0x1b1   : > { %5839 = vmax.xlane.f32.xlu0 %v12325_v51  ;;  %5841 = vmax.xlane.f32.xlu1 %v12330_v52  ;;  %v4513_v51 = vld [vmem:[%s12338_s9 + $0xb0] sm:$0xff]  ;;  %v4514_v52 = vld [vmem:[%s12338_s9 + $0xb8] sm:$0xff] }
 0x1b2   : > { %v10399_v50 = vpack.c.bf16 %v4514_v52, %v4513_v51  ;;  %v10371_v51 = vpack.c.bf16 %v4500_v62, %v4499_v60  ;;  %v4515_v52 = vld [vmem:[%s12338_s9 + $0xc0] sm:$0xff]  ;;  %v4502_v60 = vld [vmem:[%s12338_s9 + $0x58] sm:$0xff] }
 0x1b3   : > { %v10403_v30 = vpack.c.bf16 %v4516_v17, %v4515_v52 }
 0x1b4   : > { %10400 = vmatprep.subr.bf16.mxu1 %v10399_v50  ;;  %10372 = vmatprep.subr.bf16.mxu0 %v10371_v51 }
 0x1b5   : > { %10402 = vmatpush3.bf16.msra.mxu1 %v10399_v50  ;;  %v12406_v50 = vld [vmem:[#allocation2 + $0x10] sm:$0xff]  ;;  %10374 = vmatpush3.bf16.msra.mxu0 %v10371_v51  ;;  %v10407_v51 = vpack.c.bf16 %v4518_v36, %v4517_v23 }
 0x1b6   : > { %10404 = vmatprep.subr.bf16.mxu1 %v10403_v30 }
 0x1b9   : > { %10406 = vmatpush3.bf16.msra.mxu1 %v10403_v30  ;;  %v12426_v30 = vld [vmem:[#allocation2 + $0x28] sm:$0xff] }
 0x1ba   : > { %10408 = vmatprep.subr.bf16.mxu1 %v10407_v51 }
 0x1bd   : > { %10410 = vmatpush3.bf16.msra.mxu1 %v10407_v51  ;;  %v4505_v51 = vld [vmem:[%s12338_s9 + $0x70] sm:$0xff] }
 0x1be   : > { %10412 = vmatprep.subr.bf16.mxu1 %v10411_v12 }
 0x1c1   : > { %v5718_v38 = vpop.xlane.xlu0 %5717  ;;  %10414 = vmatpush3.bf16.msra.mxu1 %v10411_v12 }
 0x1c2   : > { %v5750_v9 = vpop.xlane.xlu1 %5749  ;;  %v12355_v16 = vmax.f32 %v12348_v33, %v5718_v38  ;;  %v12367_v38 = vld [vmem:[#allocation2 + $0x18] sm:$0xff] }
 0x1c3   : > { %v12360_v37 = vmax.f32 %v12350_v18, %v5750_v9 }
 0x1c4   : > { %8153 = vst.msk [vmem:[#allocation2 + $0x8] sm:$0xff] %vm14464_vm0, %v12355_v16  ;;  %6106 = vperm.xlu1 %10547, %v12355_v16   ;;  %v5908_v7 = vsub.f32 %v12348_v33, %v12355_v16 }
 0x1c5   : > { %8169 = vst.msk [vmem:[#allocation2 + $0x88] sm:$0xff] %vm14465_vm2, %v12360_v37  ;;  %v5716_v11 = vpop.xlane.xlu0 %5715  ;;  %v5924_v23 = vsub.f32 %v12350_v18, %v12360_v37  ;;  %v12445_v18 = vld [vmem:[#allocation2 + $0xa8] sm:$0xff]  ;;  %vm14481_vm2 = vmmov %vm14464_vm0 }
 0x1c6   : > { %v12374_v9 = vmax.f32 %v12362_v58, %v5716_v11  ;;  %v5722_v27 = vpop.xlane.xlu1 %5721  ;;  %v12386_v11 = vld [vmem:[#allocation2 + $0x98] sm:$0xff] }
 0x1c7   : > { %v12379_v24 = vmax.f32 %v12367_v38, %v5722_v27  ;;  %6186 = vperm.xlu0 %10548, %v12360_v37  }
 0x1c8   : > { %8152 = vst.msk [vmem:[#allocation2] sm:$0xff] %vm14466_vm3, %v12374_v9  ;;  %vm14482_vm3 = vmmov %vm14464_vm0 }
 0x1c9   : > { %8155 = vst.msk [vmem:[#allocation2 + $0x18] sm:$0xff] %vm14467_vm4, %v12379_v24  ;;  %v5748_v32 = vpop.xlane.xlu0 %5747  ;;  %vm14483_vm4 = vmmov %vm14464_vm0 }
 0x1ca   : > { %v12393_v27 = vmax.f32 %v12382_v39, %v5748_v32  ;;  %v5754_v41 = vpop.xlane.xlu1 %5753  ;;  %v4501_v32 = vld [vmem:[%s12338_s9 + $0x50] sm:$0xff] }
 0x1cb   : > { %v12398_v15 = vmax.f32 %v12386_v11, %v5754_v41  ;;  %6101 = vperm.xlu0 %10548, %v12374_v9   ;;  %v10375_v52 = vpack.c.bf16 %v4502_v60, %v4501_v32  ;;  %v4503_v32 = vld [vmem:[%s12338_s9 + $0x60] sm:$0xff]  ;;  %v4504_v60 = vld [vmem:[%s12338_s9 + $0x68] sm:$0xff] }
 0x1cc   : > { %8168 = vst.msk [vmem:[#allocation2 + $0x80] sm:$0xff] %vm14468_vm5, %v12393_v27  ;;  %6181 = vperm.xlu1 %10547, %v12393_v27   ;;  %v10379_v8 = vpack.c.bf16 %v4504_v60, %v4503_v32  ;;  %v6005_v32 = vmul.f32 1.442695, %v5924_v23  ;;  %vm14484_vm5 = vmmov %vm14464_vm0 }
 0x1cd   : > { %8171 = vst.msk [vmem:[#allocation2 + $0x98] sm:$0xff] %vm14469_vm6, %v12398_v15  ;;  %v5752_v41 = vpop.xlane.xlu0 %5751  ;;  %10376 = vmatprep.subr.bf16.mxu0 %v10375_v52  ;;  %v5926_v16 = vsub.f32 %v12386_v11, %v12398_v15  ;;  %vm14485_vm6 = vmmov %vm14464_vm0 }
 0x1ce   : > { %v12413_v62 = vmax.f32 %v12401_v40, %v5752_v41  ;;  %v5720_v17 = vpop.xlane.xlu1 %5719  ;;  %10378 = vmatpush3.bf16.msra.mxu0 %v10375_v52  ;;  %v12442_v52 = vld [vmem:[#allocation2 + $0xa0] sm:$0xff]  ;;  %10549 = vpow2.f32 %v6005_v32 }
 0x1cf   : > { %v12418_v26 = vmax.f32 %v12406_v50, %v5720_v17  ;;  %6196 = vperm.xlu0 %10548, %v12398_v15   ;;  %10380 = vmatprep.subr.bf16.mxu0 %v10379_v8  ;;  %v6009_v11 = vmul.f32 1.442695, %v5926_v16 }
 0x1d0   : > { %8170 = vst.msk [vmem:[#allocation2 + $0x90] sm:$0xff] %vm14470_vm7, %v12413_v62  ;;  %6116 = vperm.xlu1 %10547, %v12379_v24   ;;  %vm14487_vm7 = vmmov %vm14464_vm0 }
 0x1d1   : > { %8154 = vst.msk [vmem:[#allocation2 + $0x10] sm:$0xff] %vm14471_vm8, %v12418_v26  ;;  %v5724_v41 = vpop.xlane.xlu0 %5723  ;;  %vm14488_vm8 = vmmov %vm14464_vm0 }
 0x1d2   : > { %v5726_v36 = vpop.xlane.xlu1 %5725  ;;  %v12435_v17 = vmax.f32 %v12421_v21, %v5724_v41  ;;  %10382 = vmatpush3.bf16.msra.mxu0 %v10379_v8  ;;  %v4506_v41 = vld [vmem:[%s12338_s9 + $0x78] sm:$0xff] }
 0x1d3   : > { %v12440_v6 = vmax.f32 %v12426_v30, %v5726_v36  ;;  %v10383_v60 = vpack.c.bf16 %v4506_v41, %v4505_v51  ;;  %v4521_v36 = vld [vmem:[%s12338_s9 + $0xf0] sm:$0xff]  ;;  %v12464_v8 = vld [vmem:[#allocation2 + $0x38] sm:$0xff] }
 0x1d4   : > { %6111 = vperm.xlu1 %10547, %v12418_v26   ;;  %8156 = vst.msk [vmem:[#allocation2 + $0x20] sm:$0xff] %vm14472_vm9, %v12435_v17  ;;  %v10415_v3 = vpack.c.bf16 %v4522_v25, %v4521_v36  ;;  %v12477_v51 = vld [vmem:[#allocation2 + $0xb0] sm:$0xff]  ;;  %v12480_v41 = vld [vmem:[#allocation2 + $0xb8] sm:$0xff]  ;;  %vm14491_vm9 = vmmov %vm14464_vm0 }
 0x1d5   : > { %8157 = vst.msk [vmem:[#allocation2 + $0x28] sm:$0xff] %vm14473_vm10, %v12440_v6  ;;  %v5756_v37 = vpop.xlane.xlu0 %5755  ;;  %10384 = vmatprep.subr.bf16.mxu0 %v10383_v60  ;;  %v5912_v46 = vsub.f32 %v12426_v30, %v12440_v6  ;;  %v5925_v30 = vsub.f32 %v12401_v40, %v12413_v62  ;;  %vm14492_vm10 = vmmov %vm14464_vm0  ;;  %v12626_v40 = vld [vmem:[#allocation2 + $0x70] sm:$0xff] }
 0x1d6   : > { %v5758_v31 = vpop.xlane.xlu1 %5757  ;;  %v12454_v22 = vmax.f32 %v12442_v52, %v5756_v37  ;;  %10386 = vmatpush3.bf16.msra.mxu0 %v10383_v60  ;;  %10416 = vmatprep.subr.bf16.mxu1 %v10415_v3 }
 0x1d7   : > { %v12459_v55 = vmax.f32 %v12445_v18, %v5758_v31  ;;  %10418 = vmatpush3.bf16.msra.mxu1 %v10415_v3  ;;  %v5907_v31 = vsub.f32 %v12362_v58, %v12374_v9 }
 0x1d8   : > { %6191 = vperm.xlu1 %10547, %v12413_v62   ;;  %8172 = vst.msk [vmem:[#allocation2 + $0xa0] sm:$0xff] %vm14474_vm11, %v12454_v22  ;;  %v12516_v33 = vpop.eup %10549  ;;  %vm14495_vm11 = vmmov %vm14464_vm0 }
 0x1d9   : > { %8173 = vst.msk [vmem:[#allocation2 + $0xa8] sm:$0xff] %vm14475_vm12, %v12459_v55  ;;  %6206 = vperm.xlu0 %10548, %v12459_v55   ;;  %v5728_v12 = vpop.xlane.xlu0 %5727  ;;  %v5971_v9 = vmul.f32 1.442695, %v5907_v31  ;;  %14480 = vst [vmem:[#allocation64_spill] sm:$0xff] %v12516_v33  ;;  %v5923_v31 = vsub.f32 %v12382_v39, %v12393_v27  ;;  %v12545_v27 = vld [vmem:[#allocation2 + $0x58] sm:$0xff]  ;;  %v12556_v39 = vld [vmem:[#allocation2 + $0xd0] sm:$0xff] }
 0x1da   : > { %v5730_v23 = vpop.xlane.xlu1 %5729  ;;  %v12472_v37 = vmax.f32 %v12461_v10, %v5728_v12  ;;  %v12494_v12 = vld [vmem:[#allocation2 + $0x40] sm:$0xff]  ;;  %vm14496_vm12 = vmmov %vm14464_vm0 }
 0x1db   : > { %v12475_v25 = vmax.f32 %v12464_v8, %v5730_v23  ;;  %v12499_v23 = vld [vmem:[#allocation2 + $0x48] sm:$0xff]  ;;  %10551 = vpow2.f32 %v5971_v9  ;;  %v6003_v15 = vmul.f32 1.442695, %v5923_v31  ;;  %v12563_v31 = vld [vmem:[#allocation2 + $0xd8] sm:$0xff] }
 0x1dc   : > { %6126 = vperm.xlu1 %10547, %v12440_v6   ;;  %8158 = vst.msk [vmem:[#allocation2 + $0x30] sm:$0xff] %vm14476_vm13, %v12472_v37  ;;  %v12609_v6 = vld [vmem:[#allocation2 + $0xe8] sm:$0xff]  ;;  %vm14497_vm13 = vmmov %vm14464_vm0 }
 0x1dd   : > { %8159 = vst.msk [vmem:[#allocation2 + $0x38] sm:$0xff] %vm14477_vm14, %v12475_v25  ;;  %v5760_v32 = vpop.xlane.xlu0 %5759  ;;  %vm14498_vm14 = vmmov %vm14464_vm0 }
 0x1de   : > { %v5762_v60 = vpop.xlane.xlu1 %5761  ;;  %v12489_v36 = vmax.f32 %v12477_v51, %v5760_v32  ;;  %v5910_v32 = vsub.f32 %v12367_v38, %v12379_v24  ;;  %v12523_v24 = vld [vmem:[#allocation2 + $0xc8] sm:$0xff]  ;;  %v5973_v38 = vmul.f32 1.442695, %v5908_v7 }
 0x1df   : > { %v12492_v3 = vmax.f32 %v12480_v41, %v5762_v60 }
 0x1e0   : > { %6121 = vperm.xlu1 %10547, %v12435_v17   ;;  %8174 = vst.msk [vmem:[#allocation2 + $0xb0] sm:$0xff] %vm14478_vm15, %v12489_v36  ;;  %10553 = vpow2.f32 %v5973_v38  ;;  %v12574_v38 = vld [vmem:[#allocation2 + $0x60] sm:$0xff]  ;;  %vm14499_vm15 = vmmov %vm14464_vm0 }
 0x1e1   : > { %8175 = vst.msk [vmem:[#allocation2 + $0xb8] sm:$0xff] %vm14479_vm1, %v12492_v3  ;;  %6216 = vperm.xlu0 %10548, %v12492_v3   ;;  %v5732_v58 = vpop.xlane.xlu0 %5731  ;;  %vm14501_vm1 = vmmov %vm14464_vm0 }
 0x1e2   : > { %v5734_v60 = vpop.xlane.xlu1 %5733  ;;  %v12509_v63 = vmax.f32 %v12494_v12, %v5732_v58 }
 0x1e3   : > { %v12512_v1 = vmax.f32 %v12499_v23, %v5734_v60  ;;  %v5977_v60 = vmul.f32 1.442695, %v5910_v32 }
 0x1e4   : > { %6201 = vperm.xlu1 %10547, %v12454_v22   ;;  %8160 = vst.msk [vmem:[#allocation2 + $0x40] sm:$0xff] %vm14464_vm0, %v12509_v63 }
 0x1e5   : > { %8161 = vst.msk [vmem:[#allocation2 + $0x48] sm:$0xff] %vm14481_vm2, %v12512_v1  ;;  %7727 = vperm.xlu0 %10548, %v12516_v33   ;;  %v5764_v58 = vpop.xlane.xlu0 %5763  ;;  %10555 = vpow2.f32 %v5977_v60  ;;  %v12576_v33 = vpop.eup %10551  ;;  %vm14505_vm2 = vmmov %vm14464_vm0 }
 0x1e6   : > { %v5766_v59 = vpop.xlane.xlu1 %5765  ;;  %v12533_v0 = vmax.f32 %v12514_v57, %v5764_v58  ;;  %10557 = vpow2.f32 %v6003_v15  ;;  %14486 = vst [vmem:[#allocation65_spill] sm:$0xff] %v12576_v33 }
 0x1e7   : > { %v12536_v7 = vmax.f32 %v12523_v24, %v5766_v59  ;;  %10559 = vpow2.f32 %v6009_v11  ;;  %v12583_v11 = vld [vmem:[#allocation2 + $0x68] sm:$0xff] }
 0x1e8   : > { %6136 = vperm.xlu1 %10547, %v12475_v25   ;;  %8176 = vst.msk [vmem:[#allocation2 + $0xc0] sm:$0xff] %vm14482_vm3, %v12533_v0  ;;  %vm14510_vm3 = vmmov %vm14464_vm0 }
 0x1e9   : > { %8177 = vst.msk [vmem:[#allocation2 + $0xc8] sm:$0xff] %vm14483_vm4, %v12536_v7  ;;  %6146 = vperm.xlu0 %10548, %v12512_v1   ;;  %v5736_v59 = vpop.xlane.xlu0 %5735  ;;  %vm14511_vm4 = vmmov %vm14464_vm0 }
 0x1ea   : > { %v5738_v9 = vpop.xlane.xlu1 %5737  ;;  %v12551_v32 = vmax.f32 %v12538_v54, %v5736_v59  ;;  %v12595_v42 = vpop.eup %10553 }
 0x1eb   : > { %v12554_v58 = vmax.f32 %v12545_v27, %v5738_v9  ;;  %14489 = vst [vmem:[#allocation66_spill] sm:$0xff] %v12595_v42 }
 0x1ec   : > { %6131 = vperm.xlu1 %10547, %v12472_v37   ;;  %8162 = vst.msk [vmem:[#allocation2 + $0x50] sm:$0xff] %vm14484_vm5, %v12551_v32  ;;  %vm14514_vm5 = vmmov %vm14464_vm0 }
 0x1ed   : > { %8163 = vst.msk [vmem:[#allocation2 + $0x58] sm:$0xff] %vm14485_vm6, %v12554_v58  ;;  %6226 = vperm.xlu0 %10548, %v12536_v7   ;;  %v5768_v16 = vpop.xlane.xlu0 %5767  ;;  %vm14515_vm6 = vmmov %vm14464_vm0 }
 0x1ee   : > { %v5770_v60 = vpop.xlane.xlu1 %5769  ;;  %v12569_v59 = vmax.f32 %v12556_v39, %v5768_v16  ;;  %v5909_v16 = vsub.f32 %v12406_v50, %v12418_v26 }
 0x1ef   : > { %v12572_v9 = vmax.f32 %v12563_v31, %v5770_v60  ;;  %v12602_v26 = vpop.eup %10555 }
 0x1f0   : > { %6211 = vperm.xlu1 %10547, %v12489_v36   ;;  %8178 = vst.msk [vmem:[#allocation2 + $0xd0] sm:$0xff] %vm14487_vm7, %v12569_v59  ;;  %14490 = vst [vmem:[#allocation67_spill] sm:$0xff] %v12602_v26  ;;  %v12621_v28 = vpop.eup %10557 }
 0x1f1   : > { %8179 = vst.msk [vmem:[#allocation2 + $0xd8] sm:$0xff] %vm14488_vm8, %v12572_v9  ;;  %7642 = vperm.xlu0 %10548, %v12576_v33   ;;  %v5740_v60 = vpop.xlane.xlu0 %5739  ;;  %v5981_v33 = vmul.f32 1.442695, %v5912_v46  ;;  %14493 = vst [vmem:[#allocation68_spill] sm:$0xff] %v12621_v28  ;;  %v12628_v62 = vpop.eup %10559 }
 0x1f2   : > { %v5742_v47 = vpop.xlane.xlu1 %5741  ;;  %v12593_v15 = vmax.f32 %v12574_v38, %v5740_v60  ;;  %v5975_v60 = vmul.f32 1.442695, %v5909_v16  ;;  %14494 = vst [vmem:[#allocation69_spill] sm:$0xff] %v12628_v62  ;;  %vm14518_vm7 = vmmov %vm14464_vm0 }
 0x1f3   : > { %v12598_v43 = vmax.f32 %v12583_v11, %v5742_v47  ;;  %vm14519_vm8 = vmmov %vm14464_vm0 }
 0x1f4   : > { %7647 = vperm.xlu1 %10547, %v12595_v42   ;;  %8164 = vst.msk [vmem:[#allocation2 + $0x60] sm:$0xff] %vm14491_vm9, %v12593_v15  ;;  %v5928_v42 = vsub.f32 %v12445_v18, %v12459_v55  ;;  %v12635_v55 = vld [vmem:[#allocation2 + $0x78] sm:$0xff]  ;;  %v6007_v18 = vmul.f32 1.442695, %v5925_v30  ;;  %10561 = vpow2.f32 %v5975_v60  ;;  %vm14523_vm9 = vmmov %vm14464_vm0 }
 0x1f5   : > { %8165 = vst.msk [vmem:[#allocation2 + $0x68] sm:$0xff] %vm14492_vm10, %v12598_v43  ;;  %7657 = vperm.xlu0 %10548, %v12602_v26   ;;  %v5772_v47 = vpop.xlane.xlu0 %5771  ;;  %10563 = vpow2.f32 %v5981_v33  ;;  %v12653_v60 = vld [vmem:[#allocation2 + $0xf8] sm:$0xff]  ;;  %vm14524_vm10 = vmmov %vm14464_vm0 }
 0x1f6   : > { %v5774_v50 = vpop.xlane.xlu1 %5773  ;;  %v12619_v35 = vmax.f32 %v12600_v34, %v5772_v47  ;;  %10565 = vpow2.f32 %v6007_v18  ;;  %v12669_v18 = vld [vmem:[#allocation2 + $0x108] sm:$0xff] }
 0x1f7   : > { %v12624_v29 = vmax.f32 %v12609_v6, %v5774_v50  ;;  %v6013_v50 = vmul.f32 1.442695, %v5928_v42 }
 0x1f8   : > { %7722 = vperm.xlu1 %10547, %v12621_v28   ;;  %8180 = vst.msk [vmem:[#allocation2 + $0xe0] sm:$0xff] %vm14495_vm11, %v12619_v35  ;;  %v12646_v28 = vld [vmem:[#allocation2 + $0xf0] sm:$0xff]  ;;  %vm14529_vm11 = vmmov %vm14464_vm0 }
 0x1f9   : > { %8181 = vst.msk [vmem:[#allocation2 + $0xe8] sm:$0xff] %vm14496_vm12, %v12624_v29  ;;  %7737 = vperm.xlu0 %10548, %v12628_v62   ;;  %v5744_v16 = vpop.xlane.xlu0 %5743  ;;  %10567 = vpow2.f32 %v6013_v50  ;;  %v12671_v62 = vld [vmem:[#allocation2 + $0x100] sm:$0xff]  ;;  %v5911_v50 = vsub.f32 %v12421_v21, %v12435_v17  ;;  %v12691_v21 = vld [vmem:[#allocation2 + $0x188] sm:$0xff]  ;;  %vm14530_vm12 = vmmov %vm14464_vm0 }
 0x1fa   : > { %v5746_v47 = vpop.xlane.xlu1 %5745  ;;  %v12641_v26 = vmax.f32 %v12626_v40, %v5744_v16  ;;  %14500 = vst [vmem:[#allocation70_spill] sm:$0xff] %v12671_v62  ;;  %v12693_v17 = vld [vmem:[#allocation2 + $0x180] sm:$0xff] }
 0x1fb   : > { %v12644_v46 = vmax.f32 %v12635_v55, %v5746_v47  ;;  %14504 = vst [vmem:[#allocation73_spill] sm:$0xff] %v12693_v17  ;;  %v5979_v4 = vmul.f32 1.442695, %v5911_v50 }
 0x1fc   : > { %6141 = vperm.xlu1 %10547, %v12509_v63   ;;  %8166 = vst.msk [vmem:[#allocation2 + $0x70] sm:$0xff] %vm14497_vm13, %v12641_v26  ;;  %vm14533_vm13 = vmmov %vm14464_vm0 }
 0x1fd   : > { %8167 = vst.msk [vmem:[#allocation2 + $0x78] sm:$0xff] %vm14498_vm14, %v12644_v46  ;;  %6156 = vperm.xlu0 %10548, %v12554_v58   ;;  %v5776_v42 = vpop.xlane.xlu0 %5775  ;;  %10569 = vpow2.f32 %v5979_v4  ;;  %vm14534_vm14 = vmmov %vm14464_vm0 }
 0x1fe   : > { %v5778_v33 = vpop.xlane.xlu1 %5777  ;;  %v12659_v16 = vmax.f32 %v12646_v28, %v5776_v42  ;;  %v5914_v42 = vsub.f32 %v12464_v8, %v12475_v25  ;;  %v12680_v19 = vpop.eup %10561  ;;  %v5927_v8 = vsub.f32 %v12442_v52, %v12454_v22 }
 0x1ff   : > { %v12662_v47 = vmax.f32 %v12653_v60, %v5778_v33  ;;  %14502 = vst [vmem:[#allocation71_spill] sm:$0xff] %v12680_v19  ;;  %v12688_v14 = vpop.eup %10563 }
 0x200   : > { %6221 = vperm.xlu1 %10547, %v12533_v0   ;;  %8182 = vst.msk [vmem:[#allocation2 + $0xf0] sm:$0xff] %vm14499_vm15, %v12659_v16  ;;  %14503 = vst [vmem:[#allocation72_spill] sm:$0xff] %v12688_v14 }
 0x201   : > { %8183 = vst.msk [vmem:[#allocation2 + $0xf8] sm:$0xff] %vm14501_vm1, %v12662_v47  ;;  %6236 = vperm.xlu0 %10548, %v12572_v9   ;;  %vm14536_vm15 = vmmov %vm14464_vm0 }
 0x202   : > { %v5782_v33 = vpop.xlane.xlu1 %5781  ;;  %v5780_v30 = vpop.xlane.xlu0 %5779  ;;  %vm14537_vm1 = vmmov %vm14464_vm0 }
 0x203   : > { %v12683_v20 = vmax.f32 %v12669_v18, %v5782_v33  ;;  %v12686_v13 = vmax.f32 %v12671_v62, %v5780_v30  ;;  %v5985_v30 = vmul.f32 1.442695, %v5914_v42  ;;  %v5930_v33 = vsub.f32 %v12480_v41, %v12492_v3  ;;  %v12706_v62 = vpop.eup %10565  ;;  %v12719_v42 = vld [vmem:[#allocation2 + $0x110] sm:$0xff] }
 0x204   : > { %7652 = vperm.xlu1 %10547, %v12680_v19   ;;  %14506 = vst [vmem:[#allocation74_spill] sm:$0xff] %v12706_v62  ;;  %v12714_v25 = vpop.eup %10567  ;;  %14509 = vst [vmem:[#allocation77_spill] sm:$0xff] %v12719_v42  ;;  %v6011_v41 = vmul.f32 1.442695, %v5927_v8  ;;  %v12735_v8 = vld [vmem:[#allocation2 + $0x198] sm:$0xff]  ;;  %v12737_v3 = vld [vmem:[#allocation2 + $0x190] sm:$0xff] }
 0x205   : > { %8185 = vst.msk [vmem:[#allocation2 + $0x108] sm:$0xff] %vm14464_vm0, %v12683_v20  ;;  %7667 = vperm.xlu0 %10548, %v12688_v14   ;;  %14507 = vst [vmem:[#allocation75_spill] sm:$0xff] %v12714_v25  ;;  %v12717_v14 = vld [vmem:[#allocation2 + $0x118] sm:$0xff]  ;;  %10571 = vpow2.f32 %v5985_v30 }
 0x206   : > { %8184 = vst.msk [vmem:[#allocation2 + $0x100] sm:$0xff] %vm14505_vm2, %v12686_v13  ;;  %v5814_v19 = vpop.xlane.xlu1 %5813  ;;  %v5812_v50 = vpop.xlane.xlu0 %5811  ;;  %14508 = vst [vmem:[#allocation76_spill] sm:$0xff] %v12717_v14  ;;  %10573 = vpow2.f32 %v6011_v41  ;;  %v12753_v41 = vld [vmem:[#allocation2 + $0x128] sm:$0xff] }
 0x207   : > { %v12709_v52 = vmax.f32 %v12691_v21, %v5814_v19  ;;  %v12712_v22 = vmax.f32 %v12693_v17, %v5812_v50  ;;  %v6017_v19 = vmul.f32 1.442695, %v5930_v33  ;;  %14512 = vst [vmem:[#allocation78_spill] sm:$0xff] %v12735_v8  ;;  %14513 = vst [vmem:[#allocation79_spill] sm:$0xff] %v12737_v3 }
 0x208   : > { %7732 = vperm.xlu1 %10547, %v12706_v62   ;;  %vm14541_vm2 = vmmov %vm14464_vm0 }
 0x209   : > { %8201 = vst.msk [vmem:[#allocation2 + $0x188] sm:$0xff] %vm14510_vm3, %v12709_v52  ;;  %7747 = vperm.xlu0 %10548, %v12714_v25   ;;  %10575 = vpow2.f32 %v6017_v19  ;;  %v12755_v25 = vld [vmem:[#allocation2 + $0x120] sm:$0xff]  ;;  %vm14545_vm3 = vmmov %vm14464_vm0 }
 0x20a   : > { %8200 = vst.msk [vmem:[#allocation2 + $0x180] sm:$0xff] %vm14511_vm4, %v12712_v22  ;;  %v5786_v50 = vpop.xlane.xlu1 %5785  ;;  %v5784_v62 = vpop.xlane.xlu0 %5783  ;;  %14517 = vst [vmem:[#allocation81_spill] sm:$0xff] %v12755_v25 }
 0x20b   : > { %v12729_v17 = vmax.f32 %v12717_v14, %v5786_v50  ;;  %v12732_v4 = vmax.f32 %v12719_v42, %v5784_v62  ;;  %v5913_v42 = vsub.f32 %v12461_v10, %v12472_v37  ;;  %v12768_v14 = vpop.eup %10569  ;;  %vm14546_vm4 = vmmov %vm14464_vm0 }
 0x20c   : > { %6151 = vperm.xlu1 %10547, %v12551_v32   ;;  %14520 = vst [vmem:[#allocation82_spill] sm:$0xff] %v12768_v14 }
 0x20d   : > { %8187 = vst.msk [vmem:[#allocation2 + $0x118] sm:$0xff] %vm14514_vm5, %v12729_v17  ;;  %6166 = vperm.xlu0 %10548, %v12598_v43   ;;  %v5983_v5 = vmul.f32 1.442695, %v5913_v42  ;;  %vm14550_vm5 = vmmov %vm14464_vm0 }
 0x20e   : > { %8186 = vst.msk [vmem:[#allocation2 + $0x110] sm:$0xff] %vm14515_vm6, %v12732_v4  ;;  %v5818_v62 = vpop.xlane.xlu1 %5817  ;;  %v5816_v30 = vpop.xlane.xlu0 %5815  ;;  %vm14551_vm6 = vmmov %vm14464_vm0 }
 0x20f   : > { %v12747_v33 = vmax.f32 %v12735_v8, %v5818_v62  ;;  %v12750_v50 = vmax.f32 %v12737_v3, %v5816_v30  ;;  %v5916_v62 = vsub.f32 %v12499_v23, %v12512_v1  ;;  %v12776_v19 = vpop.eup %10571  ;;  %v12779_v8 = vld [vmem:[#allocation2 + $0x1a8] sm:$0xff]  ;;  %v5929_v1 = vsub.f32 %v12477_v51, %v12489_v36 }
 0x210   : > { %6231 = vperm.xlu1 %10547, %v12569_v59   ;;  %14521 = vst [vmem:[#allocation83_spill] sm:$0xff] %v12776_v19  ;;  %10577 = vpow2.f32 %v5983_v5 }
 0x211   : > { %14516 = vst [vmem:[#allocation80_spill] sm:$0xff] %v12750_v50  ;;  %8203 = vst.msk [vmem:[#allocation2 + $0x198] sm:$0xff] %vm14518_vm7, %v12747_v33  ;;  %6246 = vperm.xlu0 %10548, %v12624_v29  }
 0x212   : > { %8202 = vst.msk [vmem:[#allocation2 + $0x190] sm:$0xff] %vm14519_vm8, %v12750_v50  ;;  %v5790_v30 = vpop.xlane.xlu1 %5789  ;;  %v5788_v3 = vpop.xlane.xlu0 %5787  ;;  %v12781_v50 = vld [vmem:[#allocation2 + $0x1a0] sm:$0xff]  ;;  %vm14555_vm7 = vmmov %vm14464_vm0 }
 0x213   : > { %v12771_v10 = vmax.f32 %v12753_v41, %v5790_v30  ;;  %v12774_v37 = vmax.f32 %v12755_v25, %v5788_v3  ;;  %14522 = vst [vmem:[#allocation84_spill] sm:$0xff] %v12781_v50  ;;  %v5989_v3 = vmul.f32 1.442695, %v5916_v62  ;;  %v5932_v30 = vsub.f32 %v12523_v24, %v12536_v7  ;;  %v12794_v25 = vpop.eup %10573  ;;  %v12807_v62 = vld [vmem:[#allocation2 + $0x130] sm:$0xff]  ;;  %v12825_v7 = vld [vmem:[#allocation2 + $0x1b8] sm:$0xff]  ;;  %vm14556_vm8 = vmmov %vm14464_vm0 }
 0x214   : > { %7662 = vperm.xlu1 %10547, %v12768_v14   ;;  %14525 = vst [vmem:[#allocation85_spill] sm:$0xff] %v12794_v25  ;;  %v12802_v23 = vpop.eup %10575  ;;  %14528 = vst [vmem:[#allocation88_spill] sm:$0xff] %v12807_v62  ;;  %v6015_v24 = vmul.f32 1.442695, %v5929_v1 }
 0x215   : > { %8189 = vst.msk [vmem:[#allocation2 + $0x128] sm:$0xff] %vm14523_vm9, %v12771_v10  ;;  %7677 = vperm.xlu0 %10548, %v12776_v19   ;;  %14526 = vst [vmem:[#allocation86_spill] sm:$0xff] %v12802_v23  ;;  %v12805_v19 = vld [vmem:[#allocation2 + $0x138] sm:$0xff]  ;;  %10579 = vpow2.f32 %v5989_v3  ;;  %v12845_v3 = vld [vmem:[#allocation2 + $0x148] sm:$0xff] }
 0x216   : > { %8188 = vst.msk [vmem:[#allocation2 + $0x120] sm:$0xff] %vm14524_vm10, %v12774_v37  ;;  %v5822_v14 = vpop.xlane.xlu1 %5821  ;;  %v5820_v42 = vpop.xlane.xlu0 %5819  ;;  %14527 = vst [vmem:[#allocation87_spill] sm:$0xff] %v12805_v19  ;;  %10581 = vpow2.f32 %v6015_v24 }
 0x217   : > { %v12797_v51 = vmax.f32 %v12779_v8, %v5822_v14  ;;  %v12800_v36 = vmax.f32 %v12781_v50, %v5820_v42  ;;  %v6021_v14 = vmul.f32 1.442695, %v5932_v30  ;;  %v5918_v42 = vsub.f32 %v12545_v27, %v12554_v58  ;;  %14531 = vst [vmem:[#allocation89_spill] sm:$0xff] %v12825_v7  ;;  %vm14561_vm9 = vmmov %vm14464_vm0 }
 0x218   : > { %7742 = vperm.xlu1 %10547, %v12794_v25   ;;  %v5934_v58 = vsub.f32 %v12563_v31, %v12572_v9  ;;  %v5920_v9 = vsub.f32 %v12583_v11, %v12598_v43  ;;  %v14540_v43 = vsub.f32 %v12494_v12, %v12509_v63  ;;  %vm14562_vm10 = vmmov %vm14464_vm0 }
 0x219   : > { %8205 = vst.msk [vmem:[#allocation2 + $0x1a8] sm:$0xff] %vm14529_vm11, %v12797_v51  ;;  %7757 = vperm.xlu0 %10548, %v12802_v23   ;;  %v12827_v23 = vld [vmem:[#allocation2 + $0x1b0] sm:$0xff]  ;;  %10583 = vpow2.f32 %v6021_v14  ;;  %v5993_v27 = vmul.f32 1.442695, %v5918_v42  ;;  %vm14567_vm11 = vmmov %vm14464_vm0 }
 0x21a   : > { %8204 = vst.msk [vmem:[#allocation2 + $0x1a0] sm:$0xff] %vm14530_vm12, %v12800_v36  ;;  %v5794_v25 = vpop.xlane.xlu1 %5793  ;;  %v5792_v50 = vpop.xlane.xlu0 %5791  ;;  %14532 = vst [vmem:[#allocation90_spill] sm:$0xff] %v12827_v23  ;;  %v6025_v31 = vmul.f32 1.442695, %v5934_v58  ;;  %v5987_v11 = vmul.f32 1.442695, %v14540_v43 }
 0x21b   : > { %v12819_v5 = vmax.f32 %v12805_v19, %v5794_v25  ;;  %v12822_v1 = vmax.f32 %v12807_v62, %v5792_v50  ;;  %v12847_v62 = vld [vmem:[#allocation2 + $0x140] sm:$0xff]  ;;  %10585 = vpow2.f32 %v5993_v27  ;;  %v12869_v19 = vld [vmem:[#allocation2 + $0x1c8] sm:$0xff]  ;;  %v5997_v58 = vmul.f32 1.442695, %v5920_v9  ;;  %vm14568_vm12 = vmmov %vm14464_vm0 }
 0x21c   : > { %6161 = vperm.xlu1 %10547, %v12593_v15   ;;  %14535 = vst [vmem:[#allocation91_spill] sm:$0xff] %v12847_v62  ;;  %v12871_v27 = vld [vmem:[#allocation2 + $0x1c0] sm:$0xff]  ;;  %10587 = vpow2.f32 %v6025_v31  ;;  %v12896_v31 = vld [vmem:[#allocation2 + $0x150] sm:$0xff] }
 0x21d   : > { %8191 = vst.msk [vmem:[#allocation2 + $0x138] sm:$0xff] %vm14533_vm13, %v12819_v5  ;;  %6176 = vperm.xlu0 %10548, %v12644_v46   ;;  %10589 = vpow2.f32 %v5987_v11  ;;  %vm14574_vm13 = vmmov %vm14464_vm0 }
 0x21e   : > { %8190 = vst.msk [vmem:[#allocation2 + $0x130] sm:$0xff] %vm14534_vm14, %v12822_v1  ;;  %v5826_v25 = vpop.xlane.xlu1 %5825  ;;  %v5824_v50 = vpop.xlane.xlu0 %5823  ;;  %10591 = vpow2.f32 %v5997_v58  ;;  %v5938_v58 = vsub.f32 %v12653_v60, %v12662_v47  ;;  %v14554_v60 = vsub.f32 %v12556_v39, %v12569_v59  ;;  %vm14575_vm14 = vmmov %vm14464_vm0 }
 0x21f   : > { %v12839_v30 = vmax.f32 %v12825_v7, %v5826_v25  ;;  %v12842_v24 = vmax.f32 %v12827_v23, %v5824_v50  ;;  %v12858_v50 = vpop.eup %10577 }
 0x220   : > { %6241 = vperm.xlu1 %10547, %v12619_v35   ;;  %14538 = vst [vmem:[#allocation92_spill] sm:$0xff] %v12858_v50  ;;  %v12866_v7 = vpop.eup %10579 }
 0x221   : > { %8207 = vst.msk [vmem:[#allocation2 + $0x1b8] sm:$0xff] %vm14536_vm15, %v12839_v30  ;;  %6256 = vperm.xlu0 %10548, %v12662_v47   ;;  %14539 = vst [vmem:[#allocation93_spill] sm:$0xff] %v12866_v7  ;;  %v6023_v47 = vmul.f32 1.442695, %v14554_v60  ;;  %v12963_v60 = vld [vmem:[#allocation2 + $0x1e8] sm:$0xff] }
 0x222   : > { %8206 = vst.msk [vmem:[#allocation2 + $0x1b0] sm:$0xff] %vm14537_vm1, %v12842_v24  ;;  %v5798_v42 = vpop.xlane.xlu1 %5797  ;;  %v5796_v25 = vpop.xlane.xlu0 %5795  ;;  %vm14580_vm15 = vmmov %vm14464_vm0 }
 0x223   : > { %v12861_v23 = vmax.f32 %v12845_v3, %v5798_v42  ;;  %v12864_v14 = vmax.f32 %v12847_v62, %v5796_v25  ;;  %v5936_v42 = vsub.f32 %v12609_v6, %v12624_v29  ;;  %v12883_v62 = vpop.eup %10581  ;;  %v14544_v29 = vsub.f32 %v12514_v57, %v12533_v0  ;;  %vm14581_vm1 = vmmov %vm14464_vm0 }
 0x224   : > { %7672 = vperm.xlu1 %10547, %v12858_v50   ;;  %14542 = vst [vmem:[#allocation94_spill] sm:$0xff] %v12883_v62  ;;  %v12891_v43 = vpop.eup %10583 }
 0x225   : > { %8193 = vst.msk [vmem:[#allocation2 + $0x148] sm:$0xff] %vm14464_vm0, %v12861_v23  ;;  %7687 = vperm.xlu0 %10548, %v12866_v7   ;;  %14543 = vst [vmem:[#allocation95_spill] sm:$0xff] %v12891_v43  ;;  %v12894_v7 = vld [vmem:[#allocation2 + $0x158] sm:$0xff]  ;;  %v6019_v6 = vmul.f32 1.442695, %v14544_v29  ;;  %v12914_v57 = vpop.eup %10585  ;;  %vm14745_vm0 = vcmask 261120  }
 0x226   : > { %8192 = vst.msk [vmem:[#allocation2 + $0x140] sm:$0xff] %vm14541_vm2, %v12864_v14  ;;  %v5830_v25 = vpop.xlane.xlu1 %5829  ;;  %v5828_v50 = vpop.xlane.xlu0 %5827  ;;  %v6029_v9 = vmul.f32 1.442695, %v5936_v42  ;;  %14547 = vst [vmem:[#allocation96_spill] sm:$0xff] %v12914_v57  ;;  %v12917_v29 = vld [vmem:[#allocation2 + $0x1d8] sm:$0xff] }
 0x227   : > { %v12886_v63 = vmax.f32 %v12869_v19, %v5830_v25  ;;  %v12889_v12 = vmax.f32 %v12871_v27, %v5828_v50  ;;  %v5922_v50 = vsub.f32 %v12635_v55, %v12644_v46  ;;  %10593 = vpow2.f32 %v6019_v6  ;;  %vm14746_vm2 = vmmov %vm14745_vm0 }
 0x228   : > { %7752 = vperm.xlu1 %10547, %v12883_v62   ;;  %v14549_v46 = vsub.f32 %v12538_v54, %v12551_v32  ;;  %10595 = vpow2.f32 %v6029_v9  ;;  %v12937_v32 = vpop.eup %10587  ;;  %v6033_v9 = vmul.f32 1.442695, %v5938_v58 }
 0x229   : > { %8209 = vst.msk [vmem:[#allocation2 + $0x1c8] sm:$0xff] %vm14545_vm3, %v12886_v63  ;;  %7767 = vperm.xlu0 %10548, %v12891_v43   ;;  %v12919_v43 = vld [vmem:[#allocation2 + $0x1d0] sm:$0xff]  ;;  %14552 = vst [vmem:[#allocation98_spill] sm:$0xff] %v12937_v32 }
 0x22a   : > { %8208 = vst.msk [vmem:[#allocation2 + $0x1c0] sm:$0xff] %vm14546_vm4, %v12889_v12  ;;  %v5802_v25 = vpop.xlane.xlu1 %5801  ;;  %v5800_v62 = vpop.xlane.xlu0 %5799  ;;  %14548 = vst [vmem:[#allocation97_spill] sm:$0xff] %v12919_v43  ;;  %v5991_v55 = vmul.f32 1.442695, %v14549_v46  ;;  %v12940_v46 = vld [vmem:[#allocation2 + $0x168] sm:$0xff] }
 0x22b   : > { %v12909_v11 = vmax.f32 %v12894_v7, %v5802_v25  ;;  %v12912_v0 = vmax.f32 %v12896_v31, %v5800_v62  ;;  %v6001_v62 = vmul.f32 1.442695, %v5922_v50  ;;  %vm14747_vm3 = vmmov %vm14745_vm0 }
 0x22c   : > { %6171 = vperm.xlu1 %10547, %v12641_v26   ;;  %10597 = vpow2.f32 %v5991_v55  ;;  %vm14748_vm4 = vmmov %vm14745_vm0 }
 0x22d   : > { %8195 = vst.msk [vmem:[#allocation2 + $0x158] sm:$0xff] %vm14550_vm5, %v12909_v11  ;;  %7697 = vperm.xlu0 %10548, %v12914_v57   ;;  %v12942_v57 = vld [vmem:[#allocation2 + $0x160] sm:$0xff]  ;;  %10599 = vpow2.f32 %v6001_v62  ;;  %v14560_v62 = vsub.f32 %v12574_v38, %v12593_v15  ;;  %v12986_v15 = vld [vmem:[#allocation2 + $0x178] sm:$0xff]  ;;  %vm14749_vm5 = vmmov %vm14745_vm0 }
 0x22e   : > { %8194 = vst.msk [vmem:[#allocation2 + $0x150] sm:$0xff] %vm14551_vm6, %v12912_v0  ;;  %v5834_v42 = vpop.xlane.xlu1 %5833  ;;  %v5832_v25 = vpop.xlane.xlu0 %5831  ;;  %14553 = vst [vmem:[#allocation99_spill] sm:$0xff] %v12942_v57  ;;  %10601 = vpow2.f32 %v6023_v47 }
 0x22f   : > { %v12932_v6 = vmax.f32 %v12917_v29, %v5834_v42  ;;  %v12935_v54 = vmax.f32 %v12919_v43, %v5832_v25  ;;  %v12952_v25 = vpop.eup %10589  ;;  %v5995_v58 = vmul.f32 1.442695, %v14560_v62  ;;  %10603 = vpow2.f32 %v6033_v9  ;;  %v12988_v62 = vld [vmem:[#allocation2 + $0x170] sm:$0xff]  ;;  %vm14750_vm6 = vmmov %vm14745_vm0 }
 0x230   : > { %6251 = vperm.xlu1 %10547, %v12659_v16   ;;  %14557 = vst [vmem:[#allocation100_spill] sm:$0xff] %v12952_v25  ;;  %v12960_v59 = vpop.eup %10591  ;;  %14565 = vst [vmem:[#allocation105_spill] sm:$0xff] %v12988_v62  ;;  %v14566_v9 = vsub.f32 %v12600_v34, %v12619_v35  ;;  %v13009_v35 = vld [vmem:[#allocation2 + $0x1f8] sm:$0xff] }
 0x231   : > { %8211 = vst.msk [vmem:[#allocation2 + $0x1d8] sm:$0xff] %vm14555_vm7, %v12932_v6  ;;  %7777 = vperm.xlu0 %10548, %v12937_v32   ;;  %14558 = vst [vmem:[#allocation101_spill] sm:$0xff] %v12960_v59  ;;  %v12965_v32 = vld [vmem:[#allocation2 + $0x1e0] sm:$0xff]  ;;  %10605 = vpow2.f32 %v5995_v58 }
 0x232   : > { %8210 = vst.msk [vmem:[#allocation2 + $0x1d0] sm:$0xff] %vm14556_vm8, %v12935_v54  ;;  %v5806_v50 = vpop.xlane.xlu1 %5805  ;;  %v5804_v42 = vpop.xlane.xlu0 %5803  ;;  %14559 = vst [vmem:[#allocation102_spill] sm:$0xff] %v12965_v32 }
 0x233   : > { %v12955_v55 = vmax.f32 %v12940_v46, %v5806_v50  ;;  %v12958_v39 = vmax.f32 %v12942_v57, %v5804_v42  ;;  %14571 = vst [vmem:[#allocation108_spill] sm:$0xff] %v13009_v35  ;;  %vm14751_vm7 = vmmov %vm14745_vm0 }
 0x234   : > { %7682 = vperm.xlu1 %10547, %v12952_v25   ;;  %v12975_v25 = vpop.eup %10593  ;;  %vm14752_vm8 = vmmov %vm14745_vm0 }
 0x235   : > { %8197 = vst.msk [vmem:[#allocation2 + $0x168] sm:$0xff] %vm14561_vm9, %v12955_v55  ;;  %7707 = vperm.xlu0 %10548, %v12960_v59   ;;  %14563 = vst [vmem:[#allocation103_spill] sm:$0xff] %v12975_v25  ;;  %v12983_v38 = vpop.eup %10595  ;;  %v6027_v59 = vmul.f32 1.442695, %v14566_v9  ;;  %v13011_v9 = vld [vmem:[#allocation2 + $0x1f0] sm:$0xff] }
 0x236   : > { %8196 = vst.msk [vmem:[#allocation2 + $0x160] sm:$0xff] %vm14562_vm10, %v12958_v39  ;;  %v5838_v50 = vpop.xlane.xlu1 %5837  ;;  %v5836_v42 = vpop.xlane.xlu0 %5835  ;;  %14564 = vst [vmem:[#allocation104_spill] sm:$0xff] %v12983_v38 }
 0x237   : > { %v12978_v57 = vmax.f32 %v12963_v60, %v5838_v50  ;;  %v12981_v47 = vmax.f32 %v12965_v32, %v5836_v42  ;;  %14572 = vst [vmem:[#allocation109_spill] sm:$0xff] %v13011_v9  ;;  %10607 = vpow2.f32 %v6027_v59  ;;  %vm14753_vm9 = vmmov %vm14745_vm0 }
 0x238   : > { %7762 = vperm.xlu1 %10547, %v12975_v25   ;;  %v12998_v25 = vpop.eup %10597  ;;  %vm14754_vm10 = vmmov %vm14745_vm0 }
 0x239   : > { %8213 = vst.msk [vmem:[#allocation2 + $0x1e8] sm:$0xff] %vm14567_vm11, %v12978_v57  ;;  %7787 = vperm.xlu0 %10548, %v12983_v38   ;;  %14569 = vst [vmem:[#allocation106_spill] sm:$0xff] %v12998_v25  ;;  %v13006_v34 = vpop.eup %10599  ;;  %v14573_v38 = vsub.f32 %v12626_v40, %v12641_v26 }
 0x23a   : > { %8212 = vst.msk [vmem:[#allocation2 + $0x1e0] sm:$0xff] %vm14568_vm12, %v12981_v47  ;;  %v5810_v50 = vpop.xlane.xlu1 %5809  ;;  %v5808_v42 = vpop.xlane.xlu0 %5807  ;;  %14570 = vst [vmem:[#allocation107_spill] sm:$0xff] %v13006_v34 }
 0x23b   : > { %v13001_v32 = vmax.f32 %v12986_v15, %v5810_v50  ;;  %v13004_v58 = vmax.f32 %v12988_v62, %v5808_v42  ;;  %v5999_v43 = vmul.f32 1.442695, %v14573_v38  ;;  %v14579_v38 = vsub.f32 %v12646_v28, %v12659_v16  ;;  %vm14755_vm11 = vmmov %vm14745_vm0 }
 0x23c   : > { %7692 = vperm.xlu1 %10547, %v12998_v25   ;;  %v13021_v25 = vpop.eup %10601  ;;  %vm14756_vm12 = vmmov %vm14745_vm0 }
 0x23d   : > { %8199 = vst.msk [vmem:[#allocation2 + $0x178] sm:$0xff] %vm14574_vm13, %v13001_v32  ;;  %7717 = vperm.xlu0 %10548, %v13006_v34   ;;  %14576 = vst [vmem:[#allocation110_spill] sm:$0xff] %v13021_v25  ;;  %v13029_v40 = vpop.eup %10603  ;;  %10609 = vpow2.f32 %v5999_v43  ;;  %v6031_v34 = vmul.f32 1.442695, %v14579_v38  ;;  %v4539_v38 = vld [vmem:[%s12338_s9 + $0x180] sm:$0xff] }
 0x23e   : > { %8198 = vst.msk [vmem:[#allocation2 + $0x170] sm:$0xff] %vm14575_vm14, %v13004_v58  ;;  %v5842_v50 = vpop.xlane.xlu1 %5841  ;;  %v5840_v42 = vpop.xlane.xlu0 %5839  ;;  %14578 = vst [vmem:[#allocation112_spill] sm:$0xff] %v13029_v40 }
 0x23f   : > { %v13024_v59 = vmax.f32 %v13009_v35, %v5842_v50  ;;  %v13027_v26 = vmax.f32 %v13011_v9, %v5840_v42  ;;  %v4523_v50 = vld [vmem:[%s12338_s9 + $0x100] sm:$0xff]  ;;  %v4524_v42 = vld [vmem:[%s12338_s9 + $0x108] sm:$0xff]  ;;  %v13042_v9 = vpop.eup %10605  ;;  %10611 = vpow2.f32 %v6031_v34  ;;  %vm14757_vm13 = vmmov %vm14745_vm0 }
 0x240   : > { %7772 = vperm.xlu1 %10547, %v13021_v25   ;;  %14582 = vst [vmem:[#allocation113_spill] sm:$0xff] %v13042_v9  ;;  %v13044_v43 = vpack.c.bf16 %v4524_v42, %v4523_v50  ;;  %vm14759_vm14 = vmmov %vm14745_vm0 }
 0x241   : > { %14577 = vst [vmem:[#allocation111_spill] sm:$0xff] %v13027_v26  ;;  %8215 = vst.msk [vmem:[#allocation2 + $0x1f8] sm:$0xff] %vm14580_vm15, %v13024_v59  ;;  %7797 = vperm.xlu0 %10548, %v13029_v40   ;;  %v4540_v40 = vld [vmem:[%s12338_s9 + $0x188] sm:$0xff]  ;;  %v13052_v62 = vpop.eup %10607 }
 0x242   : > { %8214 = vst.msk [vmem:[#allocation2 + $0x1f0] sm:$0xff] %vm14581_vm1, %v13027_v26  ;;  %10420 = vmatprep.subr.bf16.mxu0 %v13044_v43  ;;  %14583 = vst [vmem:[#allocation114_spill] sm:$0xff] %v13052_v62  ;;  %v13054_v26 = vpack.c.bf16 %v4540_v40, %v4539_v38 }
 0x243   : > { %v6107_v25 = vpop.permute.xlu1 %6106  ;;  %vm14760_vm15 = vmmov %vm14745_vm0 }
 0x244   : > { %7702 = vperm.xlu1 %10547, %v13042_v9   ;;  %v6420_v28 = vsub.f32 %v11586_v44, %v6107_v25  ;;  %10452 = vmatprep.subr.bf16.mxu1 %v13054_v26  ;;  %vm14761_vm1 = vmmov %vm14745_vm0 }
 0x245   : > { %6266 = vperm.xlu0 %10548, %v12683_v20  }
 0x246   : > { %v6187_v16 = vpop.permute.xlu0 %6186  ;;  %v6485_v34 = vmul.f32 1.442695, %v6420_v28 }
 0x247   : > { %v6436_v50 = vsub.f32 %v11591_v45, %v6187_v16  ;;  %v13060_v9 = vpop.eup %10609 }
 0x248   : > { %7782 = vperm.xlu1 %10547, %v13052_v62   ;;  %14584 = vst [vmem:[#allocation115_spill] sm:$0xff] %v13060_v9  ;;  %10613 = vpow2.f32 %v6485_v34 }
 0x249   : > { %6346 = vperm.xlu0 %10548, %v12709_v52   ;;  %v6517_v40 = vmul.f32 1.442695, %v6436_v50  ;;  %v13066_v16 = vpop.eup %10611 }
 0x24a   : > { %v6102_v42 = vpop.permute.xlu0 %6101  ;;  %14585 = vst [vmem:[#allocation116_spill] sm:$0xff] %v13066_v16 }
 0x24b   : > { %v6419_v44 = vsub.f32 %v11602_v48, %v6102_v42  ;;  %v6182_v25 = vpop.permute.xlu1 %6181 }
 0x24c   : > { %v6435_v35 = vsub.f32 %v11625_v56, %v6182_v25  ;;  %7712 = vperm.xlu1 %10547, %v13060_v9  }
 0x24d   : > { %v6483_v38 = vmul.f32 1.442695, %v6419_v44  ;;  %6276 = vperm.xlu0 %10548, %v12729_v17   ;;  %v14586_v44 = vsub.f32 %v12669_v18, %v12683_v20  ;;  %v14589_v18 = vsub.f32 %v12691_v21, %v12709_v52  ;;  %v4543_v21 = vld [vmem:[%s12338_s9 + $0x1a0] sm:$0xff]  ;;  %v4544_v52 = vld [vmem:[%s12338_s9 + $0x1a8] sm:$0xff] }
 0x24e   : > { %v6515_v45 = vmul.f32 1.442695, %v6435_v35  ;;  %v6197_v56 = vpop.permute.xlu0 %6196  ;;  %v10459_v9 = vpack.c.bf16 %v4544_v52, %v4543_v21 }
 0x24f   : > { %10615 = vpow2.f32 %v6483_v38  ;;  %v6117_v28 = vpop.permute.xlu1 %6116  ;;  %v6438_v34 = vsub.f32 %v11617_v53, %v6197_v56  ;;  %v6037_v25 = vmul.f32 1.442695, %v14586_v44  ;;  %v4525_v38 = vld [vmem:[%s12338_s9 + $0x110] sm:$0xff]  ;;  %v4542_v53 = vld [vmem:[%s12338_s9 + $0x198] sm:$0xff] }
 0x250   : > { %10617 = vpow2.f32 %v6515_v45  ;;  %7792 = vperm.xlu1 %10547, %v13066_v16   ;;  %v6422_v48 = vsub.f32 %v11607_v49, %v6117_v28  ;;  %v4526_v45 = vld [vmem:[%s12338_s9 + $0x118] sm:$0xff] }
 0x251   : > { %10619 = vpow2.f32 %v6517_v40  ;;  %6356 = vperm.xlu0 %10548, %v12747_v33   ;;  %v6521_v56 = vmul.f32 1.442695, %v6438_v34  ;;  %v10423_v44 = vpack.c.bf16 %v4526_v45, %v4525_v38  ;;  %v14591_v38 = vld [vmem:[#allocation9_spill] sm:$0xff] }
 0x252   : > { %v6489_v42 = vmul.f32 1.442695, %v6422_v48  ;;  %v13080_v28 = vpop.eup %10613 }
 0x253   : > { %v6112_v50 = vpop.permute.xlu1 %6111 }
 0x254   : > { %v6421_v35 = vsub.f32 %v11649_v2, %v6112_v50  ;;  %6261 = vperm.xlu1 %10547, %v12686_v13   ;;  %v4541_v50 = vld [vmem:[%s12338_s9 + $0x190] sm:$0xff] }
 0x255   : > { %6286 = vperm.xlu0 %10548, %v12771_v10  }
 0x256   : > { %v6487_v49 = vmul.f32 1.442695, %v6421_v35 }
 0x257   : > { %v6192_v40 = vpop.permute.xlu1 %6191 }
 0x258   : > { %10621 = vpow2.f32 %v6487_v49  ;;  %v6437_v2 = vsub.f32 %v11637_v61, %v6192_v40  ;;  %6341 = vperm.xlu1 %10547, %v12712_v22   ;;  %v6069_v61 = vmul.f32 1.442695, %v14589_v18  ;;  %v4528_v40 = vld [vmem:[%s12338_s9 + $0x128] sm:$0xff]  ;;  %v6207_v16 = vpop.permute.xlu0 %6206 }
 0x259   : > { %v13086_v48 = vpop.eup %10615  ;;  %10623 = vpow2.f32 %v6489_v42  ;;  %6366 = vperm.xlu0 %10548, %v12797_v51   ;;  %v4527_v42 = vld [vmem:[%s12338_s9 + $0x120] sm:$0xff] }
 0x25a   : > { %14587 = vst [vmem:[#allocation117_spill] sm:$0xff] %v13086_v48  ;;  %v13089_v20 = vpop.eup %10617  ;;  %10625 = vpow2.f32 %v6037_v25  ;;  %v6519_v35 = vmul.f32 1.442695, %v6437_v2  ;;  %9971 = vmatprep.mubr.f32.mxu0 %v13086_v48  ;;  %v10455_v25 = vpack.c.bf16 %v4542_v53, %v4541_v50  ;;  %v10427_v2 = vpack.c.bf16 %v4528_v40, %v4527_v42  ;;  %v14592_v50 = vld [vmem:[#allocation70_spill] sm:$0xff]  ;;  %v14594_v48 = vld [vmem:[#allocation80_spill] sm:$0xff] }
 0x25b   : > { %14588 = vst [vmem:[#allocation118_spill] sm:$0xff] %v13089_v20  ;;  %v13095_v49 = vpop.eup %10619  ;;  %10027 = vmatprep.mubr.f32.mxu1 %v13089_v20  ;;  %v6127_v34 = vpop.permute.xlu1 %6126  ;;  %9972 = vmatmul.mubr.f32.vlgmr.msra.gmra.mrb[32].mxu0 %v13080_v28  ;;  %v5939_v53 = vsub.f32 %v14592_v50, %v12686_v13 }
 0x25c   : > { %14590 = vst [vmem:[#allocation119_spill] sm:$0xff] %v13095_v49  ;;  %10627 = vpow2.f32 %v6519_v35  ;;  %6271 = vperm.xlu1 %10547, %v12732_v4   ;;  %10028 = vmatmul.mubr.f32.vlgmr.msra.gmra.mrb[32].mxu1 %v13095_v49  ;;  %v6424_v45 = vsub.f32 %v14591_v38, %v6127_v34  ;;  %v4529_v35 = vld [vmem:[%s12338_s9 + $0x130] sm:$0xff]  ;;  %v14593_v34 = vld [vmem:[#allocation8_spill] sm:$0xff]  ;;  %v14595_v49 = vld [vmem:[#allocation11_spill] sm:$0xff] }
 0x25d   : > { %10629 = vpow2.f32 %v6521_v56  ;;  %6296 = vperm.xlu0 %10548, %v12819_v5   ;;  %10422 = vmatpush3.bf16.msra.mxu0 %v13044_v43  ;;  %v4530_v56 = vld [vmem:[%s12338_s9 + $0x138] sm:$0xff]  ;;  %v4545_v43 = vld [vmem:[%s12338_s9 + $0x1b0] sm:$0xff]  ;;  %v6035_v50 = vmul.f32 1.442695, %v5939_v53  ;;  %v4548_v53 = vld [vmem:[%s12338_s9 + $0x1c8] sm:$0xff] }
 0x25e   : > { %10631 = vpow2.f32 %v6069_v61  ;;  %10424 = vmatprep.subr.bf16.mxu0 %v10423_v44  ;;  %10454 = vmatpush3.bf16.msra.mxu1 %v13054_v26  ;;  %v4546_v61 = vld [vmem:[%s12338_s9 + $0x1b8] sm:$0xff]  ;;  %v6440_v26 = vsub.f32 %v14595_v49, %v6207_v16  ;;  %v6493_v42 = vmul.f32 1.442695, %v6424_v45  ;;  %v10431_v21 = vpack.c.bf16 %v4530_v56, %v4529_v35  ;;  %v4531_v16 = vld [vmem:[%s12338_s9 + $0x140] sm:$0xff]  ;;  %v4532_v49 = vld [vmem:[%s12338_s9 + $0x148] sm:$0xff] }
 0x25f   : > { %v6122_v18 = vpop.permute.xlu1 %6121  ;;  %10456 = vmatprep.subr.bf16.mxu1 %v10455_v25  ;;  %v10463_v45 = vpack.c.bf16 %v4546_v61, %v4545_v43  ;;  %v14601_v35 = vld [vmem:[#allocation73_spill] sm:$0xff]  ;;  %v14602_v61 = vld [vmem:[#allocation76_spill] sm:$0xff] }
 0x260   : > { %v6423_v38 = vsub.f32 %v14593_v34, %v6122_v18  ;;  %v13114_v62 = vpop.permute.xlu0 %6216  ;;  %6351 = vperm.xlu1 %10547, %v14594_v48   ;;  %v5955_v56 = vsub.f32 %v14601_v35, %v12712_v22 }
 0x261   : > { %6376 = vperm.xlu0 %10548, %v12839_v30   ;;  %10426 = vmatpush3.bf16.msra.mxu0 %v10423_v44  ;;  %v14599_v44 = vld [vmem:[#allocation10_spill] sm:$0xff] }
 0x262   : > { %v13121_v13 = vpop.eup %10621  ;;  %v6491_v40 = vmul.f32 1.442695, %v6423_v38  ;;  %10428 = vmatprep.subr.bf16.mxu0 %v10427_v2  ;;  %10458 = vmatpush3.bf16.msra.mxu1 %v10455_v25  ;;  %v4547_v25 = vld [vmem:[%s12338_s9 + $0x1c0] sm:$0xff] }
 0x263   : > { %14596 = vst [vmem:[#allocation9_spill] sm:$0xff] %v13121_v13  ;;  %v13123_v52 = vpop.eup %10623  ;;  %v6202_v18 = vpop.permute.xlu1 %6201  ;;  %9974 = vmatprep.mubr.f32.mxu0 %v13121_v13  ;;  %10460 = vmatprep.subr.bf16.mxu1 %v10459_v9  ;;  %v6525_v13 = vmul.f32 1.442695, %v6440_v26  ;;  %v10467_v35 = vpack.c.bf16 %v4548_v53, %v4547_v25  ;;  %v14607_v25 = vld [vmem:[#allocation78_spill] sm:$0xff] }
 0x264   : > { %14597 = vst [vmem:[#allocation70_spill] sm:$0xff] %v13123_v52  ;;  %v13128_v34 = vpop.eup %10625  ;;  %10633 = vpow2.f32 %v6491_v40  ;;  %v6439_v38 = vsub.f32 %v14599_v44, %v6202_v18  ;;  %v13131_v20 = vpop.permute.xlu0 %7727  ;;  %6281 = vperm.xlu1 %10547, %v12774_v37   ;;  %9975 = vmatmul.mubr.f32.gmra.mrb[34].mxu0 %v13123_v52  ;;  %v14603_v40 = vsub.f32 %v14602_v61, %v12729_v17  ;;  %v14609_v52 = vld [vmem:[#allocation12_spill] sm:$0xff] }
 0x265   : > { %14598 = vst [vmem:[#allocation8_spill] sm:$0xff] %v13128_v34  ;;  %14600 = vst [vmem:[#allocation80_spill] sm:$0xff] %v13131_v20  ;;  %10635 = vpow2.f32 %v6493_v42  ;;  %7807 = vperm.xlu0 %10548, %v13128_v34   ;;  %10430 = vmatpush3.bf16.msra.mxu0 %v10427_v2  ;;  %v10435_v20 = vpack.c.bf16 %v4532_v49, %v4531_v16  ;;  %v4533_v2 = vld [vmem:[%s12338_s9 + $0x150] sm:$0xff]  ;;  %v4534_v42 = vld [vmem:[%s12338_s9 + $0x158] sm:$0xff]  ;;  %v6067_v16 = vmul.f32 1.442695, %v5955_v56 }
 0x266   : > { %v13140_v43 = vpop.eup %10627  ;;  %v6041_v18 = vmul.f32 1.442695, %v14603_v40  ;;  %v6523_v44 = vmul.f32 1.442695, %v6439_v38  ;;  %10432 = vmatprep.subr.bf16.mxu0 %v10431_v21  ;;  %10462 = vmatpush3.bf16.msra.mxu1 %v10459_v9  ;;  %10637 = vpow2.f32 %v6035_v50  ;;  %v4549_v9 = vld [vmem:[%s12338_s9 + $0x1d0] sm:$0xff]  ;;  %v4550_v50 = vld [vmem:[%s12338_s9 + $0x1d8] sm:$0xff]  ;;  %v14608_v53 = vsub.f32 %v14607_v25, %v12747_v33 }
 0x267   : > { %v13145_v22 = vpop.eup %10629  ;;  %v6137_v26 = vpop.permute.xlu1 %6136  ;;  %10030 = vmatprep.mubr.f32.mxu1 %v13140_v43  ;;  %10464 = vmatprep.subr.bf16.mxu1 %v10463_v45  ;;  %v14606_v49 = vld [vmem:[#allocation13_spill] sm:$0xff]  ;;  %v10439_v40 = vpack.c.bf16 %v4534_v42, %v4533_v2  ;;  %v14610_v33 = vld [vmem:[#allocation15_spill] sm:$0xff] }
 0x268   : > { %14604 = vst [vmem:[#allocation11_spill] sm:$0xff] %v13145_v22  ;;  %v13150_v34 = vpop.eup %10631  ;;  %10639 = vpow2.f32 %v6523_v44  ;;  %v13152_v17 = vpop.permute.xlu0 %6146  ;;  %6361 = vperm.xlu1 %10547, %v12800_v36   ;;  %10031 = vmatmul.mubr.f32.gmra.mrb[34].mxu1 %v13145_v22  ;;  %v6426_v38 = vsub.f32 %v14606_v49, %v6137_v26  ;;  %v6073_v61 = vmul.f32 1.442695, %v14608_v53  ;;  %v4535_v22 = vld [vmem:[%s12338_s9 + $0x160] sm:$0xff]  ;;  %v4536_v56 = vld [vmem:[%s12338_s9 + $0x168] sm:$0xff] }
 0x269   : > { %14605 = vst [vmem:[#allocation10_spill] sm:$0xff] %v13150_v34  ;;  %10641 = vpow2.f32 %v6525_v13  ;;  %7887 = vperm.xlu0 %10548, %v13150_v34   ;;  %10434 = vmatpush3.bf16.msra.mxu0 %v10431_v21  ;;  %v10471_v13 = vpack.c.bf16 %v4550_v50, %v4549_v9  ;;  %v4551_v21 = vld [vmem:[%s12338_s9 + $0x1e0] sm:$0xff]  ;;  %v10443_v9 = vpack.c.bf16 %v4536_v56, %v4535_v22  ;;  %v4554_v22 = vld [vmem:[%s12338_s9 + $0x1f8] sm:$0xff]  ;;  %v14613_v56 = vld [vmem:[#allocation77_spill] sm:$0xff] }
 0x26a   : > { %10643 = vpow2.f32 %v6041_v18  ;;  %10436 = vmatprep.subr.bf16.mxu0 %v10435_v20  ;;  %10466 = vmatpush3.bf16.msra.mxu1 %v10463_v45  ;;  %v4552_v18 = vld [vmem:[%s12338_s9 + $0x1e8] sm:$0xff]  ;;  %v6442_v45 = vsub.f32 %v14610_v33, %v13114_v62  ;;  %v6497_v2 = vmul.f32 1.442695, %v6426_v38  ;;  %v4537_v62 = vld [vmem:[%s12338_s9 + $0x170] sm:$0xff]  ;;  %v4538_v38 = vld [vmem:[%s12338_s9 + $0x178] sm:$0xff] }
 0x26b   : > { %v6132_v44 = vpop.permute.xlu1 %6131  ;;  %10468 = vmatprep.subr.bf16.mxu1 %v10467_v35  ;;  %10645 = vpow2.f32 %v6067_v16  ;;  %v10475_v25 = vpack.c.bf16 %v4552_v18, %v4551_v21 }
 0x26c   : > { %v6425_v26 = vsub.f32 %v14609_v52, %v6132_v44  ;;  %v13166_v49 = vpop.permute.xlu0 %6226  ;;  %6291 = vperm.xlu1 %10547, %v12822_v1   ;;  %10647 = vpow2.f32 %v6073_v61  ;;  %v6529_v33 = vmul.f32 1.442695, %v6442_v45 }
 0x26d   : > { %6306 = vperm.xlu0 %10548, %v12861_v23   ;;  %10438 = vmatpush3.bf16.msra.mxu0 %v10435_v20  ;;  %v14611_v20 = vld [vmem:[#allocation14_spill] sm:$0xff] }
 0x26e   : > { %v13174_v42 = vpop.eup %10633  ;;  %v6495_v52 = vmul.f32 1.442695, %v6425_v26  ;;  %10440 = vmatprep.subr.bf16.mxu0 %v10439_v40  ;;  %10470 = vmatpush3.bf16.msra.mxu1 %v10467_v35  ;;  %v4553_v35 = vld [vmem:[%s12338_s9 + $0x1f0] sm:$0xff]  ;;  %v5941_v26 = vsub.f32 %v14613_v56, %v12732_v4 }
 0x26f   : > { %v13176_v50 = vpop.eup %10635  ;;  %v6212_v16 = vpop.permute.xlu1 %6211  ;;  %9977 = vmatprep.mubr.f32.mxu0 %v13174_v42  ;;  %10472 = vmatprep.subr.bf16.mxu1 %v10471_v13  ;;  %v10479_v34 = vpack.c.bf16 %v4554_v22, %v4553_v35 }
 0x270   : > { %10649 = vpow2.f32 %v6495_v52  ;;  %v6441_v53 = vsub.f32 %v14611_v20, %v6212_v16  ;;  %v13182_v44 = vpop.permute.xlu0 %7642  ;;  %6371 = vperm.xlu1 %10547, %v12842_v24   ;;  %9978 = vmatmul.mubr.f32.gmra.mrb[36].mxu0 %v13176_v50  ;;  %v13188_v61 = vpop.eup %10637  ;;  %v10447_v52 = vpack.c.bf16 %v4538_v38, %v4537_v62  ;;  %v14616_v62 = vsub.f32 %v12753_v41, %v12771_v10 }
 0x271   : > { %14612 = vst [vmem:[#allocation73_spill] sm:$0xff] %v13188_v61  ;;  %10651 = vpow2.f32 %v6497_v2  ;;  %6386 = vperm.xlu0 %10548, %v12886_v63   ;;  %10442 = vmatpush3.bf16.msra.mxu0 %v10439_v40  ;;  %v6039_v40 = vmul.f32 1.442695, %v5941_v26  ;;  %v14620_v10 = vsub.f32 %v12779_v8, %v12797_v51 }
 0x272   : > { %v13193_v21 = vpop.eup %10639  ;;  %v6527_v18 = vmul.f32 1.442695, %v6441_v53  ;;  %10444 = vmatprep.subr.bf16.mxu0 %v10443_v9  ;;  %10474 = vmatpush3.bf16.msra.mxu1 %v10471_v13  ;;  %v14615_v13 = vld [vmem:[#allocation79_spill] sm:$0xff]  ;;  %v6045_v38 = vmul.f32 1.442695, %v14616_v62 }
 0x273   : > { %v13195_v16 = vpop.eup %10641  ;;  %v13197_v20 = vpop.permute.xlu1 %7647  ;;  %10033 = vmatprep.mubr.f32.mxu1 %v13193_v21  ;;  %10476 = vmatprep.subr.bf16.mxu1 %v10475_v25  ;;  %v5957_v2 = vsub.f32 %v14615_v13, %v14594_v48 }
 0x274   : > { %v13200_v4 = vpop.eup %10643  ;;  %10653 = vpow2.f32 %v6527_v18  ;;  %v13202_v45 = vpop.permute.xlu0 %7657  ;;  %7802 = vperm.xlu1 %10547, %v13188_v61   ;;  %10034 = vmatmul.mubr.f32.gmra.mrb[36].mxu1 %v13195_v16 }
 0x275   : > { %14614 = vst [vmem:[#allocation76_spill] sm:$0xff] %v13200_v4  ;;  %10655 = vpow2.f32 %v6529_v33  ;;  %7817 = vperm.xlu0 %10548, %v13200_v4   ;;  %10446 = vmatpush3.bf16.msra.mxu0 %v10443_v9  ;;  %v13212_v53 = vpop.eup %10645  ;;  %v6071_v48 = vmul.f32 1.442695, %v5957_v2  ;;  %v14619_v9 = vld [vmem:[#allocation17_spill] sm:$0xff] }
 0x276   : > { %10448 = vmatprep.subr.bf16.mxu0 %v10447_v52  ;;  %10478 = vmatpush3.bf16.msra.mxu1 %v10475_v25  ;;  %14617 = vst [vmem:[#allocation13_spill] sm:$0xff] %v13212_v53  ;;  %v13216_v22 = vpop.eup %10647  ;;  %10657 = vpow2.f32 %v6039_v40  ;;  %v6428_v26 = vsub.f32 %v14619_v9, %v13152_v17  ;;  %v6077_v25 = vmul.f32 1.442695, %v14620_v10  ;;  %v14621_v40 = vld [vmem:[#allocation16_spill] sm:$0xff]  ;;  %v14623_v9 = vld [vmem:[#allocation18_spill] sm:$0xff] }
 0x277   : > { %v13214_v35 = vpop.permute.xlu1 %7722  ;;  %10480 = vmatprep.subr.bf16.mxu1 %v10479_v34  ;;  %14618 = vst [vmem:[#allocation78_spill] sm:$0xff] %v13216_v22  ;;  %10659 = vpow2.f32 %v6045_v38 }
 0x278   : > { %v13218_v56 = vpop.permute.xlu0 %7737  ;;  %7882 = vperm.xlu1 %10547, %v13212_v53   ;;  %10661 = vpow2.f32 %v6071_v48  ;;  %v6501_v17 = vmul.f32 1.442695, %v6428_v26  ;;  %v14635_v53 = vld [vmem:[#allocation20_spill] sm:$0xff] }
 0x279   : > { %7897 = vperm.xlu0 %10548, %v13216_v22   ;;  %10450 = vmatpush3.bf16.msra.mxu0 %v10447_v52  ;;  %v14622_v52 = vld [vmem:[#allocation19_spill] sm:$0xff]  ;;  %10663 = vpow2.f32 %v6077_v25 }
 0x27a   : > { %v13224_v41 = vpop.eup %10649  ;;  %10482 = vmatpush3.bf16.msra.mxu1 %v10479_v34  ;;  %v6444_v62 = vsub.f32 %v14622_v52, %v13166_v49  ;;  %v14624_v49 = vld [vmem:[#allocation81_spill] sm:$0xff] }
 0x27b   : > { %v13229_v33 = vpop.eup %10651  ;;  %v6142_v18 = vpop.permute.xlu1 %6141  ;;  %9980 = vmatprep.mubr.f32.mxu0 %v13224_v41  ;;  %v5943_v48 = vsub.f32 %v14624_v49, %v12774_v37 }
 0x27c   : > { %v6427_v13 = vsub.f32 %v14621_v40, %v6142_v18  ;;  %v6157_v2 = vpop.permute.xlu0 %6156  ;;  %6301 = vperm.xlu1 %10547, %v12864_v14   ;;  %9981 = vmatmul.mubr.f32.gmra.mrb[38].mxu0 %v13229_v33  ;;  %v6533_v26 = vmul.f32 1.442695, %v6444_v62 }
 0x27d   : > { %6316 = vperm.xlu0 %10548, %v12909_v11  }
 0x27e   : > { %v13238_v8 = vpop.eup %10653  ;;  %v6499_v51 = vmul.f32 1.442695, %v6427_v13 }
 0x27f   : > { %v13240_v34 = vpop.eup %10655  ;;  %v6222_v38 = vpop.permute.xlu1 %6221  ;;  %10036 = vmatprep.mubr.f32.mxu1 %v13238_v8 }
 0x280   : > { %10665 = vpow2.f32 %v6499_v51  ;;  %v6443_v10 = vsub.f32 %v14623_v9, %v6222_v38  ;;  %v6237_v18 = vpop.permute.xlu0 %6236  ;;  %6381 = vperm.xlu1 %10547, %v12889_v12   ;;  %10037 = vmatmul.mubr.f32.gmra.mrb[38].mxu1 %v13240_v34  ;;  %v13249_v40 = vpop.eup %10657  ;;  %v6043_v38 = vmul.f32 1.442695, %v5943_v48  ;;  %v14627_v9 = vld [vmem:[#allocation84_spill] sm:$0xff] }
 0x281   : > { %10667 = vpow2.f32 %v6501_v17  ;;  %6396 = vperm.xlu0 %10548, %v12932_v6   ;;  %14625 = vst [vmem:[#allocation12_spill] sm:$0xff] %v13249_v40  ;;  %v13253_v52 = vpop.eup %10659  ;;  %v5959_v37 = vsub.f32 %v14627_v9, %v12800_v36  ;;  %v14628_v17 = vld [vmem:[#allocation87_spill] sm:$0xff]  ;;  %v14632_v36 = vld [vmem:[#allocation21_spill] sm:$0xff] }
 0x282   : > { %v6531_v25 = vmul.f32 1.442695, %v6443_v10  ;;  %14626 = vst [vmem:[#allocation15_spill] sm:$0xff] %v13253_v52  ;;  %v14629_v62 = vsub.f32 %v14628_v17, %v12819_v5  ;;  %v13264_v49 = vpop.eup %10661  ;;  %v14633_v5 = vld [vmem:[#allocation89_spill] sm:$0xff] }
 0x283   : > { %v13251_v13 = vpop.permute.xlu1 %7652  ;;  %14630 = vst [vmem:[#allocation14_spill] sm:$0xff] %v13264_v49  ;;  %v6075_v48 = vmul.f32 1.442695, %v5959_v37  ;;  %v14634_v17 = vsub.f32 %v14633_v5, %v12839_v30  ;;  %v14636_v37 = vld [vmem:[#allocation23_spill] sm:$0xff] }
 0x284   : > { %10669 = vpow2.f32 %v6531_v25  ;;  %v13255_v51 = vpop.permute.xlu0 %7667  ;;  %7812 = vperm.xlu1 %10547, %v13249_v40   ;;  %v6049_v10 = vmul.f32 1.442695, %v14629_v62  ;;  %v13268_v25 = vpop.eup %10663 }
 0x285   : > { %10671 = vpow2.f32 %v6533_v26  ;;  %7827 = vperm.xlu0 %10548, %v13253_v52   ;;  %14631 = vst [vmem:[#allocation77_spill] sm:$0xff] %v13268_v25  ;;  %v6430_v26 = vsub.f32 %v14632_v36, %v6157_v2  ;;  %v6081_v62 = vmul.f32 1.442695, %v14634_v17 }
 0x286   : > { %10673 = vpow2.f32 %v6043_v38 }
 0x287   : > { %v13266_v22 = vpop.permute.xlu1 %7732  ;;  %10675 = vpow2.f32 %v6049_v10  ;;  %v6505_v2 = vmul.f32 1.442695, %v6430_v26  ;;  %v6446_v10 = vsub.f32 %v14636_v37, %v6237_v18  ;;  %v14638_v18 = vld [vmem:[#allocation88_spill] sm:$0xff] }
 0x288   : > { %v13270_v4 = vpop.permute.xlu0 %7747  ;;  %7892 = vperm.xlu1 %10547, %v13264_v49   ;;  %10677 = vpow2.f32 %v6075_v48  ;;  %v5945_v48 = vsub.f32 %v14638_v18, %v12822_v1 }
 0x289   : > { %7907 = vperm.xlu0 %10548, %v13268_v25   ;;  %10679 = vpow2.f32 %v6081_v62  ;;  %v6537_v26 = vmul.f32 1.442695, %v6446_v10 }
 0x28a   : > { %v13275_v9 = vpop.eup %10665  ;;  %v6047_v1 = vmul.f32 1.442695, %v5945_v48 }
 0x28b   : > { %v13280_v52 = vpop.eup %10667  ;;  %v6152_v40 = vpop.permute.xlu1 %6151  ;;  %9983 = vmatprep.mubr.f32.mxu0 %v13275_v9 }
 0x28c   : > { %v6429_v49 = vsub.f32 %v14635_v53, %v6152_v40  ;;  %v6167_v38 = vpop.permute.xlu0 %6166  ;;  %6311 = vperm.xlu1 %10547, %v12912_v0   ;;  %9984 = vmatmul.mubr.f32.gmra.mrb[40].mxu0 %v13280_v52  ;;  %v14637_v53 = vld [vmem:[#allocation22_spill] sm:$0xff] }
 0x28d   : > { %6326 = vperm.xlu0 %10548, %v12955_v55  }
 0x28e   : > { %v13288_v30 = vpop.eup %10669  ;;  %v6503_v36 = vmul.f32 1.442695, %v6429_v49  ;;  %v5948_v49 = vsub.f32 %v12845_v3, %v12861_v23  ;;  %v5964_v3 = vsub.f32 %v12869_v19, %v12886_v63  ;;  %v5950_v63 = vsub.f32 %v12894_v7, %v12909_v11 }
 0x28f   : > { %v13290_v5 = vpop.eup %10671  ;;  %v6232_v17 = vpop.permute.xlu1 %6231  ;;  %10039 = vmatprep.mubr.f32.mxu1 %v13288_v30 }
 0x290   : > { %10681 = vpow2.f32 %v6503_v36  ;;  %v6445_v40 = vsub.f32 %v14637_v53, %v6232_v17  ;;  %v6247_v25 = vpop.permute.xlu0 %6246  ;;  %6391 = vperm.xlu1 %10547, %v12935_v54   ;;  %10040 = vmatmul.mubr.f32.gmra.mrb[40].mxu1 %v13290_v5  ;;  %v13301_v37 = vpop.eup %10673  ;;  %v6053_v23 = vmul.f32 1.442695, %v5948_v49  ;;  %v6085_v19 = vmul.f32 1.442695, %v5964_v3 }
 0x291   : > { %10683 = vpow2.f32 %v6505_v2  ;;  %6406 = vperm.xlu0 %10548, %v12978_v57   ;;  %14639 = vst [vmem:[#allocation79_spill] sm:$0xff] %v13301_v37  ;;  %v13305_v17 = vpop.eup %10675  ;;  %v14641_v2 = vld [vmem:[#allocation90_spill] sm:$0xff]  ;;  %v6057_v11 = vmul.f32 1.442695, %v5950_v63  ;;  %v5966_v3 = vsub.f32 %v12917_v29, %v12932_v6 }
 0x292   : > { %v6535_v62 = vmul.f32 1.442695, %v6445_v40  ;;  %14640 = vst [vmem:[#allocation17_spill] sm:$0xff] %v13305_v17  ;;  %v5961_v10 = vsub.f32 %v14641_v2, %v12842_v24  ;;  %v13315_v40 = vpop.eup %10677  ;;  %v14644_v24 = vld [vmem:[#allocation25_spill] sm:$0xff] }
 0x293   : > { %v13303_v36 = vpop.permute.xlu1 %7662  ;;  %14642 = vst [vmem:[#allocation16_spill] sm:$0xff] %v13315_v40  ;;  %v6089_v6 = vmul.f32 1.442695, %v5966_v3 }
 0x294   : > { %10685 = vpow2.f32 %v6535_v62  ;;  %v13307_v53 = vpop.permute.xlu0 %7677  ;;  %7822 = vperm.xlu1 %10547, %v13301_v37   ;;  %v13319_v62 = vpop.eup %10679  ;;  %v6079_v48 = vmul.f32 1.442695, %v5961_v10  ;;  %v14645_v37 = vld [vmem:[#allocation24_spill] sm:$0xff]  ;;  %v14646_v10 = vld [vmem:[#allocation27_spill] sm:$0xff] }
 0x295   : > { %10687 = vpow2.f32 %v6537_v26  ;;  %7837 = vperm.xlu0 %10548, %v13305_v17   ;;  %14643 = vst [vmem:[#allocation19_spill] sm:$0xff] %v13319_v62  ;;  %v6432_v26 = vsub.f32 %v14644_v24, %v6167_v38 }
 0x296   : > { %10689 = vpow2.f32 %v6047_v1 }
 0x297   : > { %v13317_v18 = vpop.permute.xlu1 %7742  ;;  %10691 = vpow2.f32 %v6053_v23  ;;  %v6509_v38 = vmul.f32 1.442695, %v6432_v26  ;;  %v6448_v23 = vsub.f32 %v14646_v10, %v6247_v25  ;;  %v14648_v25 = vld [vmem:[#allocation91_spill] sm:$0xff] }
 0x298   : > { %v13321_v61 = vpop.permute.xlu0 %7757  ;;  %7902 = vperm.xlu1 %10547, %v13315_v40   ;;  %10693 = vpow2.f32 %v6079_v48  ;;  %v14647_v48 = vld [vmem:[#allocation26_spill] sm:$0xff] }
 0x299   : > { %7917 = vperm.xlu0 %10548, %v13319_v62   ;;  %10695 = vpow2.f32 %v6085_v19  ;;  %v5947_v19 = vsub.f32 %v14648_v25, %v12864_v14  ;;  %v6541_v29 = vmul.f32 1.442695, %v6448_v23 }
 0x29a   : > { %v13326_v49 = vpop.eup %10681 }
 0x29b   : > { %v13330_v2 = vpop.eup %10683  ;;  %v6162_v17 = vpop.permute.xlu1 %6161  ;;  %9986 = vmatprep.mubr.f32.mxu0 %v13326_v49  ;;  %v6051_v14 = vmul.f32 1.442695, %v5947_v19 }
 0x29c   : > { %v6431_v40 = vsub.f32 %v14645_v37, %v6162_v17  ;;  %v13334_v1 = vpop.permute.xlu0 %6176  ;;  %6321 = vperm.xlu1 %10547, %v12958_v39   ;;  %9987 = vmatmul.mubr.f32.gmra.mrb[42].mxu0 %v13330_v2 }
 0x29d   : > { %6336 = vperm.xlu0 %10548, %v13001_v32  }
 0x29e   : > { %v13340_v7 = vpop.eup %10685  ;;  %v6507_v37 = vmul.f32 1.442695, %v6431_v40  ;;  %v5952_v40 = vsub.f32 %v12940_v46, %v12955_v55  ;;  %v5968_v55 = vsub.f32 %v12963_v60, %v12978_v57 }
 0x29f   : > { %v13344_v17 = vpop.eup %10687  ;;  %v6242_v24 = vpop.permute.xlu1 %6241  ;;  %10042 = vmatprep.mubr.f32.mxu1 %v13340_v7 }
 0x2a0   : > { %10697 = vpow2.f32 %v6507_v37  ;;  %v6447_v26 = vsub.f32 %v14647_v48, %v6242_v24  ;;  %v13348_v62 = vpop.permute.xlu0 %6256  ;;  %6401 = vperm.xlu1 %10547, %v12981_v47   ;;  %10043 = vmatmul.mubr.f32.gmra.mrb[42].mxu1 %v13344_v17  ;;  %v13357_v10 = vpop.eup %10689  ;;  %v6061_v46 = vmul.f32 1.442695, %v5952_v40  ;;  %v6093_v60 = vmul.f32 1.442695, %v5968_v55 }
 0x2a1   : > { %10699 = vpow2.f32 %v6509_v38  ;;  %6416 = vperm.xlu0 %10548, %v13024_v59   ;;  %14649 = vst [vmem:[#allocation18_spill] sm:$0xff] %v13357_v10  ;;  %v13361_v24 = vpop.eup %10691  ;;  %v5963_v38 = vsub.f32 %v12871_v27, %v12889_v12  ;;  %v14656_v12 = vld [vmem:[#allocation29_spill] sm:$0xff] }
 0x2a2   : > { %10701 = vpow2.f32 %v6057_v11  ;;  %v6539_v63 = vmul.f32 1.442695, %v6447_v26  ;;  %14650 = vst [vmem:[#allocation81_spill] sm:$0xff] %v13361_v24  ;;  %v13371_v23 = vpop.eup %10693  ;;  %v5949_v11 = vsub.f32 %v12896_v31, %v12912_v0  ;;  %v6434_v19 = vsub.f32 %v14656_v12, %v13334_v1  ;;  %v14659_v1 = vld [vmem:[#allocation28_spill] sm:$0xff] }
 0x2a3   : > { %v13359_v37 = vpop.permute.xlu1 %7672  ;;  %14652 = vst [vmem:[#allocation87_spill] sm:$0xff] %v13371_v23  ;;  %v13377_v26 = vpop.eup %10695  ;;  %v6083_v27 = vmul.f32 1.442695, %v5963_v38  ;;  %v5954_v31 = vsub.f32 %v12986_v15, %v13001_v32  ;;  %v14661_v15 = vld [vmem:[#allocation31_spill] sm:$0xff] }
 0x2a4   : > { %10703 = vpow2.f32 %v6539_v63  ;;  %v13363_v48 = vpop.permute.xlu0 %7687  ;;  %7832 = vperm.xlu1 %10547, %v13357_v10   ;;  %14654 = vst [vmem:[#allocation89_spill] sm:$0xff] %v13377_v26  ;;  %v6513_v32 = vmul.f32 1.442695, %v6434_v19 }
 0x2a5   : > { %14651 = vst [vmem:[#allocation84_spill] sm:$0xff] %v13363_v48  ;;  %10705 = vpow2.f32 %v6541_v29  ;;  %7847 = vperm.xlu0 %10548, %v13361_v24   ;;  %v6055_v29 = vmul.f32 1.442695, %v5949_v11  ;;  %v6065_v55 = vmul.f32 1.442695, %v5954_v31  ;;  %v14662_v11 = vld [vmem:[#allocation108_spill] sm:$0xff] }
 0x2a6   : > { %10707 = vpow2.f32 %v6089_v6  ;;  %v14657_v6 = vld [vmem:[#allocation97_spill] sm:$0xff] }
 0x2a7   : > { %v13375_v3 = vpop.permute.xlu1 %7752  ;;  %10709 = vpow2.f32 %v6051_v14  ;;  %v5965_v40 = vsub.f32 %v14657_v6, %v12935_v54  ;;  %v5970_v6 = vsub.f32 %v14662_v11, %v13024_v59  ;;  %v14667_v59 = vld [vmem:[#allocation99_spill] sm:$0xff] }
 0x2a8   : > { %14653 = vst [vmem:[#allocation21_spill] sm:$0xff] %v13375_v3  ;;  %v13379_v25 = vpop.permute.xlu0 %7767  ;;  %7912 = vperm.xlu1 %10547, %v13371_v23   ;;  %10711 = vpow2.f32 %v6061_v46  ;;  %v6450_v46 = vsub.f32 %v14661_v15, %v13348_v62  ;;  %v14664_v62 = vld [vmem:[#allocation30_spill] sm:$0xff]  ;;  %v5951_v31 = vsub.f32 %v14667_v59, %v12958_v39 }
 0x2a9   : > { %14655 = vst [vmem:[#allocation20_spill] sm:$0xff] %v13379_v25  ;;  %7927 = vperm.xlu0 %10548, %v13377_v26   ;;  %10713 = vpow2.f32 %v6083_v27  ;;  %v6087_v26 = vmul.f32 1.442695, %v5965_v40  ;;  %v6097_v40 = vmul.f32 1.442695, %v5970_v6  ;;  %v14699_v25 = vld [vmem:[#allocation37_spill] sm:$0xff] }
 0x2aa   : > { %v13385_v57 = vpop.eup %10697  ;;  %10715 = vpow2.f32 %v6093_v60  ;;  %v14666_v60 = vld [vmem:[#allocation111_spill] sm:$0xff]  ;;  %v6059_v39 = vmul.f32 1.442695, %v5951_v31 }
 0x2ab   : > { %v13389_v0 = vpop.eup %10699  ;;  %v6172_v63 = vpop.permute.xlu1 %6171  ;;  %9989 = vmatprep.mubr.f32.mxu0 %v13385_v57  ;;  %10717 = vpow2.f32 %v6055_v29  ;;  %v6545_v29 = vmul.f32 1.442695, %v6450_v46 }
 0x2ac   : > { %v13394_v14 = vpop.eup %10701  ;;  %v6433_v38 = vsub.f32 %v14659_v1, %v6172_v63  ;;  %v13397_v12 = vpop.permute.xlu0 %7697  ;;  %6331 = vperm.xlu1 %10547, %v13004_v58   ;;  %9990 = vmatmul.mubr.f32.gmra.mrb[44].mxu0 %v13389_v0 }
 0x2ad   : > { %14658 = vst [vmem:[#allocation23_spill] sm:$0xff] %v13394_v14  ;;  %14660 = vst [vmem:[#allocation22_spill] sm:$0xff] %v13397_v12  ;;  %7857 = vperm.xlu0 %10548, %v13394_v14  }
 0x2ae   : > { %v13404_v54 = vpop.eup %10703  ;;  %v6511_v63 = vmul.f32 1.442695, %v6433_v38 }
 0x2af   : > { %v13408_v1 = vpop.eup %10705  ;;  %v6252_v24 = vpop.permute.xlu1 %6251  ;;  %10045 = vmatprep.mubr.f32.mxu1 %v13404_v54 }
 0x2b0   : > { %v13411_v27 = vpop.eup %10707  ;;  %10719 = vpow2.f32 %v6511_v63  ;;  %v6449_v19 = vsub.f32 %v14664_v62, %v6252_v24  ;;  %v13414_v15 = vpop.permute.xlu0 %7777  ;;  %6411 = vperm.xlu1 %10547, %v14666_v60   ;;  %10046 = vmatmul.mubr.f32.gmra.mrb[44].mxu1 %v13408_v1 }
 0x2b1   : > { %14663 = vst [vmem:[#allocation88_spill] sm:$0xff] %v13411_v27  ;;  %14665 = vst [vmem:[#allocation90_spill] sm:$0xff] %v13414_v15  ;;  %10721 = vpow2.f32 %v6513_v32  ;;  %7937 = vperm.xlu0 %10548, %v13411_v27   ;;  %v13421_v11 = vpop.eup %10709  ;;  %v14672_v32 = vld [vmem:[#allocation102_spill] sm:$0xff] }
 0x2b2   : > { %10723 = vpow2.f32 %v6065_v55  ;;  %v6543_v38 = vmul.f32 1.442695, %v6449_v19  ;;  %14668 = vst [vmem:[#allocation25_spill] sm:$0xff] %v13421_v11  ;;  %v13425_v63 = vpop.eup %10711  ;;  %v5967_v46 = vsub.f32 %v14672_v32, %v12981_v47  ;;  %v14678_v47 = vld [vmem:[#allocation105_spill] sm:$0xff] }
 0x2b3   : > { %10725 = vpow2.f32 %v6087_v26  ;;  %v13423_v24 = vpop.permute.xlu1 %7682  ;;  %14670 = vst [vmem:[#allocation27_spill] sm:$0xff] %v13425_v63  ;;  %v13433_v55 = vpop.eup %10713 }
 0x2b4   : > { %14669 = vst [vmem:[#allocation24_spill] sm:$0xff] %v13423_v24  ;;  %10727 = vpow2.f32 %v6543_v38  ;;  %v13427_v62 = vpop.permute.xlu0 %7707  ;;  %7842 = vperm.xlu1 %10547, %v13421_v11   ;;  %14673 = vst [vmem:[#allocation91_spill] sm:$0xff] %v13433_v55  ;;  %v13437_v6 = vpop.eup %10715  ;;  %v6091_v31 = vmul.f32 1.442695, %v5967_v46  ;;  %v14683_v46 = vld [vmem:[#allocation109_spill] sm:$0xff] }
 0x2b5   : > { %14671 = vst [vmem:[#allocation26_spill] sm:$0xff] %v13427_v62  ;;  %10729 = vpow2.f32 %v6545_v29  ;;  %7867 = vperm.xlu0 %10548, %v13425_v63   ;;  %14675 = vst [vmem:[#allocation97_spill] sm:$0xff] %v13437_v6  ;;  %v13442_v59 = vpop.eup %10717  ;;  %v5953_v29 = vsub.f32 %v14678_v47, %v13004_v58  ;;  %v5969_v47 = vsub.f32 %v14683_v46, %v14666_v60 }
 0x2b6   : > { %10731 = vpow2.f32 %v6097_v40  ;;  %14677 = vst [vmem:[#allocation31_spill] sm:$0xff] %v13442_v59 }
 0x2b7   : > { %v13435_v26 = vpop.permute.xlu1 %7762  ;;  %10733 = vpow2.f32 %v6059_v39  ;;  %v6063_v58 = vmul.f32 1.442695, %v5953_v29  ;;  %v6095_v60 = vmul.f32 1.442695, %v5969_v47 }
 0x2b8   : > { %14674 = vst [vmem:[#allocation29_spill] sm:$0xff] %v13435_v26  ;;  %v13439_v19 = vpop.permute.xlu0 %7787  ;;  %7922 = vperm.xlu1 %10547, %v13433_v55   ;;  %10735 = vpow2.f32 %v6091_v31 }
 0x2b9   : > { %14676 = vst [vmem:[#allocation28_spill] sm:$0xff] %v13439_v19  ;;  %7947 = vperm.xlu0 %10548, %v13437_v6   ;;  %10737 = vpow2.f32 %v6063_v58  ;;  %v14696_v19 = vld [vmem:[#allocation33_spill] sm:$0xff] }
 0x2ba   : > { %v13447_v40 = vpop.eup %10719  ;;  %10739 = vpow2.f32 %v6095_v60  ;;  %v14695_v60 = vld [vmem:[#allocation32_spill] sm:$0xff] }
 0x2bb   : > { %v13449_v38 = vpop.eup %10721  ;;  %v13451_v32 = vpop.permute.xlu1 %7692  ;;  %9992 = vmatprep.mubr.f32.mxu0 %v13447_v40 }
 0x2bc   : > { %14679 = vst [vmem:[#allocation108_spill] sm:$0xff] %v13451_v32  ;;  %v13454_v63 = vpop.eup %10723  ;;  %v13456_v27 = vpop.permute.xlu0 %7717  ;;  %7852 = vperm.xlu1 %10547, %v13442_v59   ;;  %9993 = vmatmul.mubr.f32.gmra.mrb[46].mxu0 %v13449_v38 }
 0x2bd   : > { %14680 = vst [vmem:[#allocation30_spill] sm:$0xff] %v13454_v63  ;;  %14681 = vst [vmem:[#allocation111_spill] sm:$0xff] %v13456_v27  ;;  %v13460_v39 = vpop.eup %10725  ;;  %7877 = vperm.xlu0 %10548, %v13454_v63  }
 0x2be   : > { %14682 = vst [vmem:[#allocation99_spill] sm:$0xff] %v13460_v39  ;;  %v13465_v6 = vpop.eup %10727 }
 0x2bf   : > { %v13467_v14 = vpop.eup %10729  ;;  %v13469_v55 = vpop.permute.xlu1 %7772  ;;  %10048 = vmatprep.mubr.f32.mxu1 %v13465_v6 }
 0x2c0   : > { %14684 = vst [vmem:[#allocation102_spill] sm:$0xff] %v13469_v55  ;;  %v13472_v59 = vpop.eup %10731  ;;  %v13474_v11 = vpop.permute.xlu0 %7797  ;;  %7932 = vperm.xlu1 %10547, %v13460_v39   ;;  %10049 = vmatmul.mubr.f32.gmra.mrb[46].mxu1 %v13467_v14  ;;  %v14697_v55 = vld [vmem:[#allocation35_spill] sm:$0xff] }
 0x2c1   : > { %14685 = vst [vmem:[#allocation105_spill] sm:$0xff] %v13472_v59  ;;  %14686 = vst [vmem:[#allocation109_spill] sm:$0xff] %v13474_v11  ;;  %7957 = vperm.xlu0 %10548, %v13472_v59   ;;  %v13479_v31 = vpop.eup %10733 }
 0x2c2   : > { %14687 = vst [vmem:[#allocation120_spill] sm:$0xff] %v13479_v31  ;;  %v13484_v63 = vpop.eup %10735 }
 0x2c3   : > { %v13481_v29 = vpop.permute.xlu1 %7702  ;;  %14689 = vst [vmem:[#allocation122_spill] sm:$0xff] %v13484_v63  ;;  %v13489_v39 = vpop.eup %10737 }
 0x2c4   : > { %14688 = vst [vmem:[#allocation121_spill] sm:$0xff] %v13481_v29  ;;  %v6267_v46 = vpop.permute.xlu0 %6266  ;;  %7862 = vperm.xlu1 %10547, %v13479_v31   ;;  %14691 = vst [vmem:[#allocation124_spill] sm:$0xff] %v13489_v39  ;;  %v13494_v59 = vpop.eup %10739 }
 0x2c5   : > { %14693 = vst [vmem:[#allocation126_spill] sm:$0xff] %v13494_v59  ;;  %v6452_v27 = vsub.f32 %v14695_v60, %v6267_v46  ;;  %v14700_v46 = vld [vmem:[#allocation36_spill] sm:$0xff] }
 0x2c7   : > { %v13486_v23 = vpop.permute.xlu1 %7782  ;;  %v6549_v62 = vmul.f32 1.442695, %v6452_v27 }
 0x2c8   : > { %14690 = vst [vmem:[#allocation123_spill] sm:$0xff] %v13486_v23  ;;  %v6347_v10 = vpop.permute.xlu0 %6346  ;;  %7942 = vperm.xlu1 %10547, %v13484_v63  }
 0x2c9   : > { %v6468_v15 = vsub.f32 %v14697_v55, %v6347_v10 }
 0x2cb   : > { %v13491_v58 = vpop.permute.xlu1 %7712 }
 0x2cc   : > { %14692 = vst [vmem:[#allocation125_spill] sm:$0xff] %v13491_v58  ;;  %v6277_v47 = vpop.permute.xlu0 %6276  ;;  %7872 = vperm.xlu1 %10547, %v13489_v39   ;;  %v14698_v39 = vld [vmem:[#allocation34_spill] sm:$0xff] }
 0x2cd   : > { %v6454_v24 = vsub.f32 %v14699_v25, %v6277_v47  ;;  %v14705_v47 = vld [vmem:[#allocation118_spill] sm:$0xff] }
 0x2cf   : > { %v13496_v11 = vpop.permute.xlu1 %7792  ;;  %v6553_v27 = vmul.f32 1.442695, %v6454_v24  ;;  %v14704_v24 = vld [vmem:[#allocation40_spill] sm:$0xff] }
 0x2d0   : > { %14694 = vst [vmem:[#allocation127_spill] sm:$0xff] %v13496_v11  ;;  %v6357_v31 = vpop.permute.xlu0 %6356  ;;  %7952 = vperm.xlu1 %10547, %v13494_v59   ;;  %v6581_v11 = vmul.f32 1.442695, %v6468_v15 }
 0x2d3   : > { %v6262_v23 = vpop.permute.xlu1 %6261 }
 0x2d4   : > { %v6451_v29 = vsub.f32 %v14696_v19, %v6262_v23  ;;  %v6287_v63 = vpop.permute.xlu0 %6286  ;;  %v14701_v19 = vld [vmem:[#allocation39_spill] sm:$0xff] }
 0x2d5   : > { %v6470_v10 = vsub.f32 %v14701_v19, %v6357_v31 }
 0x2d6   : > { %v6547_v58 = vmul.f32 1.442695, %v6451_v29 }
 0x2d7   : > { %v6342_v32 = vpop.permute.xlu1 %6341  ;;  %v6585_v25 = vmul.f32 1.442695, %v6470_v10 }
 0x2d8   : > { %10741 = vpow2.f32 %v6547_v58  ;;  %v6467_v12 = vsub.f32 %v14698_v39, %v6342_v32  ;;  %v6367_v26 = vpop.permute.xlu0 %6366  ;;  %v14702_v58 = vld [vmem:[#allocation38_spill] sm:$0xff] }
 0x2d9   : > { %10743 = vpow2.f32 %v6549_v62  ;;  %v14703_v62 = vld [vmem:[#allocation41_spill] sm:$0xff] }
 0x2da   : > { %v6579_v59 = vmul.f32 1.442695, %v6467_v12 }
 0x2db   : > { %v6272_v48 = vpop.permute.xlu1 %6271 }
 0x2dc   : > { %10745 = vpow2.f32 %v6579_v59  ;;  %v6453_v60 = vsub.f32 %v14700_v46, %v6272_v48  ;;  %v6297_v23 = vpop.permute.xlu0 %6296  ;;  %v6456_v59 = vsub.f32 %v14703_v62, %v6287_v63  ;;  %v14707_v63 = vld [vmem:[#allocation43_spill] sm:$0xff] }
 0x2dd   : > { %10747 = vpow2.f32 %v6581_v11 }
 0x2de   : > { %v6551_v55 = vmul.f32 1.442695, %v6453_v60  ;;  %v6557_v60 = vmul.f32 1.442695, %v6456_v59 }
 0x2df   : > { %v6352_v29 = vpop.permute.xlu1 %6351 }
 0x2e0   : > { %10749 = vpow2.f32 %v6551_v55  ;;  %v6469_v32 = vsub.f32 %v14702_v58, %v6352_v29  ;;  %6741 = vadd.xlane.f32.xlu0 %v13080_v28  ;;  %v6377_v15 = vpop.permute.xlu0 %6376  ;;  %v14708_v29 = vld [vmem:[#allocation42_spill] sm:$0xff] }
 0x2e1   : > { %10751 = vpow2.f32 %v6553_v27  ;;  %v6472_v27 = vsub.f32 %v14707_v63, %v6367_v26  ;;  %v14711_v26 = vld [vmem:[#allocation45_spill] sm:$0xff] }
 0x2e2   : > { %v13508_v12 = vpop.eup %10741  ;;  %v6583_v48 = vmul.f32 1.442695, %v6469_v32  ;;  %v14709_v32 = vld [vmem:[#allocation9_spill] sm:$0xff] }
 0x2e3   : > { %v13511_v39 = vpop.eup %10743  ;;  %v6282_v11 = vpop.permute.xlu1 %6281  ;;  %10083 = vmatprep.mubr.f32.mxu0 %v13508_v12  ;;  %v6589_v59 = vmul.f32 1.442695, %v6472_v27  ;;  %v14713_v27 = vld [vmem:[#allocation47_spill] sm:$0xff] }
 0x2e4   : > { %10753 = vpow2.f32 %v6583_v48  ;;  %v6455_v31 = vsub.f32 %v14704_v24, %v6282_v11  ;;  %6771 = vadd.xlane.f32.xlu0 %v14705_v47  ;;  %v13516_v46 = vpop.permute.xlu0 %7807  ;;  %10084 = vmatmul.mubr.f32.vlgmr.msra.gmra.mrb[48].mxu0 %v13511_v39  ;;  %v6458_v48 = vsub.f32 %v14711_v26, %v6297_v23  ;;  %v14712_v47 = vld [vmem:[#allocation44_spill] sm:$0xff]  ;;  %v6474_v23 = vsub.f32 %v14713_v27, %v6377_v15  ;;  %v14714_v26 = vld [vmem:[#allocation46_spill] sm:$0xff] }
 0x2e5   : > { %14706 = vst [vmem:[#allocation32_spill] sm:$0xff] %v13516_v46  ;;  %10755 = vpow2.f32 %v6585_v25 }
 0x2e6   : > { %v13519_v28 = vpop.eup %10745  ;;  %v6555_v19 = vmul.f32 1.442695, %v6455_v31 }
 0x2e7   : > { %v13522_v10 = vpop.eup %10747  ;;  %v6362_v55 = vpop.permute.xlu1 %6361  ;;  %10139 = vmatprep.mubr.f32.mxu1 %v13519_v28 }
 0x2e8   : > { %10757 = vpow2.f32 %v6555_v19  ;;  %v6471_v58 = vsub.f32 %v14708_v29, %v6362_v55  ;;  %6743 = vadd.xlane.f32.xlu0 %v14709_v32  ;;  %v13527_v62 = vpop.permute.xlu0 %7887  ;;  %10140 = vmatmul.mubr.f32.vlgmr.msra.gmra.mrb[48].mxu1 %v13522_v10 }
 0x2e9   : > { %14710 = vst [vmem:[#allocation33_spill] sm:$0xff] %v13527_v62  ;;  %10759 = vpow2.f32 %v6557_v60  ;;  %v6561_v60 = vmul.f32 1.442695, %v6458_v48  ;;  %v14724_v62 = vld [vmem:[#allocation51_spill] sm:$0xff] }
 0x2ea   : > { %v13530_v25 = vpop.eup %10749  ;;  %v6587_v11 = vmul.f32 1.442695, %v6471_v58 }
 0x2eb   : > { %v13533_v24 = vpop.eup %10751  ;;  %v6292_v31 = vpop.permute.xlu1 %6291  ;;  %10086 = vmatprep.mubr.f32.mxu0 %v13530_v25 }
 0x2ec   : > { %10761 = vpow2.f32 %v6587_v11  ;;  %v6457_v63 = vsub.f32 %v14712_v47, %v6292_v31  ;;  %6775 = vadd.xlane.f32.xlu0 %v13140_v43  ;;  %v6307_v19 = vpop.permute.xlu0 %6306  ;;  %10087 = vmatmul.mubr.f32.gmra.mrb[50].mxu0 %v13533_v24 }
 0x2ed   : > { %10763 = vpow2.f32 %v6589_v59  ;;  %v6593_v59 = vmul.f32 1.442695, %v6474_v23 }
 0x2ee   : > { %v13539_v55 = vpop.eup %10753  ;;  %v6559_v29 = vmul.f32 1.442695, %v6457_v63 }
 0x2ef   : > { %v13542_v58 = vpop.eup %10755  ;;  %v6372_v32 = vpop.permute.xlu1 %6371  ;;  %10142 = vmatprep.mubr.f32.mxu1 %v13539_v55 }
 0x2f0   : > { %10765 = vpow2.f32 %v6559_v29  ;;  %v6473_v11 = vsub.f32 %v14714_v26, %v6372_v32  ;;  %6747 = vadd.xlane.f32.xlu0 %v13174_v42  ;;  %v6387_v43 = vpop.permute.xlu0 %6386  ;;  %10143 = vmatmul.mubr.f32.gmra.mrb[50].mxu1 %v13542_v58  ;;  %v14717_v42 = vld [vmem:[#allocation119_spill] sm:$0xff]  ;;  %v14721_v26 = vld [vmem:[#allocation49_spill] sm:$0xff] }
 0x2f1   : > { %10767 = vpow2.f32 %v6561_v60 }
 0x2f2   : > { %v13548_v31 = vpop.eup %10757  ;;  %v6591_v48 = vmul.f32 1.442695, %v6473_v11  ;;  %v6460_v11 = vsub.f32 %v14721_v26, %v6307_v19 }
 0x2f3   : > { %v13550_v15 = vpop.permute.xlu1 %7802  ;;  %10089 = vmatprep.mubr.f32.mxu0 %v13548_v31  ;;  %v13553_v47 = vpop.eup %10759 }
 0x2f4   : > { %14715 = vst [vmem:[#allocation35_spill] sm:$0xff] %v13550_v15  ;;  %10769 = vpow2.f32 %v6591_v48  ;;  %6779 = vadd.xlane.f32.xlu0 %v13193_v21  ;;  %v13556_v63 = vpop.permute.xlu0 %7817  ;;  %6773 = vadd.xlane.f32.xlu1 %v14717_v42  ;;  %v14720_v21 = vld [vmem:[#allocation117_spill] sm:$0xff]  ;;  %v14722_v42 = vld [vmem:[#allocation48_spill] sm:$0xff]  ;;  %v6476_v15 = vsub.f32 %v14724_v62, %v6387_v43 }
 0x2f5   : > { %14716 = vst [vmem:[#allocation34_spill] sm:$0xff] %v13556_v63  ;;  %10090 = vmatmul.mubr.f32.gmra.mrb[52].mxu0 %v13553_v47  ;;  %10771 = vpow2.f32 %v6593_v59 }
 0x2f6   : > { %v13560_v27 = vpop.eup %10761 }
 0x2f7   : > { %v13562_v60 = vpop.permute.xlu1 %7882  ;;  %10145 = vmatprep.mubr.f32.mxu1 %v13560_v27  ;;  %v13565_v23 = vpop.eup %10763 }
 0x2f8   : > { %14718 = vst [vmem:[#allocation37_spill] sm:$0xff] %v13562_v60  ;;  %6751 = vadd.xlane.f32.xlu0 %v13224_v41  ;;  %v13568_v29 = vpop.permute.xlu0 %7897  ;;  %6739 = vadd.xlane.f32.xlu1 %v14720_v21  ;;  %v14723_v60 = vld [vmem:[#allocation70_spill] sm:$0xff] }
 0x2f9   : > { %14719 = vst [vmem:[#allocation36_spill] sm:$0xff] %v13568_v29  ;;  %10146 = vmatmul.mubr.f32.gmra.mrb[52].mxu1 %v13565_v23  ;;  %v6565_v29 = vmul.f32 1.442695, %v6460_v11  ;;  %v6597_v11 = vmul.f32 1.442695, %v6476_v15 }
 0x2fa   : > { %v13572_v32 = vpop.eup %10765 }
 0x2fb   : > { %v6302_v48 = vpop.permute.xlu1 %6301  ;;  %10092 = vmatprep.mubr.f32.mxu0 %v13572_v32  ;;  %v13576_v59 = vpop.eup %10767 }
 0x2fc   : > { %v6459_v63 = vsub.f32 %v14722_v42, %v6302_v48  ;;  %6783 = vadd.xlane.f32.xlu0 %v13238_v8  ;;  %v6317_v41 = vpop.permute.xlu0 %6316  ;;  %6745 = vadd.xlane.f32.xlu1 %v14723_v60  ;;  %v14725_v48 = vld [vmem:[#allocation50_spill] sm:$0xff]  ;;  %v14726_v60 = vld [vmem:[#allocation11_spill] sm:$0xff] }
 0x2fd   : > { %10093 = vmatmul.mubr.f32.gmra.mrb[54].mxu0 %v13576_v59 }
 0x2fe   : > { %v13582_v21 = vpop.eup %10769  ;;  %v6563_v19 = vmul.f32 1.442695, %v6459_v63 }
 0x2ff   : > { %v6382_v26 = vpop.permute.xlu1 %6381  ;;  %10148 = vmatprep.mubr.f32.mxu1 %v13582_v21  ;;  %v13586_v46 = vpop.eup %10771 }
 0x300   : > { %10773 = vpow2.f32 %v6563_v19  ;;  %v6475_v42 = vsub.f32 %v14725_v48, %v6382_v26  ;;  %6755 = vadd.xlane.f32.xlu0 %v13275_v9  ;;  %v6397_v8 = vpop.permute.xlu0 %6396  ;;  %6777 = vadd.xlane.f32.xlu1 %v14726_v60  ;;  %v14728_v26 = vld [vmem:[#allocation52_spill] sm:$0xff] }
 0x301   : > { %10149 = vmatmul.mubr.f32.gmra.mrb[54].mxu1 %v13586_v46  ;;  %10775 = vpow2.f32 %v6565_v29  ;;  %v14727_v29 = vld [vmem:[#allocation53_spill] sm:$0xff] }
 0x302   : > { %v6595_v3 = vmul.f32 1.442695, %v6475_v42  ;;  %v6462_v19 = vsub.f32 %v14727_v29, %v6317_v41  ;;  %v14729_v42 = vld [vmem:[#allocation55_spill] sm:$0xff] }
 0x303   : > { %v13592_v62 = vpop.permute.xlu1 %7812  ;;  %v6478_v60 = vsub.f32 %v14729_v42, %v6397_v8 }
 0x304   : > { %10777 = vpow2.f32 %v6595_v3  ;;  %6787 = vadd.xlane.f32.xlu0 %v13288_v30  ;;  %v13595_v43 = vpop.permute.xlu0 %7827  ;;  %6749 = vadd.xlane.f32.xlu1 %v13176_v50 }
 0x305   : > { %10779 = vpow2.f32 %v6597_v11 }
 0x307   : > { %v13598_v63 = vpop.permute.xlu1 %7892 }
 0x308   : > { %6759 = vadd.xlane.f32.xlu0 %v13326_v49  ;;  %v13601_v9 = vpop.permute.xlu0 %7907  ;;  %6781 = vadd.xlane.f32.xlu1 %v13195_v16  ;;  %v6569_v16 = vmul.f32 1.442695, %v6462_v19 }
 0x30a   : > { %v13604_v15 = vpop.eup %10773 }
 0x30b   : > { %v6312_v3 = vpop.permute.xlu1 %6311  ;;  %10095 = vmatprep.mubr.f32.mxu0 %v13604_v15  ;;  %v13608_v30 = vpop.eup %10775 }
 0x30c   : > { %v6461_v50 = vsub.f32 %v14728_v26, %v6312_v3  ;;  %6791 = vadd.xlane.f32.xlu0 %v13340_v7  ;;  %6753 = vadd.xlane.f32.xlu1 %v13229_v33  ;;  %v6327_v49 = vpop.permute.xlu0 %6326  ;;  %v14730_v3 = vld [vmem:[#allocation54_spill] sm:$0xff]  ;;  %v6601_v33 = vmul.f32 1.442695, %v6478_v60 }
 0x30d   : > { %10096 = vmatmul.mubr.f32.gmra.mrb[56].mxu0 %v13608_v30 }
 0x30e   : > { %v13614_v48 = vpop.eup %10777  ;;  %v6567_v41 = vmul.f32 1.442695, %v6461_v50 }
 0x30f   : > { %v6392_v11 = vpop.permute.xlu1 %6391  ;;  %10151 = vmatprep.mubr.f32.mxu1 %v13614_v48  ;;  %v13618_v29 = vpop.eup %10779 }
 0x310   : > { %10781 = vpow2.f32 %v6567_v41  ;;  %v6477_v26 = vsub.f32 %v14730_v3, %v6392_v11  ;;  %6763 = vadd.xlane.f32.xlu0 %v13385_v57  ;;  %6785 = vadd.xlane.f32.xlu1 %v13240_v34  ;;  %v6407_v19 = vpop.permute.xlu0 %6406  ;;  %v14735_v11 = vld [vmem:[#allocation59_spill] sm:$0xff] }
 0x311   : > { %10152 = vmatmul.mubr.f32.gmra.mrb[56].mxu1 %v13618_v29  ;;  %10783 = vpow2.f32 %v6569_v16  ;;  %v14733_v16 = vld [vmem:[#allocation57_spill] sm:$0xff]  ;;  %v6480_v3 = vsub.f32 %v14735_v11, %v6407_v19  ;;  %v7576_v11 = vld [vmem:[#allocation4] sm:$0xff] }
 0x312   : > { %v6599_v7 = vmul.f32 1.442695, %v6477_v26  ;;  %v6464_v42 = vsub.f32 %v14733_v16, %v6327_v49  ;;  %v14737_v16 = vld [vmem:[#allocation58_spill] sm:$0xff] }
 0x313   : > { %v13624_v8 = vpop.permute.xlu1 %7822 }
 0x314   : > { %10785 = vpow2.f32 %v6599_v7  ;;  %6795 = vadd.xlane.f32.xlu0 %v13404_v54  ;;  %6757 = vadd.xlane.f32.xlu1 %v13280_v52  ;;  %v13632_v34 = vpop.permute.xlu0 %7837  ;;  %v14734_v54 = vld [vmem:[#allocation56_spill] sm:$0xff] }
 0x315   : > { %10787 = vpow2.f32 %v6601_v33  ;;  %14732 = vst [vmem:[#allocation38_spill] sm:$0xff] %v13632_v34 }
 0x317   : > { %v13628_v50 = vpop.permute.xlu1 %7902 }
 0x318   : > { %14731 = vst [vmem:[#allocation39_spill] sm:$0xff] %v13628_v50  ;;  %6767 = vadd.xlane.f32.xlu0 %v13447_v40  ;;  %6789 = vadd.xlane.f32.xlu1 %v13290_v5  ;;  %v6573_v40 = vmul.f32 1.442695, %v6464_v42  ;;  %v13647_v49 = vpop.permute.xlu0 %7917 }
 0x319   : > { %14736 = vst [vmem:[#allocation41_spill] sm:$0xff] %v13647_v49 }
 0x31a   : > { %v13634_v57 = vpop.eup %10781 }
 0x31b   : > { %v6322_v60 = vpop.permute.xlu1 %6321  ;;  %10098 = vmatprep.mubr.f32.mxu0 %v13634_v57  ;;  %v13638_v41 = vpop.eup %10783 }
 0x31c   : > { %v6463_v52 = vsub.f32 %v14734_v54, %v6322_v60  ;;  %6799 = vadd.xlane.f32.xlu0 %v13465_v6  ;;  %6761 = vadd.xlane.f32.xlu1 %v13330_v2  ;;  %v6605_v2 = vmul.f32 1.442695, %v6480_v3  ;;  %v6337_v60 = vpop.permute.xlu0 %6336 }
 0x31d   : > { %10099 = vmatmul.mubr.f32.gmra.mrb[58].mxu0 %v13638_v41 }
 0x31e   : > { %v13644_v5 = vpop.eup %10785  ;;  %v6571_v26 = vmul.f32 1.442695, %v6463_v52  ;;  %v14740_v52 = vld [vmem:[#allocation61_spill] sm:$0xff] }
 0x31f   : > { %v6402_v33 = vpop.permute.xlu1 %6401  ;;  %10154 = vmatprep.mubr.f32.mxu1 %v13644_v5  ;;  %v13650_v7 = vpop.eup %10787 }
 0x320   : > { %10789 = vpow2.f32 %v6571_v26  ;;  %v6479_v6 = vsub.f32 %v14737_v16, %v6402_v33  ;;  %6803 = vadd.xlane.f32.xlu0 %v13508_v12  ;;  %6793 = vadd.xlane.f32.xlu1 %v13344_v17  ;;  %v7577_v12 = vld [vmem:[#allocation4 + $0x8] sm:$0xff]  ;;  %v6417_v3 = vpop.permute.xlu0 %6416  ;;  %v14741_v33 = vld [vmem:[#allocation60_spill] sm:$0xff] }
 0x321   : > { %10155 = vmatmul.mubr.f32.gmra.mrb[58].mxu1 %v13650_v7  ;;  %10791 = vpow2.f32 %v6573_v40  ;;  %v6466_v40 = vsub.f32 %v14740_v52, %v6337_v60  ;;  %v14742_v60 = vld [vmem:[#allocation63_spill] sm:$0xff] }
 0x322   : > { %v6603_v19 = vmul.f32 1.442695, %v6479_v6  ;;  %v6482_v52 = vsub.f32 %v14742_v60, %v6417_v3 }
 0x323   : > { %v13656_v42 = vpop.permute.xlu1 %7832 }
 0x324   : > { %14738 = vst [vmem:[#allocation40_spill] sm:$0xff] %v13656_v42  ;;  %10793 = vpow2.f32 %v6603_v19  ;;  %6835 = vadd.xlane.f32.xlu0 %v13519_v28  ;;  %6765 = vadd.xlane.f32.xlu1 %v13389_v0  ;;  %v7593_v0 = vld [vmem:[#allocation4 + $0x88] sm:$0xff]  ;;  %v6577_v19 = vmul.f32 1.442695, %v6466_v40  ;;  %v14743_v42 = vld [vmem:[#allocation80_spill] sm:$0xff] }
 0x325   : > { %10795 = vpow2.f32 %v6605_v2  ;;  %v7960_v2 = vmul.f32 %v13182_v44, %v7576_v11  ;;  %v6609_v11 = vmul.f32 1.442695, %v6482_v52  ;;  %v13713_v52 = vpop.permute.xlu0 %7847 }
 0x327   : > { %v13660_v54 = vpop.permute.xlu1 %7912 }
 0x328   : > { %14739 = vst [vmem:[#allocation118_spill] sm:$0xff] %v13660_v54  ;;  %6807 = vadd.xlane.f32.xlu0 %v13530_v25  ;;  %6797 = vadd.xlane.f32.xlu1 %v13408_v1  ;;  %v7961_v1 = vmul.f32 %v13197_v20, %v7577_v12  ;;  %v7592_v25 = vld [vmem:[#allocation4 + $0x80] sm:$0xff]  ;;  %v14744_v12 = vld [vmem:[#allocation62_spill] sm:$0xff] }
 0x32a   : > { %v13664_v17 = vpop.eup %10789 }
 0x32b   : > { %v6332_v26 = vpop.permute.xlu1 %6331  ;;  %10101 = vmatprep.mubr.f32.mxu0 %v13664_v17  ;;  %v13668_v28 = vpop.eup %10791 }
 0x32c   : > { %v6465_v16 = vsub.f32 %v14741_v33, %v6332_v26  ;;  %6839 = vadd.xlane.f32.xlu0 %v13539_v55  ;;  %6769 = vadd.xlane.f32.xlu1 %v13449_v38  ;;  %v7977_v26 = vmul.f32 %v14743_v42, %v7593_v0  ;;  %v7976_v38 = vmul.f32 %v13214_v35, %v7592_v25 }
 0x32d   : > { %10102 = vmatmul.mubr.f32.gmra.mrb[60].mxu0 %v13668_v28 }
 0x32e   : > { %v13675_v6 = vpop.eup %10793  ;;  %v6575_v54 = vmul.f32 1.442695, %v6465_v16  ;;  %v9973_v49 = vpop.f32.mrb[32].mxu0  ;;  %v7594_v16 = vld [vmem:[#allocation4 + $0x90] sm:$0xff] }
 0x32f   : > { %v8025_v33 = vadd.f32 %v9973_v49, %v7961_v1  ;;  %v6412_v55 = vpop.permute.xlu1 %6411  ;;  %v7062_v34 = vpop.f32.mrb[33].mxu0  ;;  %10157 = vmatprep.mubr.f32.mxu1 %v13675_v6 }
 0x330   : > { %v13681_v20 = vpop.eup %10795  ;;  %10797 = vpow2.f32 %v6575_v54  ;;  %v6481_v50 = vsub.f32 %v14744_v12, %v6412_v55  ;;  %v8024_v44 = vadd.f32 %v7960_v2, %v7062_v34  ;;  %v10029_v40 = vpop.f32.mrb[32].mxu1  ;;  %6811 = vadd.xlane.f32.xlu0 %v13548_v31  ;;  %6801 = vadd.xlane.f32.xlu1 %v13467_v14  ;;  %v7579_v54 = vld [vmem:[#allocation4 + $0x18] sm:$0xff]  ;;  %v7578_v34 = vld [vmem:[#allocation4 + $0x10] sm:$0xff]  ;;  %v7596_v12 = vld [vmem:[#allocation4 + $0xa0] sm:$0xff] }
 0x331   : > { %8089 = vst.msk [vmem:[#allocation4 + $0x8] sm:$0xff] %vm14745_vm0, %v8025_v33  ;;  %v8041_v49 = vadd.f32 %v10029_v40, %v7977_v26  ;;  %v7207_v42 = vpop.f32.mrb[33].mxu1  ;;  %10158 = vmatmul.mubr.f32.gmra.mrb[60].mxu1 %v13681_v20  ;;  %10799 = vpow2.f32 %v6577_v19  ;;  %v7963_v14 = vmul.f32 %v13202_v45, %v7579_v54  ;;  %v7595_v31 = vld [vmem:[#allocation4 + $0x98] sm:$0xff]  ;;  %v7978_v45 = vmul.f32 %v13266_v22, %v7594_v16  ;;  %v7581_v22 = vld [vmem:[#allocation4 + $0x28] sm:$0xff] }
 0x332   : > { %v6607_v3 = vmul.f32 1.442695, %v6481_v50  ;;  %8088 = vst.msk [vmem:[#allocation4] sm:$0xff] %vm14746_vm2, %v8024_v44  ;;  %v8040_v35 = vadd.f32 %v7976_v38, %v7207_v42  ;;  %v7962_v50 = vmul.f32 %v13251_v13, %v7578_v34  ;;  %v7597_v33 = vld [vmem:[#allocation4 + $0xa8] sm:$0xff]  ;;  %vm14766_vm2 = vmmov %vm14745_vm0 }
 0x333   : > { %8105 = vst.msk [vmem:[#allocation4 + $0x88] sm:$0xff] %vm14747_vm3, %v8041_v49  ;;  %v13726_v49 = vpop.permute.xlu0 %7927  ;;  %vm14767_vm3 = vmmov %vm14745_vm0 }
 0x334   : > { %10801 = vpow2.f32 %v6607_v3  ;;  %8104 = vst.msk [vmem:[#allocation4 + $0x80] sm:$0xff] %vm14748_vm4, %v8040_v35  ;;  %6843 = vadd.xlane.f32.xlu0 %v13560_v27  ;;  %6805 = vadd.xlane.f32.xlu1 %v13511_v39  ;;  %v7979_v27 = vmul.f32 %v13218_v56, %v7595_v31  ;;  %v7599_v35 = vld [vmem:[#allocation4 + $0xb8] sm:$0xff]  ;;  %vm14768_vm4 = vmmov %vm14745_vm0 }
 0x335   : > { %10803 = vpow2.f32 %v6609_v11 }
 0x337   : > { %v9976_v0 = vpop.f32.mrb[34].mxu0  ;;  %v13735_v3 = vpop.permute.xlu0 %7857 }
 0x338   : > { %v8027_v1 = vadd.f32 %v9976_v0, %v7963_v14  ;;  %6815 = vadd.xlane.f32.xlu0 %v13572_v32  ;;  %v7072_v25 = vpop.f32.mrb[35].mxu0  ;;  %6837 = vadd.xlane.f32.xlu1 %v13522_v10  ;;  %v13749_v0 = vpop.permute.xlu1 %7842 }
 0x339   : > { %v8026_v2 = vadd.f32 %v7962_v50, %v7072_v25  ;;  %v7585_v25 = vld [vmem:[#allocation4 + $0x48] sm:$0xff] }
 0x33a   : > { %v13698_v19 = vpop.eup %10797  ;;  %8091 = vst.msk [vmem:[#allocation4 + $0x18] sm:$0xff] %vm14749_vm5, %v8027_v1  ;;  %vm14772_vm5 = vcmask 7168  }
 0x33b   : > { %8090 = vst.msk [vmem:[#allocation4 + $0x10] sm:$0xff] %vm14750_vm6, %v8026_v2  ;;  %v10032_v13 = vpop.f32.mrb[34].mxu1  ;;  %10104 = vmatprep.mubr.f32.mxu0 %v13698_v19  ;;  %v13705_v39 = vpop.eup %10799  ;;  %v7584_v2 = vld [vmem:[#allocation4 + $0x40] sm:$0xff]  ;;  %vm14775_vm6 = vmmov %vm14745_vm0 }
 0x33c   : > { %v8043_v32 = vadd.f32 %v10032_v13, %v7979_v27  ;;  %6847 = vadd.xlane.f32.xlu0 %v13582_v21  ;;  %v7217_v10 = vpop.f32.mrb[35].mxu1  ;;  %6809 = vadd.xlane.f32.xlu1 %v13533_v24  ;;  %v7580_v21 = vld [vmem:[#allocation4 + $0x20] sm:$0xff]  ;;  %v7965_v24 = vmul.f32 %v13255_v51, %v7581_v22  ;;  %v7980_v51 = vmul.f32 %v13317_v18, %v7596_v12  ;;  %v13744_v31 = vpop.permute.xlu0 %7937 }
 0x33d   : > { %v8042_v60 = vadd.f32 %v7978_v45, %v7217_v10  ;;  %10105 = vmatmul.mubr.f32.gmra.mrb[62].mxu0 %v13705_v39  ;;  %v7964_v55 = vmul.f32 %v13303_v36, %v7580_v21  ;;  %v7601_v45 = vld [vmem:[#allocation4 + $0xc8] sm:$0xff]  ;;  %v14763_v13 = vld [vmem:[#allocation24_spill] sm:$0xff] }
 0x33e   : > { %v13710_v56 = vpop.eup %10801  ;;  %8107 = vst.msk [vmem:[#allocation4 + $0x98] sm:$0xff] %vm14751_vm7, %v8043_v32  ;;  %v7968_v32 = vmul.f32 %v14763_v13, %v7584_v2  ;;  %v14776_v2 = vld [vmem:[#allocation102_spill] sm:$0xff]  ;;  %vm14777_vm7 = vmmov %vm14745_vm0  ;;  %v14779_v13 = vld [vmem:[#allocation71_spill] sm:$0xff] }
 0x33f   : > { %8106 = vst.msk [vmem:[#allocation4 + $0x90] sm:$0xff] %vm14752_vm8, %v8042_v60  ;;  %10160 = vmatprep.mubr.f32.mxu1 %v13710_v56  ;;  %v13717_v26 = vpop.eup %10803  ;;  %v7600_v60 = vld [vmem:[#allocation4 + $0xc0] sm:$0xff]  ;;  %vm14778_vm8 = vmmov %vm14772_vm5 }
 0x340   : > { %6819 = vadd.xlane.f32.xlu0 %v13604_v15  ;;  %6841 = vadd.xlane.f32.xlu1 %v13542_v58  ;;  %v7981_v58 = vmul.f32 %v13270_v4, %v7597_v33  ;;  %v7582_v4 = vld [vmem:[#allocation4 + $0x30] sm:$0xff]  ;;  %v13755_v1 = vpop.permute.xlu0 %7867 }
 0x341   : > { %10161 = vmatmul.mubr.f32.gmra.mrb[62].mxu1 %v13717_v26 }
 0x343   : > { %v9979_v38 = vpop.f32.mrb[36].mxu0 }
 0x344   : > { %v8029_v44 = vadd.f32 %v9979_v38, %v7965_v24  ;;  %6851 = vadd.xlane.f32.xlu0 %v13614_v48  ;;  %v7082_v40 = vpop.f32.mrb[37].mxu0  ;;  %6813 = vadd.xlane.f32.xlu1 %v13553_v47  ;;  %v7583_v47 = vld [vmem:[#allocation4 + $0x38] sm:$0xff]  ;;  %v14764_v24 = vld [vmem:[#allocation20_spill] sm:$0xff] }
 0x345   : > { %v8028_v15 = vadd.f32 %v7964_v55, %v7082_v40  ;;  %v7967_v18 = vmul.f32 %v13307_v53, %v7583_v47  ;;  %v6627_v47 = vld [vmem:[#allocation3 + $0x80] sm:$0xff] }
 0x346   : > { %8093 = vst.msk [vmem:[#allocation4 + $0x28] sm:$0xff] %vm14753_vm9, %v8029_v44  ;;  %vm14780_vm9 = vmmov %vm14745_vm0 }
 0x347   : > { %8092 = vst.msk [vmem:[#allocation4 + $0x20] sm:$0xff] %vm14754_vm10, %v8028_v15  ;;  %v10035_v36 = vpop.f32.mrb[36].mxu1  ;;  %vm14781_vm10 = vmmov %vm14745_vm0 }
 0x348   : > { %v8045_v42 = vadd.f32 %v10035_v36, %v7981_v58  ;;  %6823 = vadd.xlane.f32.xlu0 %v13634_v57  ;;  %v7227_v11 = vpop.f32.mrb[37].mxu1  ;;  %6845 = vadd.xlane.f32.xlu1 %v13565_v23  ;;  %v7966_v57 = vmul.f32 %v13359_v37, %v7582_v4  ;;  %v7598_v23 = vld [vmem:[#allocation4 + $0xb0] sm:$0xff]  ;;  %v6612_v58 = vld [vmem:[#allocation3 + $0x8] sm:$0xff] }
 0x349   : > { %v8044_v48 = vadd.f32 %v7980_v51, %v7227_v11  ;;  %v7587_v51 = vld [vmem:[#allocation4 + $0x58] sm:$0xff]  ;;  %v14769_v11 = vld [vmem:[#allocation66_spill] sm:$0xff] }
 0x34a   : > { %8109 = vst.msk [vmem:[#allocation4 + $0xa8] sm:$0xff] %vm14755_vm11, %v8045_v42  ;;  %v7586_v42 = vld [vmem:[#allocation4 + $0x50] sm:$0xff]  ;;  %vm14782_vm11 = vmmov %vm14772_vm5 }
 0x34b   : > { %8108 = vst.msk [vmem:[#allocation4 + $0xa0] sm:$0xff] %vm14756_vm12, %v8044_v48  ;;  %v14770_v4 = vld [vmem:[#allocation22_spill] sm:$0xff]  ;;  %vm14784_vm12 = vmmov %vm14772_vm5 }
 0x34c   : > { %6855 = vadd.xlane.f32.xlu0 %v13644_v5  ;;  %6817 = vadd.xlane.f32.xlu1 %v13576_v59  ;;  %v7983_v5 = vmul.f32 %v13321_v61, %v7599_v35  ;;  %v14758_v59 = vld [vmem:[#allocation21_spill] sm:$0xff]  ;;  %v13760_v61 = vpop.permute.xlu1 %7922 }
 0x34d   : > { %v7982_v53 = vmul.f32 %v14758_v59, %v7598_v23 }
 0x34f   : > { %v9982_v54 = vpop.f32.mrb[38].mxu0 }
 0x350   : > { %v8031_v34 = vadd.f32 %v9982_v54, %v7967_v18  ;;  %6827 = vadd.xlane.f32.xlu0 %v13664_v17  ;;  %v7092_v14 = vpop.f32.mrb[39].mxu0  ;;  %6849 = vadd.xlane.f32.xlu1 %v13586_v46  ;;  %v13768_v10 = vpop.permute.xlu1 %7852  ;;  %v7971_v18 = vmul.f32 %v14770_v4, %v7587_v51  ;;  %v14771_v54 = vld [vmem:[#allocation108_spill] sm:$0xff] }
 0x351   : > { %v8030_v50 = vadd.f32 %v7966_v57, %v7092_v14  ;;  %v7603_v57 = vld [vmem:[#allocation4 + $0xd8] sm:$0xff]  ;;  %v7970_v23 = vmul.f32 %v14771_v54, %v7586_v42 }
 0x352   : > { %8095 = vst.msk [vmem:[#allocation4 + $0x38] sm:$0xff] %vm14757_vm13, %v8031_v34  ;;  %v7602_v34 = vld [vmem:[#allocation4 + $0xd0] sm:$0xff]  ;;  %vm14788_vm13 = vmmov %vm14772_vm5 }
 0x353   : > { %8094 = vst.msk [vmem:[#allocation4 + $0x30] sm:$0xff] %vm14759_vm14, %v8030_v50  ;;  %v10038_v37 = vpop.f32.mrb[38].mxu1  ;;  %vm14792_vm14 = vmmov %vm14745_vm0 }
 0x354   : > { %v8047_v16 = vadd.f32 %v10038_v37, %v7983_v5  ;;  %6859 = vadd.xlane.f32.xlu0 %v13675_v6  ;;  %v7237_v17 = vpop.f32.mrb[39].mxu1  ;;  %6821 = vadd.xlane.f32.xlu1 %v13608_v30  ;;  %v13764_v30 = vpop.permute.xlu0 %7947  ;;  %v14762_v6 = vld [vmem:[#allocation84_spill] sm:$0xff] }
 0x355   : > { %v8046_v46 = vadd.f32 %v7982_v53, %v7237_v17  ;;  %v7969_v27 = vmul.f32 %v14762_v6, %v7585_v25  ;;  %v13778_v40 = vpop.permute.xlu1 %7932  ;;  %v14773_v5 = vld [vmem:[#allocation68_spill] sm:$0xff]  ;;  %v14774_v17 = vld [vmem:[#allocation90_spill] sm:$0xff]  ;;  %v7986_v6 = vmul.f32 %v14776_v2, %v7602_v34 }
 0x356   : > { %8111 = vst.msk [vmem:[#allocation4 + $0xb8] sm:$0xff] %vm14760_vm15, %v8047_v16  ;;  %v6613_v16 = vld [vmem:[#allocation3 + $0x10] sm:$0xff]  ;;  %v14791_v2 = vld [vmem:[#allocation28_spill] sm:$0xff]  ;;  %vm14794_vm15 = vmmov %vm14745_vm0 }
 0x357   : > { %8110 = vst.msk [vmem:[#allocation4 + $0xb0] sm:$0xff] %vm14761_vm1, %v8046_v46  ;;  %v7987_v46 = vmul.f32 %v14774_v17, %v7603_v57  ;;  %v14787_v57 = vld [vmem:[#allocation121_spill] sm:$0xff]  ;;  %vm14795_vm1 = vmmov %vm14772_vm5 }
 0x358   : > { %6831 = vadd.xlane.f32.xlu0 %v13698_v19  ;;  %6853 = vadd.xlane.f32.xlu1 %v13618_v29  ;;  %v13774_v55 = vpop.permute.xlu0 %7877 }
 0x359   : > { %v13785_v36 = vpop.permute.xlu1 %7862 }
 0x35c   : > { %6863 = vadd.xlane.f32.xlu0 %v13710_v56  ;;  %6825 = vadd.xlane.f32.xlu1 %v13638_v41  ;;  %v7985_v56 = vmul.f32 %v14764_v24, %v7601_v45  ;;  %v14765_v41 = vld [vmem:[#allocation29_spill] sm:$0xff] }
 0x35d   : > { %v7984_v33 = vmul.f32 %v14765_v41, %v7600_v60  ;;  %v13794_v59 = vpop.permute.xlu1 %7942 }
 0x35f   : > { %v9985_v19 = vpop.f32.mrb[40].mxu0 }
 0x360   : > { %v8033_v29 = vadd.f32 %v9985_v19, %v7969_v27  ;;  %v7102_v22 = vpop.f32.mrb[41].mxu0  ;;  %6857 = vadd.xlane.f32.xlu1 %v13650_v7  ;;  %v13783_v7 = vpop.permute.xlu0 %7957 }
 0x361   : > { %v8032_v21 = vadd.f32 %v7968_v32, %v7102_v22  ;;  %v6677_v32 = vmul.f32 %v14779_v13, %v6613_v16 }
 0x362   : > { %8097 = vst.msk [vmem:[#allocation4 + $0x48] sm:$0xff] %vm14745_vm0, %v8033_v29  ;;  %v6629_v29 = vld [vmem:[#allocation3 + $0x90] sm:$0xff]  ;;  %vm14796_vm0 = vmmov %vm14795_vm1 }
 0x363   : > { %8096 = vst.msk [vmem:[#allocation4 + $0x40] sm:$0xff] %vm14766_vm2, %v8032_v21  ;;  %v10041_v38 = vpop.f32.mrb[40].mxu1  ;;  %v13803_v21 = vpop.permute.xlu1 %7872 }
 0x364   : > { %v8049_v12 = vadd.f32 %v10041_v38, %v7985_v56  ;;  %v7247_v44 = vpop.f32.mrb[41].mxu1  ;;  %6829 = vadd.xlane.f32.xlu1 %v13668_v28  ;;  %v6676_v28 = vmul.f32 %v14769_v11, %v6612_v58  ;;  %v14783_v56 = vld [vmem:[#allocation74_spill] sm:$0xff]  ;;  %v6615_v38 = vld [vmem:[#allocation3 + $0x20] sm:$0xff] }
 0x365   : > { %v8048_v15 = vadd.f32 %v7984_v33, %v7247_v44  ;;  %v6693_v41 = vmul.f32 %v14783_v56, %v6629_v29  ;;  %v7589_v44 = vld [vmem:[#allocation4 + $0x68] sm:$0xff]  ;;  %v14785_v58 = vld [vmem:[#allocation82_spill] sm:$0xff]  ;;  %v14797_v29 = vld [vmem:[#allocation92_spill] sm:$0xff] }
 0x366   : > { %8113 = vst.msk [vmem:[#allocation4 + $0xc8] sm:$0xff] %vm14767_vm3, %v8049_v12  ;;  %v6679_v51 = vmul.f32 %v14785_v58, %v6615_v38  ;;  %vm14799_vm3 = vmmov %vm14766_vm2 }
 0x367   : > { %8112 = vst.msk [vmem:[#allocation4 + $0xc0] sm:$0xff] %vm14768_vm4, %v8048_v15  ;;  %v7588_v15 = vld [vmem:[#allocation4 + $0x60] sm:$0xff]  ;;  %v13810_v42 = vpop.permute.xlu1 %7952  ;;  %vm14800_vm4 = vmmov %vm14796_vm0 }
 0x368   : > { %6861 = vadd.xlane.f32.xlu1 %v13681_v20  ;;  %v7972_v54 = vmul.f32 %v14787_v57, %v7588_v15 }
 0x36c   : > { %6833 = vadd.xlane.f32.xlu1 %v13705_v39  ;;  %v6691_v39 = vmul.f32 %v14773_v5, %v6627_v47  ;;  %v14786_v47 = vld [vmem:[#allocation26_spill] sm:$0xff] }
 0x36d   : > { %v6742_v48 = vpop.xlane.xlu0 %6741  ;;  %v7973_v4 = vmul.f32 %v14786_v47, %v7589_v44  ;;  %v6614_v44 = vld [vmem:[#allocation3 + $0x18] sm:$0xff] }
 0x36e   : > { %v6868_v35 = vadd.f32 %v6742_v48, %v6676_v28  ;;  %v6631_v28 = vld [vmem:[#allocation3 + $0xa0] sm:$0xff]  ;;  %v6628_v48 = vld [vmem:[#allocation3 + $0x88] sm:$0xff] }
 0x36f   : > { %v9988_v20 = vpop.f32.mrb[42].mxu0 }
 0x370   : > { %6933 = vst.msk [vmem:[#allocation3 + $0x8] sm:$0xff] %vm14772_vm5, %v6868_v35  ;;  %v8035_v14 = vadd.f32 %v9988_v20, %v7971_v18  ;;  %v7112_v50 = vpop.f32.mrb[43].mxu0  ;;  %6865 = vadd.xlane.f32.xlu1 %v13717_v26  ;;  %v7605_v35 = vld [vmem:[#allocation4 + $0xe8] sm:$0xff]  ;;  %v7604_v20 = vld [vmem:[#allocation4 + $0xe0] sm:$0xff]  ;;  %vm14801_vm5 = vmmov %vm14796_vm0 }
 0x371   : > { %v8034_v53 = vadd.f32 %v7970_v23, %v7112_v50  ;;  %v6772_v37 = vpop.xlane.xlu0 %6771  ;;  %v14789_v50 = vld [vmem:[#allocation85_spill] sm:$0xff] }
 0x372   : > { %8099 = vst.msk [vmem:[#allocation4 + $0x58] sm:$0xff] %vm14775_vm6, %v8035_v14  ;;  %v6883_v25 = vadd.f32 %v6772_v37, %v6691_v39  ;;  %v6695_v5 = vmul.f32 %v14789_v50, %v6631_v28  ;;  %v14790_v39 = vld [vmem:[#allocation64_spill] sm:$0xff]  ;;  %v14803_v28 = vld [vmem:[#allocation67_spill] sm:$0xff]  ;;  %vm14804_vm6 = vmmov %vm14796_vm0 }
 0x373   : > { %8098 = vst.msk [vmem:[#allocation4 + $0x50] sm:$0xff] %vm14777_vm7, %v8034_v53  ;;  %v10044_v27 = vpop.f32.mrb[42].mxu1  ;;  %v6692_v53 = vmul.f32 %v14790_v39, %v6628_v48  ;;  %v6678_v48 = vmul.f32 %v14803_v28, %v6614_v44  ;;  %vm14805_vm7 = vmmov %vm14796_vm0  ;;  %v6621_v44 = vld [vmem:[#allocation3 + $0x50] sm:$0xff] }
 0x374   : > { %6948 = vst.msk [vmem:[#allocation3 + $0x80] sm:$0xff] %vm14778_vm8, %v6883_v25  ;;  %v8051_v26 = vadd.f32 %v10044_v27, %v7987_v46  ;;  %v7257_v45 = vpop.f32.mrb[43].mxu1  ;;  %v6617_v46 = vld [vmem:[#allocation3 + $0x30] sm:$0xff]  ;;  %v6611_v25 = vld [vmem:[#allocation3] sm:$0xff]  ;;  %vm14810_vm8 = vmmov %vm14796_vm0 }
 0x375   : > { %v8050_v19 = vadd.f32 %v7986_v6, %v7257_v45  ;;  %v6744_v60 = vpop.xlane.xlu0 %6743  ;;  %v7989_v6 = vmul.f32 %v14791_v2, %v7605_v35  ;;  %v14793_v45 = vld [vmem:[#allocation123_spill] sm:$0xff] }
 0x376   : > { %8115 = vst.msk [vmem:[#allocation4 + $0xd8] sm:$0xff] %vm14780_vm9, %v8051_v26  ;;  %v6869_v22 = vadd.f32 %v6744_v60, %v6677_v32  ;;  %v7988_v13 = vmul.f32 %v14793_v45, %v7604_v20  ;;  %v6630_v35 = vld [vmem:[#allocation3 + $0x98] sm:$0xff]  ;;  %vm14811_vm9 = vmmov %vm14796_vm0 }
 0x377   : > { %8114 = vst.msk [vmem:[#allocation4 + $0xd0] sm:$0xff] %vm14781_vm10, %v8050_v19  ;;  %v8281_v24 = vld [vmem:[#allocation3 + $0x8] sm:$0xff]  ;;  %vm14815_vm10 = vmmov %vm14766_vm2 }
 0x378   : > { %6934 = vst.msk [vmem:[#allocation3 + $0x10] sm:$0xff] %vm14782_vm11, %v6869_v22  ;;  %8351 = vperm.xlu0 %10548, %v8281_v24   ;;  %v6681_v22 = vmul.f32 %v14797_v29, %v6617_v46  ;;  %v14798_v24 = vld [vmem:[#allocation65_spill] sm:$0xff]  ;;  %v14808_v46 = vld [vmem:[#allocation111_spill] sm:$0xff]  ;;  %vm14817_vm11 = vmmov %vm14766_vm2 }
 0x379   : > { %v6776_v33 = vpop.xlane.xlu0 %6775  ;;  %v6675_v56 = vmul.f32 %v14798_v24, %v6611_v25 }
 0x37a   : > { %v6885_v12 = vadd.f32 %v6776_v33, %v6693_v41 }
 0x37c   : > { %6950 = vst.msk [vmem:[#allocation3 + $0x90] sm:$0xff] %vm14784_vm12, %v6885_v12  ;;  %v6633_v12 = vld [vmem:[#allocation3 + $0xb0] sm:$0xff]  ;;  %vm14818_vm12 = vmmov %vm14796_vm0 }
 0x37d   : > { %v6748_v11 = vpop.xlane.xlu0 %6747 }
 0x37e   : > { %v6871_v18 = vadd.f32 %v6748_v11, %v6679_v51  ;;  %v14802_v51 = vld [vmem:[#allocation94_spill] sm:$0xff] }
 0x37f   : > { %v9991_v23 = vpop.f32.mrb[44].mxu0  ;;  %v6697_v11 = vmul.f32 %v14802_v51, %v6633_v12 }
 0x380   : > { %6936 = vst.msk [vmem:[#allocation3 + $0x20] sm:$0xff] %vm14788_vm13, %v6871_v18  ;;  %v8037_v34 = vadd.f32 %v9991_v23, %v7973_v4  ;;  %v7122_v14 = vpop.f32.mrb[45].mxu0  ;;  %v6619_v18 = vld [vmem:[#allocation3 + $0x40] sm:$0xff]  ;;  %v7591_v23 = vld [vmem:[#allocation4 + $0x78] sm:$0xff]  ;;  %vm14819_vm13 = vmmov %vm14796_vm0 }
 0x381   : > { %v8036_v37 = vadd.f32 %v7972_v54, %v7122_v14  ;;  %v6780_v16 = vpop.xlane.xlu0 %6779  ;;  %v6774_v17 = vpop.xlane.xlu1 %6773  ;;  %v14806_v14 = vld [vmem:[#allocation100_spill] sm:$0xff]  ;;  %v7975_v25 = vmul.f32 %v14808_v46, %v7591_v23  ;;  %v14820_v23 = vld [vmem:[#allocation106_spill] sm:$0xff] }
 0x382   : > { %8101 = vst.msk [vmem:[#allocation4 + $0x68] sm:$0xff] %vm14792_vm14, %v8037_v34  ;;  %v6887_v27 = vadd.f32 %v6780_v16, %v6695_v5  ;;  %v6884_v26 = vadd.f32 %v6774_v17, %v6692_v53  ;;  %v7590_v34 = vld [vmem:[#allocation4 + $0x70] sm:$0xff]  ;;  %v6683_v50 = vmul.f32 %v14806_v14, %v6619_v18  ;;  %v14807_v5 = vld [vmem:[#allocation69_spill] sm:$0xff]  ;;  %v6635_v16 = vld [vmem:[#allocation3 + $0xc0] sm:$0xff] }
 0x383   : > { %8100 = vst.msk [vmem:[#allocation4 + $0x60] sm:$0xff] %vm14794_vm15, %v8036_v37  ;;  %v10047_v32 = vpop.f32.mrb[44].mxu1  ;;  %v6694_v39 = vmul.f32 %v14807_v5, %v6630_v35  ;;  %v6616_v17 = vld [vmem:[#allocation3 + $0x28] sm:$0xff]  ;;  %v8296_v35 = vld [vmem:[#allocation3 + $0x80] sm:$0xff]  ;;  %vm14822_vm14 = vmmov %vm14766_vm2 }
 0x384   : > { %6952 = vst.msk [vmem:[#allocation3 + $0xa0] sm:$0xff] %vm14795_vm1, %v6887_v27  ;;  %v8053_v19 = vadd.f32 %v10047_v32, %v7989_v6  ;;  %v7267_v60 = vpop.f32.mrb[45].mxu1  ;;  %v7607_v27 = vld [vmem:[#allocation4 + $0xf8] sm:$0xff]  ;;  %vm14823_vm15 = vmmov %vm14766_vm2 }
 0x385   : > { %6949 = vst.msk [vmem:[#allocation3 + $0x88] sm:$0xff] %vm14796_vm0, %v6884_v26  ;;  %v8052_v41 = vadd.f32 %v7988_v13, %v7267_v60  ;;  %v6752_v33 = vpop.xlane.xlu0 %6751  ;;  %v6740_v38 = vpop.xlane.xlu1 %6739  ;;  %v14809_v26 = vld [vmem:[#allocation125_spill] sm:$0xff]  ;;  %vm14824_vm1 = vmmov %vm14796_vm0 }
 0x386   : > { %8117 = vst.msk [vmem:[#allocation4 + $0xe8] sm:$0xff] %vm14766_vm2, %v8053_v19  ;;  %v6873_v15 = vadd.f32 %v6752_v33, %v6681_v22  ;;  %v6867_v58 = vadd.f32 %v6740_v38, %v6675_v56  ;;  %v7974_v45 = vmul.f32 %v14809_v26, %v7590_v34  ;;  %v7606_v19 = vld [vmem:[#allocation4 + $0xf0] sm:$0xff]  ;;  %v14812_v22 = vld [vmem:[#allocation103_spill] sm:$0xff]  ;;  %v14813_v56 = vld [vmem:[#allocation72_spill] sm:$0xff] }
 0x387   : > { %8116 = vst.msk [vmem:[#allocation4 + $0xe0] sm:$0xff] %vm14799_vm3, %v8052_v41  ;;  %v6699_v24 = vmul.f32 %v14812_v22, %v6635_v16  ;;  %v6680_v41 = vmul.f32 %v14813_v56, %v6616_v17  ;;  %v14821_v34 = vld [vmem:[#allocation75_spill] sm:$0xff]  ;;  %vm14827_vm2 = vmmov %vm14796_vm0  ;;  %v14829_v56 = vld [vmem:[#allocation113_spill] sm:$0xff] }
 0x388   : > { %6938 = vst.msk [vmem:[#allocation3 + $0x30] sm:$0xff] %vm14800_vm4, %v6873_v15  ;;  %v6632_v15 = vld [vmem:[#allocation3 + $0xa8] sm:$0xff]  ;;  %vm14828_vm3 = vmmov %vm14796_vm0 }
 0x389   : > { %6932 = vst.msk [vmem:[#allocation3] sm:$0xff] %vm14801_vm5, %v6867_v58  ;;  %v6784_v47 = vpop.xlane.xlu0 %6783  ;;  %v6746_v4 = vpop.xlane.xlu1 %6745  ;;  %v14814_v58 = vld [vmem:[#allocation109_spill] sm:$0xff]  ;;  %v6696_v14 = vmul.f32 %v14821_v34, %v6632_v15  ;;  %v6639_v15 = vld [vmem:[#allocation3 + $0xe0] sm:$0xff]  ;;  %vm14831_vm4 = vmmov %vm14796_vm0 }
 0x38a   : > { %v6889_v57 = vadd.f32 %v6784_v47, %v6697_v11  ;;  %v6870_v54 = vadd.f32 %v6746_v4, %v6678_v48  ;;  %v7991_v51 = vmul.f32 %v14814_v58, %v7607_v27  ;;  %v14816_v48 = vld [vmem:[#allocation127_spill] sm:$0xff]  ;;  %v6620_v58 = vld [vmem:[#allocation3 + $0x48] sm:$0xff]  ;;  %vm14832_vm5 = vmmov %vm14796_vm0 }
 0x38b   : > { %v7990_v47 = vmul.f32 %v14816_v48, %v7606_v19  ;;  %v14826_v27 = vld [vmem:[#allocation83_spill] sm:$0xff]  ;;  %v8284_v48 = vld [vmem:[#allocation3 + $0x20] sm:$0xff] }
 0x38c   : > { %v8297_v20 = vld [vmem:[#allocation3 + $0x88] sm:$0xff]  ;;  %6954 = vst.msk [vmem:[#allocation3 + $0xb0] sm:$0xff] %vm14804_vm6, %v6889_v57  ;;  %v6634_v19 = vld [vmem:[#allocation3 + $0xb8] sm:$0xff]  ;;  %vm14835_vm6 = vmmov %vm14796_vm0 }
 0x38d   : > { %6935 = vst.msk [vmem:[#allocation3 + $0x18] sm:$0xff] %vm14805_vm7, %v6870_v54  ;;  %8431 = vperm.xlu0 %10548, %v8297_v20   ;;  %v6756_v53 = vpop.xlane.xlu0 %6755  ;;  %v6778_v37 = vpop.xlane.xlu1 %6777  ;;  %v6685_v20 = vmul.f32 %v14820_v23, %v6621_v44  ;;  %v6625_v23 = vld [vmem:[#allocation3 + $0x70] sm:$0xff]  ;;  %vm14836_vm7 = vmmov %vm14796_vm0 }
 0x38e   : > { %v6875_v2 = vadd.f32 %v6756_v53, %v6683_v50  ;;  %v6886_v6 = vadd.f32 %v6778_v37, %v6694_v39  ;;  %v6637_v53 = vld [vmem:[#allocation3 + $0xd0] sm:$0xff]  ;;  %v6618_v37 = vld [vmem:[#allocation3 + $0x38] sm:$0xff] }
 0x38f   : > { %v9994_v13 = vpop.f32.mrb[46].mxu0  ;;  %v6682_v26 = vmul.f32 %v14826_v27, %v6618_v37  ;;  %v14838_v37 = vld [vmem:[#allocation95_spill] sm:$0xff] }
 0x390   : > { %v8280_v32 = vld [vmem:[#allocation3] sm:$0xff]  ;;  %6940 = vst.msk [vmem:[#allocation3 + $0x40] sm:$0xff] %vm14810_vm8, %v6875_v2  ;;  %v8039_v60 = vadd.f32 %v9994_v13, %v7975_v25  ;;  %v7132_v29 = vpop.f32.mrb[47].mxu0  ;;  %v8282_v25 = vld [vmem:[#allocation3 + $0x10] sm:$0xff]  ;;  %vm14839_vm8 = vmmov %vm14796_vm0 }
 0x391   : > { %6951 = vst.msk [vmem:[#allocation3 + $0x98] sm:$0xff] %vm14811_vm9, %v6886_v6  ;;  %8346 = vperm.xlu1 %10547, %v8280_v32   ;;  %v8038_v33 = vadd.f32 %v7974_v45, %v7132_v29  ;;  %v6788_v38 = vpop.xlane.xlu0 %6787  ;;  %v6750_v12 = vpop.xlane.xlu1 %6749  ;;  %v14825_v2 = vld [vmem:[#allocation110_spill] sm:$0xff]  ;;  %v6623_v32 = vld [vmem:[#allocation3 + $0x60] sm:$0xff]  ;;  %vm14840_vm9 = vmmov %vm14796_vm0 }
 0x392   : > { %8103 = vst.msk [vmem:[#allocation4 + $0x78] sm:$0xff] %vm14815_vm10, %v8039_v60  ;;  %v6891_v11 = vadd.f32 %v6788_v38, %v6699_v24  ;;  %v6872_v28 = vadd.f32 %v6750_v12, %v6680_v41  ;;  %v6701_v6 = vmul.f32 %v14825_v2, %v6637_v53  ;;  %v8298_v24 = vld [vmem:[#allocation3 + $0x90] sm:$0xff]  ;;  %v6687_v41 = vmul.f32 %v14829_v56, %v6623_v32  ;;  %v6622_v2 = vld [vmem:[#allocation3 + $0x58] sm:$0xff]  ;;  %vm14843_vm10 = vmmov %vm14796_vm0 }
 0x393   : > { %8102 = vst.msk [vmem:[#allocation4 + $0x70] sm:$0xff] %vm14817_vm11, %v8038_v33  ;;  %v10050_v4 = vpop.f32.mrb[46].mxu1  ;;  %v14830_v33 = vld [vmem:[#allocation86_spill] sm:$0xff]  ;;  %v6638_v56 = vld [vmem:[#allocation3 + $0xd8] sm:$0xff]  ;;  %vm14844_vm11 = vmmov %vm14796_vm0 }
 0x394   : > { %v8283_v18 = vld [vmem:[#allocation3 + $0x18] sm:$0xff]  ;;  %6956 = vst.msk [vmem:[#allocation3 + $0xc0] sm:$0xff] %vm14818_vm12, %v6891_v11  ;;  %v8055_v57 = vadd.f32 %v10050_v4, %v7991_v51  ;;  %v7277_v54 = vpop.f32.mrb[47].mxu1  ;;  %v6698_v38 = vmul.f32 %v14830_v33, %v6634_v19  ;;  %v14842_v19 = vld [vmem:[#allocation96_spill] sm:$0xff]  ;;  %vm14847_vm12 = vmmov %vm14796_vm0 }
 0x395   : > { %6937 = vst.msk [vmem:[#allocation3 + $0x28] sm:$0xff] %vm14819_vm13, %v6872_v28  ;;  %8361 = vperm.xlu0 %10548, %v8283_v18   ;;  %8426 = vperm.xlu1 %10547, %v8296_v35   ;;  %v8054_v50 = vadd.f32 %v7990_v47, %v7277_v54  ;;  %v6760_v5 = vpop.xlane.xlu0 %6759  ;;  %v6782_v39 = vpop.xlane.xlu1 %6781  ;;  %v14833_v47 = vld [vmem:[#allocation114_spill] sm:$0xff]  ;;  %v14834_v18 = vld [vmem:[#allocation93_spill] sm:$0xff]  ;;  %vm14848_vm13 = vmmov %vm14796_vm0 }
 0x396   : > { %8119 = vst.msk [vmem:[#allocation4 + $0xf8] sm:$0xff] %vm14822_vm14, %v8055_v57  ;;  %v6877_v16 = vadd.f32 %v6760_v5, %v6685_v20  ;;  %v6888_v17 = vadd.f32 %v6782_v39, %v6696_v14  ;;  %v6703_v4 = vmul.f32 %v14833_v47, %v6639_v15  ;;  %v6684_v35 = vmul.f32 %v14834_v18, %v6620_v58  ;;  %v6636_v20 = vld [vmem:[#allocation3 + $0xc8] sm:$0xff]  ;;  %v8300_v5 = vld [vmem:[#allocation3 + $0xa0] sm:$0xff]  ;;  %v14837_v39 = vld [vmem:[#allocation115_spill] sm:$0xff] }
 0x397   : > { %8118 = vst.msk [vmem:[#allocation4 + $0xf0] sm:$0xff] %vm14823_vm15, %v8054_v50  ;;  %v6689_v53 = vmul.f32 %v14837_v39, %v6625_v23  ;;  %v14846_v58 = vld [vmem:[#allocation98_spill] sm:$0xff]  ;;  %v6624_v47 = vld [vmem:[#allocation3 + $0x68] sm:$0xff]  ;;  %vm14851_vm14 = vmmov %vm14796_vm0 }
 0x398   : > { %v8299_v46 = vld [vmem:[#allocation3 + $0x98] sm:$0xff]  ;;  %6942 = vst.msk [vmem:[#allocation3 + $0x50] sm:$0xff] %vm14824_vm1, %v6877_v16  ;;  %v6700_v16 = vmul.f32 %v14838_v37, %v6636_v20  ;;  %v14850_v20 = vld [vmem:[#allocation101_spill] sm:$0xff]  ;;  %vm14852_vm15 = vmmov %vm14796_vm0 }
 0x399   : > { %6953 = vst.msk [vmem:[#allocation3 + $0xa8] sm:$0xff] %vm14796_vm0, %v6888_v17  ;;  %8441 = vperm.xlu0 %10548, %v8299_v46   ;;  %8356 = vperm.xlu1 %10547, %v8282_v25   ;;  %v6792_v45 = vpop.xlane.xlu0 %6791  ;;  %v6754_v13 = vpop.xlane.xlu1 %6753  ;;  %v6641_v25 = vld [vmem:[#allocation3 + $0xf0] sm:$0xff]  ;;  %v6640_v39 = vld [vmem:[#allocation3 + $0xe8] sm:$0xff]  ;;  %vm14857_vm1 = vmmov %vm14796_vm0 }
 0x39a   : > { %v6893_v60 = vadd.f32 %v6792_v45, %v6701_v6  ;;  %v6874_v29 = vadd.f32 %v6754_v13, %v6682_v26  ;;  %v8286_v45 = vld [vmem:[#allocation3 + $0x30] sm:$0xff]  ;;  %v14841_v13 = vld [vmem:[#allocation116_spill] sm:$0xff] }
 0x39b   : > { %v6705_v32 = vmul.f32 %v14841_v13, %v6641_v25  ;;  %v7608_v25 = vld [vmem:[#allocation4 + $0x100] sm:$0xff] }
 0x39c   : > { %v8285_v22 = vld [vmem:[#allocation3 + $0x28] sm:$0xff]  ;;  %6958 = vst.msk [vmem:[#allocation3 + $0xd0] sm:$0xff] %vm14827_vm2, %v6893_v60  ;;  %v6686_v60 = vmul.f32 %v14842_v19, %v6622_v2  ;;  %v14853_v2 = vld [vmem:[#allocation12_spill] sm:$0xff]  ;;  %v6626_v19 = vld [vmem:[#allocation3 + $0x78] sm:$0xff]  ;;  %vm14861_vm2 = vcmask 261120  }
 0x39d   : > { %6939 = vst.msk [vmem:[#allocation3 + $0x38] sm:$0xff] %vm14828_vm3, %v6874_v29  ;;  %8371 = vperm.xlu0 %10548, %v8285_v22   ;;  %8436 = vperm.xlu1 %10547, %v8298_v24   ;;  %v6764_v12 = vpop.xlane.xlu0 %6763  ;;  %v6786_v44 = vpop.xlane.xlu1 %6785  ;;  %v6643_v24 = vld [vmem:[#allocation3 + $0x100] sm:$0xff]  ;;  %vm14863_vm3 = vmmov %vm14861_vm2 }
 0x39e   : > { %v6879_v51 = vadd.f32 %v6764_v12, %v6687_v41  ;;  %v6890_v11 = vadd.f32 %v6786_v44, %v6698_v38  ;;  %v8302_v12 = vld [vmem:[#allocation3 + $0xb0] sm:$0xff]  ;;  %v14845_v44 = vld [vmem:[#allocation73_spill] sm:$0xff] }
 0x39f   : > { %v6707_v15 = vmul.f32 %v14845_v44, %v6643_v24  ;;  %v8290_v44 = vld [vmem:[#allocation3 + $0x50] sm:$0xff] }
 0x3a0   : > { %v8301_v28 = vld [vmem:[#allocation3 + $0xa8] sm:$0xff]  ;;  %6944 = vst.msk [vmem:[#allocation3 + $0x60] sm:$0xff] %vm14831_vm4, %v6879_v51  ;;  %v6702_v51 = vmul.f32 %v14846_v58, %v6638_v56  ;;  %vm14864_vm4 = vmmov %vm14796_vm0 }
 0x3a1   : > { %6955 = vst.msk [vmem:[#allocation3 + $0xb8] sm:$0xff] %vm14832_vm5, %v6890_v11  ;;  %8451 = vperm.xlu0 %10548, %v8301_v28   ;;  %8366 = vperm.xlu1 %10547, %v8284_v48   ;;  %v6796_v57 = vpop.xlane.xlu0 %6795  ;;  %v6758_v54 = vpop.xlane.xlu1 %6757  ;;  %v6659_v48 = vld [vmem:[#allocation3 + $0x180] sm:$0xff]  ;;  %v7625_v56 = vld [vmem:[#allocation4 + $0x188] sm:$0xff]  ;;  %vm14865_vm5 = vmmov %vm14796_vm0 }
 0x3a2   : > { %v6895_v34 = vadd.f32 %v6796_v57, %v6703_v4  ;;  %v6876_v14 = vadd.f32 %v6758_v54, %v6684_v35  ;;  %v8288_v57 = vld [vmem:[#allocation3 + $0x40] sm:$0xff]  ;;  %v14849_v54 = vld [vmem:[#allocation13_spill] sm:$0xff] }
 0x3a3   : > { %v6723_v23 = vmul.f32 %v14849_v54, %v6659_v48  ;;  %v14859_v48 = vld [vmem:[#allocation107_spill] sm:$0xff] }
 0x3a4   : > { %v8287_v50 = vld [vmem:[#allocation3 + $0x38] sm:$0xff]  ;;  %6960 = vst.msk [vmem:[#allocation3 + $0xe0] sm:$0xff] %vm14835_vm6, %v6895_v34  ;;  %v6688_v34 = vmul.f32 %v14850_v20, %v6624_v47  ;;  %v6690_v47 = vmul.f32 %v14859_v48, %v6626_v19  ;;  %v6663_v19 = vld [vmem:[#allocation3 + $0x1a0] sm:$0xff]  ;;  %vm14869_vm6 = vmmov %vm14861_vm2 }
 0x3a5   : > { %6941 = vst.msk [vmem:[#allocation3 + $0x48] sm:$0xff] %vm14836_vm7, %v6876_v14  ;;  %8381 = vperm.xlu0 %10548, %v8287_v50   ;;  %8446 = vperm.xlu1 %10547, %v8300_v5   ;;  %v6768_v17 = vpop.xlane.xlu0 %6767  ;;  %v6790_v46 = vpop.xlane.xlu1 %6789  ;;  %v6645_v5 = vld [vmem:[#allocation3 + $0x110] sm:$0xff]  ;;  %v6642_v54 = vld [vmem:[#allocation3 + $0xf8] sm:$0xff]  ;;  %vm14870_vm7 = vmmov %vm14861_vm2 }
 0x3a6   : > { %v6881_v6 = vadd.f32 %v6768_v17, %v6689_v53  ;;  %v6892_v27 = vadd.f32 %v6790_v46, %v6700_v16  ;;  %v7609_v16 = vld [vmem:[#allocation4 + $0x108] sm:$0xff]  ;;  %v8304_v46 = vld [vmem:[#allocation3 + $0xc0] sm:$0xff] }
 0x3a7   : > { %v14874_v48 = vld [vmem:[#allocation8_spill] sm:$0xff] }
 0x3a8   : > { %v8303_v26 = vld [vmem:[#allocation3 + $0xb8] sm:$0xff]  ;;  %6946 = vst.msk [vmem:[#allocation3 + $0x70] sm:$0xff] %vm14839_vm8, %v6881_v6  ;;  %v6709_v6 = vmul.f32 %v14853_v2, %v6645_v5  ;;  %v14862_v5 = vld [vmem:[#allocation37_spill] sm:$0xff]  ;;  %vm14871_vm8 = vmmov %vm14796_vm0 }
 0x3a9   : > { %6957 = vst.msk [vmem:[#allocation3 + $0xc8] sm:$0xff] %vm14840_vm9, %v6892_v27  ;;  %8461 = vperm.xlu0 %10548, %v8303_v26   ;;  %8376 = vperm.xlu1 %10547, %v8286_v45   ;;  %v6800_v29 = vpop.xlane.xlu0 %6799  ;;  %v6762_v22 = vpop.xlane.xlu1 %6761  ;;  %v14854_v27 = vld [vmem:[#allocation104_spill] sm:$0xff]  ;;  %v14866_v2 = vld [vmem:[#allocation79_spill] sm:$0xff]  ;;  %vm14872_vm9 = vmmov %vm14796_vm0 }
 0x3aa   : > { %v6897_v41 = vadd.f32 %v6800_v29, %v6705_v32  ;;  %v6878_v33 = vadd.f32 %v6762_v22, %v6686_v60  ;;  %v6704_v26 = vmul.f32 %v14854_v27, %v6640_v39  ;;  %v6661_v32 = vld [vmem:[#allocation3 + $0x190] sm:$0xff]  ;;  %v14855_v60 = vld [vmem:[#allocation32_spill] sm:$0xff] }
 0x3ab   : > { %v7993_v29 = vmul.f32 %v14855_v60, %v7609_v16  ;;  %v8306_v16 = vld [vmem:[#allocation3 + $0xd0] sm:$0xff]  ;;  %v14867_v27 = vld [vmem:[#allocation112_spill] sm:$0xff]  ;;  %v6644_v60 = vld [vmem:[#allocation3 + $0x108] sm:$0xff] }
 0x3ac   : > { %v8289_v38 = vld [vmem:[#allocation3 + $0x48] sm:$0xff]  ;;  %6962 = vst.msk [vmem:[#allocation3 + $0xf0] sm:$0xff] %vm14843_vm10, %v6897_v41  ;;  %v14856_v41 = vld [vmem:[#allocation35_spill] sm:$0xff]  ;;  %vm14876_vm10 = vmmov %vm14861_vm2 }
 0x3ad   : > { %6943 = vst.msk [vmem:[#allocation3 + $0x58] sm:$0xff] %vm14844_vm11, %v6878_v33  ;;  %8391 = vperm.xlu0 %10548, %v8289_v38   ;;  %8456 = vperm.xlu1 %10547, %v8302_v12   ;;  %v6804_v11 = vpop.xlane.xlu0 %6803  ;;  %v6794_v28 = vpop.xlane.xlu1 %6793  ;;  %v7992_v33 = vmul.f32 %v14856_v41, %v7608_v25  ;;  %v7627_v41 = vld [vmem:[#allocation4 + $0x198] sm:$0xff]  ;;  %vm14877_vm11 = vmmov %vm14861_vm2 }
 0x3ae   : > { %v6899_v4 = vadd.f32 %v6804_v11, %v6707_v15  ;;  %v6894_v18 = vadd.f32 %v6794_v28, %v6702_v51  ;;  %v7624_v15 = vld [vmem:[#allocation4 + $0x180] sm:$0xff]  ;;  %v14858_v11 = vld [vmem:[#allocation14_spill] sm:$0xff] }
 0x3af   : > { %v6725_v28 = vmul.f32 %v14858_v11, %v6661_v32  ;;  %v8008_v39 = vmul.f32 %v14862_v5, %v7624_v15  ;;  %v7626_v15 = vld [vmem:[#allocation4 + $0x190] sm:$0xff]  ;;  %v14873_v11 = vld [vmem:[#allocation16_spill] sm:$0xff] }
 0x3b0   : > { %v8305_v35 = vld [vmem:[#allocation3 + $0xc8] sm:$0xff]  ;;  %6964 = vst.msk [vmem:[#allocation3 + $0x100] sm:$0xff] %vm14847_vm12, %v6899_v4  ;;  %vm14878_vm12 = vmmov %vm14796_vm0 }
 0x3b1   : > { %6959 = vst.msk [vmem:[#allocation3 + $0xd8] sm:$0xff] %vm14848_vm13, %v6894_v18  ;;  %8471 = vperm.xlu0 %10548, %v8305_v35   ;;  %8386 = vperm.xlu1 %10547, %v8288_v57   ;;  %v6836_v14 = vpop.xlane.xlu0 %6835  ;;  %v6766_v50 = vpop.xlane.xlu1 %6765  ;;  %v6647_v57 = vld [vmem:[#allocation3 + $0x120] sm:$0xff]  ;;  %vm14879_vm13 = vmmov %vm14796_vm0 }
 0x3b2   : > { %v6915_v53 = vadd.f32 %v6836_v14, %v6723_v23  ;;  %v6880_v37 = vadd.f32 %v6766_v50, %v6688_v34  ;;  %v14860_v23 = vld [vmem:[#allocation33_spill] sm:$0xff]  ;;  %v7611_v50 = vld [vmem:[#allocation4 + $0x118] sm:$0xff] }
 0x3b3   : > { %v8009_v20 = vmul.f32 %v14860_v23, %v7625_v56 }
 0x3b4   : > { %v8291_v17 = vld [vmem:[#allocation3 + $0x58] sm:$0xff]  ;;  %6980 = vst.msk [vmem:[#allocation3 + $0x180] sm:$0xff] %vm14851_vm14, %v6915_v53  ;;  %vm14882_vm14 = vmmov %vm14861_vm2 }
 0x3b5   : > { %6945 = vst.msk [vmem:[#allocation3 + $0x68] sm:$0xff] %vm14852_vm15, %v6880_v37  ;;  %8401 = vperm.xlu0 %10548, %v8291_v17   ;;  %8466 = vperm.xlu1 %10547, %v8304_v46   ;;  %v6808_v45 = vpop.xlane.xlu0 %6807  ;;  %v6798_v13 = vpop.xlane.xlu1 %6797  ;;  %v7610_v17 = vld [vmem:[#allocation4 + $0x110] sm:$0xff]  ;;  %vm14883_vm15 = vmmov %vm14861_vm2 }
 0x3b6   : > { %v6901_v22 = vadd.f32 %v6808_v45, %v6709_v6  ;;  %v6896_v24 = vadd.f32 %v6798_v13, %v6704_v26  ;;  %v6711_v6 = vmul.f32 %v14866_v2, %v6647_v57  ;;  %v6706_v26 = vmul.f32 %v14867_v27, %v6642_v54  ;;  %v6660_v57 = vld [vmem:[#allocation3 + $0x188] sm:$0xff]  ;;  %v14875_v54 = vld [vmem:[#allocation36_spill] sm:$0xff] }
 0x3b7   : > { %v10085_v38 = vpop.f32.mrb[48].mxu0  ;;  %v8011_v23 = vmul.f32 %v14875_v54, %v7627_v41  ;;  %v14887_v54 = vld [vmem:[#allocation39_spill] sm:$0xff] }
 0x3b8   : > { %v8307_v12 = vld [vmem:[#allocation3 + $0xd8] sm:$0xff]  ;;  %6966 = vst.msk [vmem:[#allocation3 + $0x110] sm:$0xff] %vm14857_vm1, %v6901_v22  ;;  %v8057_v58 = vadd.f32 %v10085_v38, %v7993_v29  ;;  %v7352_v51 = vpop.f32.mrb[49].mxu0  ;;  %v14868_v29 = vld [vmem:[#allocation34_spill] sm:$0xff]  ;;  %vm14884_vm1 = vmmov %vm14796_vm0 }
 0x3b9   : > { %6961 = vst.msk [vmem:[#allocation3 + $0xe8] sm:$0xff] %vm14796_vm0, %v6896_v24  ;;  %8481 = vperm.xlu0 %10548, %v8307_v12   ;;  %8396 = vperm.xlu1 %10547, %v8290_v44   ;;  %v8056_v4 = vadd.f32 %v7992_v33, %v7352_v51  ;;  %v6840_v18 = vpop.xlane.xlu0 %6839  ;;  %v6770_v35 = vpop.xlane.xlu1 %6769  ;;  %v7995_v22 = vmul.f32 %v14868_v29, %v7611_v50  ;;  %v8292_v44 = vld [vmem:[#allocation3 + $0x60] sm:$0xff] }
 0x3ba   : > { %8121 = vst.msk [vmem:[#allocation4 + $0x108] sm:$0xff] %vm14861_vm2, %v8057_v58  ;;  %v6917_v34 = vadd.f32 %v6840_v18, %v6725_v28  ;;  %v6882_v14 = vadd.f32 %v6770_v35, %v6690_v47  ;;  %v7994_v33 = vmul.f32 %v13592_v62, %v7610_v17  ;;  %v6727_v28 = vmul.f32 %v14873_v11, %v6663_v19  ;;  %v6649_v35 = vld [vmem:[#allocation3 + $0x130] sm:$0xff]  ;;  %v6646_v19 = vld [vmem:[#allocation3 + $0x118] sm:$0xff]  ;;  %v6651_v11 = vld [vmem:[#allocation3 + $0x140] sm:$0xff] }
 0x3bb   : > { %8120 = vst.msk [vmem:[#allocation4 + $0x100] sm:$0xff] %vm14863_vm3, %v8056_v4  ;;  %v10141_v53 = vpop.f32.mrb[48].mxu1  ;;  %v6708_v47 = vmul.f32 %v14874_v48, %v6644_v60  ;;  %v14880_v17 = vld [vmem:[#allocation18_spill] sm:$0xff]  ;;  %vm14888_vm3 = vmmov %vm14861_vm2 }
 0x3bc   : > { %v8293_v37 = vld [vmem:[#allocation3 + $0x68] sm:$0xff]  ;;  %6982 = vst.msk [vmem:[#allocation3 + $0x190] sm:$0xff] %vm14864_vm4, %v6917_v34  ;;  %v8073_v46 = vadd.f32 %v10141_v53, %v8009_v20  ;;  %v7497_v25 = vpop.f32.mrb[49].mxu1  ;;  %vm14889_vm4 = vmmov %vm14796_vm0 }
 0x3bd   : > { %6947 = vst.msk [vmem:[#allocation3 + $0x78] sm:$0xff] %vm14865_vm5, %v6882_v14  ;;  %8411 = vperm.xlu0 %10548, %v8293_v37   ;;  %8476 = vperm.xlu1 %10547, %v8306_v16   ;;  %v8072_v45 = vadd.f32 %v8008_v39, %v7497_v25  ;;  %v6812_v13 = vpop.xlane.xlu0 %6811  ;;  %v6802_v32 = vpop.xlane.xlu1 %6801  ;;  %v8010_v14 = vmul.f32 %v13598_v63, %v7626_v15  ;;  %v8308_v39 = vld [vmem:[#allocation3 + $0xe0] sm:$0xff]  ;;  %v7613_v53 = vld [vmem:[#allocation4 + $0x128] sm:$0xff]  ;;  %v14881_v25 = vld [vmem:[#allocation10_spill] sm:$0xff] }
 0x3be   : > { %8137 = vst.msk [vmem:[#allocation4 + $0x188] sm:$0xff] %vm14869_vm6, %v8073_v46  ;;  %v6903_v24 = vadd.f32 %v6812_v13, %v6711_v6  ;;  %v6898_v56 = vadd.f32 %v6802_v32, %v6706_v26  ;;  %v6713_v46 = vmul.f32 %v14880_v17, %v6649_v35  ;;  %v6724_v2 = vmul.f32 %v14881_v25, %v6660_v57  ;;  %v7612_v6 = vld [vmem:[#allocation4 + $0x120] sm:$0xff]  ;;  %v8310_v35 = vld [vmem:[#allocation3 + $0xf0] sm:$0xff]  ;;  %v7615_v57 = vld [vmem:[#allocation4 + $0x138] sm:$0xff] }
 0x3bf   : > { %8136 = vst.msk [vmem:[#allocation4 + $0x180] sm:$0xff] %vm14870_vm7, %v8072_v45  ;;  %v10088_v38 = vpop.f32.mrb[50].mxu0  ;;  %v6665_v45 = vld [vmem:[#allocation3 + $0x1b0] sm:$0xff]  ;;  %v7997_v60 = vmul.f32 %v13595_v43, %v7613_v53  ;;  %vm14891_vm5 = vmmov %vm14796_vm0 }
 0x3c0   : > { %v8309_v12 = vld [vmem:[#allocation3 + $0xe8] sm:$0xff]  ;;  %6968 = vst.msk [vmem:[#allocation3 + $0x120] sm:$0xff] %vm14871_vm8, %v6903_v24  ;;  %v8059_v58 = vadd.f32 %v10088_v38, %v7995_v22  ;;  %v7362_v51 = vpop.f32.mrb[51].mxu0  ;;  %v8294_v22 = vld [vmem:[#allocation3 + $0x70] sm:$0xff]  ;;  %vm14894_vm6 = vmmov %vm14861_vm2 }
 0x3c1   : > { %6963 = vst.msk [vmem:[#allocation3 + $0xf8] sm:$0xff] %vm14872_vm9, %v6898_v56  ;;  %8491 = vperm.xlu0 %10548, %v8309_v12   ;;  %8406 = vperm.xlu1 %10547, %v8292_v44   ;;  %v8058_v4 = vadd.f32 %v7994_v33, %v7362_v51  ;;  %v6844_v62 = vpop.xlane.xlu0 %6843  ;;  %v6806_v18 = vpop.xlane.xlu1 %6805  ;;  %v7629_v24 = vld [vmem:[#allocation4 + $0x1a8] sm:$0xff]  ;;  %v7996_v56 = vmul.f32 %v13624_v8, %v7612_v6  ;;  %v14885_v33 = vld [vmem:[#allocation87_spill] sm:$0xff]  ;;  %v7628_v12 = vld [vmem:[#allocation4 + $0x1a0] sm:$0xff] }
 0x3c2   : > { %8123 = vst.msk [vmem:[#allocation4 + $0x118] sm:$0xff] %vm14876_vm10, %v8059_v58  ;;  %v6919_v20 = vadd.f32 %v6844_v62, %v6727_v28  ;;  %v6900_v34 = vadd.f32 %v6806_v18, %v6708_v47  ;;  %v6729_v38 = vmul.f32 %v14885_v33, %v6665_v45  ;;  %v14886_v58 = vld [vmem:[#allocation76_spill] sm:$0xff]  ;;  %v6662_v8 = vld [vmem:[#allocation3 + $0x198] sm:$0xff]  ;;  %v14892_v53 = vld [vmem:[#allocation78_spill] sm:$0xff] }
 0x3c3   : > { %8122 = vst.msk [vmem:[#allocation4 + $0x110] sm:$0xff] %vm14877_vm11, %v8058_v4  ;;  %v10144_v50 = vpop.f32.mrb[50].mxu1  ;;  %v6710_v51 = vmul.f32 %v14886_v58, %v6646_v19  ;;  %v8013_v4 = vmul.f32 %v13601_v9, %v7629_v24  ;;  %v14893_v6 = vld [vmem:[#allocation38_spill] sm:$0xff]  ;;  %v8312_v45 = vld [vmem:[#allocation3 + $0x100] sm:$0xff]  ;;  %vm14896_vm7 = vmmov %vm14861_vm2 }
 0x3c4   : > { %v8295_v5 = vld [vmem:[#allocation3 + $0x78] sm:$0xff]  ;;  %6984 = vst.msk [vmem:[#allocation3 + $0x1a0] sm:$0xff] %vm14878_vm12, %v6919_v20  ;;  %v8075_v37 = vadd.f32 %v10144_v50, %v8011_v23  ;;  %v7507_v16 = vpop.f32.mrb[51].mxu1  ;;  %v8012_v23 = vmul.f32 %v14887_v54, %v7628_v12  ;;  %v7614_v50 = vld [vmem:[#allocation4 + $0x130] sm:$0xff]  ;;  %vm14897_vm8 = vmmov %vm14796_vm0 }
 0x3c5   : > { %6965 = vst.msk [vmem:[#allocation3 + $0x108] sm:$0xff] %vm14879_vm13, %v6900_v34  ;;  %8421 = vperm.xlu0 %10548, %v8295_v5   ;;  %8486 = vperm.xlu1 %10547, %v8308_v39   ;;  %v8074_v63 = vadd.f32 %v8010_v14, %v7507_v16  ;;  %v6816_v27 = vpop.xlane.xlu0 %6815  ;;  %v6838_v26 = vpop.xlane.xlu1 %6837  ;;  %v14890_v34 = vld [vmem:[#allocation25_spill] sm:$0xff]  ;;  %v6667_v16 = vld [vmem:[#allocation3 + $0x1c0] sm:$0xff]  ;;  %v7630_v24 = vld [vmem:[#allocation4 + $0x1b0] sm:$0xff] }
 0x3c6   : > { %8139 = vst.msk [vmem:[#allocation4 + $0x198] sm:$0xff] %vm14882_vm14, %v8075_v37  ;;  %v6905_v13 = vadd.f32 %v6816_v27, %v6713_v46  ;;  %v6916_v32 = vadd.f32 %v6838_v26, %v6724_v2  ;;  %v6715_v14 = vmul.f32 %v14890_v34, %v6651_v11  ;;  %v6726_v37 = vmul.f32 %v14892_v53, %v6662_v8  ;;  %v6648_v2 = vld [vmem:[#allocation3 + $0x128] sm:$0xff]  ;;  %vm14899_vm9 = vmmov %vm14796_vm0  ;;  %v14903_v8 = vld [vmem:[#allocation118_spill] sm:$0xff] }
 0x3c7   : > { %8138 = vst.msk [vmem:[#allocation4 + $0x190] sm:$0xff] %vm14883_vm15, %v8074_v63  ;;  %v7999_v63 = vmul.f32 %v14893_v6, %v7615_v57  ;;  %v14901_v11 = vld [vmem:[#allocation41_spill] sm:$0xff]  ;;  %vm14902_vm10 = vmmov %vm14861_vm2  ;;  %v6650_v53 = vld [vmem:[#allocation3 + $0x138] sm:$0xff] }
 0x3c8   : > { %v8311_v29 = vld [vmem:[#allocation3 + $0xf8] sm:$0xff]  ;;  %6970 = vst.msk [vmem:[#allocation3 + $0x130] sm:$0xff] %vm14884_vm1, %v6905_v13  ;;  %v10091_v41 = vpop.f32.mrb[52].mxu0  ;;  %vm14904_vm11 = vmmov %vm14861_vm2  ;;  %v14908_v34 = vld [vmem:[#allocation77_spill] sm:$0xff] }
 0x3c9   : > { %6981 = vst.msk [vmem:[#allocation3 + $0x188] sm:$0xff] %vm14796_vm0, %v6916_v32  ;;  %8501 = vperm.xlu0 %10548, %v8311_v29   ;;  %8416 = vperm.xlu1 %10547, %v8294_v22   ;;  %v8061_v44 = vadd.f32 %v10091_v41, %v7997_v60  ;;  %v7372_v15 = vpop.f32.mrb[53].mxu0  ;;  %v6848_v43 = vpop.xlane.xlu0 %6847  ;;  %v7631_v13 = vld [vmem:[#allocation4 + $0x1b8] sm:$0xff]  ;;  %v14895_v32 = vld [vmem:[#allocation40_spill] sm:$0xff]  ;;  %vm14905_vm12 = vmmov %vm14796_vm0 }
 0x3ca   : > { %v8060_v28 = vadd.f32 %v7996_v56, %v7372_v15  ;;  %v6921_v48 = vadd.f32 %v6848_v43, %v6729_v38  ;;  %v6810_v47 = vpop.xlane.xlu1 %6809  ;;  %v7998_v19 = vmul.f32 %v14895_v32, %v7614_v50  ;;  %v14898_v29 = vld [vmem:[#allocation91_spill] sm:$0xff]  ;;  %vm14907_vm13 = vmmov %vm14796_vm0  ;;  %v6669_v50 = vld [vmem:[#allocation3 + $0x1d0] sm:$0xff] }
 0x3cb   : > { %8125 = vst.msk [vmem:[#allocation4 + $0x128] sm:$0xff] %vm14861_vm2, %v8061_v44  ;;  %v6902_v62 = vadd.f32 %v6810_v47, %v6710_v51  ;;  %v6731_v22 = vmul.f32 %v14898_v29, %v6667_v16  ;;  %v14900_v38 = vld [vmem:[#allocation15_spill] sm:$0xff]  ;;  %v6653_v44 = vld [vmem:[#allocation3 + $0x150] sm:$0xff]  ;;  %v6664_v51 = vld [vmem:[#allocation3 + $0x1a8] sm:$0xff] }
 0x3cc   : > { %v8313_v18 = vld [vmem:[#allocation3 + $0x108] sm:$0xff]  ;;  %8124 = vst.msk [vmem:[#allocation4 + $0x120] sm:$0xff] %vm14888_vm3, %v8060_v28  ;;  %v10147_v20 = vpop.f32.mrb[52].mxu1  ;;  %v6712_v12 = vmul.f32 %v14900_v38, %v6648_v2  ;;  %v8015_v28 = vmul.f32 %v14901_v11, %v7631_v13  ;;  %v8328_v47 = vld [vmem:[#allocation3 + $0x180] sm:$0xff]  ;;  %vm14909_vm14 = vmmov %vm14861_vm2 }
 0x3cd   : > { %6986 = vst.msk [vmem:[#allocation3 + $0x1b0] sm:$0xff] %vm14889_vm4, %v6921_v48  ;;  %8511 = vperm.xlu0 %10548, %v8313_v18   ;;  %8496 = vperm.xlu1 %10547, %v8310_v35   ;;  %v8077_v9 = vadd.f32 %v10147_v20, %v8013_v4  ;;  %v7517_v5 = vpop.f32.mrb[53].mxu1  ;;  %v6820_v39 = vpop.xlane.xlu0 %6819  ;;  %v8014_v4 = vmul.f32 %v14903_v8, %v7630_v24  ;;  %v14906_v35 = vld [vmem:[#allocation31_spill] sm:$0xff]  ;;  %v8314_v16 = vld [vmem:[#allocation3 + $0x110] sm:$0xff]  ;;  %vm14910_vm15 = vmmov %vm14861_vm2 }
 0x3ce   : > { %6967 = vst.msk [vmem:[#allocation3 + $0x118] sm:$0xff] %vm14891_vm5, %v6902_v62  ;;  %v8076_v17 = vadd.f32 %v8012_v23, %v7517_v5  ;;  %v6907_v46 = vadd.f32 %v6820_v39, %v6715_v14  ;;  %v6842_v25 = vpop.xlane.xlu1 %6841  ;;  %v6717_v57 = vmul.f32 %v14906_v35, %v6653_v44  ;;  %v6728_v14 = vmul.f32 %v14908_v34, %v6664_v51  ;;  %vm14911_vm1 = vmmov %vm14796_vm0  ;;  %v14913_v6 = vld [vmem:[#allocation17_spill] sm:$0xff]  ;;  %v6666_v13 = vld [vmem:[#allocation3 + $0x1b8] sm:$0xff] }
 0x3cf   : > { %8141 = vst.msk [vmem:[#allocation4 + $0x1a8] sm:$0xff] %vm14894_vm6, %v8077_v9  ;;  %v6918_v27 = vadd.f32 %v6842_v25, %v6726_v37  ;;  %vm14914_vm2 = vmmov %vm14796_vm0  ;;  %v8316_v11 = vld [vmem:[#allocation3 + $0x120] sm:$0xff] }
 0x3d0   : > { %v8329_v26 = vld [vmem:[#allocation3 + $0x188] sm:$0xff]  ;;  %8140 = vst.msk [vmem:[#allocation4 + $0x1a0] sm:$0xff] %vm14896_vm7, %v8076_v17  ;;  %v10094_v60 = vpop.f32.mrb[54].mxu0  ;;  %vm14916_vm3 = vmmov %vm14796_vm0 }
 0x3d1   : > { %6972 = vst.msk [vmem:[#allocation3 + $0x140] sm:$0xff] %vm14897_vm8, %v6907_v46  ;;  %8591 = vperm.xlu0 %10548, %v8329_v26   ;;  %8506 = vperm.xlu1 %10547, %v8312_v45   ;;  %v8063_v56 = vadd.f32 %v10094_v60, %v7999_v63  ;;  %v7382_v41 = vpop.f32.mrb[55].mxu0  ;;  %v6852_v33 = vpop.xlane.xlu0 %6851  ;;  %v14912_v46 = vld [vmem:[#allocation99_spill] sm:$0xff]  ;;  %v6714_v63 = vmul.f32 %v14913_v6, %v6650_v53  ;;  %v7617_v60 = vld [vmem:[#allocation4 + $0x148] sm:$0xff]  ;;  %vm14918_vm4 = vmmov %vm14796_vm0 }
 0x3d2   : > { %6983 = vst.msk [vmem:[#allocation3 + $0x198] sm:$0xff] %vm14899_vm9, %v6918_v27  ;;  %v8062_v15 = vadd.f32 %v7998_v19, %v7382_v41  ;;  %v6923_v43 = vadd.f32 %v6852_v33, %v6731_v22  ;;  %v6814_v58 = vpop.xlane.xlu1 %6813  ;;  %v6733_v25 = vmul.f32 %v14912_v46, %v6669_v50  ;;  %v6655_v27 = vld [vmem:[#allocation3 + $0x160] sm:$0xff]  ;;  %v8330_v19 = vld [vmem:[#allocation3 + $0x190] sm:$0xff]  ;;  %v14917_v33 = vld [vmem:[#allocation19_spill] sm:$0xff] }
 0x3d3   : > { %8127 = vst.msk [vmem:[#allocation4 + $0x138] sm:$0xff] %vm14902_vm10, %v8063_v56  ;;  %v6904_v48 = vadd.f32 %v6814_v58, %v6712_v12  ;;  %v14915_v22 = vld [vmem:[#allocation120_spill] sm:$0xff]  ;;  %v6730_v38 = vmul.f32 %v14917_v33, %v6666_v13  ;;  %v8001_v58 = vmul.f32 %v13713_v52, %v7617_v60  ;;  %vm14920_vm5 = vmmov %vm14796_vm0  ;;  %v14921_v52 = vld [vmem:[#allocation81_spill] sm:$0xff] }
 0x3d4   : > { %8126 = vst.msk [vmem:[#allocation4 + $0x130] sm:$0xff] %vm14904_vm11, %v8062_v15  ;;  %v10150_v62 = vpop.f32.mrb[54].mxu1  ;;  %v6719_v24 = vmul.f32 %v14915_v22, %v6655_v27  ;;  %v7616_v56 = vld [vmem:[#allocation4 + $0x140] sm:$0xff]  ;;  %v6668_v50 = vld [vmem:[#allocation3 + $0x1c8] sm:$0xff]  ;;  %vm14922_vm7 = vmmov %vm14894_vm6 }
 0x3d5   : > { %6988 = vst.msk [vmem:[#allocation3 + $0x1c0] sm:$0xff] %vm14905_vm12, %v6923_v43  ;;  %v8315_v18 = vld [vmem:[#allocation3 + $0x118] sm:$0xff]  ;;  %8586 = vperm.xlu1 %10547, %v8328_v47   ;;  %v8079_v54 = vadd.f32 %v10150_v62, %v8015_v28  ;;  %v7527_v23 = vpop.f32.mrb[55].mxu1  ;;  %v6824_v20 = vpop.xlane.xlu0 %6823  ;;  %v6671_v12 = vld [vmem:[#allocation3 + $0x1e0] sm:$0xff]  ;;  %v6652_v43 = vld [vmem:[#allocation3 + $0x148] sm:$0xff] }
 0x3d6   : > { %6969 = vst.msk [vmem:[#allocation3 + $0x128] sm:$0xff] %vm14907_vm13, %v6904_v48  ;;  %8521 = vperm.xlu0 %10548, %v8315_v18   ;;  %v8078_v9 = vadd.f32 %v8014_v4, %v7527_v23  ;;  %v6909_v5 = vadd.f32 %v6824_v20, %v6717_v57  ;;  %v6846_v39 = vpop.xlane.xlu1 %6845  ;;  %v7633_v28 = vld [vmem:[#allocation4 + $0x1c8] sm:$0xff]  ;;  %v8000_v48 = vmul.f32 %v13749_v0, %v7616_v56  ;;  %v14919_v4 = vld [vmem:[#allocation122_spill] sm:$0xff]  ;;  %v7632_v18 = vld [vmem:[#allocation4 + $0x1c0] sm:$0xff] }
 0x3d7   : > { %8143 = vst.msk [vmem:[#allocation4 + $0x1b8] sm:$0xff] %vm14909_vm14, %v8079_v54  ;;  %v6920_v37 = vadd.f32 %v6846_v39, %v6728_v14  ;;  %v6735_v62 = vmul.f32 %v14919_v4, %v6671_v12  ;;  %v6716_v23 = vmul.f32 %v14921_v52, %v6652_v43  ;;  %v6657_v20 = vld [vmem:[#allocation3 + $0x170] sm:$0xff]  ;;  %v8332_v39 = vld [vmem:[#allocation3 + $0x1a0] sm:$0xff]  ;;  %v8016_v53 = vmul.f32 %v13760_v61, %v7632_v18  ;;  %vm14923_vm8 = vmmov %vm14796_vm0 }
 0x3d8   : > { %8142 = vst.msk [vmem:[#allocation4 + $0x1b0] sm:$0xff] %vm14910_vm15, %v8078_v9  ;;  %v8017_v9 = vmul.f32 %v13726_v49, %v7633_v28  ;;  %vm14925_vm9 = vmmov %vm14796_vm0  ;;  %v14926_v6 = vld [vmem:[#allocation89_spill] sm:$0xff]  ;;  %v6673_v27 = vld [vmem:[#allocation3 + $0x1f0] sm:$0xff] }
 0x3d9   : > { %6974 = vst.msk [vmem:[#allocation3 + $0x150] sm:$0xff] %vm14911_vm1, %v6909_v5  ;;  %v8331_v17 = vld [vmem:[#allocation3 + $0x198] sm:$0xff]  ;;  %8516 = vperm.xlu1 %10547, %v8314_v16   ;;  %v6856_v2 = vpop.xlane.xlu0 %6855  ;;  %vm14927_vm10 = vmmov %vm14894_vm6  ;;  %v7634_v52 = vld [vmem:[#allocation4 + $0x1d0] sm:$0xff] }
 0x3da   : > { %6985 = vst.msk [vmem:[#allocation3 + $0x1a8] sm:$0xff] %vm14796_vm0, %v6920_v37  ;;  %8601 = vperm.xlu0 %10548, %v8331_v17   ;;  %v6925_v26 = vadd.f32 %v6856_v2, %v6733_v25  ;;  %v6818_v45 = vpop.xlane.xlu1 %6817  ;;  %v14924_v17 = vld [vmem:[#allocation124_spill] sm:$0xff]  ;;  %v6654_v13 = vld [vmem:[#allocation3 + $0x158] sm:$0xff]  ;;  %vm14928_vm11 = vmmov %vm14894_vm6 }
 0x3db   : > { %v6906_v32 = vadd.f32 %v6818_v45, %v6714_v63  ;;  %v6721_v46 = vmul.f32 %v14924_v17, %v6657_v20  ;;  %v6732_v63 = vmul.f32 %v14926_v6, %v6668_v50  ;;  %vm14929_vm12 = vmmov %vm14796_vm0  ;;  %v14932_v56 = vld [vmem:[#allocation23_spill] sm:$0xff] }
 0x3dc   : > { %6990 = vst.msk [vmem:[#allocation3 + $0x1d0] sm:$0xff] %vm14914_vm2, %v6925_v26  ;;  %vm14931_vm13 = vmmov %vm14796_vm0  ;;  %v6670_v12 = vld [vmem:[#allocation3 + $0x1d8] sm:$0xff] }
 0x3dd   : > { %v8317_v29 = vld [vmem:[#allocation3 + $0x128] sm:$0xff]  ;;  %8596 = vperm.xlu1 %10547, %v8330_v19   ;;  %6971 = vst.msk [vmem:[#allocation3 + $0x138] sm:$0xff] %vm14916_vm3, %v6906_v32  ;;  %v6828_v41 = vpop.xlane.xlu0 %6827  ;;  %v8318_v19 = vld [vmem:[#allocation3 + $0x130] sm:$0xff]  ;;  %v7619_v43 = vld [vmem:[#allocation4 + $0x158] sm:$0xff] }
 0x3de   : > { %8531 = vperm.xlu0 %10548, %v8317_v29   ;;  %v6911_v44 = vadd.f32 %v6828_v41, %v6719_v24  ;;  %v6850_v15 = vpop.xlane.xlu1 %6849  ;;  %v14930_v29 = vld [vmem:[#allocation126_spill] sm:$0xff]  ;;  %v6718_v41 = vmul.f32 %v14932_v56, %v6654_v13  ;;  %vm14933_vm14 = vmmov %vm14796_vm0  ;;  %v7635_v18 = vld [vmem:[#allocation4 + $0x1d8] sm:$0xff] }
 0x3df   : > { %v6922_v51 = vadd.f32 %v6850_v15, %v6730_v38  ;;  %v6737_v22 = vmul.f32 %v14930_v29, %v6673_v27  ;;  %v8334_v15 = vld [vmem:[#allocation3 + $0x1b0] sm:$0xff]  ;;  %vm14934_vm15 = vmmov %vm14796_vm0  ;;  %v6674_v13 = vld [vmem:[#allocation3 + $0x1f8] sm:$0xff] }
 0x3e0   : > { %6976 = vst.msk [vmem:[#allocation3 + $0x160] sm:$0xff] %vm14918_vm4, %v6911_v44  ;;  %v10097_v47 = vpop.f32.mrb[56].mxu0  ;;  %vm14936_vm1 = vmmov %vm14796_vm0 }
 0x3e1   : > { %v8333_v8 = vld [vmem:[#allocation3 + $0x1a8] sm:$0xff]  ;;  %8526 = vperm.xlu1 %10547, %v8316_v11   ;;  %6987 = vst.msk [vmem:[#allocation3 + $0x1b8] sm:$0xff] %vm14920_vm5, %v6922_v51  ;;  %v8065_v35 = vadd.f32 %v10097_v47, %v8001_v58  ;;  %v7392_v57 = vpop.f32.mrb[57].mxu0  ;;  %v6860_v54 = vpop.xlane.xlu0 %6859  ;;  %v7618_v51 = vld [vmem:[#allocation4 + $0x150] sm:$0xff]  ;;  %v14935_v11 = vld [vmem:[#allocation88_spill] sm:$0xff] }
 0x3e2   : > { %8611 = vperm.xlu0 %10548, %v8333_v8   ;;  %v8064_v34 = vadd.f32 %v8000_v48, %v7392_v57  ;;  %v6927_v14 = vadd.f32 %v6860_v54, %v6735_v62  ;;  %v6822_v0 = vpop.xlane.xlu1 %6821  ;;  %v6734_v28 = vmul.f32 %v14935_v11, %v6670_v12  ;;  %v6656_v47 = vld [vmem:[#allocation3 + $0x168] sm:$0xff]  ;;  %v8003_v8 = vmul.f32 %v13735_v3, %v7619_v43  ;;  %v8320_v62 = vld [vmem:[#allocation3 + $0x140] sm:$0xff]  ;;  %vm14938_vm0 = vmmov %vm14894_vm6 }
 0x3e3   : > { %8129 = vst.msk [vmem:[#allocation4 + $0x148] sm:$0xff] %vm14894_vm6, %v8065_v35  ;;  %v6908_v5 = vadd.f32 %v6822_v0, %v6716_v23  ;;  %v8002_v35 = vmul.f32 %v13768_v10, %v7618_v51  ;;  %v8019_v3 = vmul.f32 %v13744_v31, %v7635_v18  ;;  %v8336_v10 = vld [vmem:[#allocation3 + $0x1c0] sm:$0xff]  ;;  %vm14939_vm2 = vmmov %vm14938_vm0 }
 0x3e4   : > { %8128 = vst.msk [vmem:[#allocation4 + $0x140] sm:$0xff] %vm14922_vm7, %v8064_v34  ;;  %v10153_v37 = vpop.f32.mrb[56].mxu1  ;;  %v8319_v16 = vld [vmem:[#allocation3 + $0x138] sm:$0xff]  ;;  %vm14940_vm3 = vmmov %vm14936_vm1  ;;  %v7636_v51 = vld [vmem:[#allocation4 + $0x1e0] sm:$0xff] }
 0x3e5   : > { %6992 = vst.msk [vmem:[#allocation3 + $0x1e0] sm:$0xff] %vm14923_vm8, %v6927_v14  ;;  %8606 = vperm.xlu1 %10547, %v8332_v39   ;;  %v8081_v25 = vadd.f32 %v10153_v37, %v8017_v9  ;;  %v7537_v2 = vpop.f32.mrb[57].mxu1  ;;  %v6832_v49 = vpop.xlane.xlu0 %6831  ;;  %v14937_v34 = vld [vmem:[#allocation27_spill] sm:$0xff]  ;;  %v6672_v9 = vld [vmem:[#allocation3 + $0x1e8] sm:$0xff]  ;;  %v8018_v39 = vmul.f32 %v13778_v40, %v7634_v52  ;;  %vm14942_vm4 = vmmov %vm14938_vm0 }
 0x3e6   : > { %6973 = vst.msk [vmem:[#allocation3 + $0x148] sm:$0xff] %vm14925_vm9, %v6908_v5  ;;  %8541 = vperm.xlu0 %10548, %v8319_v16   ;;  %v8080_v26 = vadd.f32 %v8016_v53, %v7537_v2  ;;  %v6913_v61 = vadd.f32 %v6832_v49, %v6721_v46  ;;  %v6854_v45 = vpop.xlane.xlu1 %6853  ;;  %v6720_v14 = vmul.f32 %v14937_v34, %v6656_v47  ;;  %v14941_v46 = vld [vmem:[#allocation97_spill] sm:$0xff]  ;;  %v6658_v49 = vld [vmem:[#allocation3 + $0x178] sm:$0xff]  ;;  %v8322_v40 = vld [vmem:[#allocation3 + $0x150] sm:$0xff] }
 0x3e7   : > { %8145 = vst.msk [vmem:[#allocation4 + $0x1c8] sm:$0xff] %vm14927_vm10, %v8081_v25  ;;  %v6924_v32 = vadd.f32 %v6854_v45, %v6732_v63  ;;  %v6736_v25 = vmul.f32 %v14941_v46, %v6672_v9  ;;  %vm14943_vm5 = vmmov %vm14938_vm0  ;;  %v8324_v12 = vld [vmem:[#allocation3 + $0x160] sm:$0xff]  ;;  %v7623_v34 = vld [vmem:[#allocation4 + $0x178] sm:$0xff] }
 0x3e8   : > { %8144 = vst.msk [vmem:[#allocation4 + $0x1c0] sm:$0xff] %vm14928_vm11, %v8080_v26  ;;  %v8335_v60 = vld [vmem:[#allocation3 + $0x1b8] sm:$0xff]  ;;  %vm14944_vm6 = vmmov %vm14936_vm1  ;;  %v14945_v26 = vld [vmem:[#allocation30_spill] sm:$0xff] }
 0x3e9   : > { %6978 = vst.msk [vmem:[#allocation3 + $0x170] sm:$0xff] %vm14929_vm12, %v6913_v61  ;;  %8536 = vperm.xlu1 %10547, %v8318_v19   ;;  %v6864_v24 = vpop.xlane.xlu0 %6863  ;;  %v6722_v61 = vmul.f32 %v14945_v26, %v6658_v49  ;;  %v8338_v19 = vld [vmem:[#allocation3 + $0x1d0] sm:$0xff]  ;;  %vm14946_vm7 = vmmov %vm14936_vm1  ;;  %v7639_v9 = vld [vmem:[#allocation4 + $0x1f8] sm:$0xff] }
 0x3ea   : > { %6989 = vst.msk [vmem:[#allocation3 + $0x1c8] sm:$0xff] %vm14931_vm13, %v6924_v32  ;;  %8621 = vperm.xlu0 %10548, %v8335_v60   ;;  %v6929_v33 = vadd.f32 %v6864_v24, %v6737_v22  ;;  %v6826_v38 = vpop.xlane.xlu1 %6825  ;;  %v7621_v60 = vld [vmem:[#allocation4 + $0x168] sm:$0xff]  ;;  %v7620_v22 = vld [vmem:[#allocation4 + $0x160] sm:$0xff]  ;;  %vm14948_vm8 = vmmov %vm14936_vm1 }
 0x3eb   : > { %v6910_v44 = vadd.f32 %v6826_v38, %v6718_v41  ;;  %v14947_v24 = vld [vmem:[#allocation105_spill] sm:$0xff]  ;;  %vm14949_vm9 = vmmov %vm14938_vm0 }
 0x3ec   : > { %6994 = vst.msk [vmem:[#allocation3 + $0x1f0] sm:$0xff] %vm14933_vm14, %v6929_v33  ;;  %v6738_v56 = vmul.f32 %v14947_v24, %v6674_v13  ;;  %v8005_v33 = vmul.f32 %v13755_v1, %v7621_v60  ;;  %vm14950_vm10 = vmmov %vm14938_vm0  ;;  %v8219_v24 = vld [vmem:[#allocation4 + $0x18] sm:$0xff] }
 0x3ed   : > { %v8321_v58 = vld [vmem:[#allocation3 + $0x148] sm:$0xff]  ;;  %8616 = vperm.xlu1 %10547, %v8334_v15   ;;  %6975 = vst.msk [vmem:[#allocation3 + $0x158] sm:$0xff] %vm14934_vm15, %v6910_v44  ;;  %v8004_v15 = vmul.f32 %v13785_v36, %v7620_v22  ;;  %v8020_v36 = vmul.f32 %v13794_v59, %v7636_v51  ;;  %vm14951_vm11 = vmmov %vm14938_vm0 }
 0x3ee   : > { %8551 = vperm.xlu0 %10548, %v8321_v58   ;;  %v6858_v48 = vpop.xlane.xlu1 %6857  ;;  %v7637_v44 = vld [vmem:[#allocation4 + $0x1e8] sm:$0xff]  ;;  %vm14952_vm12 = vmmov %vm14938_vm0 }
 0x3ef   : > { %v6926_v4 = vadd.f32 %v6858_v48, %v6734_v28  ;;  %v8021_v1 = vmul.f32 %v13764_v30, %v7637_v44  ;;  %vm14953_vm13 = vmmov %vm14938_vm0 }
 0x3f0   : > { %v10100_v57 = vpop.f32.mrb[58].mxu0  ;;  %v8326_v52 = vld [vmem:[#allocation3 + $0x170] sm:$0xff]  ;;  %vm14954_vm14 = vmmov %vm14938_vm0 }
 0x3f1   : > { %v8337_v54 = vld [vmem:[#allocation3 + $0x1c8] sm:$0xff]  ;;  %8546 = vperm.xlu1 %10547, %v8320_v62   ;;  %6991 = vst.msk [vmem:[#allocation3 + $0x1d8] sm:$0xff] %vm14936_vm1, %v6926_v4  ;;  %v8067_v23 = vadd.f32 %v10100_v57, %v8003_v8  ;;  %v7402_v20 = vpop.f32.mrb[59].mxu0  ;;  %v8340_v4 = vld [vmem:[#allocation3 + $0x1e0] sm:$0xff]  ;;  %vm14955_vm15 = vmmov %vm14938_vm0 }
 0x3f2   : > { %8631 = vperm.xlu0 %10548, %v8337_v54   ;;  %v8066_v0 = vadd.f32 %v8002_v35, %v7402_v20  ;;  %v6830_v50 = vpop.xlane.xlu1 %6829  ;;  %v8217_v8 = vld [vmem:[#allocation4 + $0x8] sm:$0xff]  ;;  %vm14956_vm1 = vmmov %vm14938_vm0 }
 0x3f3   : > { %8131 = vst.msk [vmem:[#allocation4 + $0x158] sm:$0xff] %vm14938_vm0, %v8067_v23  ;;  %v6912_v5 = vadd.f32 %v6830_v50, %v6720_v14  ;;  %v8342_v20 = vld [vmem:[#allocation3 + $0x1f0] sm:$0xff] }
 0x3f4   : > { %8130 = vst.msk [vmem:[#allocation4 + $0x150] sm:$0xff] %vm14939_vm2, %v8066_v0  ;;  %v10156_v53 = vpop.f32.mrb[58].mxu1  ;;  %v8323_v37 = vld [vmem:[#allocation3 + $0x158] sm:$0xff]  ;;  %v7622_v14 = vld [vmem:[#allocation4 + $0x170] sm:$0xff]  ;;  %v8007_v0 = vmul.f32 %v13774_v55, %v7623_v34  ;;  %vm14957_vm2 = vmmov %vm14938_vm0 }
 0x3f5   : > { %8626 = vperm.xlu1 %10547, %v8336_v10   ;;  %6977 = vst.msk [vmem:[#allocation3 + $0x168] sm:$0xff] %vm14940_vm3, %v6912_v5  ;;  %v8083_v16 = vadd.f32 %v10156_v53, %v8019_v3  ;;  %v7547_v17 = vpop.f32.mrb[59].mxu1  ;;  %v8006_v3 = vmul.f32 %v13803_v21, %v7622_v14  ;;  %v7638_v10 = vld [vmem:[#allocation4 + $0x1f0] sm:$0xff]  ;;  %vm14958_vm3 = vmmov %vm14938_vm0 }
 0x3f6   : > { %8561 = vperm.xlu0 %10548, %v8323_v37   ;;  %v8082_v2 = vadd.f32 %v8018_v39, %v7547_v17  ;;  %v6862_v31 = vpop.xlane.xlu1 %6861 }
 0x3f7   : > { %8147 = vst.msk [vmem:[#allocation4 + $0x1d8] sm:$0xff] %vm14942_vm4, %v8083_v16  ;;  %v6928_v6 = vadd.f32 %v6862_v31, %v6736_v25  ;;  %v8352_v63 = vpop.permute.xlu0 %8351  ;;  %v8023_v16 = vmul.f32 %v13783_v7, %v7639_v9  ;;  %v8022_v25 = vmul.f32 %v13810_v42, %v7638_v10  ;;  %vm14959_vm4 = vmmov %vm14938_vm0 }
 0x3f8   : > { %8146 = vst.msk [vmem:[#allocation4 + $0x1d0] sm:$0xff] %vm14943_vm5, %v8082_v2  ;;  %10805 = vrcp.f32 %v8352_v63  ;;  %v8339_v27 = vld [vmem:[#allocation3 + $0x1d8] sm:$0xff]  ;;  %vm14960_vm5 = vmmov %vm14938_vm0 }
 0x3f9   : > { %8556 = vperm.xlu1 %10547, %v8322_v40   ;;  %6993 = vst.msk [vmem:[#allocation3 + $0x1e8] sm:$0xff] %vm14944_vm6, %v6928_v6  ;;  %v8233_v6 = vld [vmem:[#allocation4 + $0x88] sm:$0xff]  ;;  %vm14961_vm6 = vmmov %vm14938_vm0 }
 0x3fa   : > { %8641 = vperm.xlu0 %10548, %v8339_v27   ;;  %v6834_v45 = vpop.xlane.xlu1 %6833  ;;  %v8216_v27 = vld [vmem:[#allocation4] sm:$0xff] }
 0x3fb   : > { %v6914_v32 = vadd.f32 %v6834_v45, %v6722_v61 }
 0x3fc   : > { %v8325_v29 = vld [vmem:[#allocation3 + $0x168] sm:$0xff] }
 0x3fd   : > { %8636 = vperm.xlu1 %10547, %v8338_v19   ;;  %6979 = vst.msk [vmem:[#allocation3 + $0x178] sm:$0xff] %vm14946_vm7, %v6914_v32  ;;  %v8232_v32 = vld [vmem:[#allocation4 + $0x80] sm:$0xff]  ;;  %vm14962_vm7 = vmmov %vm14938_vm0 }
 0x3fe   : > { %8571 = vperm.xlu0 %10548, %v8325_v29   ;;  %v6866_v41 = vpop.xlane.xlu1 %6865 }
 0x3ff   : > { %v6930_v38 = vadd.f32 %v6866_v41, %v6738_v56 }
 0x400   : > { %v10103_v43 = vpop.f32.mrb[60].mxu0  ;;  %v8341_v58 = vld [vmem:[#allocation3 + $0x1e8] sm:$0xff] }
 0x401   : > { %8566 = vperm.xlu1 %10547, %v8324_v12   ;;  %6995 = vst.msk [vmem:[#allocation3 + $0x1f8] sm:$0xff] %vm14948_vm8, %v6930_v38  ;;  %v8069_v11 = vadd.f32 %v10103_v43, %v8005_v33  ;;  %v7412_v28 = vpop.f32.mrb[61].mxu0  ;;  %v8218_v33 = vld [vmem:[#allocation4 + $0x10] sm:$0xff]  ;;  %vm14963_vm8 = vmmov %vm14938_vm0 }
 0x402   : > { %8651 = vperm.xlu0 %10548, %v8341_v58   ;;  %v10806_v48 = vpop.eup %10805  ;;  %v8068_v47 = vadd.f32 %v8004_v15, %v7412_v28  ;;  %v8235_v15 = vld [vmem:[#allocation4 + $0x98] sm:$0xff] }
 0x403   : > { %8133 = vst.msk [vmem:[#allocation4 + $0x168] sm:$0xff] %vm14949_vm9, %v8069_v11  ;;  %v8667_v62 = vmul.f32 %v10806_v48, %v8217_v8  ;;  %v8234_v11 = vld [vmem:[#allocation4 + $0x90] sm:$0xff]  ;;  %vm14964_vm9 = vmmov %vm14938_vm0 }
 0x404   : > { %8132 = vst.msk [vmem:[#allocation4 + $0x160] sm:$0xff] %vm14950_vm10, %v8068_v47  ;;  %v10159_v18 = vpop.f32.mrb[60].mxu1  ;;  %v8327_v35 = vld [vmem:[#allocation3 + $0x178] sm:$0xff]  ;;  %vm14965_vm10 = vmmov %vm14938_vm0 }
 0x405   : > { %8646 = vperm.xlu1 %10547, %v8340_v4   ;;  %v8085_v57 = vadd.f32 %v10159_v18, %v8021_v1  ;;  %v7557_v54 = vpop.f32.mrb[61].mxu1  ;;  %8793 = vst.msk [vmem:[%s14004_s18 + $0x8] sm:$0xff] %vm14951_vm11, %v8667_v62  ;;  %v8221_v1 = vld [vmem:[#allocation4 + $0x28] sm:$0xff]  ;;  %vm14966_vm11 = vmmov %vm14938_vm0 }
 0x406   : > { %8581 = vperm.xlu0 %10548, %v8327_v35   ;;  %v8084_v30 = vadd.f32 %v8020_v36, %v7557_v54  ;;  %v8220_v36 = vld [vmem:[#allocation4 + $0x20] sm:$0xff]  ;;  %v8237_v54 = vld [vmem:[#allocation4 + $0xa8] sm:$0xff] }
 0x407   : > { %8149 = vst.msk [vmem:[#allocation4 + $0x1e8] sm:$0xff] %vm14952_vm12, %v8085_v57  ;;  %vm14967_vm12 = vmmov %vm14938_vm0 }
 0x408   : > { %8148 = vst.msk [vmem:[#allocation4 + $0x1e0] sm:$0xff] %vm14953_vm13, %v8084_v30  ;;  %v8343_v59 = vld [vmem:[#allocation3 + $0x1f8] sm:$0xff]  ;;  %vm14968_vm13 = vmmov %vm14938_vm0 }
 0x409   : > { %8576 = vperm.xlu1 %10547, %v8326_v52  }
 0x40a   : > { %8661 = vperm.xlu0 %10548, %v8343_v59  }
 0x40c   : > { %v8432_v23 = vpop.permute.xlu0 %8431 }
 0x40d   : > { %10807 = vrcp.f32 %v8432_v23  ;;  %8656 = vperm.xlu1 %10547, %v8342_v20   ;;  %v8236_v23 = vld [vmem:[#allocation4 + $0xa0] sm:$0xff] }
 0x410   : > { %v8347_v50 = vpop.permute.xlu1 %8346  ;;  %v10106_v5 = vpop.f32.mrb[62].mxu0 }
 0x411   : > { %10809 = vrcp.f32 %v8347_v50  ;;  %v8071_v39 = vadd.f32 %v10106_v5, %v8007_v0  ;;  %v7422_v53 = vpop.f32.mrb[63].mxu0  ;;  %v8223_v50 = vld [vmem:[#allocation4 + $0x38] sm:$0xff]  ;;  %v8222_v5 = vld [vmem:[#allocation4 + $0x30] sm:$0xff] }
 0x412   : > { %v8070_v37 = vadd.f32 %v8006_v3, %v7422_v53 }
 0x413   : > { %8135 = vst.msk [vmem:[#allocation4 + $0x178] sm:$0xff] %vm14954_vm14, %v8071_v39  ;;  %vm14969_vm14 = vmmov %vm14938_vm0 }
 0x414   : > { %v8427_v17 = vpop.permute.xlu1 %8426  ;;  %v8362_v46 = vpop.permute.xlu0 %8361  ;;  %8134 = vst.msk [vmem:[#allocation4 + $0x170] sm:$0xff] %vm14955_vm15, %v8070_v37  ;;  %v8239_v37 = vld [vmem:[#allocation4 + $0xb8] sm:$0xff]  ;;  %vm14970_vm15 = vmmov %vm14938_vm0 }
 0x415   : > { %v10162_v55 = vpop.f32.mrb[62].mxu1  ;;  %10811 = vrcp.f32 %v8427_v17 }
 0x416   : > { %v8087_v2 = vadd.f32 %v10162_v55, %v8023_v16  ;;  %10813 = vrcp.f32 %v8362_v46  ;;  %v7567_v21 = vpop.f32.mrb[63].mxu1 }
 0x417   : > { %v10808_v31 = vpop.eup %10807  ;;  %v8086_v49 = vadd.f32 %v8022_v25, %v7567_v21  ;;  %v8238_v25 = vld [vmem:[#allocation4 + $0xb0] sm:$0xff] }
 0x418   : > { %8151 = vst.msk [vmem:[#allocation4 + $0x1f8] sm:$0xff] %vm14956_vm1, %v8087_v2  ;;  %v8357_v7 = vpop.permute.xlu1 %8356  ;;  %v8442_v63 = vpop.permute.xlu0 %8441  ;;  %v8699_v40 = vmul.f32 %v10808_v31, %v8233_v6  ;;  %v8225_v2 = vld [vmem:[#allocation4 + $0x48] sm:$0xff]  ;;  %vm14971_vm1 = vmmov %vm14938_vm0 }
 0x419   : > { %8150 = vst.msk [vmem:[#allocation4 + $0x1f0] sm:$0xff] %vm14938_vm0, %v8086_v49  ;;  %10815 = vrcp.f32 %v8357_v7  ;;  %vm8872_vm0 = vcmask 523520  }
 0x41a   : > { %10817 = vrcp.f32 %v8442_v63  ;;  %8826 = vrot.lane.b32.xlu0 %v8699_v40, %s11016_s19  ;;  %v8224_v63 = vld [vmem:[#allocation4 + $0x40] sm:$0xff] }
 0x41b   : > { %v10810_v42 = vpop.eup %10809 }
 0x41c   : > { %v8437_v26 = vpop.permute.xlu1 %8436  ;;  %v8372_v61 = vpop.permute.xlu0 %8371  ;;  %v8665_v45 = vmul.f32 %v10810_v42, %v8216_v27 }
 0x41d   : > { %10819 = vrcp.f32 %v8437_v26 }
 0x41e   : > { %10821 = vrcp.f32 %v8372_v61  ;;  %8792 = vst.msk [vmem:[%s14004_s18] sm:$0xff] %vm14957_vm2, %v8665_v45  ;;  %v8241_v61 = vld [vmem:[#allocation4 + $0xc8] sm:$0xff]  ;;  %vm8953_vm2 = vcmask 785920  }
 0x41f   : > { %v10812_v13 = vpop.eup %10811 }
 0x420   : > { %v10814_v19 = vpop.eup %10813  ;;  %v8367_v60 = vpop.permute.xlu1 %8366  ;;  %v8697_v22 = vmul.f32 %v10812_v13, %v8232_v32  ;;  %v8240_v32 = vld [vmem:[#allocation4 + $0xc0] sm:$0xff] }
 0x421   : > { %v8452_v29 = vpop.permute.xlu0 %8451  ;;  %10823 = vrcp.f32 %v8367_v60  ;;  %v8671_v56 = vmul.f32 %v10814_v19, %v8219_v24  ;;  %v8227_v60 = vld [vmem:[#allocation4 + $0x58] sm:$0xff] }
 0x422   : > { %10825 = vrcp.f32 %v8452_v29  ;;  %8824 = vrot.lane.b32.xlu1 %v8697_v22, %s11016_s19 }
 0x423   : > { %v10816_v41 = vpop.eup %10815  ;;  %8795 = vst.msk [vmem:[%s14004_s18 + $0x18] sm:$0xff] %vm14958_vm3, %v8671_v56  ;;  %vm9034_vm3 = vcmask 1048320  }
 0x424   : > { %v10818_v38 = vpop.eup %10817  ;;  %v8447_v12 = vpop.permute.xlu1 %8446  ;;  %v8669_v43 = vmul.f32 %v10816_v41, %v8218_v33  ;;  %v8226_v33 = vld [vmem:[#allocation4 + $0x50] sm:$0xff] }
 0x425   : > { %v8382_v44 = vpop.permute.xlu0 %8381  ;;  %10827 = vrcp.f32 %v8447_v12  ;;  %v8703_v58 = vmul.f32 %v10818_v38, %v8235_v15 }
 0x426   : > { %10829 = vrcp.f32 %v8382_v44  ;;  %8794 = vst.msk [vmem:[%s14004_s18 + $0x10] sm:$0xff] %vm14959_vm4, %v8669_v43  ;;  %v8243_v43 = vld [vmem:[#allocation4 + $0xd8] sm:$0xff] }
 0x427   : > { %v10820_v51 = vpop.eup %10819  ;;  %8830 = vrot.lane.b32.xlu0 %v8703_v58, %s11016_s19 }
 0x428   : > { %v10822_v28 = vpop.eup %10821  ;;  %v8377_v48 = vpop.permute.xlu1 %8376  ;;  %v8701_v8 = vmul.f32 %v10820_v51, %v8234_v11  ;;  %v8242_v11 = vld [vmem:[#allocation4 + $0xd0] sm:$0xff] }
 0x429   : > { %v8462_v47 = vpop.permute.xlu0 %8461  ;;  %10831 = vrcp.f32 %v8377_v48  ;;  %v8675_v4 = vmul.f32 %v10822_v28, %v8221_v1  ;;  %v8229_v48 = vld [vmem:[#allocation4 + $0x68] sm:$0xff] }
 0x42a   : > { %10833 = vrcp.f32 %v8462_v47  ;;  %8828 = vrot.lane.b32.xlu1 %v8701_v8, %s11016_s19 }
 0x42b   : > { %v10824_v62 = vpop.eup %10823  ;;  %8797 = vst.msk [vmem:[%s14004_s18 + $0x28] sm:$0xff] %vm14960_vm5, %v8675_v4 }
 0x42c   : > { %v10826_v18 = vpop.eup %10825  ;;  %v8457_v35 = vpop.permute.xlu1 %8456  ;;  %v8673_v30 = vmul.f32 %v10824_v62, %v8220_v36  ;;  %v8228_v36 = vld [vmem:[#allocation4 + $0x60] sm:$0xff] }
 0x42d   : > { %v8392_v57 = vpop.permute.xlu0 %8391  ;;  %10835 = vrcp.f32 %v8457_v35  ;;  %v8707_v52 = vmul.f32 %v10826_v18, %v8237_v54 }
 0x42e   : > { %10837 = vrcp.f32 %v8392_v57  ;;  %8796 = vst.msk [vmem:[%s14004_s18 + $0x20] sm:$0xff] %vm14961_vm6, %v8673_v30  ;;  %v8245_v30 = vld [vmem:[#allocation4 + $0xe8] sm:$0xff] }
 0x42f   : > { %v10828_v59 = vpop.eup %10827  ;;  %8834 = vrot.lane.b32.xlu0 %v8707_v52, %s11016_s19 }
 0x430   : > { %v10830_v20 = vpop.eup %10829  ;;  %v8387_v34 = vpop.permute.xlu1 %8386  ;;  %v8705_v0 = vmul.f32 %v10828_v59, %v8236_v23  ;;  %v8244_v23 = vld [vmem:[#allocation4 + $0xe0] sm:$0xff] }
 0x431   : > { %v8472_v14 = vpop.permute.xlu0 %8471  ;;  %10839 = vrcp.f32 %v8387_v34  ;;  %v8679_v9 = vmul.f32 %v10830_v20, %v8223_v50  ;;  %v8231_v34 = vld [vmem:[#allocation4 + $0x78] sm:$0xff] }
 0x432   : > { %10841 = vrcp.f32 %v8472_v14  ;;  %8832 = vrot.lane.b32.xlu1 %v8705_v0, %s11016_s19 }
 0x433   : > { %v10832_v3 = vpop.eup %10831  ;;  %8799 = vst.msk [vmem:[%s14004_s18 + $0x38] sm:$0xff] %vm14962_vm7, %v8679_v9 }
 0x434   : > { %v10834_v10 = vpop.eup %10833  ;;  %v8467_v39 = vpop.permute.xlu1 %8466  ;;  %v8677_v16 = vmul.f32 %v10832_v3, %v8222_v5  ;;  %v8230_v5 = vld [vmem:[#allocation4 + $0x70] sm:$0xff] }
 0x435   : > { %v8402_v53 = vpop.permute.xlu0 %8401  ;;  %10843 = vrcp.f32 %v8467_v39  ;;  %v8711_v17 = vmul.f32 %v10834_v10, %v8239_v37  ;;  %v8247_v37 = vld [vmem:[#allocation4 + $0xf8] sm:$0xff] }
 0x436   : > { %10845 = vrcp.f32 %v8402_v53  ;;  %8798 = vst.msk [vmem:[%s14004_s18 + $0x30] sm:$0xff] %vm14963_vm8, %v8677_v16 }
 0x437   : > { %v10836_v46 = vpop.eup %10835  ;;  %8838 = vrot.lane.b32.xlu0 %v8711_v17, %s11016_s19 }
 0x438   : > { %v10838_v55 = vpop.eup %10837  ;;  %v8397_v21 = vpop.permute.xlu1 %8396  ;;  %v8709_v49 = vmul.f32 %v10836_v46, %v8238_v25  ;;  %v8246_v25 = vld [vmem:[#allocation4 + $0xf0] sm:$0xff] }
 0x439   : > { %v8482_v31 = vpop.permute.xlu0 %8481  ;;  %v8683_v6 = vmul.f32 %v10838_v55, %v8225_v2  ;;  %10847 = vrcp.f32 %v8397_v21 }
 0x43a   : > { %10849 = vrcp.f32 %v8482_v31  ;;  %8836 = vrot.lane.b32.xlu1 %v8709_v49, %s11016_s19  ;;  %v8249_v31 = vld [vmem:[#allocation4 + $0x108] sm:$0xff] }
 0x43b   : > { %v10840_v7 = vpop.eup %10839  ;;  %8801 = vst.msk [vmem:[%s14004_s18 + $0x48] sm:$0xff] %vm14964_vm9, %v8683_v6 }
 0x43c   : > { %v10842_v40 = vpop.eup %10841  ;;  %v8681_v42 = vmul.f32 %v10840_v7, %v8224_v63  ;;  %v8477_v27 = vpop.permute.xlu1 %8476  ;;  %v8248_v63 = vld [vmem:[#allocation4 + $0x100] sm:$0xff] }
 0x43d   : > { %v8412_v26 = vpop.permute.xlu0 %8411  ;;  %10851 = vrcp.f32 %v8477_v27  ;;  %v8715_v45 = vmul.f32 %v10842_v40, %v8241_v61 }
 0x43e   : > { %10853 = vrcp.f32 %v8412_v26  ;;  %8800 = vst.msk [vmem:[%s14004_s18 + $0x40] sm:$0xff] %vm14965_vm10, %v8681_v42  ;;  %v8265_v26 = vld [vmem:[#allocation4 + $0x188] sm:$0xff] }
 0x43f   : > { %v10844_v13 = vpop.eup %10843  ;;  %8842 = vrot.lane.b32.xlu0 %v8715_v45, %s11016_s19 }
 0x440   : > { %v10846_v19 = vpop.eup %10845  ;;  %v8407_v29 = vpop.permute.xlu1 %8406  ;;  %v8713_v24 = vmul.f32 %v10844_v13, %v8240_v32  ;;  %v8264_v32 = vld [vmem:[#allocation4 + $0x180] sm:$0xff] }
 0x441   : > { %v8492_v22 = vpop.permute.xlu0 %8491  ;;  %v8687_v56 = vmul.f32 %v10846_v19, %v8227_v60  ;;  %10855 = vrcp.f32 %v8407_v29 }
 0x442   : > { %10857 = vrcp.f32 %v8492_v22  ;;  %8840 = vrot.lane.b32.xlu1 %v8713_v24, %s11016_s19  ;;  %v8251_v22 = vld [vmem:[#allocation4 + $0x118] sm:$0xff] }
 0x443   : > { %v10848_v41 = vpop.eup %10847  ;;  %8803 = vst.msk [vmem:[%s14004_s18 + $0x58] sm:$0xff] %vm14966_vm11, %v8687_v56 }
 0x444   : > { %v10850_v38 = vpop.eup %10849  ;;  %v8685_v12 = vmul.f32 %v10848_v41, %v8226_v33  ;;  %v8487_v44 = vpop.permute.xlu1 %8486  ;;  %v8250_v33 = vld [vmem:[#allocation4 + $0x110] sm:$0xff] }
 0x445   : > { %v8422_v15 = vpop.permute.xlu0 %8421  ;;  %10859 = vrcp.f32 %v8487_v44  ;;  %v8719_v58 = vmul.f32 %v10850_v38, %v8243_v43 }
 0x446   : > { %10861 = vrcp.f32 %v8422_v15  ;;  %8802 = vst.msk [vmem:[%s14004_s18 + $0x50] sm:$0xff] %vm14967_vm12, %v8685_v12  ;;  %v8267_v15 = vld [vmem:[#allocation4 + $0x198] sm:$0xff] }
 0x447   : > { %v10852_v51 = vpop.eup %10851  ;;  %8846 = vrot.lane.b32.xlu0 %v8719_v58, %s11016_s19 }
 0x448   : > { %v10854_v28 = vpop.eup %10853  ;;  %v8417_v47 = vpop.permute.xlu1 %8416  ;;  %v8717_v1 = vmul.f32 %v10852_v51, %v8242_v11  ;;  %v8266_v11 = vld [vmem:[#allocation4 + $0x190] sm:$0xff] }
 0x449   : > { %v8502_v8 = vpop.permute.xlu0 %8501  ;;  %v8691_v4 = vmul.f32 %v10854_v28, %v8229_v48  ;;  %10863 = vrcp.f32 %v8417_v47 }
 0x44a   : > { %10865 = vrcp.f32 %v8502_v8  ;;  %8844 = vrot.lane.b32.xlu1 %v8717_v1, %s11016_s19  ;;  %v8253_v8 = vld [vmem:[#allocation4 + $0x128] sm:$0xff] }
 0x44b   : > { %v10856_v62 = vpop.eup %10855  ;;  %8805 = vst.msk [vmem:[%s14004_s18 + $0x68] sm:$0xff] %vm14968_vm13, %v8691_v4 }
 0x44c   : > { %v10858_v18 = vpop.eup %10857  ;;  %v8689_v35 = vmul.f32 %v10856_v62, %v8228_v36  ;;  %v8497_v57 = vpop.permute.xlu1 %8496  ;;  %v8252_v36 = vld [vmem:[#allocation4 + $0x120] sm:$0xff] }
 0x44d   : > { %v8512_v54 = vpop.permute.xlu0 %8511  ;;  %10867 = vrcp.f32 %v8497_v57  ;;  %v8723_v52 = vmul.f32 %v10858_v18, %v8245_v30 }
 0x44e   : > { %10869 = vrcp.f32 %v8512_v54  ;;  %8804 = vst.msk [vmem:[%s14004_s18 + $0x60] sm:$0xff] %vm14969_vm14, %v8689_v35  ;;  %v8269_v54 = vld [vmem:[#allocation4 + $0x1a8] sm:$0xff] }
 0x44f   : > { %v10860_v59 = vpop.eup %10859  ;;  %8850 = vrot.lane.b32.xlu0 %v8723_v52, %s11016_s19 }
 0x450   : > { %v10862_v20 = vpop.eup %10861  ;;  %v8507_v14 = vpop.permute.xlu1 %8506  ;;  %v8721_v50 = vmul.f32 %v10860_v59, %v8244_v23  ;;  %v8268_v23 = vld [vmem:[#allocation4 + $0x1a0] sm:$0xff] }
 0x451   : > { %v8592_v0 = vpop.permute.xlu0 %8591  ;;  %v8695_v9 = vmul.f32 %v10862_v20, %v8231_v34  ;;  %10871 = vrcp.f32 %v8507_v14 }
 0x452   : > { %10873 = vrcp.f32 %v8592_v0  ;;  %8848 = vrot.lane.b32.xlu1 %v8721_v50, %s11016_s19  ;;  %v8255_v0 = vld [vmem:[#allocation4 + $0x138] sm:$0xff] }
 0x453   : > { %v10864_v3 = vpop.eup %10863  ;;  %8807 = vst.msk [vmem:[%s14004_s18 + $0x78] sm:$0xff] %vm14970_vm15, %v8695_v9 }
 0x454   : > { %v10866_v10 = vpop.eup %10865  ;;  %v8693_v39 = vmul.f32 %v10864_v3, %v8230_v5  ;;  %v8587_v53 = vpop.permute.xlu1 %8586  ;;  %v8254_v5 = vld [vmem:[#allocation4 + $0x130] sm:$0xff] }
 0x455   : > { %10875 = vrcp.f32 %v8587_v53  ;;  %v8522_v16 = vpop.permute.xlu0 %8521  ;;  %v8727_v17 = vmul.f32 %v10866_v10, %v8247_v37  ;;  %v8271_v37 = vld [vmem:[#allocation4 + $0x1b8] sm:$0xff] }
 0x456   : > { %10877 = vrcp.f32 %v8522_v16  ;;  %8806 = vst.msk [vmem:[%s14004_s18 + $0x70] sm:$0xff] %vm14971_vm1, %v8693_v39 }
 0x457   : > { %v10868_v46 = vpop.eup %10867  ;;  %8854 = vrot.lane.b32.xlu0 %v8727_v17, %s11016_s19 }
 0x458   : > { %v10870_v55 = vpop.eup %10869  ;;  %v8517_v2 = vpop.permute.xlu1 %8516  ;;  %v8725_v21 = vmul.f32 %v10868_v46, %v8246_v25  ;;  %v8270_v25 = vld [vmem:[#allocation4 + $0x1b0] sm:$0xff] }
 0x459   : > { %10879 = vrcp.f32 %v8517_v2  ;;  %v8602_v49 = vpop.permute.xlu0 %8601  ;;  %v8731_v6 = vmul.f32 %v10870_v55, %v8249_v31  ;;  %v8257_v31 = vld [vmem:[#allocation4 + $0x148] sm:$0xff] }
 0x45a   : > { %10881 = vrcp.f32 %v8602_v49  ;;  %8852 = vrot.lane.b32.xlu1 %v8725_v21, %s11016_s19 }
 0x45b   : > { %v10872_v7 = vpop.eup %10871  ;;  %8907 = vrot.lane.b32.xlu0 %v8731_v6, %s11017_s21 }
 0x45c   : > { %v10874_v40 = vpop.eup %10873  ;;  %v8597_v42 = vpop.permute.xlu1 %8596  ;;  %v8729_v27 = vmul.f32 %v10872_v7, %v8248_v63  ;;  %v8256_v63 = vld [vmem:[#allocation4 + $0x140] sm:$0xff] }
 0x45d   : > { %10883 = vrcp.f32 %v8597_v42  ;;  %v8532_v61 = vpop.permute.xlu0 %8531  ;;  %v8763_v45 = vmul.f32 %v10874_v40, %v8265_v26  ;;  %v8273_v26 = vld [vmem:[#allocation4 + $0x1c8] sm:$0xff] }
 0x45e   : > { %10885 = vrcp.f32 %v8532_v61  ;;  %8905 = vrot.lane.b32.xlu1 %v8729_v27, %s11017_s21 }
 0x45f   : > { %v10876_v13 = vpop.eup %10875  ;;  %8988 = vrot.lane.b32.xlu0 %v8763_v45, %s11018_s23 }
 0x460   : > { %v10878_v19 = vpop.eup %10877  ;;  %v8527_v60 = vpop.permute.xlu1 %8526  ;;  %v8761_v29 = vmul.f32 %v10876_v13, %v8264_v32  ;;  %v8272_v32 = vld [vmem:[#allocation4 + $0x1c0] sm:$0xff] }
 0x461   : > { %10887 = vrcp.f32 %v8527_v60  ;;  %v8612_v24 = vpop.permute.xlu0 %8611  ;;  %v8735_v56 = vmul.f32 %v10878_v19, %v8251_v22  ;;  %v8259_v22 = vld [vmem:[#allocation4 + $0x158] sm:$0xff] }
 0x462   : > { %10889 = vrcp.f32 %v8612_v24  ;;  %8986 = vrot.lane.b32.xlu1 %v8761_v29, %s11018_s23 }
 0x463   : > { %v10880_v41 = vpop.eup %10879  ;;  %8911 = vrot.lane.b32.xlu0 %v8735_v56, %s11017_s21 }
 0x464   : > { %v10882_v38 = vpop.eup %10881  ;;  %v8607_v12 = vpop.permute.xlu1 %8606  ;;  %v8733_v44 = vmul.f32 %v10880_v41, %v8250_v33  ;;  %v8258_v33 = vld [vmem:[#allocation4 + $0x150] sm:$0xff] }
 0x465   : > { %10891 = vrcp.f32 %v8607_v12  ;;  %v8542_v43 = vpop.permute.xlu0 %8541  ;;  %v8767_v58 = vmul.f32 %v10882_v38, %v8267_v15  ;;  %v8275_v15 = vld [vmem:[#allocation4 + $0x1d8] sm:$0xff] }
 0x466   : > { %10893 = vrcp.f32 %v8542_v43  ;;  %8909 = vrot.lane.b32.xlu1 %v8733_v44, %s11017_s21 }
 0x467   : > { %v10884_v51 = vpop.eup %10883  ;;  %8992 = vrot.lane.b32.xlu0 %v8767_v58, %s11018_s23 }
 0x468   : > { %v10886_v28 = vpop.eup %10885  ;;  %v8537_v48 = vpop.permute.xlu1 %8536  ;;  %v8765_v47 = vmul.f32 %v10884_v51, %v8266_v11  ;;  %v8274_v11 = vld [vmem:[#allocation4 + $0x1d0] sm:$0xff] }
 0x469   : > { %10895 = vrcp.f32 %v8537_v48  ;;  %v8622_v1 = vpop.permute.xlu0 %8621  ;;  %v8739_v4 = vmul.f32 %v10886_v28, %v8253_v8  ;;  %v8261_v8 = vld [vmem:[#allocation4 + $0x168] sm:$0xff] }
 0x46a   : > { %10897 = vrcp.f32 %v8622_v1  ;;  %8990 = vrot.lane.b32.xlu1 %v8765_v47, %s11018_s23 }
 0x46b   : > { %v10888_v62 = vpop.eup %10887  ;;  %8915 = vrot.lane.b32.xlu0 %v8739_v4, %s11017_s21 }
 0x46c   : > { %v10890_v18 = vpop.eup %10889  ;;  %v8617_v35 = vpop.permute.xlu1 %8616  ;;  %v8737_v57 = vmul.f32 %v10888_v62, %v8252_v36  ;;  %v8260_v36 = vld [vmem:[#allocation4 + $0x160] sm:$0xff] }
 0x46d   : > { %10899 = vrcp.f32 %v8617_v35  ;;  %v8552_v30 = vpop.permute.xlu0 %8551  ;;  %v8771_v52 = vmul.f32 %v10890_v18, %v8269_v54  ;;  %v8277_v54 = vld [vmem:[#allocation4 + $0x1e8] sm:$0xff] }
 0x46e   : > { %10901 = vrcp.f32 %v8552_v30  ;;  %8913 = vrot.lane.b32.xlu1 %v8737_v57, %s11017_s21 }
 0x46f   : > { %v10892_v59 = vpop.eup %10891  ;;  %8996 = vrot.lane.b32.xlu0 %v8771_v52, %s11018_s23 }
 0x470   : > { %v10894_v20 = vpop.eup %10893  ;;  %v8547_v34 = vpop.permute.xlu1 %8546  ;;  %v8769_v14 = vmul.f32 %v10892_v59, %v8268_v23  ;;  %v8276_v23 = vld [vmem:[#allocation4 + $0x1e0] sm:$0xff] }
 0x471   : > { %10903 = vrcp.f32 %v8547_v34  ;;  %v8632_v50 = vpop.permute.xlu0 %8631  ;;  %v8743_v9 = vmul.f32 %v10894_v20, %v8255_v0 }
 0x472   : > { %10905 = vrcp.f32 %v8632_v50  ;;  %8994 = vrot.lane.b32.xlu1 %v8769_v14, %s11018_s23  ;;  %v8263_v14 = vld [vmem:[#allocation4 + $0x178] sm:$0xff] }
 0x473   : > { %v10896_v3 = vpop.eup %10895  ;;  %8919 = vrot.lane.b32.xlu0 %v8743_v9, %s11017_s21  ;;  %v8262_v9 = vld [vmem:[#allocation4 + $0x170] sm:$0xff] }
 0x474   : > { %v10898_v10 = vpop.eup %10897  ;;  %v8627_v39 = vpop.permute.xlu1 %8626  ;;  %v8741_v53 = vmul.f32 %v10896_v3, %v8254_v5 }
 0x475   : > { %10907 = vrcp.f32 %v8627_v39  ;;  %v8562_v16 = vpop.permute.xlu0 %8561  ;;  %v8775_v17 = vmul.f32 %v10898_v10, %v8271_v37  ;;  %v8279_v39 = vld [vmem:[#allocation4 + $0x1f8] sm:$0xff] }
 0x476   : > { %10909 = vrcp.f32 %v8562_v16  ;;  %8917 = vrot.lane.b32.xlu1 %v8741_v53, %s11017_s21  ;;  %v8278_v16 = vld [vmem:[#allocation4 + $0x1f0] sm:$0xff] }
 0x477   : > { %v10900_v46 = vpop.eup %10899  ;;  %9000 = vrot.lane.b32.xlu0 %v8775_v17, %s11018_s23 }
 0x478   : > { %v10902_v55 = vpop.eup %10901  ;;  %v8557_v2 = vpop.permute.xlu1 %8556  ;;  %v8773_v21 = vmul.f32 %v10900_v46, %v8270_v25 }
 0x479   : > { %10911 = vrcp.f32 %v8557_v2  ;;  %v8642_v49 = vpop.permute.xlu0 %8641  ;;  %v8747_v6 = vmul.f32 %v10902_v55, %v8257_v31 }
 0x47a   : > { %10913 = vrcp.f32 %v8642_v49  ;;  %8998 = vrot.lane.b32.xlu1 %v8773_v21, %s11018_s23 }
 0x47b   : > { %v10904_v7 = vpop.eup %10903  ;;  %8923 = vrot.lane.b32.xlu0 %v8747_v6, %s11017_s21 }
 0x47c   : > { %v10906_v40 = vpop.eup %10905  ;;  %v8637_v42 = vpop.permute.xlu1 %8636  ;;  %v8745_v27 = vmul.f32 %v10904_v7, %v8256_v63 }
 0x47d   : > { %10915 = vrcp.f32 %v8637_v42  ;;  %v8572_v61 = vpop.permute.xlu0 %8571  ;;  %v8779_v45 = vmul.f32 %v10906_v40, %v8273_v26 }
 0x47e   : > { %10917 = vrcp.f32 %v8572_v61  ;;  %8921 = vrot.lane.b32.xlu1 %v8745_v27, %s11017_s21 }
 0x47f   : > { %v10908_v13 = vpop.eup %10907  ;;  %9004 = vrot.lane.b32.xlu0 %v8779_v45, %s11018_s23 }
 0x480   : > { %v10910_v19 = vpop.eup %10909  ;;  %v8567_v60 = vpop.permute.xlu1 %8566  ;;  %v8777_v29 = vmul.f32 %v10908_v13, %v8272_v32 }
 0x481   : > { %10919 = vrcp.f32 %v8567_v60  ;;  %v8652_v24 = vpop.permute.xlu0 %8651  ;;  %v8751_v56 = vmul.f32 %v10910_v19, %v8259_v22 }
 0x482   : > { %10921 = vrcp.f32 %v8652_v24  ;;  %9002 = vrot.lane.b32.xlu1 %v8777_v29, %s11018_s23 }
 0x483   : > { %v10912_v41 = vpop.eup %10911  ;;  %8927 = vrot.lane.b32.xlu0 %v8751_v56, %s11017_s21 }
 0x484   : > { %v10914_v38 = vpop.eup %10913  ;;  %v8647_v12 = vpop.permute.xlu1 %8646  ;;  %v8749_v44 = vmul.f32 %v10912_v41, %v8258_v33 }
 0x485   : > { %10923 = vrcp.f32 %v8647_v12  ;;  %v8582_v43 = vpop.permute.xlu0 %8581  ;;  %v8783_v58 = vmul.f32 %v10914_v38, %v8275_v15 }
 0x486   : > { %10925 = vrcp.f32 %v8582_v43  ;;  %8925 = vrot.lane.b32.xlu1 %v8749_v44, %s11017_s21 }
 0x487   : > { %v10916_v51 = vpop.eup %10915  ;;  %9008 = vrot.lane.b32.xlu0 %v8783_v58, %s11018_s23 }
 0x488   : > { %v10918_v28 = vpop.eup %10917  ;;  %v8577_v48 = vpop.permute.xlu1 %8576  ;;  %v8781_v47 = vmul.f32 %v10916_v51, %v8274_v11 }
 0x489   : > { %10927 = vrcp.f32 %v8577_v48  ;;  %v8662_v1 = vpop.permute.xlu0 %8661  ;;  %v8755_v4 = vmul.f32 %v10918_v28, %v8261_v8 }
 0x48a   : > { %10929 = vrcp.f32 %v8662_v1  ;;  %9006 = vrot.lane.b32.xlu1 %v8781_v47, %s11018_s23 }
 0x48b   : > { %v10920_v62 = vpop.eup %10919  ;;  %8931 = vrot.lane.b32.xlu0 %v8755_v4, %s11017_s21 }
 0x48c   : > { %v10922_v18 = vpop.eup %10921  ;;  %v8657_v35 = vpop.permute.xlu1 %8656  ;;  %v8753_v57 = vmul.f32 %v10920_v62, %v8260_v36 }
 0x48d   : > { %10931 = vrcp.f32 %v8657_v35  ;;  %v8827_v30 = vpop.permute.xlu0 %8826  ;;  %v8787_v52 = vmul.f32 %v10922_v18, %v8277_v54 }
 0x48e   : > { %8874 = vst.msk [vmem:[%s14004_s18 + $0x8] sm:$0xff] %vm8872_vm0, %v8827_v30  ;;  %8929 = vrot.lane.b32.xlu1 %v8753_v57, %s11017_s21 }
 0x48f   : > { %v10924_v59 = vpop.eup %10923  ;;  %9012 = vrot.lane.b32.xlu0 %v8787_v52, %s11018_s23 }
 0x490   : > { %v10926_v20 = vpop.eup %10925  ;;  %v8785_v34 = vmul.f32 %v10924_v59, %v8276_v23 }
 0x491   : > { %v8759_v0 = vmul.f32 %v10926_v20, %v8263_v14 }
 0x492   : > { %9010 = vrot.lane.b32.xlu1 %v8785_v34, %s11018_s23 }
 0x493   : > { %v10928_v50 = vpop.eup %10927  ;;  %8935 = vrot.lane.b32.xlu0 %v8759_v0, %s11017_s21 }
 0x494   : > { %v10930_v3 = vpop.eup %10929  ;;  %v8825_v5 = vpop.permute.xlu1 %8824  ;;  %v8757_v10 = vmul.f32 %v10928_v50, %v8262_v9 }
 0x495   : > { %8873 = vst.msk [vmem:[%s14004_s18] sm:$0xff] %vm8872_vm0, %v8825_v5  ;;  %v8791_v53 = vmul.f32 %v10930_v3, %v8279_v39 }
 0x496   : > { %8933 = vrot.lane.b32.xlu1 %v8757_v10, %s11017_s21 }
 0x497   : > { %v10932_v37 = vpop.eup %10931  ;;  %9016 = vrot.lane.b32.xlu0 %v8791_v53, %s11018_s23 }
 0x498   : > { %v8789_v17 = vmul.f32 %v10932_v37, %v8278_v16 }
 0x499   : > { %v8831_v46 = vpop.permute.xlu0 %8830 }
 0x49a   : > { %8876 = vst.msk [vmem:[%s14004_s18 + $0x18] sm:$0xff] %vm8872_vm0, %v8831_v46  ;;  %9014 = vrot.lane.b32.xlu1 %v8789_v17, %s11018_s23 }
 0x49c   : > { %v8829_v25 = vpop.permute.xlu1 %8828 }
 0x49d   : > { %8875 = vst.msk [vmem:[%s14004_s18 + $0x10] sm:$0xff] %vm8872_vm0, %v8829_v25 }
 0x4a1   : > { %v8835_v55 = vpop.permute.xlu0 %8834 }
 0x4a2   : > { %8878 = vst.msk [vmem:[%s14004_s18 + $0x28] sm:$0xff] %vm8872_vm0, %v8835_v55 }
 0x4a4   : > { %v8833_v2 = vpop.permute.xlu1 %8832 }
 0x4a5   : > { %8877 = vst.msk [vmem:[%s14004_s18 + $0x20] sm:$0xff] %vm8872_vm0, %v8833_v2 }
 0x4a9   : > { %v8839_v21 = vpop.permute.xlu0 %8838 }
 0x4aa   : > { %8880 = vst.msk [vmem:[%s14004_s18 + $0x38] sm:$0xff] %vm8872_vm0, %v8839_v21 }
 0x4ac   : > { %v8837_v31 = vpop.permute.xlu1 %8836 }
 0x4ad   : > { %8879 = vst.msk [vmem:[%s14004_s18 + $0x30] sm:$0xff] %vm8872_vm0, %v8837_v31 }
 0x4b1   : > { %v8843_v49 = vpop.permute.xlu0 %8842 }
 0x4b2   : > { %8882 = vst.msk [vmem:[%s14004_s18 + $0x48] sm:$0xff] %vm8872_vm0, %v8843_v49 }
 0x4b4   : > { %v8841_v6 = vpop.permute.xlu1 %8840 }
 0x4b5   : > { %8881 = vst.msk [vmem:[%s14004_s18 + $0x40] sm:$0xff] %vm8872_vm0, %v8841_v6 }
 0x4b9   : > { %v8847_v7 = vpop.permute.xlu0 %8846 }
 0x4ba   : > { %8884 = vst.msk [vmem:[%s14004_s18 + $0x58] sm:$0xff] %vm8872_vm0, %v8847_v7 }
 0x4bc   : > { %v8845_v63 = vpop.permute.xlu1 %8844 }
 0x4bd   : > { %8883 = vst.msk [vmem:[%s14004_s18 + $0x50] sm:$0xff] %vm8872_vm0, %v8845_v63 }
 0x4c1   : > { %v8851_v40 = vpop.permute.xlu0 %8850 }
 0x4c2   : > { %8886 = vst.msk [vmem:[%s14004_s18 + $0x68] sm:$0xff] %vm8872_vm0, %v8851_v40 }
 0x4c4   : > { %v8849_v42 = vpop.permute.xlu1 %8848 }
 0x4c5   : > { %8885 = vst.msk [vmem:[%s14004_s18 + $0x60] sm:$0xff] %vm8872_vm0, %v8849_v42 }
 0x4c9   : > { %v8855_v27 = vpop.permute.xlu0 %8854 }
 0x4ca   : > { %8888 = vst.msk [vmem:[%s14004_s18 + $0x78] sm:$0xff] %vm8872_vm0, %v8855_v27 }
 0x4cc   : > { %v8853_v26 = vpop.permute.xlu1 %8852 }
 0x4cd   : > { %8887 = vst.msk [vmem:[%s14004_s18 + $0x70] sm:$0xff] %vm8872_vm0, %v8853_v26  ;;  %v8908_v61 = vpop.permute.xlu0 %8907 }
 0x4ce   : > { %8955 = vst.msk [vmem:[%s14004_s18 + $0x8] sm:$0xff] %vm8953_vm2, %v8908_v61 }
 0x4d0   : > { %v8906_v45 = vpop.permute.xlu1 %8905 }
 0x4d1   : > { %8954 = vst.msk [vmem:[%s14004_s18] sm:$0xff] %vm8953_vm2, %v8906_v45  ;;  %v8989_v13 = vpop.permute.xlu0 %8988 }
 0x4d2   : > { %9036 = vst.msk [vmem:[%s14004_s18 + $0x8] sm:$0xff] %vm9034_vm3, %v8989_v13 }
 0x4d4   : > { %v8987_v32 = vpop.permute.xlu1 %8986 }
 0x4d5   : > { %9035 = vst.msk [vmem:[%s14004_s18] sm:$0xff] %vm9034_vm3, %v8987_v32  ;;  %v8912_v19 = vpop.permute.xlu0 %8911 }
 0x4d6   : > { %8957 = vst.msk [vmem:[%s14004_s18 + $0x18] sm:$0xff] %vm8953_vm2, %v8912_v19 }
 0x4d8   : > { %v8910_v60 = vpop.permute.xlu1 %8909 }
 0x4d9   : > { %8956 = vst.msk [vmem:[%s14004_s18 + $0x10] sm:$0xff] %vm8953_vm2, %v8910_v60  ;;  %v8993_v29 = vpop.permute.xlu0 %8992 }
 0x4da   : > { %9038 = vst.msk [vmem:[%s14004_s18 + $0x18] sm:$0xff] %vm9034_vm3, %v8993_v29 }
 0x4dc   : > { %v8991_v22 = vpop.permute.xlu1 %8990 }
 0x4dd   : > { %9037 = vst.msk [vmem:[%s14004_s18 + $0x10] sm:$0xff] %vm9034_vm3, %v8991_v22  ;;  %v8916_v24 = vpop.permute.xlu0 %8915 }
 0x4de   : > { %8959 = vst.msk [vmem:[%s14004_s18 + $0x28] sm:$0xff] %vm8953_vm2, %v8916_v24 }
 0x4e0   : > { %v8914_v56 = vpop.permute.xlu1 %8913 }
 0x4e1   : > { %8958 = vst.msk [vmem:[%s14004_s18 + $0x20] sm:$0xff] %vm8953_vm2, %v8914_v56  ;;  %v8997_v41 = vpop.permute.xlu0 %8996 }
 0x4e2   : > { %9040 = vst.msk [vmem:[%s14004_s18 + $0x28] sm:$0xff] %vm9034_vm3, %v8997_v41 }
 0x4e4   : > { %v8995_v33 = vpop.permute.xlu1 %8994 }
 0x4e5   : > { %9039 = vst.msk [vmem:[%s14004_s18 + $0x20] sm:$0xff] %vm9034_vm3, %v8995_v33  ;;  %v8920_v38 = vpop.permute.xlu0 %8919 }
 0x4e6   : > { %8961 = vst.msk [vmem:[%s14004_s18 + $0x38] sm:$0xff] %vm8953_vm2, %v8920_v38 }
 0x4e8   : > { %v8918_v12 = vpop.permute.xlu1 %8917 }
 0x4e9   : > { %8960 = vst.msk [vmem:[%s14004_s18 + $0x30] sm:$0xff] %vm8953_vm2, %v8918_v12  ;;  %v9001_v44 = vpop.permute.xlu0 %9000 }
 0x4ea   : > { %9042 = vst.msk [vmem:[%s14004_s18 + $0x38] sm:$0xff] %vm9034_vm3, %v9001_v44 }
 0x4ec   : > { %v8999_v15 = vpop.permute.xlu1 %8998 }
 0x4ed   : > { %9041 = vst.msk [vmem:[%s14004_s18 + $0x30] sm:$0xff] %vm9034_vm3, %v8999_v15  ;;  %v8924_v43 = vpop.permute.xlu0 %8923 }
 0x4ee   : > { %8963 = vst.msk [vmem:[%s14004_s18 + $0x48] sm:$0xff] %vm8953_vm2, %v8924_v43 }
 0x4f0   : > { %v8922_v58 = vpop.permute.xlu1 %8921 }
 0x4f1   : > { %8962 = vst.msk [vmem:[%s14004_s18 + $0x40] sm:$0xff] %vm8953_vm2, %v8922_v58  ;;  %v9005_v51 = vpop.permute.xlu0 %9004 }
 0x4f2   : > { %9044 = vst.msk [vmem:[%s14004_s18 + $0x48] sm:$0xff] %vm9034_vm3, %v9005_v51 }
 0x4f4   : > { %v9003_v11 = vpop.permute.xlu1 %9002 }
 0x4f5   : > { %9043 = vst.msk [vmem:[%s14004_s18 + $0x40] sm:$0xff] %vm9034_vm3, %v9003_v11  ;;  %v8928_v28 = vpop.permute.xlu0 %8927 }
 0x4f6   : > { %8965 = vst.msk [vmem:[%s14004_s18 + $0x58] sm:$0xff] %vm8953_vm2, %v8928_v28 }
 0x4f8   : > { %v8926_v48 = vpop.permute.xlu1 %8925 }
 0x4f9   : > { %8964 = vst.msk [vmem:[%s14004_s18 + $0x50] sm:$0xff] %vm8953_vm2, %v8926_v48  ;;  %v9009_v47 = vpop.permute.xlu0 %9008 }
 0x4fa   : > { %9046 = vst.msk [vmem:[%s14004_s18 + $0x58] sm:$0xff] %vm9034_vm3, %v9009_v47 }
 0x4fc   : > { %v9007_v8 = vpop.permute.xlu1 %9006 }
 0x4fd   : > { %9045 = vst.msk [vmem:[%s14004_s18 + $0x50] sm:$0xff] %vm9034_vm3, %v9007_v8  ;;  %v8932_v1 = vpop.permute.xlu0 %8931 }
 0x4fe   : > { %8967 = vst.msk [vmem:[%s14004_s18 + $0x68] sm:$0xff] %vm8953_vm2, %v8932_v1 }
 0x500   : > { %v8930_v4 = vpop.permute.xlu1 %8929 }
 0x501   : > { %8966 = vst.msk [vmem:[%s14004_s18 + $0x60] sm:$0xff] %vm8953_vm2, %v8930_v4  ;;  %v9013_v62 = vpop.permute.xlu0 %9012 }
 0x502   : > { %9048 = vst.msk [vmem:[%s14004_s18 + $0x68] sm:$0xff] %vm9034_vm3, %v9013_v62 }
 0x504   : > { %v9011_v36 = vpop.permute.xlu1 %9010 }
 0x505   : > { %9047 = vst.msk [vmem:[%s14004_s18 + $0x60] sm:$0xff] %vm9034_vm3, %v9011_v36  ;;  %v8936_v18 = vpop.permute.xlu0 %8935 }
 0x506   : > { %8969 = vst.msk [vmem:[%s14004_s18 + $0x78] sm:$0xff] %vm8953_vm2, %v8936_v18 }
 0x508   : > { %v8934_v35 = vpop.permute.xlu1 %8933 }
 0x509   : > { %8968 = vst.msk [vmem:[%s14004_s18 + $0x70] sm:$0xff] %vm8953_vm2, %v8934_v35  ;;  %v9017_v57 = vpop.permute.xlu0 %9016 }
 0x50a   : > { %9050 = vst.msk [vmem:[%s14004_s18 + $0x78] sm:$0xff] %vm9034_vm3, %v9017_v57 }
 0x50c   : > { %v9015_v54 = vpop.permute.xlu1 %9014 }
 0x50d   : > { %9049 = vst.msk [vmem:[%s14004_s18 + $0x70] sm:$0xff] %vm9034_vm3, %v9015_v54 }
 0x50e   : > { %10946 = shalt.err (!%p10943_p5)
}
 0x50f   : > { %s10947_s8 = scalar_lea.hbm %s14193_s30, 2048  ;;  %s10951_s11 = scalar_lea.hbm %s14252_s3, 4096 }
 0x510   : > { %p10948_p6 = scmp.ne.s32.totalorder %s14193_s30, %s10947_s8  ;;  %p10952_p10 = scmp.lt.u32.totalorder %s14193_s30, %s14252_s3 }
 0x511   : > { %p10953_p11 = scmp.lt.u32.totalorder %s10951_s11, %s10947_s8  ;;  %p10955_p13 = scmp.lt.u32.totalorder %s10947_s8, %s14193_s30 }
 0x512   : > { %p10949_p7 = pnand %p10948_p6, %p11083_p4 }
 0x513   : > { %p10954_p12 = por %p10953_p11, %p10952_p10 }
 0x514   : > { %p10950_p9 = pneg %p10949_p7 }
 0x515   : > { %p10956_p0 = por %p10955_p13, %p10954_p12 }
 0x517   : > { %p10957_p1 = pnand %p10956_p0, %p10950_p9 }
 0x519   : > { %10960 = shalt.err (!%p10957_p1)
}
 0x51a   : > { %s11020_s21 = smov 128   ;;  %s11021_s23 = smov 256  }
 0x51b   : > { %s11022_s26 = smov 8  }
 0x51c   : > { %10483 = dma.vmem_to_hbm [thread:$0]  (%p11083_p4), %s14197_s27, 2048, %s14193_s30, %s14203_s15, %s11020_s21, %s11021_s23, %s11022_s26  }
 0x51d PF: > { %p10489_p2 = scmp.ge.s32.totalorder %s11011_s17, 2  ;;  %s9082_s28 = sand.u32 1, %s10991_s12  }
 0x51e   : > { %s9083_s29 = scalar_lea.sflag [#allocation6], %s9082_s28 }
 0x51f   : > { %p10486_p3 = pnand %p10489_p2, %p11090_p8 }
 0x521   : > { %10986 = dma.done.wait (!%p10486_p3), %s9083_s29, 2048  }
 0x522   : > { %10988 = vsyncadd (!%p10486_p3), %s9083_s29, 4294965248  ;;  %s16_s17 = sadd.s32 1, %s11011_s17   ;;  %s14972_s12 = smov %s10995_s13 }
 0x523   : > { %p13_p5 = scmp.ge.s32.totalorder %s16_s17, 4   ;;  %s14973_s13 = smov %s10999_s14 }
 0x524   : > { %s14974_s14 = smov %s11096_s25  ;;  %s14975_s15 = smov %s11007_s16 }
 0x525   : > { %s14976_s16 = smov %s14978_s20  ;;  %15 = sbr.rel (!%p13_p5) target bundleno = 4 (0x4), region = 85 }
 0x52c   :  { %9088 = vsyncpa [#allocation6], 1 }
 0x52d   :  { %9090 = vsyncpa [#allocation6 + $0x1], 1 }

</bundles_post_ra>
